<compile_context>
chip_gen: v6e
topology: v6e:2x2x1
jax: 0.10.0
libtpu: 0.0.40
codegen_flags: <defaults>
</compile_context>

<pallas_src>
import functools

import jax
import jax.numpy as jnp
from jax import lax
from jax.experimental import pallas as pl
from jax.experimental.pallas import tpu as pltpu


# --------------------------------- kernel ------------------------------------
def layer_kernel(x_ref, wqkv_ref, wo_ref, ww_ref, wv_ref, wmo_ref,
                 cos_ref, sin_ref, o_ref, *, n_head: int, use_roll: bool):
    f32, bf16 = jnp.float32, jnp.bfloat16
    x = x_ref[0]                                  # (S, D) f32
    S, D = x.shape
    d_head = D // n_head
    half = d_head // 2
    scale = 1.0 / (d_head ** 0.5)

    def rmsnorm(v):
        return v * lax.rsqrt(jnp.mean(v * v, axis=-1, keepdims=True) + 1e-8)

    # ---------------- attention branch ----------------
    # Feature-major QKV: (3D, D) @ (D, S) -> (3D, S); head split is leading-dim reshapes.
    xn_t = rmsnorm(x).astype(bf16).T                                   # (D, S) bf16
    qkv_t = jnp.dot(wqkv_ref[...], xn_t, preferred_element_type=f32)   # (3D, S) f32

    q_t = qkv_t[:D].reshape(n_head, d_head, S)                         # (nh, dh, S)
    k_t = qkv_t[D:2 * D].reshape(n_head, d_head, S)
    v_t = qkv_t[2 * D:].reshape(n_head, d_head, S)

    cos = cos_ref[...]                                                 # (1, dh, S)
    sin = sin_ref[...]                                                 # rotate_half sign folded in

    def rope(t):                                                       # t: (nh, dh, S) f32
        if use_roll:
            # shift == dh/2 swaps the two halves along the sublane axis (XLU rotate).
            rot = pltpu.roll(t, half, axis=1)
        else:
            rot = jnp.concatenate([t[:, half:, :], t[:, :half, :]], axis=1)
        return t * cos + rot * sin

    q_t = rope(q_t) * scale                                            # fold 1/sqrt(dh) into Q
    k_t = rope(k_t)

    qh = jnp.transpose(q_t.astype(bf16), (0, 2, 1))                    # (nh, S, dh) bf16
    kt = k_t.astype(bf16)                                              # (nh, dh, S) bf16
    vt = v_t.astype(bf16)                                              # (nh, dh, S) bf16

    scores = jnp.einsum("hqd,hdk->hqk", qh, kt,
                        preferred_element_type=f32)                    # (nh, S, S) f32
    row = lax.broadcasted_iota(jnp.int32, (S, S), 0)
    col = lax.broadcasted_iota(jnp.int32, (S, S), 1)
    scores = jnp.where((row >= col)[None], scores, -1e30)
    scores = scores - jnp.max(scores, axis=-1, keepdims=True)
    p = jnp.exp(scores)
    p = p * pl.reciprocal(jnp.sum(p, axis=-1, keepdims=True), approx=True)

    z_t = jnp.einsum("hdk,hqk->hdq", vt, p.astype(bf16),
                     preferred_element_type=f32)                       # (nh, dh, S) f32
    z = z_t.reshape(D, S).astype(bf16).T                               # (S, D) bf16
    x = x + jnp.dot(z, wo_ref[...], preferred_element_type=f32)

    # ---------------- MLP branch (bilinear) ----------------
    xn2 = rmsnorm(x).astype(bf16)
    left = jnp.dot(xn2, ww_ref[...], preferred_element_type=f32)       # (S, H)
    right = jnp.dot(xn2, wv_ref[...], preferred_element_type=f32)      # (S, H)
    x = x + jnp.dot((left * right).astype(bf16), wmo_ref[...],
                    preferred_element_type=f32)

    o_ref[0] = x.astype(o_ref.dtype)


# --------------------------------- wrapper ------------------------------------
def _forward(x, w_qkv, w_o, w_w, w_v, w_mo, n_head, *, use_roll: bool, buffered: bool):
    B, S, D = x.shape
    d_head = D // n_head
    half = d_head // 2
    f32, bf16 = jnp.float32, jnp.bfloat16

    # Rotary tables in head-transposed (d_head, S) layout; rotate_half's sign folded into sin.
    inv_freq = 1.0 / (10000.0 ** (jnp.arange(0, d_head, 2, dtype=f32) / d_head))
    t = jnp.arange(S, dtype=f32)
    freqs = jnp.einsum("i,j->ij", t, inv_freq)                 # (S, dh/2)
    emb = jnp.concatenate([freqs, freqs], axis=-1)             # (S, dh)
    sign = jnp.where(jnp.arange(d_head) < half, -1.0, 1.0)[None, :]
    cos_t = jnp.cos(emb).T[None]                               # (1, dh, S)
    sin_t = (jnp.sin(emb) * sign).T[None]                      # (1, dh, S)

    # bf16 MXU operands. w_qkv is kept in PyTorch (3D, D) layout (used as LHS of the
    # feature-major projection); the other weights are pre-transposed to (in, out).
    wqkv_b = w_qkv.astype(bf16)        # (3D, D)
    wo_t = w_o.T.astype(bf16)          # (D, D)
    ww_t = w_w.T.astype(bf16)          # (D, H)
    wv_t = w_v.T.astype(bf16)          # (D, H)
    wmo_t = w_mo.T.astype(bf16)        # (H, D)

    def const_spec(a):
        idx = lambda b: (0,) * a.ndim
        if buffered:
            # Block index never changes across the grid -> single buffer saves VMEM.
            return pl.BlockSpec(a.shape, idx, pipeline_mode=pl.Buffered(1))
        return pl.BlockSpec(a.shape, idx)

    kernel = functools.partial(layer_kernel, n_head=n_head, use_roll=use_roll)
    fn = pl.pallas_call(
        kernel,
        out_shape=jax.ShapeDtypeStruct((B, S, D), x.dtype),
        grid_spec=pltpu.PrefetchScalarGridSpec(
            num_scalar_prefetch=0,
            grid=(B,),
            in_specs=[
                pl.BlockSpec((1, S, D), lambda b: (b, 0, 0)),   # x
                const_spec(wqkv_b), const_spec(wo_t), const_spec(ww_t),
                const_spec(wv_t), const_spec(wmo_t),
                const_spec(cos_t), const_spec(sin_t),
            ],
            out_specs=pl.BlockSpec((1, S, D), lambda b: (b, 0, 0)),
        ),
        compiler_params=pltpu.CompilerParams(
            dimension_semantics=("parallel",),    # lets v7x shard batch over its 2 TCs
        ),
    )
    return fn(x, wqkv_b, wo_t, ww_t, wv_t, wmo_t, cos_t, sin_t)


def layer_forward(x, w_qkv, w_o, w_w, w_v, w_mo, n_head):
    """x: (B, S, D). Weights in PyTorch nn.Linear layout (out, in)."""
    configs = (
        dict(use_roll=True, buffered=True),     # preferred build
        dict(use_roll=True, buffered=False),    # no single-buffer pipeline_mode
        dict(use_roll=False, buffered=False),   # sublane-concat rotate_half fallback
    )
    err = None
    for cfg in configs:
        try:
            return jax.block_until_ready(
                _forward(x, w_qkv, w_o, w_w, w_v, w_mo, n_head, **cfg))
        except Exception as e:   # fall back to a more conservative build on this jax version
            err = e
            continue
    raise err


# --------------------------- pure-JAX reference -------------------------------
def layer_reference(x, w_qkv, w_o, w_w, w_v, w_mo, n_head):
    B, S, D = x.shape
    d_head = D // n_head

    def rmsnorm(v):
        return v * lax.rsqrt(jnp.mean(v * v, axis=-1, keepdims=True) + 1e-8)

    inv_freq = 1.0 / (10000.0 ** (jnp.arange(0, d_head, 2, dtype=jnp.float32) / d_head))
    t = jnp.arange(S, dtype=jnp.float32)
    emb = jnp.concatenate([jnp.einsum("i,j->ij", t, inv_freq)] * 2, axis=-1)
    cos, sin = jnp.cos(emb)[None, None], jnp.sin(emb)[None, None]

    xn = rmsnorm(x)
    qkv = xn @ w_qkv.T                                        # (B, S, 3D)
    qkv = qkv.reshape(B, S, 3, n_head, d_head)
    q, k, v = [jnp.transpose(qkv[:, :, i], (0, 2, 1, 3)) for i in range(3)]  # (B, nh, S, dh)

    def rot_half(u):
        return jnp.concatenate([-u[..., d_head // 2:], u[..., :d_head // 2]], axis=-1)

    q = q * cos + rot_half(q) * sin
    k = k * cos + rot_half(k) * sin

    scores = jnp.einsum("bhqd,bhkd->bhqk", q, k) / jnp.sqrt(jnp.float32(d_head))
    mask = jnp.tril(jnp.ones((S, S), dtype=bool))
    scores = jnp.where(mask[None, None], scores, -jnp.inf)
    p = jax.nn.softmax(scores, axis=-1)
    z = jnp.einsum("bhqk,bhkd->bhqd", p, v)
    z = jnp.transpose(z, (0, 2, 1, 3)).reshape(B, S, D)
    x = x + z @ w_o.T

    xn2 = rmsnorm(x)
    x = x + ((xn2 @ w_w.T) * (xn2 @ w_v.T)) @ w_mo.T
    return x


# ----------------------------------- main -------------------------------------
if __name__ == "__main__":
    B, S = 2, 32
    n_head, d_head = 4, 32
    D = n_head * d_head          # d_model = 128
    H = 4 * D                    # d_hidden = 4 * d_model = 512 (Config ratio)

    key = jax.random.PRNGKey(0)
    kx, k1, k2, k3, k4, k5 = jax.random.split(key, 6)
    x = jax.random.normal(kx, (B, S, D), dtype=jnp.float32)
    w_qkv = 0.02 * jax.random.normal(k1, (3 * D, D), dtype=jnp.float32)
    w_o   = 0.02 * jax.random.normal(k2, (D, D), dtype=jnp.float32)
    w_w   = 0.02 * jax.random.normal(k3, (H, D), dtype=jnp.float32)
    w_v   = 0.02 * jax.random.normal(k4, (H, D), dtype=jnp.float32)
    w_mo  = 0.02 * jax.random.normal(k5, (D, H), dtype=jnp.float32)

    out = layer_forward(x, w_qkv, w_o, w_w, w_v, w_mo, n_head)
    out = jax.block_until_ready(out)

    ref = layer_reference(x, w_qkv, w_o, w_w, w_v, w_mo, n_head)
    assert out.shape == (B, S, D)
    # Tolerance accounts for intentional bf16 MXU operands (f32 accumulation) in the kernel.
    assert jnp.allclose(out, ref, atol=1e-2, rtol=1e-2), "mismatch vs JAX reference"

    print("KERNEL_OK")
</pallas_src>

<mosaic_0001>
module attributes {stable_mosaic.version = 11 : i64} {
  func.func @layer_kernel(%arg0: i32, %arg1: memref<1x32x128xf32, #tpu.memory_space<vmem>>, %arg2: memref<384x128xbf16, #tpu.memory_space<vmem>>, %arg3: memref<128x128xbf16, #tpu.memory_space<vmem>>, %arg4: memref<128x512xbf16, #tpu.memory_space<vmem>>, %arg5: memref<128x512xbf16, #tpu.memory_space<vmem>>, %arg6: memref<512x128xbf16, #tpu.memory_space<vmem>>, %arg7: memref<1x32x32xf32, #tpu.memory_space<vmem>>, %arg8: memref<1x32x32xf32, #tpu.memory_space<vmem>>, %arg9: memref<1x32x128xf32, #tpu.memory_space<vmem>>) attributes {dimension_semantics = [#tpu.dimension_semantics<parallel>], iteration_bounds = array<i64: 2>, scalar_prefetch = 0 : i64, scratch_operands = 0 : i64, tpu.core_type = #tpu.core_type<tc>, window_params = [{transform_indices = @transform_0, window_bounds = array<i64: 1, 32, 128>}, {pipeline_mode = #tpu.pipeline_mode<synchronous>, transform_indices = @transform_1, window_bounds = array<i64: 384, 128>}, {pipeline_mode = #tpu.pipeline_mode<synchronous>, transform_indices = @transform_2, window_bounds = array<i64: 128, 128>}, {pipeline_mode = #tpu.pipeline_mode<synchronous>, transform_indices = @transform_3, window_bounds = array<i64: 128, 512>}, {pipeline_mode = #tpu.pipeline_mode<synchronous>, transform_indices = @transform_4, window_bounds = array<i64: 128, 512>}, {pipeline_mode = #tpu.pipeline_mode<synchronous>, transform_indices = @transform_5, window_bounds = array<i64: 512, 128>}, {pipeline_mode = #tpu.pipeline_mode<synchronous>, transform_indices = @transform_6, window_bounds = array<i64: 1, 32, 32>}, {pipeline_mode = #tpu.pipeline_mode<synchronous>, transform_indices = @transform_7, window_bounds = array<i64: 1, 32, 32>}, {transform_indices = @transform_8, window_bounds = array<i64: 1, 32, 128>}]} {
    %c0 = arith.constant 0 : index
    %c0_0 = arith.constant 0 : index
    %c0_1 = arith.constant 0 : index
    %0 = vector.load %arg1[%c0, %c0_0, %c0_1] : memref<1x32x128xf32, #tpu.memory_space<vmem>>, vector<1x32x128xf32>
    %1 = vector.shape_cast %0 : vector<1x32x128xf32> to vector<32x128xf32>
    %2 = arith.mulf %1, %1 : vector<32x128xf32>
    %cst = arith.constant dense<0.000000e+00> : vector<32xf32>
    %3 = vector.multi_reduction <add>, %2, %cst [1] : vector<32x128xf32> to vector<32xf32>
    %4 = vector.shape_cast %3 : vector<32xf32> to vector<32x1xf32>
    %cst_2 = arith.constant 1.280000e+02 : f32
    %5 = vector.broadcast %cst_2 : f32 to vector<32x1xf32>
    %6 = arith.divf %4, %5 : vector<32x1xf32>
    %cst_3 = arith.constant 9.99999993E-9 : f32
    %7 = vector.broadcast %cst_3 : f32 to vector<32x1xf32>
    %8 = arith.addf %6, %7 : vector<32x1xf32>
    %9 = math.rsqrt %8 : vector<32x1xf32>
    %10 = vector.broadcast %9 : vector<32x1xf32> to vector<32x128xf32>
    %11 = arith.mulf %1, %10 : vector<32x128xf32>
    %12 = arith.truncf %11 : vector<32x128xf32> to vector<32x128xbf16>
    %13 = tpu.transpose %12, [1, 0] : vector<32x128xbf16> -> vector<128x32xbf16>
    %c0_4 = arith.constant 0 : index
    %c0_5 = arith.constant 0 : index
    %14 = vector.load %arg2[%c0_4, %c0_5] : memref<384x128xbf16, #tpu.memory_space<vmem>>, vector<384x128xbf16>
    %cst_6 = arith.constant dense<0.000000e+00> : vector<384x32xf32>
    %15 = tpu.matmul %14, %13, %cst_6 {dimension_numbers = #tpu.dot_dimension_numbers<[1], [0], [0], [1], [0, 0, 1, 1], [], []>} : vector<384x128xbf16>, vector<128x32xbf16>, vector<384x32xf32> -> vector<384x32xf32>
    %16 = vector.extract_strided_slice %15 {offsets = [0, 0], sizes = [128, 32], strides = [1, 1]} : vector<384x32xf32> to vector<128x32xf32>
    %17 = vector.shape_cast %16 : vector<128x32xf32> to vector<4x32x32xf32>
    %18 = vector.extract_strided_slice %15 {offsets = [128, 0], sizes = [128, 32], strides = [1, 1]} : vector<384x32xf32> to vector<128x32xf32>
    %19 = vector.shape_cast %18 : vector<128x32xf32> to vector<4x32x32xf32>
    %20 = vector.extract_strided_slice %15 {offsets = [256, 0], sizes = [128, 32], strides = [1, 1]} : vector<384x32xf32> to vector<128x32xf32>
    %21 = vector.shape_cast %20 : vector<128x32xf32> to vector<4x32x32xf32>
    %c0_7 = arith.constant 0 : index
    %c0_8 = arith.constant 0 : index
    %c0_9 = arith.constant 0 : index
    %22 = vector.load %arg7[%c0_7, %c0_8, %c0_9] : memref<1x32x32xf32, #tpu.memory_space<vmem>>, vector<1x32x32xf32>
    %c0_10 = arith.constant 0 : index
    %c0_11 = arith.constant 0 : index
    %c0_12 = arith.constant 0 : index
    %23 = vector.load %arg8[%c0_10, %c0_11, %c0_12] : memref<1x32x32xf32, #tpu.memory_space<vmem>>, vector<1x32x32xf32>
    %c16_i32 = arith.constant 16 : i32
    %24 = tpu.dynamic_rotate %17 by %c16_i32 dim 1 : vector<4x32x32xf32>, i32 -> vector<4x32x32xf32>
    %25 = vector.broadcast %22 : vector<1x32x32xf32> to vector<4x32x32xf32>
    %26 = arith.mulf %17, %25 : vector<4x32x32xf32>
    %27 = vector.broadcast %23 : vector<1x32x32xf32> to vector<4x32x32xf32>
    %28 = arith.mulf %24, %27 : vector<4x32x32xf32>
    %29 = arith.addf %26, %28 : vector<4x32x32xf32>
    %cst_13 = arith.constant 0.176776692 : f32
    %30 = vector.broadcast %cst_13 : f32 to vector<4x32x32xf32>
    %31 = arith.mulf %29, %30 : vector<4x32x32xf32>
    %c16_i32_14 = arith.constant 16 : i32
    %32 = tpu.dynamic_rotate %19 by %c16_i32_14 dim 1 : vector<4x32x32xf32>, i32 -> vector<4x32x32xf32>
    %33 = vector.broadcast %22 : vector<1x32x32xf32> to vector<4x32x32xf32>
    %34 = arith.mulf %19, %33 : vector<4x32x32xf32>
    %35 = vector.broadcast %23 : vector<1x32x32xf32> to vector<4x32x32xf32>
    %36 = arith.mulf %32, %35 : vector<4x32x32xf32>
    %37 = arith.addf %34, %36 : vector<4x32x32xf32>
    %38 = arith.truncf %31 : vector<4x32x32xf32> to vector<4x32x32xbf16>
    %39 = tpu.transpose %38, [0, 2, 1] : vector<4x32x32xbf16> -> vector<4x32x32xbf16>
    %40 = arith.truncf %37 : vector<4x32x32xf32> to vector<4x32x32xbf16>
    %41 = arith.truncf %21 : vector<4x32x32xf32> to vector<4x32x32xbf16>
    "tpu.trace_start"() <{level = 10 : i32, message = "hqd,hdk->hqk"}> : () -> ()
    %cst_15 = arith.constant dense<0.000000e+00> : vector<4x32x32xf32>
    %42 = tpu.matmul %39, %40, %cst_15 {dimension_numbers = #tpu.dot_dimension_numbers<[2], [1], [1], [2], [0, 0, 0, 1, 1, 2], [0], [0]>} : vector<4x32x32xbf16>, vector<4x32x32xbf16>, vector<4x32x32xf32> -> vector<4x32x32xf32>
    "tpu.trace_stop"() : () -> ()
    %43 = tpu.iota {dimensions = array<i32: 0>} : vector<32x32xi32>
    %44 = tpu.iota {dimensions = array<i32: 1>} : vector<32x32xi32>
    %45 = arith.cmpi sge, %43, %44 : vector<32x32xi32>
    %46 = vector.shape_cast %45 : vector<32x32xi1> to vector<1x32x32xi1>
    %cst_16 = arith.constant -1.000000e+30 : f32
    %47 = vector.shape_cast %46 : vector<1x32x32xi1> to vector<1x32x32xi1>
    %48 = vector.broadcast %47 : vector<1x32x32xi1> to vector<4x32x32xi1>
    %49 = vector.broadcast %cst_16 : f32 to vector<4x32x32xf32>
    %50 = arith.select %48, %42, %49 : vector<4x32x32xi1>, vector<4x32x32xf32>
    %cst_17 = arith.constant dense<0xFF800000> : vector<4x32xf32>
    %51 = vector.multi_reduction <maximumf>, %50, %cst_17 [2] : vector<4x32x32xf32> to vector<4x32xf32>
    %52 = vector.shape_cast %51 : vector<4x32xf32> to vector<4x32x1xf32>
    %53 = vector.broadcast %52 : vector<4x32x1xf32> to vector<4x32x32xf32>
    %54 = arith.subf %50, %53 : vector<4x32x32xf32>
    %55 = math.exp %54 : vector<4x32x32xf32>
    %cst_18 = arith.constant dense<0.000000e+00> : vector<4x32xf32>
    %56 = vector.multi_reduction <add>, %55, %cst_18 [2] : vector<4x32x32xf32> to vector<4x32xf32>
    %57 = vector.shape_cast %56 : vector<4x32xf32> to vector<4x32x1xf32>
    %58 = tpu.reciprocal %57 {approx = true} : vector<4x32x1xf32> -> vector<4x32x1xf32>
    %59 = vector.broadcast %58 : vector<4x32x1xf32> to vector<4x32x32xf32>
    %60 = arith.mulf %55, %59 : vector<4x32x32xf32>
    %61 = arith.truncf %60 : vector<4x32x32xf32> to vector<4x32x32xbf16>
    "tpu.trace_start"() <{level = 10 : i32, message = "hdk,hqk->hdq"}> : () -> ()
    %cst_19 = arith.constant dense<0.000000e+00> : vector<4x32x32xf32>
    %62 = tpu.matmul %41, %61, %cst_19 {dimension_numbers = #tpu.dot_dimension_numbers<[2], [2], [1], [1], [0, 0, 0, 1, 1, 1], [0], [0]>} : vector<4x32x32xbf16>, vector<4x32x32xbf16>, vector<4x32x32xf32> -> vector<4x32x32xf32>
    "tpu.trace_stop"() : () -> ()
    %63 = vector.shape_cast %62 : vector<4x32x32xf32> to vector<128x32xf32>
    %64 = arith.truncf %63 : vector<128x32xf32> to vector<128x32xbf16>
    %65 = tpu.transpose %64, [1, 0] : vector<128x32xbf16> -> vector<32x128xbf16>
    %c0_20 = arith.constant 0 : index
    %c0_21 = arith.constant 0 : index
    %66 = vector.load %arg3[%c0_20, %c0_21] : memref<128x128xbf16, #tpu.memory_space<vmem>>, vector<128x128xbf16>
    %cst_22 = arith.constant dense<0.000000e+00> : vector<32x128xf32>
    %67 = tpu.matmul %65, %66, %cst_22 {dimension_numbers = #tpu.dot_dimension_numbers<[1], [0], [0], [1], [0, 0, 1, 1], [], []>} : vector<32x128xbf16>, vector<128x128xbf16>, vector<32x128xf32> -> vector<32x128xf32>
    %68 = arith.addf %1, %67 : vector<32x128xf32>
    %69 = arith.mulf %68, %68 : vector<32x128xf32>
    %cst_23 = arith.constant dense<0.000000e+00> : vector<32xf32>
    %70 = vector.multi_reduction <add>, %69, %cst_23 [1] : vector<32x128xf32> to vector<32xf32>
    %71 = vector.shape_cast %70 : vector<32xf32> to vector<32x1xf32>
    %cst_24 = arith.constant 1.280000e+02 : f32
    %72 = vector.broadcast %cst_24 : f32 to vector<32x1xf32>
    %73 = arith.divf %71, %72 : vector<32x1xf32>
    %cst_25 = arith.constant 9.99999993E-9 : f32
    %74 = vector.broadcast %cst_25 : f32 to vector<32x1xf32>
    %75 = arith.addf %73, %74 : vector<32x1xf32>
    %76 = math.rsqrt %75 : vector<32x1xf32>
    %77 = vector.broadcast %76 : vector<32x1xf32> to vector<32x128xf32>
    %78 = arith.mulf %68, %77 : vector<32x128xf32>
    %79 = arith.truncf %78 : vector<32x128xf32> to vector<32x128xbf16>
    %c0_26 = arith.constant 0 : index
    %c0_27 = arith.constant 0 : index
    %80 = vector.load %arg4[%c0_26, %c0_27] : memref<128x512xbf16, #tpu.memory_space<vmem>>, vector<128x512xbf16>
    %cst_28 = arith.constant dense<0.000000e+00> : vector<32x512xf32>
    %81 = tpu.matmul %79, %80, %cst_28 {dimension_numbers = #tpu.dot_dimension_numbers<[1], [0], [0], [1], [0, 0, 1, 1], [], []>} : vector<32x128xbf16>, vector<128x512xbf16>, vector<32x512xf32> -> vector<32x512xf32>
    %c0_29 = arith.constant 0 : index
    %c0_30 = arith.constant 0 : index
    %82 = vector.load %arg5[%c0_29, %c0_30] : memref<128x512xbf16, #tpu.memory_space<vmem>>, vector<128x512xbf16>
    %cst_31 = arith.constant dense<0.000000e+00> : vector<32x512xf32>
    %83 = tpu.matmul %79, %82, %cst_31 {dimension_numbers = #tpu.dot_dimension_numbers<[1], [0], [0], [1], [0, 0, 1, 1], [], []>} : vector<32x128xbf16>, vector<128x512xbf16>, vector<32x512xf32> -> vector<32x512xf32>
    %84 = arith.mulf %81, %83 : vector<32x512xf32>
    %85 = arith.truncf %84 : vector<32x512xf32> to vector<32x512xbf16>
    %c0_32 = arith.constant 0 : index
    %c0_33 = arith.constant 0 : index
    %86 = vector.load %arg6[%c0_32, %c0_33] : memref<512x128xbf16, #tpu.memory_space<vmem>>, vector<512x128xbf16>
    %cst_34 = arith.constant dense<0.000000e+00> : vector<32x128xf32>
    %87 = tpu.matmul %85, %86, %cst_34 {dimension_numbers = #tpu.dot_dimension_numbers<[1], [0], [0], [1], [0, 0, 1, 1], [], []>} : vector<32x512xbf16>, vector<512x128xbf16>, vector<32x128xf32> -> vector<32x128xf32>
    %88 = arith.addf %68, %87 : vector<32x128xf32>
    %c0_35 = arith.constant 0 : index
    %c0_36 = arith.constant 0 : index
    %c0_37 = arith.constant 0 : index
    %89 = vector.load %arg9[%c0_35, %c0_36, %c0_37] : memref<1x32x128xf32, #tpu.memory_space<vmem>>, vector<1x32x128xf32>
    %90 = vector.shape_cast %89 : vector<1x32x128xf32> to vector<32x128xf32>
    %91 = vector.shape_cast %88 : vector<32x128xf32> to vector<1x32x128xf32>
    tpu.vector_store %arg9[%c0_35, %c0_36, %c0_37], %91 {strides = array<i32>} : memref<1x32x128xf32, #tpu.memory_space<vmem>>, vector<1x32x128xf32>,
    return
  }
  func.func @transform_0(%arg0: i32) -> (i32, i32, i32) {
    %c0_i32 = arith.constant 0 : i32
    %c0_i32_0 = arith.constant 0 : i32
    %c0_i32_1 = arith.constant 0 : i32
    return %arg0, %c0_i32, %c0_i32_0 : i32, i32, i32
  }
  func.func @transform_1(%arg0: i32) -> (i32, i32) {
    %c0_i32 = arith.constant 0 : i32
    %c0_i32_0 = arith.constant 0 : i32
    %c0_i32_1 = arith.constant 0 : i32
    return %c0_i32, %c0_i32_0 : i32, i32
  }
  func.func @transform_2(%arg0: i32) -> (i32, i32) {
    %c0_i32 = arith.constant 0 : i32
    %c0_i32_0 = arith.constant 0 : i32
    %c0_i32_1 = arith.constant 0 : i32
    return %c0_i32, %c0_i32_0 : i32, i32
  }
  func.func @transform_3(%arg0: i32) -> (i32, i32) {
    %c0_i32 = arith.constant 0 : i32
    %c0_i32_0 = arith.constant 0 : i32
    %c0_i32_1 = arith.constant 0 : i32
    return %c0_i32, %c0_i32_0 : i32, i32
  }
  func.func @transform_4(%arg0: i32) -> (i32, i32) {
    %c0_i32 = arith.constant 0 : i32
    %c0_i32_0 = arith.constant 0 : i32
    %c0_i32_1 = arith.constant 0 : i32
    return %c0_i32, %c0_i32_0 : i32, i32
  }
  func.func @transform_5(%arg0: i32) -> (i32, i32) {
    %c0_i32 = arith.constant 0 : i32
    %c0_i32_0 = arith.constant 0 : i32
    %c0_i32_1 = arith.constant 0 : i32
    return %c0_i32, %c0_i32_0 : i32, i32
  }
  func.func @transform_6(%arg0: i32) -> (i32, i32, i32) {
    %c0_i32 = arith.constant 0 : i32
    %c0_i32_0 = arith.constant 0 : i32
    %c0_i32_1 = arith.constant 0 : i32
    %c0_i32_2 = arith.constant 0 : i32
    return %c0_i32, %c0_i32_0, %c0_i32_1 : i32, i32, i32
  }
  func.func @transform_7(%arg0: i32) -> (i32, i32, i32) {
    %c0_i32 = arith.constant 0 : i32
    %c0_i32_0 = arith.constant 0 : i32
    %c0_i32_1 = arith.constant 0 : i32
    %c0_i32_2 = arith.constant 0 : i32
    return %c0_i32, %c0_i32_0, %c0_i32_1 : i32, i32, i32
  }
  func.func @transform_8(%arg0: i32) -> (i32, i32, i32) {
    %c0_i32 = arith.constant 0 : i32
    %c0_i32_0 = arith.constant 0 : i32
    %c0_i32_1 = arith.constant 0 : i32
    return %arg0, %c0_i32, %c0_i32_0 : i32, i32, i32
  }
}

module attributes {stable_mosaic.version = 11 : i64} {
  func.func @layer_kernel(%arg0: i32, %arg1: memref<1x32x128xf32, #tpu.memory_space<vmem>>, %arg2: memref<384x128xbf16, #tpu.memory_space<vmem>>, %arg3: memref<128x128xbf16, #tpu.memory_space<vmem>>, %arg4: memref<128x512xbf16, #tpu.memory_space<vmem>>, %arg5: memref<128x512xbf16, #tpu.memory_space<vmem>>, %arg6: memref<512x128xbf16, #tpu.memory_space<vmem>>, %arg7: memref<1x32x32xf32, #tpu.memory_space<vmem>>, %arg8: memref<1x32x32xf32, #tpu.memory_space<vmem>>, %arg9: memref<1x32x128xf32, #tpu.memory_space<vmem>>) attributes {dimension_semantics = [#tpu.dimension_semantics<parallel>], iteration_bounds = array<i64: 2>, scalar_prefetch = 0 : i64, scratch_operands = 0 : i64, tpu.core_type = #tpu.core_type<tc>, window_params = [{transform_indices = @transform_0, window_bounds = array<i64: 1, 32, 128>}, {pipeline_mode = #tpu.pipeline_mode<synchronous>, transform_indices = @transform_1, window_bounds = array<i64: 384, 128>}, {pipeline_mode = #tpu.pipeline_mode<synchronous>, transform_indices = @transform_2, window_bounds = array<i64: 128, 128>}, {pipeline_mode = #tpu.pipeline_mode<synchronous>, transform_indices = @transform_3, window_bounds = array<i64: 128, 512>}, {pipeline_mode = #tpu.pipeline_mode<synchronous>, transform_indices = @transform_4, window_bounds = array<i64: 128, 512>}, {pipeline_mode = #tpu.pipeline_mode<synchronous>, transform_indices = @transform_5, window_bounds = array<i64: 512, 128>}, {pipeline_mode = #tpu.pipeline_mode<synchronous>, transform_indices = @transform_6, window_bounds = array<i64: 1, 32, 32>}, {pipeline_mode = #tpu.pipeline_mode<synchronous>, transform_indices = @transform_7, window_bounds = array<i64: 1, 32, 32>}, {transform_indices = @transform_8, window_bounds = array<i64: 1, 32, 128>}]} {
    %c0 = arith.constant 0 : index
    %c0_0 = arith.constant 0 : index
    %c0_1 = arith.constant 0 : index
    %0 = vector.load %arg1[%c0, %c0_0, %c0_1] : memref<1x32x128xf32, #tpu.memory_space<vmem>>, vector<1x32x128xf32>
    %1 = vector.shape_cast %0 : vector<1x32x128xf32> to vector<32x128xf32>
    %2 = arith.mulf %1, %1 : vector<32x128xf32>
    %cst = arith.constant dense<0.000000e+00> : vector<32xf32>
    %3 = vector.multi_reduction <add>, %2, %cst [1] : vector<32x128xf32> to vector<32xf32>
    %4 = vector.shape_cast %3 : vector<32xf32> to vector<32x1xf32>
    %cst_2 = arith.constant 1.280000e+02 : f32
    %5 = vector.broadcast %cst_2 : f32 to vector<32x1xf32>
    %6 = arith.divf %4, %5 : vector<32x1xf32>
    %cst_3 = arith.constant 9.99999993E-9 : f32
    %7 = vector.broadcast %cst_3 : f32 to vector<32x1xf32>
    %8 = arith.addf %6, %7 : vector<32x1xf32>
    %9 = math.rsqrt %8 : vector<32x1xf32>
    %10 = vector.broadcast %9 : vector<32x1xf32> to vector<32x128xf32>
    %11 = arith.mulf %1, %10 : vector<32x128xf32>
    %12 = arith.truncf %11 : vector<32x128xf32> to vector<32x128xbf16>
    %13 = tpu.transpose %12, [1, 0] : vector<32x128xbf16> -> vector<128x32xbf16>
    %c0_4 = arith.constant 0 : index
    %c0_5 = arith.constant 0 : index
    %14 = vector.load %arg2[%c0_4, %c0_5] : memref<384x128xbf16, #tpu.memory_space<vmem>>, vector<384x128xbf16>
    %cst_6 = arith.constant dense<0.000000e+00> : vector<384x32xf32>
    %15 = tpu.matmul %14, %13, %cst_6 {dimension_numbers = #tpu.dot_dimension_numbers<[1], [0], [0], [1], [0, 0, 1, 1], [], []>} : vector<384x128xbf16>, vector<128x32xbf16>, vector<384x32xf32> -> vector<384x32xf32>
    %16 = vector.extract_strided_slice %15 {offsets = [0, 0], sizes = [128, 32], strides = [1, 1]} : vector<384x32xf32> to vector<128x32xf32>
    %17 = vector.shape_cast %16 : vector<128x32xf32> to vector<4x32x32xf32>
    %18 = vector.extract_strided_slice %15 {offsets = [128, 0], sizes = [128, 32], strides = [1, 1]} : vector<384x32xf32> to vector<128x32xf32>
    %19 = vector.shape_cast %18 : vector<128x32xf32> to vector<4x32x32xf32>
    %20 = vector.extract_strided_slice %15 {offsets = [256, 0], sizes = [128, 32], strides = [1, 1]} : vector<384x32xf32> to vector<128x32xf32>
    %21 = vector.shape_cast %20 : vector<128x32xf32> to vector<4x32x32xf32>
    %c0_7 = arith.constant 0 : index
    %c0_8 = arith.constant 0 : index
    %c0_9 = arith.constant 0 : index
    %22 = vector.load %arg7[%c0_7, %c0_8, %c0_9] : memref<1x32x32xf32, #tpu.memory_space<vmem>>, vector<1x32x32xf32>
    %c0_10 = arith.constant 0 : index
    %c0_11 = arith.constant 0 : index
    %c0_12 = arith.constant 0 : index
    %23 = vector.load %arg8[%c0_10, %c0_11, %c0_12] : memref<1x32x32xf32, #tpu.memory_space<vmem>>, vector<1x32x32xf32>
    %c16_i32 = arith.constant 16 : i32
    %24 = tpu.dynamic_rotate %17 by %c16_i32 dim 1 : vector<4x32x32xf32>, i32 -> vector<4x32x32xf32>
    %25 = vector.broadcast %22 : vector<1x32x32xf32> to vector<4x32x32xf32>
    %26 = arith.mulf %17, %25 : vector<4x32x32xf32>
    %27 = vector.broadcast %23 : vector<1x32x32xf32> to vector<4x32x32xf32>
    %28 = arith.mulf %24, %27 : vector<4x32x32xf32>
    %29 = arith.addf %26, %28 : vector<4x32x32xf32>
    %cst_13 = arith.constant 0.176776692 : f32
    %30 = vector.broadcast %cst_13 : f32 to vector<4x32x32xf32>
    %31 = arith.mulf %29, %30 : vector<4x32x32xf32>
    %c16_i32_14 = arith.constant 16 : i32
    %32 = tpu.dynamic_rotate %19 by %c16_i32_14 dim 1 : vector<4x32x32xf32>, i32 -> vector<4x32x32xf32>
    %33 = vector.broadcast %22 : vector<1x32x32xf32> to vector<4x32x32xf32>
    %34 = arith.mulf %19, %33 : vector<4x32x32xf32>
    %35 = vector.broadcast %23 : vector<1x32x32xf32> to vector<4x32x32xf32>
    %36 = arith.mulf %32, %35 : vector<4x32x32xf32>
    %37 = arith.addf %34, %36 : vector<4x32x32xf32>
    %38 = arith.truncf %31 : vector<4x32x32xf32> to vector<4x32x32xbf16>
    %39 = tpu.transpose %38, [0, 2, 1] : vector<4x32x32xbf16> -> vector<4x32x32xbf16>
    %40 = arith.truncf %37 : vector<4x32x32xf32> to vector<4x32x32xbf16>
    %41 = arith.truncf %21 : vector<4x32x32xf32> to vector<4x32x32xbf16>
    "tpu.trace_start"() <{level = 10 : i32, message = "hqd,hdk->hqk"}> : () -> ()
    %cst_15 = arith.constant dense<0.000000e+00> : vector<4x32x32xf32>
    %42 = tpu.matmul %39, %40, %cst_15 {dimension_numbers = #tpu.dot_dimension_numbers<[2], [1], [1], [2], [0, 0, 0, 1, 1, 2], [0], [0]>} : vector<4x32x32xbf16>, vector<4x32x32xbf16>, vector<4x32x32xf32> -> vector<4x32x32xf32>
    "tpu.trace_stop"() : () -> ()
    %43 = tpu.iota {dimensions = array<i32: 0>} : vector<32x32xi32>
    %44 = tpu.iota {dimensions = array<i32: 1>} : vector<32x32xi32>
    %45 = arith.cmpi sge, %43, %44 : vector<32x32xi32>
    %46 = vector.shape_cast %45 : vector<32x32xi1> to vector<1x32x32xi1>
    %cst_16 = arith.constant -1.000000e+30 : f32
    %47 = vector.shape_cast %46 : vector<1x32x32xi1> to vector<1x32x32xi1>
    %48 = vector.broadcast %47 : vector<1x32x32xi1> to vector<4x32x32xi1>
    %49 = vector.broadcast %cst_16 : f32 to vector<4x32x32xf32>
    %50 = arith.select %48, %42, %49 : vector<4x32x32xi1>, vector<4x32x32xf32>
    %cst_17 = arith.constant dense<0xFF800000> : vector<4x32xf32>
    %51 = vector.multi_reduction <maximumf>, %50, %cst_17 [2] : vector<4x32x32xf32> to vector<4x32xf32>
    %52 = vector.shape_cast %51 : vector<4x32xf32> to vector<4x32x1xf32>
    %53 = vector.broadcast %52 : vector<4x32x1xf32> to vector<4x32x32xf32>
    %54 = arith.subf %50, %53 : vector<4x32x32xf32>
    %55 = math.exp %54 : vector<4x32x32xf32>
    %cst_18 = arith.constant dense<0.000000e+00> : vector<4x32xf32>
    %56 = vector.multi_reduction <add>, %55, %cst_18 [2] : vector<4x32x32xf32> to vector<4x32xf32>
    %57 = vector.shape_cast %56 : vector<4x32xf32> to vector<4x32x1xf32>
    %58 = tpu.reciprocal %57 {approx = true} : vector<4x32x1xf32> -> vector<4x32x1xf32>
    %59 = vector.broadcast %58 : vector<4x32x1xf32> to vector<4x32x32xf32>
    %60 = arith.mulf %55, %59 : vector<4x32x32xf32>
    %61 = arith.truncf %60 : vector<4x32x32xf32> to vector<4x32x32xbf16>
    "tpu.trace_start"() <{level = 10 : i32, message = "hdk,hqk->hdq"}> : () -> ()
    %cst_19 = arith.constant dense<0.000000e+00> : vector<4x32x32xf32>
    %62 = tpu.matmul %41, %61, %cst_19 {dimension_numbers = #tpu.dot_dimension_numbers<[2], [2], [1], [1], [0, 0, 0, 1, 1, 1], [0], [0]>} : vector<4x32x32xbf16>, vector<4x32x32xbf16>, vector<4x32x32xf32> -> vector<4x32x32xf32>
    "tpu.trace_stop"() : () -> ()
    %63 = vector.shape_cast %62 : vector<4x32x32xf32> to vector<128x32xf32>
    %64 = arith.truncf %63 : vector<128x32xf32> to vector<128x32xbf16>
    %65 = tpu.transpose %64, [1, 0] : vector<128x32xbf16> -> vector<32x128xbf16>
    %c0_20 = arith.constant 0 : index
    %c0_21 = arith.constant 0 : index
    %66 = vector.load %arg3[%c0_20, %c0_21] : memref<128x128xbf16, #tpu.memory_space<vmem>>, vector<128x128xbf16>
    %cst_22 = arith.constant dense<0.000000e+00> : vector<32x128xf32>
    %67 = tpu.matmul %65, %66, %cst_22 {dimension_numbers = #tpu.dot_dimension_numbers<[1], [0], [0], [1], [0, 0, 1, 1], [], []>} : vector<32x128xbf16>, vector<128x128xbf16>, vector<32x128xf32> -> vector<32x128xf32>
    %68 = arith.addf %1, %67 : vector<32x128xf32>
    %69 = arith.mulf %68, %68 : vector<32x128xf32>
    %cst_23 = arith.constant dense<0.000000e+00> : vector<32xf32>
    %70 = vector.multi_reduction <add>, %69, %cst_23 [1] : vector<32x128xf32> to vector<32xf32>
    %71 = vector.shape_cast %70 : vector<32xf32> to vector<32x1xf32>
    %cst_24 = arith.constant 1.280000e+02 : f32
    %72 = vector.broadcast %cst_24 : f32 to vector<32x1xf32>
    %73 = arith.divf %71, %72 : vector<32x1xf32>
    %cst_25 = arith.constant 9.99999993E-9 : f32
    %74 = vector.broadcast %cst_25 : f32 to vector<32x1xf32>
    %75 = arith.addf %73, %74 : vector<32x1xf32>
    %76 = math.rsqrt %75 : vector<32x1xf32>
    %77 = vector.broadcast %76 : vector<32x1xf32> to vector<32x128xf32>
    %78 = arith.mulf %68, %77 : vector<32x128xf32>
    %79 = arith.truncf %78 : vector<32x128xf32> to vector<32x128xbf16>
    %c0_26 = arith.constant 0 : index
    %c0_27 = arith.constant 0 : index
    %80 = vector.load %arg4[%c0_26, %c0_27] : memref<128x512xbf16, #tpu.memory_space<vmem>>, vector<128x512xbf16>
    %cst_28 = arith.constant dense<0.000000e+00> : vector<32x512xf32>
    %81 = tpu.matmul %79, %80, %cst_28 {dimension_numbers = #tpu.dot_dimension_numbers<[1], [0], [0], [1], [0, 0, 1, 1], [], []>} : vector<32x128xbf16>, vector<128x512xbf16>, vector<32x512xf32> -> vector<32x512xf32>
    %c0_29 = arith.constant 0 : index
    %c0_30 = arith.constant 0 : index
    %82 = vector.load %arg5[%c0_29, %c0_30] : memref<128x512xbf16, #tpu.memory_space<vmem>>, vector<128x512xbf16>
    %cst_31 = arith.constant dense<0.000000e+00> : vector<32x512xf32>
    %83 = tpu.matmul %79, %82, %cst_31 {dimension_numbers = #tpu.dot_dimension_numbers<[1], [0], [0], [1], [0, 0, 1, 1], [], []>} : vector<32x128xbf16>, vector<128x512xbf16>, vector<32x512xf32> -> vector<32x512xf32>
    %84 = arith.mulf %81, %83 : vector<32x512xf32>
    %85 = arith.truncf %84 : vector<32x512xf32> to vector<32x512xbf16>
    %c0_32 = arith.constant 0 : index
    %c0_33 = arith.constant 0 : index
    %86 = vector.load %arg6[%c0_32, %c0_33] : memref<512x128xbf16, #tpu.memory_space<vmem>>, vector<512x128xbf16>
    %cst_34 = arith.constant dense<0.000000e+00> : vector<32x128xf32>
    %87 = tpu.matmul %85, %86, %cst_34 {dimension_numbers = #tpu.dot_dimension_numbers<[1], [0], [0], [1], [0, 0, 1, 1], [], []>} : vector<32x512xbf16>, vector<512x128xbf16>, vector<32x128xf32> -> vector<32x128xf32>
    %88 = arith.addf %68, %87 : vector<32x128xf32>
    %c0_35 = arith.constant 0 : index
    %c0_36 = arith.constant 0 : index
    %c0_37 = arith.constant 0 : index
    %89 = vector.load %arg9[%c0_35, %c0_36, %c0_37] : memref<1x32x128xf32, #tpu.memory_space<vmem>>, vector<1x32x128xf32>
    %90 = vector.shape_cast %89 : vector<1x32x128xf32> to vector<32x128xf32>
    %91 = vector.shape_cast %88 : vector<32x128xf32> to vector<1x32x128xf32>
    tpu.vector_store %arg9[%c0_35, %c0_36, %c0_37], %91 {strides = array<i32>} : memref<1x32x128xf32, #tpu.memory_space<vmem>>, vector<1x32x128xf32>,
    return
  }
  func.func @transform_0(%arg0: i32) -> (i32, i32, i32) {
    %c0_i32 = arith.constant 0 : i32
    %c0_i32_0 = arith.constant 0 : i32
    %c0_i32_1 = arith.constant 0 : i32
    return %arg0, %c0_i32, %c0_i32_0 : i32, i32, i32
  }
  func.func @transform_1(%arg0: i32) -> (i32, i32) {
    %c0_i32 = arith.constant 0 : i32
    %c0_i32_0 = arith.constant 0 : i32
    %c0_i32_1 = arith.constant 0 : i32
    return %c0_i32, %c0_i32_0 : i32, i32
  }
  func.func @transform_2(%arg0: i32) -> (i32, i32) {
    %c0_i32 = arith.constant 0 : i32
    %c0_i32_0 = arith.constant 0 : i32
    %c0_i32_1 = arith.constant 0 : i32
    return %c0_i32, %c0_i32_0 : i32, i32
  }
  func.func @transform_3(%arg0: i32) -> (i32, i32) {
    %c0_i32 = arith.constant 0 : i32
    %c0_i32_0 = arith.constant 0 : i32
    %c0_i32_1 = arith.constant 0 : i32
    return %c0_i32, %c0_i32_0 : i32, i32
  }
  func.func @transform_4(%arg0: i32) -> (i32, i32) {
    %c0_i32 = arith.constant 0 : i32
    %c0_i32_0 = arith.constant 0 : i32
    %c0_i32_1 = arith.constant 0 : i32
    return %c0_i32, %c0_i32_0 : i32, i32
  }
  func.func @transform_5(%arg0: i32) -> (i32, i32) {
    %c0_i32 = arith.constant 0 : i32
    %c0_i32_0 = arith.constant 0 : i32
    %c0_i32_1 = arith.constant 0 : i32
    return %c0_i32, %c0_i32_0 : i32, i32
  }
  func.func @transform_6(%arg0: i32) -> (i32, i32, i32) {
    %c0_i32 = arith.constant 0 : i32
    %c0_i32_0 = arith.constant 0 : i32
    %c0_i32_1 = arith.constant 0 : i32
    %c0_i32_2 = arith.constant 0 : i32
    return %c0_i32, %c0_i32_0, %c0_i32_1 : i32, i32, i32
  }
  func.func @transform_7(%arg0: i32) -> (i32, i32, i32) {
    %c0_i32 = arith.constant 0 : i32
    %c0_i32_0 = arith.constant 0 : i32
    %c0_i32_1 = arith.constant 0 : i32
    %c0_i32_2 = arith.constant 0 : i32
    return %c0_i32, %c0_i32_0, %c0_i32_1 : i32, i32, i32
  }
  func.func @transform_8(%arg0: i32) -> (i32, i32, i32) {
    %c0_i32 = arith.constant 0 : i32
    %c0_i32_0 = arith.constant 0 : i32
    %c0_i32_1 = arith.constant 0 : i32
    return %arg0, %c0_i32, %c0_i32_0 : i32, i32, i32
  }
}

module attributes {stable_mosaic.version = 11 : i64} {
  func.func @layer_kernel(%arg0: i32, %arg1: memref<1x32x128xf32, #tpu.memory_space<vmem>>, %arg2: memref<384x128xbf16, #tpu.memory_space<vmem>>, %arg3: memref<128x128xbf16, #tpu.memory_space<vmem>>, %arg4: memref<128x512xbf16, #tpu.memory_space<vmem>>, %arg5: memref<128x512xbf16, #tpu.memory_space<vmem>>, %arg6: memref<512x128xbf16, #tpu.memory_space<vmem>>, %arg7: memref<1x32x32xf32, #tpu.memory_space<vmem>>, %arg8: memref<1x32x32xf32, #tpu.memory_space<vmem>>, %arg9: memref<1x32x128xf32, #tpu.memory_space<vmem>>) attributes {dimension_semantics = [#tpu.dimension_semantics<parallel>], iteration_bounds = array<i64: 2>, scalar_prefetch = 0 : i64, scratch_operands = 0 : i64, tpu.core_type = #tpu.core_type<tc>, window_params = [{transform_indices = @transform_0, window_bounds = array<i64: 1, 32, 128>}, {pipeline_mode = #tpu.pipeline_mode<synchronous>, transform_indices = @transform_1, window_bounds = array<i64: 384, 128>}, {pipeline_mode = #tpu.pipeline_mode<synchronous>, transform_indices = @transform_2, window_bounds = array<i64: 128, 128>}, {pipeline_mode = #tpu.pipeline_mode<synchronous>, transform_indices = @transform_3, window_bounds = array<i64: 128, 512>}, {pipeline_mode = #tpu.pipeline_mode<synchronous>, transform_indices = @transform_4, window_bounds = array<i64: 128, 512>}, {pipeline_mode = #tpu.pipeline_mode<synchronous>, transform_indices = @transform_5, window_bounds = array<i64: 512, 128>}, {pipeline_mode = #tpu.pipeline_mode<synchronous>, transform_indices = @transform_6, window_bounds = array<i64: 1, 32, 32>}, {pipeline_mode = #tpu.pipeline_mode<synchronous>, transform_indices = @transform_7, window_bounds = array<i64: 1, 32, 32>}, {transform_indices = @transform_8, window_bounds = array<i64: 1, 32, 128>}]} {
    %c0 = arith.constant 0 : index
    %c0_0 = arith.constant 0 : index
    %c0_1 = arith.constant 0 : index
    %0 = vector.load %arg1[%c0, %c0_0, %c0_1] : memref<1x32x128xf32, #tpu.memory_space<vmem>>, vector<1x32x128xf32>
    %1 = vector.shape_cast %0 : vector<1x32x128xf32> to vector<32x128xf32>
    %2 = arith.mulf %1, %1 : vector<32x128xf32>
    %cst = arith.constant dense<0.000000e+00> : vector<32xf32>
    %3 = vector.multi_reduction <add>, %2, %cst [1] : vector<32x128xf32> to vector<32xf32>
    %4 = vector.shape_cast %3 : vector<32xf32> to vector<32x1xf32>
    %cst_2 = arith.constant 1.280000e+02 : f32
    %5 = vector.broadcast %cst_2 : f32 to vector<32x1xf32>
    %6 = arith.divf %4, %5 : vector<32x1xf32>
    %cst_3 = arith.constant 9.99999993E-9 : f32
    %7 = vector.broadcast %cst_3 : f32 to vector<32x1xf32>
    %8 = arith.addf %6, %7 : vector<32x1xf32>
    %9 = math.rsqrt %8 : vector<32x1xf32>
    %10 = vector.broadcast %9 : vector<32x1xf32> to vector<32x128xf32>
    %11 = arith.mulf %1, %10 : vector<32x128xf32>
    %12 = arith.truncf %11 : vector<32x128xf32> to vector<32x128xbf16>
    %13 = tpu.transpose %12, [1, 0] : vector<32x128xbf16> -> vector<128x32xbf16>
    %c0_4 = arith.constant 0 : index
    %c0_5 = arith.constant 0 : index
    %14 = vector.load %arg2[%c0_4, %c0_5] : memref<384x128xbf16, #tpu.memory_space<vmem>>, vector<384x128xbf16>
    %cst_6 = arith.constant dense<0.000000e+00> : vector<384x32xf32>
    %15 = tpu.matmul %14, %13, %cst_6 {dimension_numbers = #tpu.dot_dimension_numbers<[1], [0], [0], [1], [0, 0, 1, 1], [], []>} : vector<384x128xbf16>, vector<128x32xbf16>, vector<384x32xf32> -> vector<384x32xf32>
    %16 = vector.extract_strided_slice %15 {offsets = [0, 0], sizes = [128, 32], strides = [1, 1]} : vector<384x32xf32> to vector<128x32xf32>
    %17 = vector.shape_cast %16 : vector<128x32xf32> to vector<4x32x32xf32>
    %18 = vector.extract_strided_slice %15 {offsets = [128, 0], sizes = [128, 32], strides = [1, 1]} : vector<384x32xf32> to vector<128x32xf32>
    %19 = vector.shape_cast %18 : vector<128x32xf32> to vector<4x32x32xf32>
    %20 = vector.extract_strided_slice %15 {offsets = [256, 0], sizes = [128, 32], strides = [1, 1]} : vector<384x32xf32> to vector<128x32xf32>
    %21 = vector.shape_cast %20 : vector<128x32xf32> to vector<4x32x32xf32>
    %c0_7 = arith.constant 0 : index
    %c0_8 = arith.constant 0 : index
    %c0_9 = arith.constant 0 : index
    %22 = vector.load %arg7[%c0_7, %c0_8, %c0_9] : memref<1x32x32xf32, #tpu.memory_space<vmem>>, vector<1x32x32xf32>
    %c0_10 = arith.constant 0 : index
    %c0_11 = arith.constant 0 : index
    %c0_12 = arith.constant 0 : index
    %23 = vector.load %arg8[%c0_10, %c0_11, %c0_12] : memref<1x32x32xf32, #tpu.memory_space<vmem>>, vector<1x32x32xf32>
    %24 = vector.extract_strided_slice %17 {offsets = [0, 16, 0], sizes = [4, 16, 32], strides = [1, 1, 1]} : vector<4x32x32xf32> to vector<4x16x32xf32>
    %25 = vector.extract_strided_slice %17 {offsets = [0, 0, 0], sizes = [4, 16, 32], strides = [1, 1, 1]} : vector<4x32x32xf32> to vector<4x16x32xf32>
    %26 = tpu.concatenate %24, %25 in 1 : vector<4x16x32xf32>, vector<4x16x32xf32> -> vector<4x32x32xf32>
    %27 = vector.broadcast %22 : vector<1x32x32xf32> to vector<4x32x32xf32>
    %28 = arith.mulf %17, %27 : vector<4x32x32xf32>
    %29 = vector.broadcast %23 : vector<1x32x32xf32> to vector<4x32x32xf32>
    %30 = arith.mulf %26, %29 : vector<4x32x32xf32>
    %31 = arith.addf %28, %30 : vector<4x32x32xf32>
    %cst_13 = arith.constant 0.176776692 : f32
    %32 = vector.broadcast %cst_13 : f32 to vector<4x32x32xf32>
    %33 = arith.mulf %31, %32 : vector<4x32x32xf32>
    %34 = vector.extract_strided_slice %19 {offsets = [0, 16, 0], sizes = [4, 16, 32], strides = [1, 1, 1]} : vector<4x32x32xf32> to vector<4x16x32xf32>
    %35 = vector.extract_strided_slice %19 {offsets = [0, 0, 0], sizes = [4, 16, 32], strides = [1, 1, 1]} : vector<4x32x32xf32> to vector<4x16x32xf32>
    %36 = tpu.concatenate %34, %35 in 1 : vector<4x16x32xf32>, vector<4x16x32xf32> -> vector<4x32x32xf32>
    %37 = vector.broadcast %22 : vector<1x32x32xf32> to vector<4x32x32xf32>
    %38 = arith.mulf %19, %37 : vector<4x32x32xf32>
    %39 = vector.broadcast %23 : vector<1x32x32xf32> to vector<4x32x32xf32>
    %40 = arith.mulf %36, %39 : vector<4x32x32xf32>
    %41 = arith.addf %38, %40 : vector<4x32x32xf32>
    %42 = arith.truncf %33 : vector<4x32x32xf32> to vector<4x32x32xbf16>
    %43 = tpu.transpose %42, [0, 2, 1] : vector<4x32x32xbf16> -> vector<4x32x32xbf16>
    %44 = arith.truncf %41 : vector<4x32x32xf32> to vector<4x32x32xbf16>
    %45 = arith.truncf %21 : vector<4x32x32xf32> to vector<4x32x32xbf16>
    "tpu.trace_start"() <{level = 10 : i32, message = "hqd,hdk->hqk"}> : () -> ()
    %cst_14 = arith.constant dense<0.000000e+00> : vector<4x32x32xf32>
    %46 = tpu.matmul %43, %44, %cst_14 {dimension_numbers = #tpu.dot_dimension_numbers<[2], [1], [1], [2], [0, 0, 0, 1, 1, 2], [0], [0]>} : vector<4x32x32xbf16>, vector<4x32x32xbf16>, vector<4x32x32xf32> -> vector<4x32x32xf32>
    "tpu.trace_stop"() : () -> ()
    %47 = tpu.iota {dimensions = array<i32: 0>} : vector<32x32xi32>
    %48 = tpu.iota {dimensions = array<i32: 1>} : vector<32x32xi32>
    %49 = arith.cmpi sge, %47, %48 : vector<32x32xi32>
    %50 = vector.shape_cast %49 : vector<32x32xi1> to vector<1x32x32xi1>
    %cst_15 = arith.constant -1.000000e+30 : f32
    %51 = vector.shape_cast %50 : vector<1x32x32xi1> to vector<1x32x32xi1>
    %52 = vector.broadcast %51 : vector<1x32x32xi1> to vector<4x32x32xi1>
    %53 = vector.broadcast %cst_15 : f32 to vector<4x32x32xf32>
    %54 = arith.select %52, %46, %53 : vector<4x32x32xi1>, vector<4x32x32xf32>
    %cst_16 = arith.constant dense<0xFF800000> : vector<4x32xf32>
    %55 = vector.multi_reduction <maximumf>, %54, %cst_16 [2] : vector<4x32x32xf32> to vector<4x32xf32>
    %56 = vector.shape_cast %55 : vector<4x32xf32> to vector<4x32x1xf32>
    %57 = vector.broadcast %56 : vector<4x32x1xf32> to vector<4x32x32xf32>
    %58 = arith.subf %54, %57 : vector<4x32x32xf32>
    %59 = math.exp %58 : vector<4x32x32xf32>
    %cst_17 = arith.constant dense<0.000000e+00> : vector<4x32xf32>
    %60 = vector.multi_reduction <add>, %59, %cst_17 [2] : vector<4x32x32xf32> to vector<4x32xf32>
    %61 = vector.shape_cast %60 : vector<4x32xf32> to vector<4x32x1xf32>
    %62 = tpu.reciprocal %61 {approx = true} : vector<4x32x1xf32> -> vector<4x32x1xf32>
    %63 = vector.broadcast %62 : vector<4x32x1xf32> to vector<4x32x32xf32>
    %64 = arith.mulf %59, %63 : vector<4x32x32xf32>
    %65 = arith.truncf %64 : vector<4x32x32xf32> to vector<4x32x32xbf16>
    "tpu.trace_start"() <{level = 10 : i32, message = "hdk,hqk->hdq"}> : () -> ()
    %cst_18 = arith.constant dense<0.000000e+00> : vector<4x32x32xf32>
    %66 = tpu.matmul %45, %65, %cst_18 {dimension_numbers = #tpu.dot_dimension_numbers<[2], [2], [1], [1], [0, 0, 0, 1, 1, 1], [0], [0]>} : vector<4x32x32xbf16>, vector<4x32x32xbf16>, vector<4x32x32xf32> -> vector<4x32x32xf32>
    "tpu.trace_stop"() : () -> ()
    %67 = vector.shape_cast %66 : vector<4x32x32xf32> to vector<128x32xf32>
    %68 = arith.truncf %67 : vector<128x32xf32> to vector<128x32xbf16>
    %69 = tpu.transpose %68, [1, 0] : vector<128x32xbf16> -> vector<32x128xbf16>
    %c0_19 = arith.constant 0 : index
    %c0_20 = arith.constant 0 : index
    %70 = vector.load %arg3[%c0_19, %c0_20] : memref<128x128xbf16, #tpu.memory_space<vmem>>, vector<128x128xbf16>
    %cst_21 = arith.constant dense<0.000000e+00> : vector<32x128xf32>
    %71 = tpu.matmul %69, %70, %cst_21 {dimension_numbers = #tpu.dot_dimension_numbers<[1], [0], [0], [1], [0, 0, 1, 1], [], []>} : vector<32x128xbf16>, vector<128x128xbf16>, vector<32x128xf32> -> vector<32x128xf32>
    %72 = arith.addf %1, %71 : vector<32x128xf32>
    %73 = arith.mulf %72, %72 : vector<32x128xf32>
    %cst_22 = arith.constant dense<0.000000e+00> : vector<32xf32>
    %74 = vector.multi_reduction <add>, %73, %cst_22 [1] : vector<32x128xf32> to vector<32xf32>
    %75 = vector.shape_cast %74 : vector<32xf32> to vector<32x1xf32>
    %cst_23 = arith.constant 1.280000e+02 : f32
    %76 = vector.broadcast %cst_23 : f32 to vector<32x1xf32>
    %77 = arith.divf %75, %76 : vector<32x1xf32>
    %cst_24 = arith.constant 9.99999993E-9 : f32
    %78 = vector.broadcast %cst_24 : f32 to vector<32x1xf32>
    %79 = arith.addf %77, %78 : vector<32x1xf32>
    %80 = math.rsqrt %79 : vector<32x1xf32>
    %81 = vector.broadcast %80 : vector<32x1xf32> to vector<32x128xf32>
    %82 = arith.mulf %72, %81 : vector<32x128xf32>
    %83 = arith.truncf %82 : vector<32x128xf32> to vector<32x128xbf16>
    %c0_25 = arith.constant 0 : index
    %c0_26 = arith.constant 0 : index
    %84 = vector.load %arg4[%c0_25, %c0_26] : memref<128x512xbf16, #tpu.memory_space<vmem>>, vector<128x512xbf16>
    %cst_27 = arith.constant dense<0.000000e+00> : vector<32x512xf32>
    %85 = tpu.matmul %83, %84, %cst_27 {dimension_numbers = #tpu.dot_dimension_numbers<[1], [0], [0], [1], [0, 0, 1, 1], [], []>} : vector<32x128xbf16>, vector<128x512xbf16>, vector<32x512xf32> -> vector<32x512xf32>
    %c0_28 = arith.constant 0 : index
    %c0_29 = arith.constant 0 : index
    %86 = vector.load %arg5[%c0_28, %c0_29] : memref<128x512xbf16, #tpu.memory_space<vmem>>, vector<128x512xbf16>
    %cst_30 = arith.constant dense<0.000000e+00> : vector<32x512xf32>
    %87 = tpu.matmul %83, %86, %cst_30 {dimension_numbers = #tpu.dot_dimension_numbers<[1], [0], [0], [1], [0, 0, 1, 1], [], []>} : vector<32x128xbf16>, vector<128x512xbf16>, vector<32x512xf32> -> vector<32x512xf32>
    %88 = arith.mulf %85, %87 : vector<32x512xf32>
    %89 = arith.truncf %88 : vector<32x512xf32> to vector<32x512xbf16>
    %c0_31 = arith.constant 0 : index
    %c0_32 = arith.constant 0 : index
    %90 = vector.load %arg6[%c0_31, %c0_32] : memref<512x128xbf16, #tpu.memory_space<vmem>>, vector<512x128xbf16>
    %cst_33 = arith.constant dense<0.000000e+00> : vector<32x128xf32>
    %91 = tpu.matmul %89, %90, %cst_33 {dimension_numbers = #tpu.dot_dimension_numbers<[1], [0], [0], [1], [0, 0, 1, 1], [], []>} : vector<32x512xbf16>, vector<512x128xbf16>, vector<32x128xf32> -> vector<32x128xf32>
    %92 = arith.addf %72, %91 : vector<32x128xf32>
    %c0_34 = arith.constant 0 : index
    %c0_35 = arith.constant 0 : index
    %c0_36 = arith.constant 0 : index
    %93 = vector.load %arg9[%c0_34, %c0_35, %c0_36] : memref<1x32x128xf32, #tpu.memory_space<vmem>>, vector<1x32x128xf32>
    %94 = vector.shape_cast %93 : vector<1x32x128xf32> to vector<32x128xf32>
    %95 = vector.shape_cast %92 : vector<32x128xf32> to vector<1x32x128xf32>
    tpu.vector_store %arg9[%c0_34, %c0_35, %c0_36], %95 {strides = array<i32>} : memref<1x32x128xf32, #tpu.memory_space<vmem>>, vector<1x32x128xf32>,
    return
  }
  func.func @transform_0(%arg0: i32) -> (i32, i32, i32) {
    %c0_i32 = arith.constant 0 : i32
    %c0_i32_0 = arith.constant 0 : i32
    %c0_i32_1 = arith.constant 0 : i32
    return %arg0, %c0_i32, %c0_i32_0 : i32, i32, i32
  }
  func.func @transform_1(%arg0: i32) -> (i32, i32) {
    %c0_i32 = arith.constant 0 : i32
    %c0_i32_0 = arith.constant 0 : i32
    %c0_i32_1 = arith.constant 0 : i32
    return %c0_i32, %c0_i32_0 : i32, i32
  }
  func.func @transform_2(%arg0: i32) -> (i32, i32) {
    %c0_i32 = arith.constant 0 : i32
    %c0_i32_0 = arith.constant 0 : i32
    %c0_i32_1 = arith.constant 0 : i32
    return %c0_i32, %c0_i32_0 : i32, i32
  }
  func.func @transform_3(%arg0: i32) -> (i32, i32) {
    %c0_i32 = arith.constant 0 : i32
    %c0_i32_0 = arith.constant 0 : i32
    %c0_i32_1 = arith.constant 0 : i32
    return %c0_i32, %c0_i32_0 : i32, i32
  }
  func.func @transform_4(%arg0: i32) -> (i32, i32) {
    %c0_i32 = arith.constant 0 : i32
    %c0_i32_0 = arith.constant 0 : i32
    %c0_i32_1 = arith.constant 0 : i32
    return %c0_i32, %c0_i32_0 : i32, i32
  }
  func.func @transform_5(%arg0: i32) -> (i32, i32) {
    %c0_i32 = arith.constant 0 : i32
    %c0_i32_0 = arith.constant 0 : i32
    %c0_i32_1 = arith.constant 0 : i32
    return %c0_i32, %c0_i32_0 : i32, i32
  }
  func.func @transform_6(%arg0: i32) -> (i32, i32, i32) {
    %c0_i32 = arith.constant 0 : i32
    %c0_i32_0 = arith.constant 0 : i32
    %c0_i32_1 = arith.constant 0 : i32
    %c0_i32_2 = arith.constant 0 : i32
    return %c0_i32, %c0_i32_0, %c0_i32_1 : i32, i32, i32
  }
  func.func @transform_7(%arg0: i32) -> (i32, i32, i32) {
    %c0_i32 = arith.constant 0 : i32
    %c0_i32_0 = arith.constant 0 : i32
    %c0_i32_1 = arith.constant 0 : i32
    %c0_i32_2 = arith.constant 0 : i32
    return %c0_i32, %c0_i32_0, %c0_i32_1 : i32, i32, i32
  }
  func.func @transform_8(%arg0: i32) -> (i32, i32, i32) {
    %c0_i32 = arith.constant 0 : i32
    %c0_i32_0 = arith.constant 0 : i32
    %c0_i32_1 = arith.constant 0 : i32
    return %arg0, %c0_i32, %c0_i32_0 : i32, i32, i32
  }
}

</mosaic_0001>

<bundles_post_ra>
// kernel: tpu_custom_call.1
= control target key start
LH: loop header
LB: loop body
LE: loop exit
PB: predicated region body
PF: predicated region fallthrough
CT: control target
= control target key end

     0   :  { %s4906_s0 = inlined_call_operand.hbm [shape: f32[2,32,128], index: 0, kind: input, shape index: {}]   ;;  %s4907_s1 = inlined_call_operand.hbm [shape: bf16[384,128], index: 1, kind: input, shape index: {}]   ;;  %s4908_s2 = inlined_call_operand.hbm [shape: bf16[128,128], index: 2, kind: input, shape index: {}]   ;;  %s4909_s3 = inlined_call_operand.hbm [shape: bf16[128,512], index: 3, kind: input, shape index: {}]   ;;  %s4910_s4 = inlined_call_operand.hbm [shape: bf16[128,512], index: 4, kind: input, shape index: {}]   ;;  %s4911_s5 = inlined_call_operand.hbm [shape: bf16[512,128], index: 5, kind: input, shape index: {}]   ;;  %s4912_s6 = inlined_call_operand.hbm [shape: f32[1,32,32], index: 6, kind: input, shape index: {}]   ;;  %s4913_s7 = inlined_call_operand.hbm [shape: f32[1,32,32], index: 7, kind: input, shape index: {}]   ;;  %s4914_s8 = inlined_call_operand.hbm [shape: f32[2,32,128], index: 8, kind: output, shape index: {}]  }
   0x1   :  { %4921 = sst [smem:[#allocation23_spill]] %s4907_s1 }
   0x2   :  { %4922 = sst [smem:[#allocation24_spill]] %s4908_s2 }
   0x3   :  { %13 = vsyncpa [#allocation3], 0 }
   0x4   :  { %15 = vsyncpa [#allocation3 + $0x1], 0 }
   0x5   :  { %16 = vsyncpa [#allocation6], 0 }
   0x6   :  { %17 = vsyncpa [#allocation9], 0 }
   0x7   :  { %18 = vsyncpa [#allocation12], 0 }
   0x8   :  { %19 = vsyncpa [#allocation15], 0 }
   0x9   :  { %20 = vsyncpa [#allocation4], 0 }
   0xa   :  { %22 = vsyncpa [#allocation4 + $0x1], 0  ;;  %s4245_s27 = smov 0   ;;  %s4247_s28 = smov 0  }
   0xb   :  { %s4249_s29 = smov 0   ;;  %s4251_s30 = smov 0  }
   0xc LB: > { %s4182_s9 = smov [#allocation5]   ;;  %s4266_s11 = sadd.s32 4294967295, %s4180_s30   ;;  %s4180_s30 = sphi %s4251_s30, %s4950_s30   ;;  %s4176_s29 = sphi %s4249_s29, %s4949_s29   ;;  %s4172_s28 = sphi %s4247_s28, %s4948_s28   ;;  %s4168_s27 = sphi %s4245_s27, %s4947_s27  }
   0xd   : > { %s244_s10 = sshll.u32 %s4182_s9, 4  ;;  %p3079_p0 = scmp.ge.s32.totalorder %s4180_s30, 1  ;;  %s245_s10 = int_to_ptr.vmem [resolvable:$true] %s244_s10 }
   0xe   : > { %p4917_p1 = scmp.eq.s32.totalorder %s4266_s11, 0  ;;  %p232_p2 = scmp.lt.s32.totalorder %s4180_s30, 3 }
   0xf   : > { %s4183_s13 = smov [#allocation8]   ;;  %s4184_s16 = smov [#allocation11]  }
  0x10   : > { %p4271_p3 = pnand %p3079_p0, %p232_p2  ;;  %s270_s14 = sshll.u32 %s4183_s13, 4  ;;  %s4284_s14 = int_to_ptr.vmem [resolvable:$true] %s270_s14 }
  0x11   : > { %s4286_s17 = sshll.u32 %s4184_s16, 4  ;;  %s3901_s19 = scalar_lea.vmem %s245_s10, 3072  ;;  %s297_s17 = int_to_ptr.vmem [resolvable:$true] %s4286_s17 }
  0x12   : > { %s4923_s12 = scalar_select %p4271_p3, 1, 0 }
  0x13   : > { %p3552_p5 = pneg %p4271_p3  ;;  %p3902_p8 = scmp.ne.s32.totalorder %s245_s10, %s3901_s19 }
  0x14   : > { %p3909_p11 = scmp.lt.s32.totalorder %s245_s10, %s245_s10  ;;  %p3910_p12 = scmp.lt.s32.totalorder %s3901_s19, %s3901_s19 }
  0x15   : > { %p4280_p6 = pnand %p3552_p5, %p4917_p1 }
  0x16   : > { %p3911_p13 = por %p3910_p12, %p3909_p11 }
  0x17   : > { %p4290_p7 = pneg %p4280_p6 }
  0x19   : > { %p3904_p9 = pnand %p3902_p8, %p4290_p7 }
  0x1b   : > { %p3905_p10 = pneg %p3904_p9 }
  0x1d   : > { %p3912_p0 = pnand %p3911_p13, %p3905_p10 }
  0x1f   : > { %3915 = shalt.err (!%p3912_p0)
}
  0x20   : > { %s4185_s20 = smov 64   ;;  %s4186_s21 = smov 4  }
  0x21   : > { %s4926_s1 = sld [smem:[#allocation23_spill]]  ;;  %s3927_s24 = scalar_lea.vmem %s4284_s14, 4096 }
  0x22   : > { %p3928_p2 = scmp.ne.s32.totalorder %s4284_s14, %s3927_s24  ;;  %p3935_p9 = scmp.lt.s32.totalorder %s4284_s14, %s4284_s14 }
  0x23   : > { %p3936_p10 = scmp.lt.s32.totalorder %s3927_s24, %s3927_s24 }
  0x24   : > { %p3930_p5 = pnand %p3928_p2, %p4290_p7 }
  0x25   : > { %p3937_p11 = por %p3936_p10, %p3935_p9 }
  0x26   : > { %p3931_p8 = pneg %p3930_p5 }
  0x27   : > { %3555 = dma.hbm_to_vmem [thread:$0]  (!%p4280_p6), %s4926_s1, 3072, %s245_s10, [#allocation6], %s4185_s20, %s4185_s20, %s4186_s21  }
  0x28   : > { %p3938_p12 = pnand %p3937_p11, %p3931_p8 }
  0x2a   : > { %3941 = shalt.err (!%p3938_p12)
}
  0x2b   : > { %s4187_s25 = smov 256   ;;  %s4188_s26 = smov 16  }
  0x2c   : > { %3561 = dma.hbm_to_vmem [thread:$0]  (!%p4280_p6), %s4909_s3, 4096, %s4284_s14, [#allocation9], %s4187_s25, %s4187_s25, %s4188_s26  }
  0x2d   : > { %s3953_s13 = scalar_lea.vmem %s297_s17, 4096  ;;  %p3961_p5 = scmp.lt.s32.totalorder %s297_s17, %s297_s17 }
  0x2e   : > { %p3954_p13 = scmp.ne.s32.totalorder %s297_s17, %s3953_s13  ;;  %p3962_p8 = scmp.lt.s32.totalorder %s3953_s13, %s3953_s13 }
  0x30   : > { %p3956_p0 = pnand %p3954_p13, %p4290_p7  ;;  %p3963_p9 = por %p3962_p8, %p3961_p5 }
  0x32   : > { %p3957_p2 = pneg %p3956_p0 }
  0x34   : > { %p3964_p10 = pnand %p3963_p9, %p3957_p2 }
  0x36   : > { %3967 = shalt.err (!%p3964_p10)
}
  0x37   : > { %3567 = dma.hbm_to_vmem [thread:$0]  (!%p4280_p6), %s4911_s5, 4096, %s297_s17, [#allocation12], %s4185_s20, %s4185_s20, %s4186_s21  }
  0x38   : > { %s4189_s14 = smov [#allocation7]   ;;  %s4190_s23 = smov [#allocation10]  }
  0x39   : > { %s257_s22 = sshll.u32 %s4189_s14, 4  ;;  %s283_s24 = sshll.u32 %s4190_s23, 4  ;;  %s258_s22 = int_to_ptr.vmem [resolvable:$true] %s257_s22  ;;  %s284_s24 = int_to_ptr.vmem [resolvable:$true] %s283_s24 }
  0x3a   : > { %s3979_s9 = scalar_lea.vmem %s258_s22, 1024  ;;  %p3987_p0 = scmp.lt.s32.totalorder %s258_s22, %s258_s22 }
  0x3b   : > { %p3980_p11 = scmp.ne.s32.totalorder %s258_s22, %s3979_s9  ;;  %p3988_p2 = scmp.lt.s32.totalorder %s3979_s9, %s3979_s9 }
  0x3d   : > { %p3982_p12 = pnand %p3980_p11, %p4290_p7  ;;  %p3989_p5 = por %p3988_p2, %p3987_p0 }
  0x3f   : > { %p3983_p13 = pneg %p3982_p12 }
  0x41   : > { %p3990_p8 = pnand %p3989_p5, %p3983_p13 }
  0x43   : > { %3993 = shalt.err (!%p3990_p8)
}
  0x44   : > { %s4927_s2 = sld [smem:[#allocation24_spill]]  ;;  %s4005_s13 = scalar_lea.vmem %s284_s24, 4096 }
  0x45   : > { %p4006_p9 = scmp.ne.s32.totalorder %s284_s24, %s4005_s13  ;;  %p4013_p12 = scmp.lt.s32.totalorder %s284_s24, %s284_s24 }
  0x46   : > { %p4014_p0 = scmp.lt.s32.totalorder %s4005_s13, %s4005_s13 }
  0x47   : > { %p4008_p10 = pnand %p4006_p9, %p4290_p7 }
  0x48   : > { %p4015_p13 = por %p4014_p0, %p4013_p12 }
  0x49   : > { %p4009_p11 = pneg %p4008_p10 }
  0x4a   : > { %3558 = dma.hbm_to_vmem [thread:$0]  (!%p4280_p6), %s4927_s2, 1024, %s258_s22, [#allocation6], %s4185_s20, %s4185_s20, %s4186_s21  }
  0x4b   : > { %p4016_p2 = pnand %p4015_p13, %p4009_p11 }
  0x4d   : > { %4019 = shalt.err (!%p4016_p2)
}
  0x4e   : > { %3564 = dma.hbm_to_vmem [thread:$0]  (!%p4280_p6), %s4910_s4, 4096, %s284_s24, [#allocation9], %s4187_s25, %s4187_s25, %s4188_s26  }
  0x4f   : > { %s4191_s20 = smov [#allocation13]  }
  0x50   : > { %s309_s21 = sshll.u32 %s4191_s20, 4  ;;  %s310_s21 = int_to_ptr.vmem [resolvable:$true] %s309_s21 }
  0x51   : > { %s4031_s14 = scalar_lea.vmem %s310_s21, 512  ;;  %p4039_p10 = scmp.lt.s32.totalorder %s310_s21, %s310_s21 }
  0x52   : > { %p4032_p5 = scmp.ne.s32.totalorder %s310_s21, %s4031_s14  ;;  %p4040_p11 = scmp.lt.s32.totalorder %s4031_s14, %s4031_s14 }
  0x54   : > { %p4034_p8 = pnand %p4032_p5, %p4290_p7  ;;  %p4041_p12 = por %p4040_p11, %p4039_p10 }
  0x56   : > { %p4035_p9 = pneg %p4034_p8 }
  0x58   : > { %p4042_p0 = pnand %p4041_p12, %p4035_p9 }
  0x5a   : > { %4045 = shalt.err (!%p4042_p0)
}
  0x5b   : > { %s4915_s22 = smov 128   ;;  %s4916_s23 = smov 8  }
  0x5c   : > { %3570 = dma.hbm_to_vmem [thread:$0]  (!%p4280_p6), %s4912_s6, 512, %s310_s21, [#allocation12], %s4915_s22, %s4915_s22, %s4916_s23  }
  0x5d   : > { %s4194_s24 = smov [#allocation14]  }
  0x5e   : > { %s322_s9 = sshll.u32 %s4194_s24, 4  ;;  %s323_s9 = int_to_ptr.vmem [resolvable:$true] %s322_s9 }
  0x5f   : > { %s4057_s17 = scalar_lea.vmem %s323_s9, 512  ;;  %p4065_p8 = scmp.lt.s32.totalorder %s323_s9, %s323_s9 }
  0x60   : > { %p4058_p13 = scmp.ne.s32.totalorder %s323_s9, %s4057_s17  ;;  %p4066_p9 = scmp.lt.s32.totalorder %s4057_s17, %s4057_s17 }
  0x62   : > { %p4060_p2 = pnand %p4058_p13, %p4290_p7  ;;  %p4067_p10 = por %p4066_p9, %p4065_p8 }
  0x64   : > { %p4061_p5 = pneg %p4060_p2 }
  0x66   : > { %p4068_p11 = pnand %p4067_p10, %p4061_p5 }
  0x68   : > { %4071 = shalt.err (!%p4068_p11)
}
  0x69   : > { %3573 = dma.hbm_to_vmem [thread:$0]  (!%p4280_p6), %s4913_s7, 512, %s323_s9, [#allocation15], %s4915_s22, %s4915_s22, %s4916_s23  }
  0x6a   : > { %s3078_s15 = sadd.s32 4294967294, %s4180_s30   ;;  %s4372_s18 = sadd.s32 1, %s4180_s30  }
  0x6b   : > { %s35_s16 = sadd.s32 1, %s4176_s29  ;;  %s32_s19 = ssub.s32 %s4180_s30, %s4372_s18 }
  0x6c   : > { %p42_p7 = scmp.ne.s32.totalorder %s4176_s29, %s4172_s28  ;;  %p33_p12 = scmp.eq.s32.totalorder %s32_s19, 0 }
  0x6d   : > { %p43_p0 = scmp.eq.s32.totalorder %s4180_s30, 0  ;;  %p48_p13 = scmp.ne.s32.totalorder %s4172_s28, %s4168_s27 }
  0x6e   : > { %p219_p2 = scmp.eq.s32.totalorder %s4266_s11, 1  ;;  %p225_p9 = scmp.eq.s32.totalorder %s3078_s15, 1 }
  0x6f   : > { %s4384_s20 = scalar_select %p33_p12, %s4176_s29, %s35_s16  }
  0x70   : > { %p44_p5 = por %p43_p0, %p42_p7  ;;  %p4388_p8 = por %p4917_p1, %p48_p13 }
  0x71   : > { %p4392_p6 = por %p219_p2, %p42_p7  ;;  %p3589_p10 = scmp.lt.s32.totalorder %s4180_s30, 2 }
  0x72   : > { %s4928_s21 = scalar_select %p4388_p8, 1, 0 }
  0x73   : > { %s4929_s14 = scalar_select %p4392_p6, 1, 0 }
  0x74   : > { %s336_s25 = sand.u32 1, %s4176_s29   ;;  %p4398_p11 = por %p225_p9, %p48_p13 }
  0x75   : > { %s3088_s24 = sshll.u32 %s336_s25, 5  ;;  %s3250_s9 = sshll.u32 %s4180_s30, 9 }
  0x76   : > { %s4930_s26 = scalar_select %p4398_p11, 1, 0 }
  0x77   : > { %s4406_s13 = scalar_lea.hbm %s4906_s0, %s3250_s9  ;;  %s340_s16 = scalar_lea.vmem [#allocation2], %s3088_s24 }
  0x78   : > { %s347_s19 = sshll.u32 %s340_s16, 4  ;;  %p4408_p7 = pnand %p3589_p10, %p44_p5  ;;  %s4412_s19 = int_to_ptr.vmem [resolvable:$true] %s347_s19 }
  0x79   : > { %s4414_s22 = scalar_lea.sflag [#allocation3], %s336_s25  ;;  %s4072_s23 = scalar_lea.hbm %s4406_s13, 512 }
  0x7a   : > { %p4073_p12 = scmp.ne.s32.totalorder %s4406_s13, %s4072_s23  ;;  %p4074_p0 = pneg %p4408_p7 }
  0x7b   : > { %s4077_s24 = scalar_lea.hbm %s4906_s0, 1024  ;;  %p4078_p5 = scmp.lt.s32.totalorder %s4406_s13, %s4906_s0 }
  0x7c   : > { %p4075_p13 = pnand %p4074_p0, %p4073_p12  ;;  %p4079_p9 = scmp.lt.s32.totalorder %s4077_s24, %s4072_s23 }
  0x7e   : > { %p4076_p2 = pneg %p4075_p13  ;;  %p4080_p10 = por %p4079_p9, %p4078_p5 }
  0x80   : > { %p4081_p4 = pnand %p4080_p10, %p4076_p2 }
  0x82   : > { %4084 = shalt.err (!%p4081_p4)
}
  0x83   : > { %s4085_s25 = scalar_lea.vmem %s4412_s19, 512  ;;  %s4195_s1 = smov [#allocation2]  }
  0x84   : > { %p4086_p1 = scmp.ne.s32.totalorder %s4412_s19, %s4085_s25  ;;  %s4090_s2 = sshll.u32 %s4195_s1, 4  ;;  %s4091_s2 = int_to_ptr.vmem [resolvable:$false] %s4090_s2 }
  0x85   : > { %s4092_s9 = scalar_lea.vmem %s4091_s2, 1024  ;;  %p4093_p13 = scmp.lt.s32.totalorder %s4412_s19, %s4091_s2 }
  0x86   : > { %p4088_p11 = pnand %p4086_p1, %p4074_p0  ;;  %p4094_p6 = scmp.lt.s32.totalorder %s4092_s9, %s4085_s25 }
  0x88   : > { %p4089_p12 = pneg %p4088_p11  ;;  %p4095_p8 = por %p4094_p6, %p4093_p13 }
  0x8a   : > { %p4096_p3 = pnand %p4095_p8, %p4089_p12 }
  0x8c   : > { %4099 = shalt.err (!%p4096_p3)
}
  0x8d   : > { %s4932_s23 = smov 8   ;;  %s4933_s17 = smov 128  }
  0x8e   : > { %3577 = dma.hbm_to_vmem [thread:$0]  (!%p4408_p7), %s4406_s13, 512, %s4412_s19, %s4414_s22, %s4933_s17, %s4933_s17, %s4932_s23  }
  0x8f   : > { %p4934_p1 = scmp.ne.s32.totalorder %s4923_s12, 0 }
  0x90   : > { %s4441_s1 = sand.u32 (!%p4934_p1), 1, %s4172_s28   ;;  %p4935_p3 = scmp.ne.s32.totalorder (!%p4934_p1), %s4928_s21, 0 }
  0x91   : > { %359 = sbr.rel (%p4934_p1) target bundleno = 2340 (0x924), region = 52  ;;  %s3092_s2 = sshll.u32 (!%p4934_p1), %s4441_s1, 5 }
  0x92   : > { %s362_s24 = scalar_lea.sflag (!%p4934_p1), [#allocation3], %s4441_s1  ;;  %s4447_s15 = scalar_lea.vmem (!%p4934_p1), [#allocation2], %s3092_s2 }
  0x96   : > { %4143 = dma.done.wait (%p4935_p3), %s362_s24, 512  }
  0x97   : > { %4145 = vsyncadd (%p4935_p3), %s362_s24, 4294966784  ;;  %p4936_p4 = scmp.eq.s32.totalorder %s4266_s11, 0 }
  0x99   : > { %4147 = dma.done.wait (%p4936_p4), [#allocation6], 4096   ;;  %p4937_p8 = pmov %p4936_p4 }
  0x9a   : > { %p4938_p6 = pmov %p4936_p4 }
  0x9b   : > { %4149 = vsyncadd (%p4937_p8), [#allocation6], 4294963200 }
  0x9c   : > { %4151 = dma.done.wait (%p4938_p6), [#allocation9], 8192   ;;  %p4939_p11 = pmov %p4936_p4 }
  0x9d   : > { %p4940_p7 = pmov %p4936_p4 }
  0x9e   : > { %4153 = vsyncadd (%p4939_p11), [#allocation9], 4294959104 }
  0x9f   : > { %4155 = dma.done.wait (%p4940_p7), [#allocation12], 4608   ;;  %p4941_p0 = pmov %p4936_p4 }
  0xa1   : > { %4157 = vsyncadd (%p4941_p0), [#allocation12], 4294962688  ;;  %p4942_p2 = pmov %p4941_p0 }
  0xa2   : > { %p4943_p5 = pmov %p4941_p0 }
  0xa3   : > { %4159 = dma.done.wait (%p4942_p2), [#allocation15], 512  }
  0xa4   : > { %4161 = vsyncadd (%p4943_p5), [#allocation15], 4294966784  ;;  %v429_v0 = vld [vmem:[%s4447_s15 + $0x10] sm:$0xff]  ;;  %v430_v1 = vld [vmem:[%s4447_s15 + $0x18] sm:$0xff]  ;;  %vm1087_vm0 = vcmask 261120   ;;  %s425_s12 = scalar_lea.vmem [#allocation16], %s3092_s2 }
  0xa5   : > { %v427_v2 = vld [vmem:[%s4447_s15] sm:$0xff]  ;;  %v433_v3 = vmul.f32 %v429_v0, %v429_v0  ;;  %v428_v5 = vld [vmem:[%s4447_s15 + $0x8] sm:$0xff]  ;;  %v434_v6 = vmul.f32 %v430_v1, %v430_v1  ;;  %v3648_v32 = vld [vmem:[#allocation5 + $0x10] sm:$0xff]   ;;  %s2938_s22 = sshll.u32 %s425_s12, 4  ;;  %s3251_s21 = sshll.u32 %s4266_s11, 9  ;;  %s4857_s22 = int_to_ptr.vmem [resolvable:$true] %s2938_s22 }
  0xa6   : > { %v431_v4 = vmul.f32 %v427_v2, %v427_v2  ;;  %v432_v7 = vmul.f32 %v428_v5, %v428_v5  ;;  %v3646_v8 = vld [vmem:[#allocation5] sm:$0xff]   ;;  %v3647_v31 = vld [vmem:[#allocation5 + $0x8] sm:$0xff]   ;;  %v3649_v33 = vld [vmem:[#allocation5 + $0x18] sm:$0xff]   ;;  %s4862_s10 = scalar_lea.hbm %s4914_s8, %s3251_s21  ;;  %s2925_s16 = scalar_lea.sflag [#allocation4], %s4441_s1 }
  0xa7   : > { %439 = vadd.xlane.f32.xlu0 %v433_v3  ;;  %3380 = vmatprep.mubr.bf16.mxu0 %v3646_v8  ;;  %v3650_v34 = vld [vmem:[#allocation5 + $0x20] sm:$0xff]   ;;  %v3651_v35 = vld [vmem:[#allocation5 + $0x28] sm:$0xff]   ;;  %v3652_v36 = vld [vmem:[#allocation5 + $0x30] sm:$0xff]   ;;  %s4100_s25 = scalar_lea.vmem %s4857_s22, 512  ;;  %p4944_p10 = scmp.ne.s32.totalorder %s4929_s14, 0 }
  0xa8   : > { %435 = vadd.xlane.f32.xlu1 %v431_v4  ;;  %v3653_v37 = vld [vmem:[#allocation5 + $0x38] sm:$0xff]   ;;  %v3654_v38 = vld [vmem:[#allocation5 + $0x40] sm:$0xff]   ;;  %v3655_v39 = vld [vmem:[#allocation5 + $0x48] sm:$0xff]   ;;  %p4101_p9 = scmp.ne.s32.totalorder %s4857_s22, %s4100_s25  ;;  %s4197_s11 = smov [#allocation16]  }
  0xa9   : > { %v3656_v40 = vld [vmem:[#allocation5 + $0x50] sm:$0xff]   ;;  %v3657_v41 = vld [vmem:[#allocation5 + $0x58] sm:$0xff]   ;;  %v3658_v42 = vld [vmem:[#allocation5 + $0x60] sm:$0xff]   ;;  %s4104_s9 = sshll.u32 %s4197_s11, 4  ;;  %s4105_s9 = int_to_ptr.vmem [resolvable:$false] %s4104_s9 }
  0xaa   : > { %v3659_v43 = vld [vmem:[#allocation5 + $0x68] sm:$0xff]   ;;  %v3660_v44 = vld [vmem:[#allocation5 + $0x70] sm:$0xff]   ;;  %v3661_v45 = vld [vmem:[#allocation5 + $0x78] sm:$0xff]   ;;  %p4102_p12 = pnand %p4101_p9, %p4944_p10  ;;  %s4106_s23 = scalar_lea.vmem %s4105_s9, 1024 }
  0xab   : > { %441 = vadd.xlane.f32.xlu0 %v434_v6  ;;  %v4473_v47 = vld [vmem:[#allocation13] sm:$0xff]  ;;  %v4478_v52 = vld [vmem:[#allocation14 + $0x8] sm:$0xff]  ;;  %v4482_v54 = vld [vmem:[#allocation14 + $0x18] sm:$0xff]  ;;  %p4107_p1 = scmp.lt.s32.totalorder %s4857_s22, %s4105_s9  ;;  %p4108_p3 = scmp.lt.s32.totalorder %s4106_s23, %s4100_s25 }
  0xac   : > { %437 = vadd.xlane.f32.xlu1 %v432_v7  ;;  %v4475_v49 = vld [vmem:[#allocation14] sm:$0xff]  ;;  %v4480_v53 = vld [vmem:[#allocation13 + $0x8] sm:$0xff]  ;;  %v4484_v55 = vld [vmem:[#allocation14 + $0x10] sm:$0xff]  ;;  %p4103_p13 = pneg %p4102_p12 }
  0xad   : > { %v4486_v56 = vld [vmem:[#allocation13 + $0x18] sm:$0xff]  ;;  %v4489_v59 = vld [vmem:[#allocation13 + $0x10] sm:$0xff]  ;;  %p4109_p4 = por %p4108_p3, %p4107_p1 }
  0xaf   : > { %p4110_p8 = pnand %p4109_p4, %p4103_p13 }
 0x130   : > { %v440_v9 = vpop.xlane.xlu0 %439 }
 0x131   : > { %v436_v10 = vpop.xlane.xlu1 %435  ;;  %v446_v11 = vmul.f32 0.0078125, %v440_v9 }
 0x132   : > { %v444_v12 = vmul.f32 0.0078125, %v436_v10 }
 0x133   : > { %v450_v13 = vadd.f32 1e-08, %v446_v11 }
 0x134   : > { %v448_v14 = vadd.f32 1e-08, %v444_v12  ;;  %v442_v15 = vpop.xlane.xlu0 %441 }
 0x135   : > { %v438_v16 = vpop.xlane.xlu1 %437  ;;  %v447_v17 = vmul.f32 0.0078125, %v442_v15 }
 0x136   : > { %v445_v18 = vmul.f32 0.0078125, %v438_v16  ;;  %3806 = vrsqrt.f32 %v448_v14 }
 0x137   : > { %3808 = vrsqrt.f32 %v450_v13  ;;  %v451_v19 = vadd.f32 1e-08, %v447_v17 }
 0x138   : > { %v449_v20 = vadd.f32 1e-08, %v445_v18 }
 0x139   : > { %3810 = vrsqrt.f32 %v451_v19 }
 0x13a   : > { %3812 = vrsqrt.f32 %v449_v20 }
 0x143   : > { %v3807_v21 = vpop.eup %3806 }
 0x144   : > { %v3809_v22 = vpop.eup %3808  ;;  %v456_v24 = vmul.f32 %v3807_v21, %v427_v2 }
 0x145   : > { %v458_v26 = vmul.f32 %v3809_v22, %v429_v0 }
 0x146   : > { %v3811_v23 = vpop.eup %3810 }
 0x147   : > { %v3813_v25 = vpop.eup %3812  ;;  %v459_v27 = vmul.f32 %v3811_v23, %v430_v1 }
 0x148   : > { %v457_v28 = vmul.f32 %v3813_v25, %v428_v5 }
 0x149   : > { %v461_v29 = vpack.c.bf16 %v459_v27, %v458_v26 }
 0x14a   : > { %v460_v30 = vpack.c.bf16 %v457_v28, %v456_v24 }
 0x14b   : > { %3376 = vmatprep.subr.bf16.mxu0 %v461_v29 }
 0x14c   : > { %3377 = vmatpush3.bf16.xpose.msra.mxu0 %v461_v29 }
 0x14d   : > { %3378 = vmatprep.subr.bf16.mxu0 %v460_v30 }
 0x154   : > { %3379 = vmatpush3.bf16.xpose.msra.mxu0 %v460_v30 }
 0x15b   : > { %3381 = vmatmul.mubr.bf16.vlgmr.msra.gmra.mxu0 %v3647_v31 }
 0x15c   : > { %3384 = vmatprep.mubr.bf16.mxu0 %v3648_v32 }
 0x163   : > { %3385 = vmatmul.mubr.bf16.gmra.mxu0 %v3649_v33 }
 0x164   : > { %3388 = vmatprep.mubr.bf16.mxu0 %v3650_v34 }
 0x16b   : > { %3389 = vmatmul.mubr.bf16.gmra.mxu0 %v3651_v35 }
 0x16c   : > { %3392 = vmatprep.mubr.bf16.mxu0 %v3652_v36 }
 0x173   : > { %3393 = vmatmul.mubr.bf16.gmra.mxu0 %v3653_v37 }
 0x174   : > { %3396 = vmatprep.mubr.bf16.mxu0 %v3654_v38 }
 0x17b   : > { %3397 = vmatmul.mubr.bf16.gmra.mxu0 %v3655_v39 }
 0x17c   : > { %3400 = vmatprep.mubr.bf16.mxu0 %v3656_v40 }
 0x183   : > { %3401 = vmatmul.mubr.bf16.gmra.mxu0 %v3657_v41 }
 0x184   : > { %3404 = vmatprep.mubr.bf16.mxu0 %v3658_v42 }
 0x18b   : > { %3405 = vmatmul.mubr.bf16.gmra.mxu0 %v3659_v43 }
 0x18c   : > { %3408 = vmatprep.mubr.bf16.mxu0 %v3660_v44 }
 0x193   : > { %3409 = vmatmul.mubr.bf16.gmra.mxu0 %v3661_v45 }
 0x21b   : > { %v3382_v46 = vpop.f32.mrf.mxu0 }
 0x21c   : > { %v903_v57 = vmul.f32 %v3382_v46, %v4475_v49  ;;  %v889_v4 = vmul.f32 %v3382_v46, %v4489_v59 }
 0x21d   : > { %v688_v48 = vpop.f32.mrf.mxu0 }
 0x21e   : > { %v887_v50 = vmul.f32 %v4473_v47, %v688_v48  ;;  %v905_v63 = vmul.f32 %v4484_v55, %v688_v48 }
 0x21f   : > { %v3383_v51 = vpop.f32.mrf.mxu0 }
 0x220   : > { %v904_v60 = vmul.f32 %v3383_v51, %v4478_v52  ;;  %v919_v0 = vadd.f32 %v903_v57, %v887_v50  ;;  %v890_v1 = vmul.f32 %v3383_v51, %v4486_v56  ;;  %v921_v10 = vadd.f32 %v905_v63, %v889_v4 }
 0x221   : > { %v691_v58 = vpop.f32.mrf.mxu0 }
 0x222   : > { %v888_v61 = vmul.f32 %v4480_v53, %v691_v58  ;;  %v906_v62 = vmul.f32 %v4482_v54, %v691_v58  ;;  %v935_v12 = vmul.f32 0.17677669, %v919_v0  ;;  %v937_v23 = vmul.f32 0.17677669, %v921_v10 }
 0x223   : > { %v3386_v2 = vpop.f32.mrf.mxu0 }
 0x224   : > { %v920_v3 = vadd.f32 %v904_v60, %v888_v61  ;;  %v922_v5 = vadd.f32 %v906_v62, %v890_v1  ;;  %v907_v6 = vmul.f32 %v3386_v2, %v4475_v49  ;;  %v893_v13 = vmul.f32 %v3386_v2, %v4489_v59 }
 0x225   : > { %v704_v7 = vpop.f32.mrf.mxu0 }
 0x226   : > { %v891_v8 = vmul.f32 %v4473_v47, %v704_v7  ;;  %v936_v9 = vmul.f32 0.17677669, %v920_v3  ;;  %v909_v14 = vmul.f32 %v4484_v55, %v704_v7  ;;  %v938_v16 = vmul.f32 0.17677669, %v922_v5 }
 0x227   : > { %v3387_v11 = vpop.f32.mrf.mxu0 }
 0x228   : > { %v908_v15 = vmul.f32 %v3387_v11, %v4478_v52  ;;  %v923_v17 = vadd.f32 %v907_v6, %v891_v8  ;;  %v894_v18 = vmul.f32 %v3387_v11, %v4486_v56  ;;  %v999_v20 = vpack.c.bf16 %v936_v9, %v935_v12 }
 0x229   : > { %v707_v19 = vpop.f32.mrf.mxu0  ;;  %v925_v25 = vadd.f32 %v909_v14, %v893_v13  ;;  %v1000_v30 = vpack.c.bf16 %v938_v16, %v937_v23 }
 0x22a   : > { %v892_v21 = vmul.f32 %v4480_v53, %v707_v19  ;;  %v910_v22 = vmul.f32 %v4482_v54, %v707_v19  ;;  %1007 = vxpose.xlu0.c.b16.start [1/2] (short) (narrow) %v999_v20, 32  ;;  %v939_v31 = vmul.f32 0.17677669, %v923_v17 }
 0x22b   : > { %v3390_v24 = vpop.f32.mrf.mxu0  ;;  %v941_v39 = vmul.f32 0.17677669, %v925_v25 }
 0x22c   : > { %v924_v26 = vadd.f32 %v908_v15, %v892_v21  ;;  %v926_v27 = vadd.f32 %v910_v22, %v894_v18  ;;  %v911_v28 = vmul.f32 %v3390_v24, %v4475_v49  ;;  %v897_v34 = vmul.f32 %v3390_v24, %v4489_v59 }
 0x22d   : > { %v720_v29 = vpop.f32.mrf.mxu0 }
 0x22e   : > { %v895_v32 = vmul.f32 %v4473_v47, %v720_v29  ;;  %v940_v33 = vmul.f32 0.17677669, %v924_v26  ;;  %v913_v35 = vmul.f32 %v4484_v55, %v720_v29  ;;  %1008 = vxpose.xlu0.c.b16.end [2/2] (short) (narrow) %v1000_v30, 32  ;;  %v942_v40 = vmul.f32 0.17677669, %v926_v27 }
 0x22f   : > { %v3391_v36 = vpop.f32.mrf.mxu0 }
 0x230   : > { %v898_v37 = vmul.f32 %v3391_v36, %v4486_v56  ;;  %v912_v38 = vmul.f32 %v3391_v36, %v4478_v52  ;;  %v927_v41 = vadd.f32 %v911_v28, %v895_v32  ;;  %v1001_v43 = vpack.c.bf16 %v940_v33, %v939_v31 }
 0x231   : > { %v723_v42 = vpop.f32.mrf.mxu0  ;;  %v929_v46 = vadd.f32 %v913_v35, %v897_v34  ;;  %v1002_v61 = vpack.c.bf16 %v942_v40, %v941_v39 }
 0x232   : > { %v896_v44 = vmul.f32 %v4480_v53, %v723_v42  ;;  %v914_v45 = vmul.f32 %v4482_v54, %v723_v42  ;;  %1023 = vxpose.xlu1.c.b16.start [1/2] (short) (narrow) %v1001_v43, 32  ;;  %v943_v62 = vmul.f32 0.17677669, %v927_v41 }
 0x233   : > { %v3394_v48 = vpop.f32.mrf.mxu0  ;;  %v945_v2 = vmul.f32 0.17677669, %v929_v46 }
 0x234   : > { %v928_v50 = vadd.f32 %v912_v38, %v896_v44  ;;  %v930_v51 = vadd.f32 %v914_v45, %v898_v37  ;;  %v915_v57 = vmul.f32 %v3394_v48, %v4475_v49  ;;  %v901_v58 = vmul.f32 %v3394_v48, %v4489_v59 }
 0x235   : > { %v736_v60 = vpop.f32.mrf.mxu0 }
 0x236   : > { %v899_v63 = vmul.f32 %v4473_v47, %v736_v60  ;;  %v917_v0 = vmul.f32 %v4484_v55, %v736_v60  ;;  %v944_v1 = vmul.f32 0.17677669, %v928_v50  ;;  %v946_v3 = vmul.f32 0.17677669, %v930_v51  ;;  %1024 = vxpose.xlu1.c.b16.end [2/2] (short) (narrow) %v1002_v61, 32 }
 0x237   : > { %v3395_v4 = vpop.f32.mrf.mxu0 }
 0x238   : > { %v931_v5 = vadd.f32 %v915_v57, %v899_v63  ;;  %v902_v6 = vmul.f32 %v3395_v4, %v4486_v56  ;;  %v916_v7 = vmul.f32 %v3395_v4, %v4478_v52  ;;  %v933_v8 = vadd.f32 %v917_v0, %v901_v58 }
 0x239   : > { %v739_v9 = vpop.f32.mrf.mxu0  ;;  %v1003_v10 = vpack.c.bf16 %v944_v1, %v943_v62  ;;  %v1004_v13 = vpack.c.bf16 %v946_v3, %v945_v2 }
 0x23a   : > { %v900_v11 = vmul.f32 %v4480_v53, %v739_v9  ;;  %v918_v12 = vmul.f32 %v4482_v54, %v739_v9  ;;  %v947_v17 = vmul.f32 0.17677669, %v931_v5  ;;  %v949_v18 = vmul.f32 0.17677669, %v933_v8 }
 0x23b   : > { %1039 = vxpose.xlu0.c.b16.start [1/2] (short) (narrow) %v1003_v10, 32  ;;  %v3398_v14 = vpop.f32.mrf.mxu0 }
 0x23c   : > { %v932_v15 = vadd.f32 %v916_v7, %v900_v11  ;;  %v934_v16 = vadd.f32 %v918_v12, %v902_v6  ;;  %v953_v19 = vmul.f32 %v3398_v14, %v4489_v59  ;;  %v967_v20 = vmul.f32 %v3398_v14, %v4475_v49 }
 0x23d   : > { %v752_v21 = vpop.f32.mrf.mxu0 }
 0x23e   : > { %v950_v22 = vmul.f32 0.17677669, %v934_v16  ;;  %v948_v23 = vmul.f32 0.17677669, %v932_v15  ;;  %v951_v24 = vmul.f32 %v4473_v47, %v752_v21  ;;  %v969_v25 = vmul.f32 %v4484_v55, %v752_v21 }
 0x23f   : > { %1040 = vxpose.xlu0.c.b16.end [2/2] (short) (narrow) %v1004_v13, 32  ;;  %v3399_v26 = vpop.f32.mrf.mxu0 }
 0x240   : > { %v1005_v27 = vpack.c.bf16 %v948_v23, %v947_v17  ;;  %v954_v28 = vmul.f32 %v3399_v26, %v4486_v56  ;;  %v1006_v29 = vpack.c.bf16 %v950_v22, %v949_v18  ;;  %v968_v30 = vmul.f32 %v3399_v26, %v4478_v52 }
 0x241   : > { %v755_v31 = vpop.f32.mrf.mxu0  ;;  %v983_v32 = vadd.f32 %v967_v20, %v951_v24  ;;  %v985_v35 = vadd.f32 %v969_v25, %v953_v19 }
 0x242   : > { %1055 = vxpose.xlu1.c.b16.start [1/2] (short) (narrow) %v1005_v27, 32  ;;  %v952_v33 = vmul.f32 %v4480_v53, %v755_v31  ;;  %v970_v34 = vmul.f32 %v4482_v54, %v755_v31 }
 0x243   : > { %v3402_v36 = vpop.f32.mrf.mxu0 }
 0x244   : > { %v984_v37 = vadd.f32 %v968_v30, %v952_v33  ;;  %v986_v38 = vadd.f32 %v970_v34, %v954_v28  ;;  %v971_v39 = vmul.f32 %v3402_v36, %v4475_v49  ;;  %v957_v40 = vmul.f32 %v3402_v36, %v4489_v59 }
 0x245   : > { %v768_v41 = vpop.f32.mrf.mxu0 }
 0x246   : > { %1056 = vxpose.xlu1.c.b16.end [2/2] (short) (narrow) %v1006_v29, 32  ;;  %v1072_v42 = vpack.c.bf16 %v986_v38, %v985_v35  ;;  %v1071_v43 = vpack.c.bf16 %v984_v37, %v983_v32  ;;  %v955_v44 = vmul.f32 %v4473_v47, %v768_v41  ;;  %v973_v45 = vmul.f32 %v4484_v55, %v768_v41  ;;  %v3662_v38 = vld [vmem:[#allocation5 + $0x80] sm:$0xff]  }
 0x247   : > { %v3403_v46 = vpop.f32.mrf.mxu0  ;;  %3412 = vmatprep.mubr.bf16.mxu0 %v3662_v38 }
 0x248   : > { %3428 = vmatprep.subr.bf16.mxu1 %v1072_v42  ;;  %v987_v48 = vadd.f32 %v971_v39, %v955_v44  ;;  %v958_v50 = vmul.f32 %v3403_v46, %v4486_v56  ;;  %v972_v51 = vmul.f32 %v3403_v46, %v4478_v52  ;;  %v989_v58 = vadd.f32 %v973_v45, %v957_v40  ;;  %v3663_v39 = vld [vmem:[#allocation5 + $0x88] sm:$0xff]  }
 0x249   : > { %3429 = vmatpush3.bf16.msra.mxu1 %v1072_v42  ;;  %v771_v57 = vpop.f32.mrf.mxu0  ;;  %3413 = vmatmul.mubr.bf16.gmra.mxu0 %v3663_v39  ;;  %v1308_v40 = vlaneseq }
 0x24a   : > { %3430 = vmatprep.subr.bf16.mxu1 %v1071_v43  ;;  %v956_v60 = vmul.f32 %v4480_v53, %v771_v57  ;;  %v974_v61 = vmul.f32 %v4482_v54, %v771_v57 }
 0x24b   : > { %v3406_v62 = vpop.f32.mrf.mxu0  ;;  %v4561_v41 = vshrl.u32 %v1308_v40, 7 }
 0x24c   : > { %v988_v63 = vadd.f32 %v972_v51, %v956_v60  ;;  %v990_v0 = vadd.f32 %v974_v61, %v958_v50  ;;  %v961_v1 = vmul.f32 %v3406_v62, %v4489_v59  ;;  %v975_v2 = vmul.f32 %v3406_v62, %v4475_v49 }
 0x24d   : > { %3431 = vmatpush3.bf16.msra.mxu1 %v1071_v43  ;;  %v784_v3 = vpop.f32.mrf.mxu0  ;;  %v1311_v42 = vadd.s32 16, %v4561_v41  ;;  %v4564_v43 = vand.u32 127, %v1308_v40  ;;  %v4568_v44 = vadd.s32 24, %v4561_v41  ;;  %v4573_v46 = vadd.s32 8, %v4561_v41 }
 0x24e   : > { %v959_v4 = vmul.f32 %v4473_v47, %v784_v3  ;;  %v977_v5 = vmul.f32 %v4484_v55, %v784_v3  ;;  %v1074_v6 = vpack.c.bf16 %v990_v0, %v989_v58  ;;  %v1073_v7 = vpack.c.bf16 %v988_v63, %v987_v48 }
 0x24f   : > { %v3407_v8 = vpop.f32.mrf.mxu0  ;;  %vm1317_vm1 = vcmp.ge.s32.totalorder %v1311_v42, %v4564_v43  ;;  %vm1315_vm2 = vcmp.ge.s32.totalorder %v4561_v41, %v4564_v43  ;;  %vm1318_vm3 = vcmp.ge.s32.totalorder %v4568_v44, %v4564_v43  ;;  %vm1316_vm4 = vcmp.ge.s32.totalorder %v4573_v46, %v4564_v43 }
 0x250   : > { %v991_v9 = vadd.f32 %v975_v2, %v959_v4  ;;  %v993_v10 = vadd.f32 %v977_v5, %v961_v1  ;;  %v962_v11 = vmul.f32 %v3407_v8, %v4486_v56  ;;  %v976_v12 = vmul.f32 %v3407_v8, %v4478_v52  ;;  %3436 = vmatprep.subr.bf16.mxu1 %v1074_v6 }
 0x251   : > { %v787_v13 = vpop.f32.mrf.mxu0 }
 0x252   : > { %v960_v14 = vmul.f32 %v4480_v53, %v787_v13  ;;  %v978_v15 = vmul.f32 %v4482_v54, %v787_v13  ;;  %v3664_v13 = vld [vmem:[#allocation5 + $0x90] sm:$0xff]  }
 0x253   : > { %v3410_v16 = vpop.f32.mrf.mxu0  ;;  %3416 = vmatprep.mubr.bf16.mxu0 %v3664_v13 }
 0x254   : > { %v992_v17 = vadd.f32 %v976_v12, %v960_v14  ;;  %v994_v18 = vadd.f32 %v978_v15, %v962_v11  ;;  %v965_v19 = vmul.f32 %v3410_v16, %v4489_v59  ;;  %v979_v20 = vmul.f32 %v3410_v16, %v4475_v49  ;;  %v3665_v16 = vld [vmem:[#allocation5 + $0x98] sm:$0xff]  }
 0x255   : > { %v800_v21 = vpop.f32.mrf.mxu0  ;;  %3417 = vmatmul.mubr.bf16.gmra.mxu0 %v3665_v16 }
 0x256   : > { %v963_v22 = vmul.f32 %v4473_v47, %v800_v21  ;;  %v981_v23 = vmul.f32 %v4484_v55, %v800_v21  ;;  %v1076_v24 = vpack.c.bf16 %v994_v18, %v993_v10  ;;  %v1075_v25 = vpack.c.bf16 %v992_v17, %v991_v9 }
 0x257   : > { %v3411_v26 = vpop.f32.mrf.mxu0 }
 0x258   : > { %v995_v27 = vadd.f32 %v979_v20, %v963_v22  ;;  %v997_v28 = vadd.f32 %v981_v23, %v965_v19  ;;  %v966_v29 = vmul.f32 %v3411_v26, %v4486_v56  ;;  %v980_v30 = vmul.f32 %v3411_v26, %v4478_v52 }
 0x259   : > { %v803_v31 = vpop.f32.mrf.mxu0 }
 0x25a   : > { %v964_v32 = vmul.f32 %v4480_v53, %v803_v31  ;;  %v982_v59 = vmul.f32 %v4482_v54, %v803_v31 }
 0x25c   : > { %v996_v49 = vadd.f32 %v980_v30, %v964_v32  ;;  %v998_v33 = vadd.f32 %v982_v59, %v966_v29 }
 0x25e   : > { %v1078_v34 = vpack.c.bf16 %v998_v33, %v997_v28  ;;  %v1077_v47 = vpack.c.bf16 %v996_v49, %v995_v27 }
 0x28c   : > { %v1015_v55 = vpop.trf.xlu0 }
 0x28d   : > { %3432 = vmatprep.mubr.msk.bf16.mxu1 %vm1087_vm0, %v1015_v55 }
 0x290   : > { %v1016_v35 = vpop.trf.xlu0 }
 0x291   : > { %3433 = vmatmul.mubr.msk.bf16.vlgmr.msra.gmra.mxu1 %vm1087_vm0, %v1016_v35  ;;  %v3666_v35 = vld [vmem:[#allocation5 + $0xa0] sm:$0xff]  }
 0x292   : > { %3437 = vmatpush3.bf16.msra.mxu1 %v1074_v6  ;;  %3420 = vmatprep.mubr.bf16.mxu0 %v3666_v35 }
 0x293   : > { %3438 = vmatprep.subr.bf16.mxu1 %v1073_v7 }
 0x294   : > { %v1031_v56 = vpop.trf.xlu1 }
 0x295   : > { %3440 = vmatprep.mubr.msk.bf16.mxu1 %vm1087_vm0, %v1031_v56 }
 0x296   : > { %3439 = vmatpush3.bf16.msra.mxu1 %v1073_v7 }
 0x297   : > { %3444 = vmatprep.subr.bf16.mxu1 %v1076_v24 }
 0x298   : > { %v1032_v52 = vpop.trf.xlu1 }
 0x299   : > { %3441 = vmatmul.mubr.msk.bf16.vlgmr.msra.gmra.mxu1 %vm1087_vm0, %v1032_v52  ;;  %v3667_v52 = vld [vmem:[#allocation5 + $0xa8] sm:$0xff]  }
 0x29a   : > { %3445 = vmatpush3.bf16.msra.mxu1 %v1076_v24  ;;  %3421 = vmatmul.mubr.bf16.gmra.mxu0 %v3667_v52 }
 0x29b   : > { %3446 = vmatprep.subr.bf16.mxu1 %v1075_v25 }
 0x29d   : > { %v1047_v53 = vpop.trf.xlu0 }
 0x29e   : > { %3448 = vmatprep.mubr.msk.bf16.mxu1 %vm1087_vm0, %v1047_v53  ;;  %3447 = vmatpush3.bf16.msra.mxu1 %v1075_v25  ;;  %v3668_v53 = vld [vmem:[#allocation5 + $0xb0] sm:$0xff]  }
 0x29f   : > { %3452 = vmatprep.subr.bf16.mxu1 %v1078_v34  ;;  %3424 = vmatprep.mubr.bf16.mxu0 %v3668_v53 }
 0x2a1   : > { %v1048_v54 = vpop.trf.xlu0 }
 0x2a2   : > { %3449 = vmatmul.mubr.msk.bf16.vlgmr.msra.gmra.mxu1 %vm1087_vm0, %v1048_v54  ;;  %v3669_v54 = vld [vmem:[#allocation5 + $0xb8] sm:$0xff]  }
 0x2a3   : > { %3453 = vmatpush3.bf16.msra.mxu1 %v1078_v34  ;;  %3425 = vmatmul.mubr.bf16.gmra.mxu0 %v3669_v54 }
 0x2a4   : > { %v1063_v36 = vpop.trf.xlu1  ;;  %3454 = vmatprep.subr.bf16.mxu1 %v1077_v47 }
 0x2a5   : > { %3456 = vmatprep.mubr.msk.bf16.mxu1 %vm1087_vm0, %v1063_v36 }
 0x2a7   : > { %3455 = vmatpush3.bf16.msra.mxu1 %v1077_v47 }
 0x2a8   : > { %v1064_v37 = vpop.trf.xlu1 }
 0x2aa   : > { %3457 = vmatmul.mubr.msk.bf16.vlgmr.msra.gmra.mxu1 %vm1087_vm0, %v1064_v37 }
 0x351   : > { %v3434_v45 = vpop.f32.mrf.mxu1 }
 0x352   : > { %v4577_v48 = vsel %vm1317_vm1, %v3434_v45, -1e+30 }
 0x353   : > { %v1128_v50 = vpop.f32.mrf.mxu1  ;;  %v1349_v51 = vsel %vm1087_vm0, %v4577_v48, -inf }
 0x354   : > { %v4586_v57 = vsel %vm1315_vm2, %v1128_v50, -1e+30  ;;  %1350 = vmax.xlane.f32.xlu0 %v1349_v51 }
 0x355   : > { %v3435_v58 = vpop.f32.mrf.mxu1  ;;  %v1343_v62 = vsel %vm1087_vm0, %v4586_v57, -inf }
 0x356   : > { %v4593_v60 = vsel %vm1318_vm3, %v3435_v58, -1e+30 }
 0x357   : > { %v1131_v61 = vpop.f32.mrf.mxu1  ;;  %v1352_v63 = vsel %vm1087_vm0, %v4593_v60, -inf }
 0x358   : > { %v4602_v0 = vsel %vm1316_vm4, %v1131_v61, -1e+30  ;;  %1344 = vmax.xlane.f32.xlu0 %v1343_v62  ;;  %1353 = vmax.xlane.f32.xlu1 %v1352_v63 }
 0x359   : > { %v3442_v1 = vpop.f32.mrf.mxu1  ;;  %v1346_v4 = vsel %vm1087_vm0, %v4602_v0, -inf }
 0x35a   : > { %v4606_v2 = vsel %vm1317_vm1, %v3442_v1, -1e+30 }
 0x35b   : > { %v1183_v3 = vpop.f32.mrf.mxu1  ;;  %v1361_v5 = vsel %vm1087_vm0, %v4606_v2, -inf }
 0x35c   : > { %v4615_v6 = vsel %vm1315_vm2, %v1183_v3, -1e+30  ;;  %1347 = vmax.xlane.f32.xlu1 %v1346_v4  ;;  %1362 = vmax.xlane.f32.xlu0 %v1361_v5 }
 0x35d   : > { %v3443_v7 = vpop.f32.mrf.mxu1  ;;  %v1355_v8 = vsel %vm1087_vm0, %v4615_v6, -inf }
 0x35e   : > { %v4622_v9 = vsel %vm1318_vm3, %v3443_v7, -1e+30 }
 0x35f   : > { %v1186_v10 = vpop.f32.mrf.mxu1  ;;  %v1364_v11 = vsel %vm1087_vm0, %v4622_v9, -inf }
 0x360   : > { %v4629_v12 = vsel %vm1316_vm4, %v1186_v10, -1e+30  ;;  %1356 = vmax.xlane.f32.xlu0 %v1355_v8  ;;  %1365 = vmax.xlane.f32.xlu1 %v1364_v11 }
 0x361   : > { %v1358_v15 = vsel %vm1087_vm0, %v4629_v12, -inf }
 0x362   : > { %v3450_v14 = vpop.f32.mrf.mxu1 }
 0x363   : > { %v4635_v17 = vsel %vm1317_vm1, %v3450_v14, -1e+30 }
 0x364   : > { %v1238_v18 = vpop.f32.mrf.mxu1  ;;  %v1373_v19 = vsel %vm1087_vm0, %v4635_v17, -inf  ;;  %1359 = vmax.xlane.f32.xlu1 %v1358_v15 }
 0x365   : > { %v4642_v20 = vsel %vm1315_vm2, %v1238_v18, -1e+30  ;;  %1374 = vmax.xlane.f32.xlu0 %v1373_v19 }
 0x366   : > { %v3451_v21 = vpop.f32.mrf.mxu1  ;;  %v1367_v22 = vsel %vm1087_vm0, %v4642_v20, -inf }
 0x367   : > { %v4649_v23 = vsel %vm1318_vm3, %v3451_v21, -1e+30 }
 0x368   : > { %v1241_v24 = vpop.f32.mrf.mxu1  ;;  %v1376_v25 = vsel %vm1087_vm0, %v4649_v23, -inf }
 0x369   : > { %v4656_v26 = vsel %vm1316_vm4, %v1241_v24, -1e+30  ;;  %1368 = vmax.xlane.f32.xlu0 %v1367_v22  ;;  %1377 = vmax.xlane.f32.xlu1 %v1376_v25 }
 0x36a   : > { %v3458_v27 = vpop.f32.mrf.mxu1  ;;  %v1370_v28 = vsel %vm1087_vm0, %v4656_v26, -inf }
 0x36b   : > { %v4662_v29 = vsel %vm1317_vm1, %v3458_v27, -1e+30 }
 0x36c   : > { %v1293_v30 = vpop.f32.mrf.mxu1  ;;  %v1385_v31 = vsel %vm1087_vm0, %v4662_v29, -inf }
 0x36d   : > { %v4669_v32 = vsel %vm1315_vm2, %v1293_v30, -1e+30  ;;  %1371 = vmax.xlane.f32.xlu1 %v1370_v28  ;;  %1386 = vmax.xlane.f32.xlu0 %v1385_v31 }
 0x36e   : > { %v3459_v59 = vpop.f32.mrf.mxu1  ;;  %v1379_v49 = vsel %vm1087_vm0, %v4669_v32, -inf }
 0x36f   : > { %v4676_v33 = vsel %vm1318_vm3, %v3459_v59, -1e+30 }
 0x370   : > { %v1388_v34 = vsel %vm1087_vm0, %v4676_v33, -inf  ;;  %v1296_v47 = vpop.f32.mrf.mxu1 }
 0x371   : > { %1380 = vmax.xlane.f32.xlu0 %v1379_v49  ;;  %1389 = vmax.xlane.f32.xlu1 %v1388_v34  ;;  %v4683_v55 = vsel %vm1316_vm4, %v1296_v47, -1e+30 }
 0x372   : > { %v1382_v56 = vsel %vm1087_vm0, %v4683_v55, -inf }
 0x375   : > { %1383 = vmax.xlane.f32.xlu1 %v1382_v56 }
 0x3dd   : > { %v1351_v36 = vpop.xlane.xlu0 %1350 }
 0x3de   : > { %v1393_v37 = vsub.f32 %v4577_v48, %v1351_v36 }
 0x3e0   : > { %v1411_v38 = vmul.f32 1.442695, %v1393_v37 }
 0x3e1   : > { %v1345_v39 = vpop.xlane.xlu0 %1344  ;;  %v1354_v40 = vpop.xlane.xlu1 %1353 }
 0x3e2   : > { %3814 = vpow2.f32 %v1411_v38  ;;  %v1391_v41 = vsub.f32 %v4586_v57, %v1345_v39  ;;  %v1394_v42 = vsub.f32 %v4593_v60, %v1354_v40 }
 0x3e4   : > { %v1407_v43 = vmul.f32 1.442695, %v1391_v41  ;;  %v1413_v44 = vmul.f32 1.442695, %v1394_v42 }
 0x3e5   : > { %v1348_v45 = vpop.xlane.xlu1 %1347  ;;  %v1363_v46 = vpop.xlane.xlu0 %1362 }
 0x3e6   : > { %3816 = vpow2.f32 %v1407_v43  ;;  %v1392_v50 = vsub.f32 %v4602_v0, %v1348_v45  ;;  %v1397_v51 = vsub.f32 %v4606_v2, %v1363_v46 }
 0x3e7   : > { %3818 = vpow2.f32 %v1413_v44 }
 0x3e8   : > { %v1409_v58 = vmul.f32 1.442695, %v1392_v50  ;;  %v1419_v48 = vmul.f32 1.442695, %v1397_v51 }
 0x3e9   : > { %v1357_v61 = vpop.xlane.xlu0 %1356  ;;  %v1366_v62 = vpop.xlane.xlu1 %1365 }
 0x3ea   : > { %3820 = vpow2.f32 %v1409_v58  ;;  %v1395_v63 = vsub.f32 %v4615_v6, %v1357_v61  ;;  %v1398_v57 = vsub.f32 %v4622_v9, %v1366_v62  ;;  %v4767_v62 = vpop.f32.mrf.mxu0 }
 0x3eb   : > { %3822 = vpow2.f32 %v1419_v48 }
 0x3ec   : > { %v1415_v60 = vmul.f32 1.442695, %v1395_v63  ;;  %v1421_v1 = vmul.f32 1.442695, %v1398_v57  ;;  %v816_v63 = vpop.f32.mrf.mxu0 }
 0x3ed   : > { %v1360_v3 = vpop.xlane.xlu1 %1359 }
 0x3ee   : > { %v1375_v4 = vpop.xlane.xlu0 %1374  ;;  %3824 = vpow2.f32 %v1415_v60  ;;  %v1396_v0 = vsub.f32 %v4629_v12, %v1360_v3  ;;  %v3415_v57 = vpop.f32.mrf.mxu0 }
 0x3ef   : > { %v1401_v2 = vsub.f32 %v4635_v17, %v1375_v4  ;;  %v4696_v5 = vpop.eup %3814  ;;  %3826 = vpow2.f32 %v1421_v1  ;;  %v1080_v60 = vpack.c.bf16 %v3415_v57, %v4767_v62 }
 0x3f0   : > { %v1417_v7 = vmul.f32 1.442695, %v1396_v0  ;;  %v1445_v6 = vsel %vm1087_vm0, %v4696_v5, 0.0  ;;  %v819_v1 = vpop.f32.mrf.mxu0 }
 0x3f1   : > { %v1427_v8 = vmul.f32 1.442695, %v1401_v2  ;;  %1446 = vadd.xlane.f32.xlu0 %v1445_v6  ;;  %v1079_v3 = vpack.c.bf16 %v819_v1, %v816_v63 }
 0x3f2   : > { %v1369_v10 = vpop.xlane.xlu0 %1368  ;;  %v1378_v9 = vpop.xlane.xlu1 %1377  ;;  %3828 = vpow2.f32 %v1417_v7 }
 0x3f3   : > { %v1399_v11 = vsub.f32 %v4642_v20, %v1369_v10  ;;  %v1402_v13 = vsub.f32 %v4649_v23, %v1378_v9  ;;  %v4702_v14 = vpop.eup %3816  ;;  %3830 = vpow2.f32 %v1427_v8  ;;  %3464 = vmatprep.mubr.msk.bf16.mxu1 %vm1087_vm0, %v1079_v3 }
 0x3f4   : > { %v4704_v12 = vpop.eup %3818  ;;  %v1439_v17 = vsel %vm1087_vm0, %v4702_v14, 0.0 }
 0x3f5   : > { %v1423_v15 = vmul.f32 1.442695, %v1399_v11  ;;  %v1429_v16 = vmul.f32 1.442695, %v1402_v13  ;;  %1440 = vadd.xlane.f32.xlu0 %v1439_v17  ;;  %v1448_v21 = vsel %vm1087_vm0, %v4704_v12, 0.0 }
 0x3f6   : > { %v1372_v18 = vpop.xlane.xlu1 %1371  ;;  %v1387_v19 = vpop.xlane.xlu0 %1386  ;;  %1449 = vadd.xlane.f32.xlu1 %v1448_v21 }
 0x3f7   : > { %3832 = vpow2.f32 %v1423_v15  ;;  %v1400_v20 = vsub.f32 %v4656_v26, %v1372_v18  ;;  %v1405_v22 = vsub.f32 %v4662_v29, %v1387_v19  ;;  %v4712_v23 = vpop.eup %3820  ;;  %v4773_v19 = vpop.f32.mrf.mxu0 }
 0x3f8   : > { %3834 = vpow2.f32 %v1429_v16  ;;  %v4714_v24 = vpop.eup %3822  ;;  %v1442_v28 = vsel %vm1087_vm0, %v4712_v23, 0.0 }
 0x3f9   : > { %v1425_v25 = vmul.f32 1.442695, %v1400_v20  ;;  %v1435_v27 = vmul.f32 1.442695, %v1405_v22  ;;  %v1457_v30 = vsel %vm1087_vm0, %v4714_v24, 0.0 }
 0x3fa   : > { %v1381_v31 = vpop.xlane.xlu0 %1380  ;;  %v1390_v59 = vpop.xlane.xlu1 %1389  ;;  %1458 = vadd.xlane.f32.xlu0 %v1457_v30  ;;  %1443 = vadd.xlane.f32.xlu1 %v1442_v28 }
 0x3fb   : > { %3836 = vpow2.f32 %v1425_v25  ;;  %v1403_v26 = vsub.f32 %v4669_v32, %v1381_v31  ;;  %v1406_v29 = vsub.f32 %v4676_v33, %v1390_v59  ;;  %v4722_v49 = vpop.eup %3824  ;;  %v832_v28 = vpop.f32.mrf.mxu0 }
 0x3fc   : > { %3838 = vpow2.f32 %v1435_v27  ;;  %v4724_v34 = vpop.eup %3826  ;;  %v1451_v56 = vsel %vm1087_vm0, %v4722_v49, 0.0 }
 0x3fd   : > { %v1431_v47 = vmul.f32 1.442695, %v1403_v26  ;;  %v1437_v35 = vmul.f32 1.442695, %v1406_v29  ;;  %v1460_v52 = vsel %vm1087_vm0, %v4724_v34, 0.0  ;;  %v3419_v29 = vpop.f32.mrf.mxu0 }
 0x3fe   : > { %v1384_v53 = vpop.xlane.xlu1 %1383  ;;  %1452 = vadd.xlane.f32.xlu0 %v1451_v56  ;;  %1461 = vadd.xlane.f32.xlu1 %v1460_v52 }
 0x3ff   : > { %3840 = vpow2.f32 %v1431_v47  ;;  %v1404_v32 = vsub.f32 %v4683_v55, %v1384_v53  ;;  %v4731_v33 = vpop.eup %3828 }
 0x400   : > { %3842 = vpow2.f32 %v1437_v35  ;;  %v4733_v54 = vpop.eup %3830  ;;  %v1454_v37 = vsel %vm1087_vm0, %v4731_v33, 0.0 }
 0x401   : > { %v1433_v36 = vmul.f32 1.442695, %v1404_v32  ;;  %v1469_v38 = vsel %vm1087_vm0, %v4733_v54, 0.0 }
 0x402   : > { %1470 = vadd.xlane.f32.xlu0 %v1469_v38  ;;  %1455 = vadd.xlane.f32.xlu1 %v1454_v37 }
 0x403   : > { %3844 = vpow2.f32 %v1433_v36 }
 0x404   : > { %v4739_v39 = vpop.eup %3832 }
 0x405   : > { %v4741_v40 = vpop.eup %3834  ;;  %v1463_v55 = vsel %vm1087_vm0, %v4739_v39, 0.0 }
 0x406   : > { %v1472_v41 = vsel %vm1087_vm0, %v4741_v40, 0.0  ;;  %1464 = vadd.xlane.f32.xlu0 %v1463_v55 }
 0x407   : > { %1473 = vadd.xlane.f32.xlu1 %v1472_v41 }
 0x408   : > { %v4747_v42 = vpop.eup %3836 }
 0x409   : > { %v4749_v43 = vpop.eup %3838  ;;  %v1466_v44 = vsel %vm1087_vm0, %v4747_v42, 0.0 }
 0x40a   : > { %v1481_v45 = vsel %vm1087_vm0, %v4749_v43, 0.0 }
 0x40b   : > { %1482 = vadd.xlane.f32.xlu0 %v1481_v45  ;;  %1467 = vadd.xlane.f32.xlu1 %v1466_v44 }
 0x40c   : > { %v4755_v46 = vpop.eup %3840 }
 0x40d   : > { %v4757_v50 = vpop.eup %3842  ;;  %v1475_v51 = vsel %vm1087_vm0, %v4755_v46, 0.0 }
 0x40e   : > { %v1484_v58 = vsel %vm1087_vm0, %v4757_v50, 0.0 }
 0x40f   : > { %1476 = vadd.xlane.f32.xlu0 %v1475_v51  ;;  %1485 = vadd.xlane.f32.xlu1 %v1484_v58 }
 0x410   : > { %v4763_v48 = vpop.eup %3844 }
 0x411   : > { %v1478_v61 = vsel %vm1087_vm0, %v4763_v48, 0.0 }
 0x413   : > { %1479 = vadd.xlane.f32.xlu1 %v1478_v61 }
 0x47a   : > { %v1447_v4 = vpop.xlane.xlu0 %1446 }
 0x47b   : > { %3846 = vrcp.f32 %v1447_v4 }
 0x47e   : > { %v1441_v0 = vpop.xlane.xlu0 %1440 }
 0x47f   : > { %v1450_v2 = vpop.xlane.xlu1 %1449 }
 0x480   : > { %3848 = vrcp.f32 %v1450_v2 }
 0x481   : > { %3850 = vrcp.f32 %v1441_v0 }
 0x483   : > { %v1444_v7 = vpop.xlane.xlu1 %1443  ;;  %v1459_v8 = vpop.xlane.xlu0 %1458 }
 0x484   : > { %3852 = vrcp.f32 %v1444_v7 }
 0x485   : > { %3854 = vrcp.f32 %v1459_v8 }
 0x487   : > { %v1462_v6 = vpop.xlane.xlu1 %1461  ;;  %v1453_v13 = vpop.xlane.xlu0 %1452 }
 0x488   : > { %3856 = vrcp.f32 %v1462_v6  ;;  %v3847_v10 = vpop.eup %3846 }
 0x489   : > { %v1505_v15 = vmul.f32 %v3847_v10, %v4696_v5 }
 0x48b   : > { %v1456_v9 = vpop.xlane.xlu1 %1455  ;;  %v1471_v30 = vpop.xlane.xlu0 %1470 }
 0x48c   : > { %3858 = vrcp.f32 %v1456_v9 }
 0x48d   : > { %v3849_v11 = vpop.eup %3848  ;;  %3860 = vrcp.f32 %v1453_v13 }
 0x48e   : > { %v1506_v16 = vmul.f32 %v3849_v11, %v4704_v12  ;;  %v3851_v17 = vpop.eup %3850 }
 0x48f   : > { %v1503_v25 = vmul.f32 %v3851_v17, %v4702_v14  ;;  %v1465_v53 = vpop.xlane.xlu0 %1464 }
 0x490   : > { %v1520_v18 = vpack.c.bf16 %v1506_v16, %v1505_v15  ;;  %v1474_v22 = vpop.xlane.xlu1 %1473 }
 0x491   : > { %v3853_v21 = vpop.eup %3852  ;;  %3862 = vrcp.f32 %v1474_v22 }
 0x492   : > { %3512 = vmatprep.subr.msk.bf16.mxu1 %vm1087_vm0, %v1520_v18  ;;  %v1537_v20 = vsel %vm1087_vm0, %v1520_v18, 0  ;;  %v1504_v27 = vmul.f32 %v3853_v21, %v4712_v23  ;;  %v3855_v5 = vpop.eup %3854  ;;  %3864 = vrcp.f32 %v1471_v30  ;;  %v835_v23 = vpop.f32.mrf.mxu0  ;;  %v3674_v30 = vld [vmem:[#allocation7 + $0x18] sm:$0xff]  }
 0x493   : > { %3461 = vmatpush3.bf16.xpose.msra.mxu1 %v1537_v20  ;;  %v1509_v26 = vmul.f32 %v3855_v5, %v4714_v24  ;;  %v1081_v36 = vpack.c.bf16 %v835_v23, %v832_v28  ;;  %v3672_v28 = vld [vmem:[#allocation7 + $0x28] sm:$0xff]   ;;  %v3673_v5 = vld [vmem:[#allocation7 + $0x20] sm:$0xff]  }
 0x494   : > { %v1519_v12 = vpack.c.bf16 %v1504_v27, %v1503_v25  ;;  %v1468_v56 = vpop.xlane.xlu1 %1467  ;;  %v3422_v24 = vpop.f32.mrf.mxu0 }
 0x495   : > { %v3857_v31 = vpop.eup %3856  ;;  %3866 = vrcp.f32 %v1468_v56 }
 0x496   : > { %3513 = vmatprep.subr.msk.bf16.mxu1 %vm1087_vm0, %v1519_v12  ;;  %v1510_v59 = vmul.f32 %v3857_v31, %v4724_v34  ;;  %v1534_v47 = vsel %vm1087_vm0, %v1519_v12, 0  ;;  %3868 = vrcp.f32 %v1465_v53  ;;  %v848_v44 = vpop.f32.mrf.mxu0  ;;  %v3675_v12 = vld [vmem:[#allocation7 + $0x10] sm:$0xff]   ;;  %v3676_v31 = vld [vmem:[#allocation7 + $0x8] sm:$0xff]  }
 0x498   : > { %v1522_v35 = vpack.c.bf16 %v1510_v59, %v1509_v26  ;;  %v1486_v41 = vpop.xlane.xlu1 %1485  ;;  %v3423_v58 = vpop.f32.mrf.mxu0  ;;  %v3677_v59 = vld [vmem:[#allocation7] sm:$0xff]  }
 0x499   : > { %v3859_v14 = vpop.eup %3858  ;;  %3870 = vrcp.f32 %v1486_v41  ;;  %v1084_v20 = vpack.c.bf16 %v3423_v58, %v3422_v24 }
 0x49a   : > { %v3861_v52 = vpop.eup %3860  ;;  %v1508_v32 = vmul.f32 %v3859_v14, %v4731_v33  ;;  %v1598_v37 = vsel %vm1087_vm0, %v1522_v35, 0  ;;  %v1483_v33 = vpop.xlane.xlu0 %1482 }
 0x49b   : > { %3463 = vmatpush3.bf16.xpose.msra.mxu1 %v1534_v47  ;;  %v1507_v34 = vmul.f32 %v3861_v52, %v4722_v49  ;;  %3872 = vrcp.f32 %v1483_v33 }
 0x49c   : > { %3514 = vmatprep.subr.msk.bf16.mxu1 %vm1087_vm0, %v1522_v35  ;;  %v1480_v57 = vpop.xlane.xlu1 %1479 }
 0x49d   : > { %v1521_v38 = vpack.c.bf16 %v1508_v32, %v1507_v34  ;;  %3874 = vrcp.f32 %v1480_v57  ;;  %v3678_v57 = vld [vmem:[#allocation8 + $0xe0] ss:$16 sps:$4 sm:$0xff]  }
 0x49e   : > { %v3863_v55 = vpop.eup %3862  ;;  %v1477_v3 = vpop.xlane.xlu0 %1476 }
 0x49f   : > { %v3865_v45 = vpop.eup %3864  ;;  %v1514_v51 = vmul.f32 %v3863_v55, %v4741_v40  ;;  %v1595_v61 = vsel %vm1087_vm0, %v1521_v38, 0  ;;  %3876 = vrcp.f32 %v1477_v3  ;;  %v1082_v40 = vpack.c.bf16 %v3419_v29, %v4773_v19  ;;  %v3683_v3 = vld [vmem:[#allocation8 + $0xec] ss:$16 sps:$4 sm:$0xff]  }
 0x4a0   : > { %v1513_v49 = vmul.f32 %v3865_v45, %v4733_v54 }
 0x4a2   : > { %3465 = vmatmul.mubr.msk.bf16.vlgmr.msra.gmra.mxu1 %vm1087_vm0, %v1080_v60  ;;  %v1524_v62 = vpack.c.bf16 %v1514_v51, %v1513_v49  ;;  %v3867_v63 = vpop.eup %3866  ;;  %v851_v60 = vpop.f32.mrf.mxu0 }
 0x4a3   : > { %3469 = vmatpush3.bf16.xpose.msra.mxu1 %v1598_v37  ;;  %3472 = vmatprep.mubr.msk.bf16.mxu1 %vm1087_vm0, %v1081_v36  ;;  %v3869_v1 = vpop.eup %3868  ;;  %v1512_v4 = vmul.f32 %v3867_v63, %v4747_v42  ;;  %v1083_v0 = vpack.c.bf16 %v851_v60, %v848_v44  ;;  %v3680_v60 = vld [vmem:[#allocation8 + $0xe4] ss:$16 sps:$4 sm:$0xff]  }
 0x4a4   : > { %3515 = vmatprep.subr.msk.bf16.mxu1 %vm1087_vm0, %v1521_v38  ;;  %v1511_v54 = vmul.f32 %v3869_v1, %v4739_v39  ;;  %v3426_v2 = vpop.f32.mrf.mxu0  ;;  %v1659_v7 = vsel %vm1087_vm0, %v1524_v62, 0  ;;  %v3681_v1 = vld [vmem:[#allocation8 + $0xe8] ss:$16 sps:$4 sm:$0xff]  }
 0x4a6   : > { %v1523_v8 = vpack.c.bf16 %v1512_v4, %v1511_v54  ;;  %v3871_v6 = vpop.eup %3870  ;;  %v864_v10 = vpop.f32.mrf.mxu0  ;;  %v3686_v4 = vld [vmem:[#allocation8 + $0xc4] ss:$16 sps:$4 sm:$0xff]   ;;  %v3687_v54 = vld [vmem:[#allocation8 + $0xc8] ss:$16 sps:$4 sm:$0xff]  }
 0x4a7   : > { %v1518_v9 = vmul.f32 %v3871_v6, %v4757_v50 }
 0x4a8   : > { %v3873_v42 = vpop.eup %3872  ;;  %v3427_v13 = vpop.f32.mrf.mxu0  ;;  %v1656_v39 = vsel %vm1087_vm0, %v1523_v8, 0 }
 0x4a9   : > { %v1517_v11 = vmul.f32 %v3873_v42, %v4749_v43  ;;  %v1086_v27 = vpack.c.bf16 %v3427_v13, %v3426_v2 }
 0x4aa   : > { %v3875_v16 = vpop.eup %3874  ;;  %v867_v17 = vpop.f32.mrf.mxu0 }
 0x4ab   : > { %3471 = vmatpush3.bf16.xpose.msra.mxu1 %v1595_v61  ;;  %v1526_v15 = vpack.c.bf16 %v1518_v9, %v1517_v11  ;;  %v1516_v19 = vmul.f32 %v3875_v16, %v4763_v48  ;;  %v1085_v21 = vpack.c.bf16 %v867_v17, %v864_v10  ;;  %v3670_v48 = vld [vmem:[#allocation7 + $0x38] sm:$0xff]   ;;  %v3887_v11 = vld [vmem:[%s4447_s15 + $0x8] sm:$0xff] }
 0x4ac   : > { %3516 = vmatprep.subr.msk.bf16.mxu1 %vm1087_vm0, %v1524_v62  ;;  %v3877_v18 = vpop.eup %3876  ;;  %3492 = vmatprep.subr.bf16.mxu0 %v3670_v48  ;;  %v3889_v17 = vld [vmem:[%s4447_s15 + $0x18] sm:$0xff] }
 0x4ad   : > { %v1515_v22 = vmul.f32 %v3877_v18, %v4755_v46  ;;  %v1720_v43 = vsel %vm1087_vm0, %v1526_v15, 0  ;;  %3493 = vmatpush3.bf16.msra.mxu0 %v3670_v48  ;;  %v3671_v46 = vld [vmem:[#allocation7 + $0x30] sm:$0xff]  }
 0x4ae   : > { %3494 = vmatprep.subr.bf16.mxu0 %v3671_v46  ;;  %v3696_v48 = vld [vmem:[#allocation8 + $0x80] ss:$16 sps:$4 sm:$0xff]  }
 0x4af   : > { %v1525_v50 = vpack.c.bf16 %v1516_v19, %v1515_v22  ;;  %v3695_v22 = vld [vmem:[#allocation8 + $0xac] ss:$16 sps:$4 sm:$0xff]  }
 0x4b1   : > { %v1717_v25 = vsel %vm1087_vm0, %v1525_v50, 0  ;;  %3495 = vmatpush3.bf16.msra.mxu0 %v3671_v46  ;;  %v3699_v46 = vld [vmem:[#allocation8 + $0x88] ss:$16 sps:$4 sm:$0xff]  }
 0x4b2   : > { %3473 = vmatmul.mubr.msk.bf16.vlgmr.msra.gmra.mxu1 %vm1087_vm0, %v1082_v40  ;;  %3496 = vmatprep.subr.bf16.mxu0 %v3672_v28  ;;  %v3684_v40 = vld [vmem:[#allocation8 + $0xc0] ss:$16 sps:$4 sm:$0xff]  }
 0x4b3   : > { %3477 = vmatpush3.bf16.xpose.msra.mxu1 %v1659_v7  ;;  %3480 = vmatprep.mubr.msk.bf16.mxu1 %vm1087_vm0, %v1083_v0  ;;  %v3689_v0 = vld [vmem:[#allocation8 + $0xcc] ss:$16 sps:$4 sm:$0xff]  }
 0x4b4   : > { %3517 = vmatprep.subr.msk.bf16.mxu1 %vm1087_vm0, %v1523_v8  ;;  %v3886_v8 = vld [vmem:[%s4447_s15] sm:$0xff] }
 0x4b5   : > { %3497 = vmatpush3.bf16.msra.mxu0 %v3672_v28  ;;  %v3704_v28 = vld [vmem:[#allocation8 + $0x64] ss:$16 sps:$4 sm:$0xff]  }
 0x4b6   : > { %3498 = vmatprep.subr.bf16.mxu0 %v3673_v5 }
 0x4b9   : > { %3499 = vmatpush3.bf16.msra.mxu0 %v3673_v5  ;;  %v3707_v5 = vld [vmem:[#allocation8 + $0x6c] ss:$16 sps:$4 sm:$0xff]  }
 0x4ba   : > { %3500 = vmatprep.subr.bf16.mxu0 %v3674_v30 }
 0x4bb   : > { %3479 = vmatpush3.bf16.xpose.msra.mxu1 %v1656_v39  ;;  %v3888_v39 = vld [vmem:[%s4447_s15 + $0x10] sm:$0xff] }
 0x4bc   : > { %3518 = vmatprep.subr.msk.bf16.mxu1 %vm1087_vm0, %v1526_v15 }
 0x4bd   : > { %3501 = vmatpush3.bf16.msra.mxu0 %v3674_v30  ;;  %v3702_v30 = vld [vmem:[#allocation8 + $0x60] ss:$16 sps:$4 sm:$0xff]  }
 0x4be   : > { %3502 = vmatprep.subr.bf16.mxu0 %v3675_v12 }
 0x4c1   : > { %3503 = vmatpush3.bf16.msra.mxu0 %v3675_v12  ;;  %v3705_v12 = vld [vmem:[#allocation8 + $0x68] ss:$16 sps:$4 sm:$0xff]  }
 0x4c2   : > { %3481 = vmatmul.mubr.msk.bf16.vlgmr.msra.gmra.mxu1 %vm1087_vm0, %v1084_v20  ;;  %3504 = vmatprep.subr.bf16.mxu0 %v3676_v31  ;;  %v3692_v20 = vld [vmem:[#allocation8 + $0xa4] ss:$16 sps:$4 sm:$0xff]  }
 0x4c3   : > { %3485 = vmatpush3.bf16.xpose.msra.mxu1 %v1720_v43  ;;  %3488 = vmatprep.mubr.msk.bf16.mxu1 %vm1087_vm0, %v1085_v21  ;;  %v3690_v43 = vld [vmem:[#allocation8 + $0xa0] ss:$16 sps:$4 sm:$0xff]  }
 0x4c4   : > { %3519 = vmatprep.subr.msk.bf16.mxu1 %vm1087_vm0, %v1525_v50  ;;  %v3693_v50 = vld [vmem:[#allocation8 + $0xa8] ss:$16 sps:$4 sm:$0xff]  }
 0x4c5   : > { %3505 = vmatpush3.bf16.msra.mxu0 %v3676_v31  ;;  %v3710_v31 = vld [vmem:[#allocation8 + $0x44] ss:$16 sps:$4 sm:$0xff]  }
 0x4c6   : > { %3506 = vmatprep.subr.bf16.mxu0 %v3677_v59 }
 0x4c9   : > { %3507 = vmatpush3.bf16.msra.mxu0 %v3677_v59  ;;  %v3713_v59 = vld [vmem:[#allocation8 + $0x4c] ss:$16 sps:$4 sm:$0xff]  }
 0x4ca   : > { %2187 = vmatprep.subr.bf16.mxu0 %v3683_v3  ;;  %v3726_v3 = vld [vmem:[#allocation10 + $0xe0] ss:$16 sps:$4 sm:$0xff]  }
 0x4cb   : > { %3487 = vmatpush3.bf16.xpose.msra.mxu1 %v1717_v25  ;;  %v3698_v25 = vld [vmem:[#allocation8 + $0x84] ss:$16 sps:$4 sm:$0xff]  }
 0x4cc   : > { %2134 = vmatprep.subr.bf16.mxu1 %v3680_v60 }
 0x4d2   : > { %3489 = vmatmul.mubr.msk.bf16.vlgmr.msra.gmra.mxu1 %vm1087_vm0, %v1086_v27  ;;  %v3701_v27 = vld [vmem:[#allocation8 + $0x8c] ss:$16 sps:$4 sm:$0xff]  }
 0x4d3   : > { %2135 = vmatpush1.bf16.msra.mxu1 %v3678_v57 }
 0x4d4   : > { %2136 = vmatprep.subr.bf16.mxu1 %v3686_v4  ;;  %v3729_v4 = vld [vmem:[#allocation10 + $0xe8] ss:$16 sps:$4 sm:$0xff]  }
 0x4d7   : > { %2137 = vmatpush1.bf16.msra.mxu1 %v3684_v40  ;;  %v3734_v40 = vld [vmem:[#allocation10 + $0xc4] ss:$16 sps:$4 sm:$0xff]  }
 0x4d8   : > { %2138 = vmatprep.subr.bf16.mxu1 %v3692_v20  ;;  %v3749_v20 = vld [vmem:[#allocation10 + $0x8c] ss:$16 sps:$4 sm:$0xff]  }
 0x4db   : > { %2139 = vmatpush1.bf16.msra.mxu1 %v3690_v43  ;;  %v3747_v43 = vld [vmem:[#allocation10 + $0x88] ss:$16 sps:$4 sm:$0xff]  }
 0x4dc   : > { %2140 = vmatprep.subr.bf16.mxu1 %v3698_v25  ;;  %v3755_v25 = vld [vmem:[#allocation10 + $0x6c] ss:$16 sps:$4 sm:$0xff]  }
 0x4df   : > { %2141 = vmatpush1.bf16.msra.mxu1 %v3696_v48  ;;  %v3753_v48 = vld [vmem:[#allocation10 + $0x68] ss:$16 sps:$4 sm:$0xff]  }
 0x4e0   : > { %2142 = vmatprep.subr.bf16.mxu1 %v3704_v28  ;;  %v3761_v28 = vld [vmem:[#allocation10 + $0x4c] ss:$16 sps:$4 sm:$0xff]  }
 0x4e3   : > { %2143 = vmatpush1.bf16.msra.mxu1 %v3702_v30  ;;  %v3759_v30 = vld [vmem:[#allocation10 + $0x48] ss:$16 sps:$4 sm:$0xff]  }
 0x4e4   : > { %2144 = vmatprep.subr.bf16.mxu1 %v3710_v31  ;;  %v3767_v31 = vld [vmem:[#allocation10 + $0x2c] ss:$16 sps:$4 sm:$0xff]  }
 0x562   : > { %v3466_v26 = vpop.f32.mrf.mxu1 }
 0x564   : > { %v1573_v29 = vpop.f32.mrf.mxu1 }
 0x566   : > { %v3467_v47 = vpop.f32.mrf.mxu1 }
 0x567   : > { %v1772_v56 = vpack.c.bf16 %v3467_v47, %v3466_v26  ;;  %v3708_v26 = vld [vmem:[#allocation8 + $0x40] ss:$16 sps:$4 sm:$0xff]  }
 0x568   : > { %v1576_v35 = vpop.f32.mrf.mxu1  ;;  %2145 = vmatpush1.bf16.msra.mxu1 %v3708_v26  ;;  %v3714_v47 = vld [vmem:[#allocation8 + $0x20] ss:$16 sps:$4 sm:$0xff]   ;;  %v3765_v26 = vld [vmem:[#allocation10 + $0x28] ss:$16 sps:$4 sm:$0xff]  }
 0x569   : > { %v1771_v14 = vpack.c.bf16 %v1576_v35, %v1573_v29  ;;  %v3711_v29 = vld [vmem:[#allocation8 + $0x48] ss:$16 sps:$4 sm:$0xff]   ;;  %v3716_v35 = vld [vmem:[#allocation8 + $0x24] ss:$16 sps:$4 sm:$0xff]  }
 0x56a   : > { %2146 = vmatprep.subr.bf16.mxu1 %v3716_v35  ;;  %v3768_v35 = vld [vmem:[#allocation10] ss:$16 sps:$4 sm:$0xff]  }
 0x56b   : > { %1779 = vxpose.xlu0.c.b16.start [1/8] (narrow) %v1771_v14, 32  ;;  %v3717_v14 = vld [vmem:[#allocation8 + $0x28] ss:$16 sps:$4 sm:$0xff]  }
 0x56c   : > { %2147 = vmatpush1.bf16.msra.mxu1 %v3714_v47  ;;  %v3773_v47 = vld [vmem:[#allocation10 + $0xc] ss:$16 sps:$4 sm:$0xff]  }
 0x56f   : > { %1780 = vxpose.xlu0.c.b16.cont [2/8] (narrow) %v1772_v56, 32  ;;  %v3719_v56 = vld [vmem:[#allocation8 + $0x2c] ss:$16 sps:$4 sm:$0xff]  }
 0x572   : > { %v3474_v23 = vpop.f32.mrf.mxu1 }
 0x574   : > { %v1634_v52 = vpop.f32.mrf.mxu1 }
 0x576   : > { %v3475_v53 = vpop.f32.mrf.mxu1 }
 0x577   : > { %v1774_v34 = vpack.c.bf16 %v3475_v53, %v3474_v23  ;;  %v3722_v23 = vld [vmem:[#allocation8 + $0x4] ss:$16 sps:$4 sm:$0xff]   ;;  %v3720_v53 = vld [vmem:[#allocation8] ss:$16 sps:$4 sm:$0xff]  }
 0x578   : > { %v1637_v32 = vpop.f32.mrf.mxu1  ;;  %2148 = vmatprep.subr.bf16.mxu1 %v3722_v23  ;;  %v3775_v23 = vld [vmem:[#allocation11 + $0xf8] sm:$0xff]  }
 0x579   : > { %v1773_v36 = vpack.c.bf16 %v1637_v32, %v1634_v52  ;;  %v3725_v52 = vld [vmem:[#allocation8 + $0xc] ss:$16 sps:$4 sm:$0xff]   ;;  %v3723_v32 = vld [vmem:[#allocation8 + $0x8] ss:$16 sps:$4 sm:$0xff]   ;;  %2149 = vmatpush1.bf16.msra.mxu1 %v3720_v53 }
 0x57a   : > { %v3777_v53 = vld [vmem:[#allocation11 + $0xb8] sm:$0xff]  }
 0x57b   : > { %1781 = vxpose.xlu0.c.b16.cont [3/8] (narrow) %v1773_v36, 32  ;;  %v3728_v36 = vld [vmem:[#allocation10 + $0xe4] ss:$16 sps:$4 sm:$0xff]  }
 0x57c   : > { %2432 = vmatprep.subr.bf16.mxu1 %v3728_v36  ;;  %v3779_v36 = vld [vmem:[#allocation11 + $0xf0] sm:$0xff]  }
 0x57f   : > { %1782 = vxpose.xlu0.c.b16.cont [4/8] (narrow) %v1774_v34, 32  ;;  %v4196_v34 = vmov 0  }
 0x580   : > { %2166 = vmatprep.mubr.bf16.mxu1 %v4196_v34 }
 0x582   : > { %v3482_v24 = vpop.f32.mrf.mxu1 }
 0x584   : > { %v1695_v37 = vpop.f32.mrf.mxu1 }
 0x586   : > { %v3483_v38 = vpop.f32.mrf.mxu1 }
 0x587   : > { %v1776_v44 = vpack.c.bf16 %v3483_v38, %v3482_v24  ;;  %v3731_v24 = vld [vmem:[#allocation10 + $0xec] ss:$16 sps:$4 sm:$0xff]  }
 0x588   : > { %v1698_v55 = vpop.f32.mrf.mxu1 }
 0x589   : > { %v1775_v41 = vpack.c.bf16 %v1698_v55, %v1695_v37 }
 0x58b   : > { %1783 = vxpose.xlu0.c.b16.cont [5/8] (narrow) %v1775_v41, 32 }
 0x58f   : > { %1784 = vxpose.xlu0.c.b16.cont [6/8] (narrow) %v1776_v44, 32 }
 0x592   : > { %v3490_v45 = vpop.f32.mrf.mxu1 }
 0x594   : > { %v1756_v33 = vpop.f32.mrf.mxu1 }
 0x596   : > { %v3491_v51 = vpop.f32.mrf.mxu1 }
 0x597   : > { %v1778_v61 = vpack.c.bf16 %v3491_v51, %v3490_v45 }
 0x598   : > { %v1759_v49 = vpop.f32.mrf.mxu1 }
 0x599   : > { %v1777_v58 = vpack.c.bf16 %v1759_v49, %v1756_v33 }
 0x59b   : > { %1785 = vxpose.xlu0.c.b16.cont [7/8] (narrow) %v1777_v58, 32 }
 0x59f   : > { %1786 = vxpose.xlu0.c.b16.end [8/8] (narrow) %v1778_v61, 32 }
 0x5e5   : > { %v1787_v62 = vpop.trf.xlu0 }
 0x5e6   : > { %3508 = vmatprep.mubr.bf16.mxu0 %v1787_v62 }
 0x5e9   : > { %v1788_v63 = vpop.trf.xlu0 }
 0x5ea   : > { %3509 = vmatmul.mubr.bf16.vlgmr.msra.gmra.mxu0 %v1788_v63 }
 0x5eb   : > { %2188 = vmatpush1.bf16.msra.mxu0 %v3681_v1  ;;  %2219 = vmatprep.mubr.bf16.mxu0 %v4196_v34 }
 0x5ec   : > { %2189 = vmatprep.subr.bf16.mxu0 %v3689_v0 }
 0x5ef   : > { %2190 = vmatpush1.bf16.msra.mxu0 %v3687_v54  ;;  %v3737_v54 = vld [vmem:[#allocation10 + $0xcc] ss:$16 sps:$4 sm:$0xff]  }
 0x5f0   : > { %2191 = vmatprep.subr.bf16.mxu0 %v3695_v22  ;;  %v3744_v22 = vld [vmem:[#allocation10 + $0x80] ss:$16 sps:$4 sm:$0xff]  }
 0x5f3   : > { %2192 = vmatpush1.bf16.msra.mxu0 %v3693_v50  ;;  %v3752_v50 = vld [vmem:[#allocation10 + $0x64] ss:$16 sps:$4 sm:$0xff]  }
 0x5f4   : > { %2193 = vmatprep.subr.bf16.mxu0 %v3701_v27  ;;  %v3750_v27 = vld [vmem:[#allocation10 + $0x60] ss:$16 sps:$4 sm:$0xff]  }
 0x5f7   : > { %2194 = vmatpush1.bf16.msra.mxu0 %v3699_v46  ;;  %v3758_v46 = vld [vmem:[#allocation10 + $0x44] ss:$16 sps:$4 sm:$0xff]  }
 0x5f8   : > { %2195 = vmatprep.subr.bf16.mxu0 %v3707_v5  ;;  %v3756_v5 = vld [vmem:[#allocation10 + $0x40] ss:$16 sps:$4 sm:$0xff]  }
 0x5fb   : > { %2196 = vmatpush1.bf16.msra.mxu0 %v3705_v12  ;;  %v3764_v12 = vld [vmem:[#allocation10 + $0x24] ss:$16 sps:$4 sm:$0xff]  }
 0x5fc   : > { %2197 = vmatprep.subr.bf16.mxu0 %v3713_v59  ;;  %v3762_v59 = vld [vmem:[#allocation10 + $0x20] ss:$16 sps:$4 sm:$0xff]  }
 0x5ff   : > { %2198 = vmatpush1.bf16.msra.mxu0 %v3711_v29  ;;  %v3770_v29 = vld [vmem:[#allocation10 + $0x4] ss:$16 sps:$4 sm:$0xff]  }
 0x600   : > { %2199 = vmatprep.subr.bf16.mxu0 %v3719_v56  ;;  %v3774_v56 = vld [vmem:[#allocation11 + $0x78] sm:$0xff]  }
 0x603   : > { %2200 = vmatpush1.bf16.msra.mxu0 %v3717_v14  ;;  %v3771_v14 = vld [vmem:[#allocation10 + $0x8] ss:$16 sps:$4 sm:$0xff]  }
 0x604   : > { %2201 = vmatprep.subr.bf16.mxu0 %v3725_v52  ;;  %v3776_v52 = vld [vmem:[#allocation11 + $0x38] sm:$0xff]  }
 0x607   : > { %2202 = vmatpush1.bf16.msra.mxu0 %v3723_v32  ;;  %v3778_v32 = vld [vmem:[#allocation11 + $0x70] sm:$0xff]  }
 0x608   : > { %2485 = vmatprep.subr.bf16.mxu0 %v3731_v24  ;;  %v3780_v24 = vld [vmem:[#allocation11 + $0x30] sm:$0xff]  }
 0x6aa   : > { %v3510_v2 = vpop.f32.mrf.mxu0 }
 0x6ab   : > { %v4822_v15 = vadd.f32 %v3888_v39, %v3510_v2 }
 0x6ac   : > { %v1893_v7 = vpop.f32.mrf.mxu0 }
 0x6ad   : > { %v4814_v6 = vadd.f32 %v3886_v8, %v1893_v7  ;;  %v1914_v19 = vmul.f32 %v4822_v15, %v4822_v15  ;;  %v3732_v7 = vld [vmem:[#allocation10 + $0xc0] ss:$16 sps:$4 sm:$0xff]   ;;  %v3735_v8 = vld [vmem:[#allocation10 + $0xc8] ss:$16 sps:$4 sm:$0xff]  }
 0x6ae   : > { %v3511_v10 = vpop.f32.mrf.mxu0 }
 0x6af   : > { %v1912_v42 = vmul.f32 %v4814_v6, %v4814_v6  ;;  %v4827_v18 = vadd.f32 %v3889_v17, %v3511_v10  ;;  %v3740_v10 = vld [vmem:[#allocation10 + $0xa4] ss:$16 sps:$4 sm:$0xff]   ;;  %v3741_v17 = vld [vmem:[#allocation10 + $0xa8] ss:$16 sps:$4 sm:$0xff]  }
 0x6b0   : > { %v1896_v9 = vpop.f32.mrf.mxu0 }
 0x6b1   : > { %v4819_v13 = vadd.f32 %v3887_v11, %v1896_v9  ;;  %1916 = vadd.xlane.f32.xlu1 %v1912_v42  ;;  %v1915_v21 = vmul.f32 %v4827_v18, %v4827_v18  ;;  %v3743_v42 = vld [vmem:[#allocation10 + $0xac] ss:$16 sps:$4 sm:$0xff]  }
 0x6b3   : > { %v1913_v16 = vmul.f32 %v4819_v13, %v4819_v13 }
 0x6b5   : > { %1918 = vadd.xlane.f32.xlu1 %v1913_v16  ;;  %v3738_v16 = vld [vmem:[#allocation10 + $0xa0] ss:$16 sps:$4 sm:$0xff]  }
 0x6b9   : > { %1920 = vadd.xlane.f32.xlu1 %v1914_v19 }
 0x6bd   : > { %1922 = vadd.xlane.f32.xlu1 %v1915_v21  ;;  %v3746_v21 = vld [vmem:[#allocation10 + $0x84] ss:$16 sps:$4 sm:$0xff]  }
 0x73a   : > { %v1917_v37 = vpop.xlane.xlu1 %1916 }
 0x73b   : > { %v1924_v38 = vmul.f32 0.0078125, %v1917_v37  ;;  %v3781_v37 = vld [vmem:[#allocation11 + $0xb0] sm:$0xff]  }
 0x73d   : > { %v1928_v55 = vadd.f32 1e-08, %v1924_v38  ;;  %v3782_v38 = vld [vmem:[#allocation11 + $0x68] sm:$0xff]  }
 0x73e   : > { %v1919_v41 = vpop.xlane.xlu1 %1918 }
 0x73f   : > { %v1925_v44 = vmul.f32 0.0078125, %v1919_v41  ;;  %3878 = vrsqrt.f32 %v1928_v55  ;;  %v3783_v55 = vld [vmem:[#allocation11 + $0xe8] sm:$0xff]  }
 0x740   : > { %v3785_v41 = vld [vmem:[#allocation11 + $0xa8] sm:$0xff]  }
 0x741   : > { %v1929_v45 = vadd.f32 1e-08, %v1925_v44  ;;  %v3786_v44 = vld [vmem:[#allocation11 + $0x60] sm:$0xff]  }
 0x742   : > { %v1921_v33 = vpop.xlane.xlu1 %1920 }
 0x743   : > { %3880 = vrsqrt.f32 %v1929_v45  ;;  %v1926_v51 = vmul.f32 0.0078125, %v1921_v33  ;;  %v3787_v45 = vld [vmem:[#allocation11 + $0xe0] sm:$0xff]  }
 0x744   : > { %v3788_v33 = vld [vmem:[#allocation11 + $0x20] sm:$0xff]  }
 0x745   : > { %v1930_v49 = vadd.f32 1e-08, %v1926_v51  ;;  %v3789_v51 = vld [vmem:[#allocation11 + $0xa0] sm:$0xff]  }
 0x746   : > { %v1923_v58 = vpop.xlane.xlu1 %1922 }
 0x747   : > { %v1927_v61 = vmul.f32 0.0078125, %v1923_v58  ;;  %3882 = vrsqrt.f32 %v1930_v49  ;;  %v3790_v49 = vld [vmem:[#allocation11 + $0x58] sm:$0xff]  }
 0x748   : > { %v3791_v58 = vld [vmem:[#allocation11 + $0xd8] sm:$0xff]  }
 0x749   : > { %v1931_v62 = vadd.f32 1e-08, %v1927_v61  ;;  %v3792_v61 = vld [vmem:[#allocation11 + $0x18] sm:$0xff]  }
 0x74b   : > { %3884 = vrsqrt.f32 %v1931_v62  ;;  %v3793_v62 = vld [vmem:[#allocation11 + $0x98] sm:$0xff]  }
 0x74c   : > { %v3879_v63 = vpop.eup %3878 }
 0x74d   : > { %v1936_v60 = vmul.f32 %v3879_v63, %v4814_v6  ;;  %v3794_v63 = vld [vmem:[#allocation11 + $0x50] sm:$0xff]  }
 0x750   : > { %v3881_v57 = vpop.eup %3880 }
 0x751   : > { %v1937_v1 = vmul.f32 %v3881_v57, %v4819_v13  ;;  %v3795_v57 = vld [vmem:[#allocation11 + $0xd0] sm:$0xff]  }
 0x753   : > { %v4837_v0 = vpack.c.bf16 %v1937_v1, %v1936_v60  ;;  %v3796_v60 = vld [vmem:[#allocation11 + $0x10] sm:$0xff]  }
 0x754   : > { %v3883_v2 = vpop.eup %3882  ;;  %v3797_v1 = vld [vmem:[#allocation11 + $0x90] sm:$0xff]  }
 0x755   : > { %2167 = vmatmul.mubr.bf16.vlgmr.msra.gmra.mxu1 %v4837_v0  ;;  %2220 = vmatmul.mubr.bf16.vlgmr.msra.gmra.mxu0 %v4837_v0  ;;  %v1938_v11 = vmul.f32 %v3883_v2, %v4822_v15  ;;  %v3803_v2 = vld [vmem:[#allocation11 + $0xc0] sm:$0xff]  }
 0x756   : > { %2433 = vmatpush1.bf16.msra.mxu1 %v3726_v3  ;;  %2486 = vmatpush1.bf16.msra.mxu0 %v3729_v4  ;;  %v3798_v3 = vld [vmem:[#allocation11 + $0x48] sm:$0xff]  }
 0x757   : > { %2434 = vmatprep.subr.bf16.mxu1 %v3734_v40  ;;  %2487 = vmatprep.subr.bf16.mxu0 %v3737_v54  ;;  %v3799_v4 = vld [vmem:[#allocation11 + $0xc8] sm:$0xff]   ;;  %v3802_v54 = vld [vmem:[#allocation11 + $0x40] sm:$0xff]  }
 0x758   : > { %v3885_v9 = vpop.eup %3884  ;;  %2176 = vmatprep.mubr.bf16.mxu1 %v4196_v34  ;;  %2229 = vmatprep.mubr.bf16.mxu0 %v4196_v34  ;;  %v3801_v40 = vld [vmem:[#allocation11 + $0x88] sm:$0xff]  }
 0x759   : > { %v1939_v39 = vmul.f32 %v3885_v9, %v4827_v18 }
 0x75a   : > { %2435 = vmatpush1.bf16.msra.mxu1 %v3732_v7  ;;  %2488 = vmatpush1.bf16.msra.mxu0 %v3735_v8  ;;  %v3804_v7 = vld [vmem:[#allocation11] sm:$0xff]  }
 0x75b   : > { %2436 = vmatprep.subr.bf16.mxu1 %v3740_v10  ;;  %2489 = vmatprep.subr.bf16.mxu0 %v3743_v42  ;;  %v1941_v19 = vpack.c.bf16 %v1939_v39, %v1938_v11  ;;  %v3805_v8 = vld [vmem:[#allocation11 + $0x80] sm:$0xff]  }
 0x75d   : > { %2177 = vmatmul.mubr.bf16.gmra.mxu1 %v1941_v19  ;;  %2230 = vmatmul.mubr.bf16.gmra.mxu0 %v1941_v19 }
 0x75e   : > { %2437 = vmatpush1.bf16.msra.mxu1 %v3738_v16  ;;  %2490 = vmatpush1.bf16.msra.mxu0 %v3741_v17 }
 0x75f   : > { %2438 = vmatprep.subr.bf16.mxu1 %v3746_v21  ;;  %2491 = vmatprep.subr.bf16.mxu0 %v3749_v20 }
 0x760   : > { %2464 = vmatprep.mubr.bf16.mxu1 %v4196_v34  ;;  %2517 = vmatprep.mubr.bf16.mxu0 %v4196_v34 }
 0x762   : > { %2439 = vmatpush1.bf16.msra.mxu1 %v3744_v22  ;;  %2492 = vmatpush1.bf16.msra.mxu0 %v3747_v43 }
 0x763   : > { %2440 = vmatprep.subr.bf16.mxu1 %v3752_v50  ;;  %2493 = vmatprep.subr.bf16.mxu0 %v3755_v25 }
 0x766   : > { %2441 = vmatpush1.bf16.msra.mxu1 %v3750_v27  ;;  %2494 = vmatpush1.bf16.msra.mxu0 %v3753_v48 }
 0x767   : > { %2442 = vmatprep.subr.bf16.mxu1 %v3758_v46  ;;  %2495 = vmatprep.subr.bf16.mxu0 %v3761_v28 }
 0x76a   : > { %2443 = vmatpush1.bf16.msra.mxu1 %v3756_v5  ;;  %2496 = vmatpush1.bf16.msra.mxu0 %v3759_v30 }
 0x76b   : > { %2444 = vmatprep.subr.bf16.mxu1 %v3764_v12  ;;  %2497 = vmatprep.subr.bf16.mxu0 %v3767_v31 }
 0x76e   : > { %2445 = vmatpush1.bf16.msra.mxu1 %v3762_v59  ;;  %2498 = vmatpush1.bf16.msra.mxu0 %v3765_v26 }
 0x76f   : > { %2446 = vmatprep.subr.bf16.mxu1 %v3770_v29  ;;  %2499 = vmatprep.subr.bf16.mxu0 %v3773_v47 }
 0x772   : > { %2447 = vmatpush1.bf16.msra.mxu1 %v3768_v35  ;;  %2500 = vmatpush1.bf16.msra.mxu0 %v3771_v14 }
 0x773   : > { %3320 = vmatprep.subr.bf16.mxu1 %v3774_v56  ;;  %3348 = vmatprep.subr.bf16.mxu0 %v3775_v23 }
 0x775   : > { %2465 = vmatmul.mubr.bf16.vlgmr.msra.gmra.mxu1 %v4837_v0  ;;  %2518 = vmatmul.mubr.bf16.vlgmr.msra.gmra.mxu0 %v4837_v0  ;;  %v3800_v0 = vld [vmem:[#allocation11 + $0x8] sm:$0xff]  }
 0x776   : > { %2474 = vmatprep.mubr.bf16.mxu1 %v4196_v34  ;;  %2527 = vmatprep.mubr.bf16.mxu0 %v4196_v34  ;;  %v3784_v34 = vld [vmem:[#allocation11 + $0x28] sm:$0xff]  }
 0x777   : > { %3321 = vmatpush3.bf16.msra.mxu1 %v3776_v52  ;;  %3349 = vmatpush3.bf16.msra.mxu0 %v3777_v53 }
 0x778   : > { %3322 = vmatprep.subr.bf16.mxu1 %v3778_v32  ;;  %3350 = vmatprep.subr.bf16.mxu0 %v3779_v36 }
 0x77b   : > { %3323 = vmatpush3.bf16.msra.mxu1 %v3780_v24  ;;  %3351 = vmatpush3.bf16.msra.mxu0 %v3781_v37 }
 0x77c   : > { %3324 = vmatprep.subr.bf16.mxu1 %v3782_v38  ;;  %3352 = vmatprep.subr.bf16.mxu0 %v3783_v55 }
 0x77d   : > { %2475 = vmatmul.mubr.bf16.gmra.mxu1 %v1941_v19  ;;  %2528 = vmatmul.mubr.bf16.gmra.mxu0 %v1941_v19 }
 0x77f   : > { %3325 = vmatpush3.bf16.msra.mxu1 %v3784_v34  ;;  %3353 = vmatpush3.bf16.msra.mxu0 %v3785_v41 }
 0x780   : > { %3326 = vmatprep.subr.bf16.mxu1 %v3786_v44  ;;  %3354 = vmatprep.subr.bf16.mxu0 %v3787_v45 }
 0x783   : > { %3327 = vmatpush3.bf16.msra.mxu1 %v3788_v33  ;;  %3355 = vmatpush3.bf16.msra.mxu0 %v3789_v51 }
 0x784   : > { %3328 = vmatprep.subr.bf16.mxu1 %v3790_v49  ;;  %3356 = vmatprep.subr.bf16.mxu0 %v3791_v58 }
 0x787   : > { %3329 = vmatpush3.bf16.msra.mxu1 %v3792_v61  ;;  %3357 = vmatpush3.bf16.msra.mxu0 %v3793_v62 }
 0x788   : > { %3330 = vmatprep.subr.bf16.mxu1 %v3794_v63  ;;  %3358 = vmatprep.subr.bf16.mxu0 %v3795_v57 }
 0x78b   : > { %3331 = vmatpush3.bf16.msra.mxu1 %v3796_v60  ;;  %3359 = vmatpush3.bf16.msra.mxu0 %v3797_v1 }
 0x78c   : > { %3332 = vmatprep.subr.bf16.mxu1 %v3798_v3  ;;  %3360 = vmatprep.subr.bf16.mxu0 %v3799_v4 }
 0x78f   : > { %3333 = vmatpush3.bf16.msra.mxu1 %v3800_v0  ;;  %3361 = vmatpush3.bf16.msra.mxu0 %v3801_v40 }
 0x790   : > { %3334 = vmatprep.subr.bf16.mxu1 %v3802_v54  ;;  %3362 = vmatprep.subr.bf16.mxu0 %v3803_v2 }
 0x793   : > { %3335 = vmatpush3.bf16.msra.mxu1 %v3804_v7  ;;  %3363 = vmatpush3.bf16.msra.mxu0 %v3805_v8 }
 0x815   : > { %v2168_v10 = vpop.f32.mrf.mxu1  ;;  %v2221_v42 = vpop.f32.mrf.mxu0 }
 0x817   : > { %v2170_v9 = vpop.f32.mrf.mxu1  ;;  %v2223_v11 = vpop.f32.mrf.mxu0 }
 0x819   : > { %v2172_v39 = vpop.f32.mrf.mxu1  ;;  %v2225_v16 = vpop.f32.mrf.mxu0 }
 0x81b   : > { %v2174_v17 = vpop.f32.mrf.mxu1  ;;  %v2227_v19 = vpop.f32.mrf.mxu0 }
 0x81d   : > { %v2178_v21 = vpop.f32.mrf.mxu1  ;;  %v2231_v20 = vpop.f32.mrf.mxu0 }
 0x81f   : > { %v2180_v22 = vpop.f32.mrf.mxu1  ;;  %v2233_v43 = vpop.f32.mrf.mxu0 }
 0x821   : > { %v2182_v50 = vpop.f32.mrf.mxu1  ;;  %v2235_v25 = vpop.f32.mrf.mxu0 }
 0x823   : > { %v2184_v27 = vpop.f32.mrf.mxu1  ;;  %v2237_v48 = vpop.f32.mrf.mxu0 }
 0x835   : > { %v2466_v46 = vpop.f32.mrf.mxu1  ;;  %v2519_v28 = vpop.f32.mrf.mxu0 }
 0x836   : > { %v2538_v52 = vmul.f32 %v2466_v46, %v2168_v10  ;;  %v2540_v53 = vmul.f32 %v2519_v28, %v2221_v42 }
 0x837   : > { %v2468_v5 = vpop.f32.mrf.mxu1  ;;  %v2521_v30 = vpop.f32.mrf.mxu0 }
 0x838   : > { %v2539_v35 = vmul.f32 %v2468_v5, %v2170_v9  ;;  %v2541_v14 = vmul.f32 %v2521_v30, %v2223_v11 }
 0x839   : > { %v2470_v12 = vpop.f32.mrf.mxu1  ;;  %v2523_v31 = vpop.f32.mrf.mxu0 }
 0x83a   : > { %v2542_v59 = vmul.f32 %v2470_v12, %v2172_v39  ;;  %v2544_v26 = vmul.f32 %v2523_v31, %v2225_v16 }
 0x83b   : > { %v2472_v29 = vpop.f32.mrf.mxu1  ;;  %v2525_v47 = vpop.f32.mrf.mxu0 }
 0x83c   : > { %v2543_v56 = vmul.f32 %v2472_v29, %v2174_v17  ;;  %v2545_v23 = vmul.f32 %v2525_v47, %v2227_v19  ;;  %v2554_v38 = vpack.c.bf16 %v2542_v59, %v2538_v52  ;;  %v2556_v55 = vpack.c.bf16 %v2544_v26, %v2540_v53 }
 0x83d   : > { %v2476_v32 = vpop.f32.mrf.mxu1  ;;  %v2529_v36 = vpop.f32.mrf.mxu0 }
 0x83e   : > { %v2555_v24 = vpack.c.bf16 %v2543_v56, %v2539_v35  ;;  %v2557_v37 = vpack.c.bf16 %v2545_v23, %v2541_v14  ;;  %v2546_v60 = vmul.f32 %v2476_v32, %v2178_v21  ;;  %v2548_v1 = vmul.f32 %v2529_v36, %v2231_v20 }
 0x83f   : > { %v2478_v34 = vpop.f32.mrf.mxu1  ;;  %v2531_v41 = vpop.f32.mrf.mxu0 }
 0x840   : > { %2850 = vmatprep.mubr.bf16.mxu1 %v2555_v24  ;;  %2899 = vmatprep.mubr.bf16.mxu0 %v2557_v37  ;;  %v2547_v61 = vmul.f32 %v2478_v34, %v2180_v22  ;;  %v2549_v62 = vmul.f32 %v2531_v41, %v2233_v43 }
 0x841   : > { %v2480_v44 = vpop.f32.mrf.mxu1  ;;  %v2533_v45 = vpop.f32.mrf.mxu0  ;;  %2851 = vmatmul.mubr.bf16.vlgmr.msra.gmra.mxu1 %v2554_v38  ;;  %2900 = vmatmul.mubr.bf16.vlgmr.msra.gmra.mxu0 %v2556_v55 }
 0x842   : > { %v2550_v33 = vmul.f32 %v2480_v44, %v2182_v50  ;;  %v2552_v51 = vmul.f32 %v2533_v45, %v2235_v25 }
 0x843   : > { %v2482_v49 = vpop.f32.mrf.mxu1  ;;  %v2535_v58 = vpop.f32.mrf.mxu0 }
 0x844   : > { %v2551_v63 = vmul.f32 %v2482_v49, %v2184_v27  ;;  %v2553_v57 = vmul.f32 %v2535_v58, %v2237_v48  ;;  %v2558_v0 = vpack.c.bf16 %v2550_v33, %v2546_v60  ;;  %v2560_v40 = vpack.c.bf16 %v2552_v51, %v2548_v1 }
 0x846   : > { %v2559_v3 = vpack.c.bf16 %v2551_v63, %v2547_v61  ;;  %v2561_v4 = vpack.c.bf16 %v2553_v57, %v2549_v62 }
 0x848   : > { %2858 = vmatprep.mubr.bf16.mxu1 %v2559_v3  ;;  %2907 = vmatprep.mubr.bf16.mxu0 %v2561_v4 }
 0x849   : > { %2859 = vmatmul.mubr.bf16.gmra.mxu1 %v2558_v0  ;;  %2908 = vmatmul.mubr.bf16.gmra.mxu0 %v2560_v40 }
 0x901   : > { %v3336_v54 = vpop.f32.mrf.mxu1  ;;  %v3364_v2 = vpop.f32.mrf.mxu0 }
 0x903   : > { %v3337_v7 = vpop.f32.mrf.mxu1  ;;  %v3365_v8 = vpop.f32.mrf.mxu0 }
 0x904   : > { %v3338_v10 = vadd.f32 %v3337_v7, %v3336_v54  ;;  %v3366_v42 = vadd.f32 %v3365_v8, %v3364_v2 }
 0x905   : > { %v3339_v9 = vpop.f32.mrf.mxu1  ;;  %v3367_v11 = vpop.f32.mrf.mxu0 }
 0x906   : > { %v2902_v39 = vadd.f32 %v3366_v42, %v3338_v10 }
 0x907   : > { %v3340_v16 = vpop.f32.mrf.mxu1  ;;  %v3368_v17 = vpop.f32.mrf.mxu0 }
 0x908   : > { %v2916_v19 = vadd.f32 %v2902_v39, %v4814_v6  ;;  %v3341_v21 = vadd.f32 %v3340_v16, %v3339_v9  ;;  %v3369_v20 = vadd.f32 %v3368_v17, %v3367_v11 }
 0x909   : > { %v3342_v22 = vpop.f32.mrf.mxu1  ;;  %v3370_v43 = vpop.f32.mrf.mxu0 }
 0x90a   : > { %2920 = vst [vmem:[%s425_s12] sm:$0xff] %v2916_v19  ;;  %v2905_v50 = vadd.f32 %v3369_v20, %v3341_v21 }
 0x90b   : > { %v3343_v25 = vpop.f32.mrf.mxu1  ;;  %v3371_v27 = vpop.f32.mrf.mxu0 }
 0x90c   : > { %v2917_v48 = vadd.f32 %v2905_v50, %v4819_v13  ;;  %v3344_v46 = vadd.f32 %v3343_v25, %v3342_v22  ;;  %v3372_v28 = vadd.f32 %v3371_v27, %v3370_v43 }
 0x90d   : > { %v3345_v5 = vpop.f32.mrf.mxu1  ;;  %v3373_v30 = vpop.f32.mrf.mxu0 }
 0x90e   : > { %2921 = vst [vmem:[%s425_s12 + $0x8] sm:$0xff] %v2917_v48  ;;  %v2910_v6 = vadd.f32 %v3372_v28, %v3344_v46 }
 0x90f   : > { %v3346_v12 = vpop.f32.mrf.mxu1  ;;  %v3374_v31 = vpop.f32.mrf.mxu0 }
 0x910   : > { %v2918_v59 = vadd.f32 %v2910_v6, %v4822_v15  ;;  %v3347_v26 = vadd.f32 %v3346_v12, %v3345_v5  ;;  %v3375_v29 = vadd.f32 %v3374_v31, %v3373_v30 }
 0x912   : > { %2922 = vst [vmem:[%s425_s12 + $0x10] sm:$0xff] %v2918_v59  ;;  %v2913_v13 = vadd.f32 %v3375_v29, %v3347_v26 }
 0x914   : > { %v2919_v47 = vadd.f32 %v2913_v13, %v4827_v18 }
 0x916   : > { %2923 = vst [vmem:[%s425_s12 + $0x18] sm:$0xff] %v2919_v47 }
 0x917   : > { %4113 = shalt.err (!%p4110_p8)
}
 0x918   : > { %s4114_s17 = scalar_lea.hbm %s4862_s10, 512  ;;  %s4118_s15 = scalar_lea.hbm %s4914_s8, 1024 }
 0x919   : > { %p4115_p6 = scmp.ne.s32.totalorder %s4862_s10, %s4114_s17  ;;  %p4119_p0 = scmp.lt.s32.totalorder %s4862_s10, %s4914_s8 }
 0x91a   : > { %p4120_p2 = scmp.lt.s32.totalorder %s4118_s15, %s4114_s17 }
 0x91b   : > { %p4116_p11 = pnand %p4115_p6, %p4944_p10 }
 0x91c   : > { %p4121_p5 = por %p4120_p2, %p4119_p0 }
 0x91d   : > { %p4117_p7 = pneg %p4116_p11 }
 0x91f   : > { %p4122_p9 = pnand %p4121_p5, %p4117_p7 }
 0x921   : > { %4125 = shalt.err (!%p4122_p9)
}
 0x922   : > { %s4198_s13 = smov 128   ;;  %s4199_s19 = smov 8  }
 0x923   : > { %3550 = dma.vmem_to_hbm [thread:$0]  (%p4944_p10), %s4857_s22, 512, %s4862_s10, %s2925_s16, %s4198_s13, %s4198_s13, %s4199_s19  }
 0x924 PF: > { %s2953_s25 = sand.u32 1, %s4168_s27   ;;  %p4945_p12 = scmp.ne.s32.totalorder %s4930_s26, 0 }
 0x925   : > { %p4946_p13 = scmp.ge.s32.totalorder %s4180_s30, 2  ;;  %s2954_s11 = scalar_lea.sflag [#allocation4], %s2953_s25 }
 0x927   : > { %p3579_p1 = pnand %p4946_p13, %p4945_p12 }
 0x929   : > { %p3580_p3 = pneg %p3579_p1 }
 0x92b   : > { %4163 = dma.done.wait (%p3580_p3), %s2954_s11, 512  }
 0x92c   : > { %4165 = vsyncadd (%p3580_p3), %s2954_s11, 4294966784  ;;  %p25_p4 = scmp.ge.s32.totalorder %s4372_s18, 4   ;;  %s4947_s27 = smov %s4172_s28 }
 0x92d   : > { %s4948_s28 = smov %s4176_s29  ;;  %s4949_s29 = smov %s4384_s20 }
 0x92e   : > { %s4950_s30 = smov %s4372_s18  ;;  %27 = sbr.rel (!%p25_p4) target bundleno = 12 (0xc), region = 125 }
 0x933   :  { %2959 = vsyncpa [#allocation3], 1 }
 0x934   :  { %2961 = vsyncpa [#allocation3 + $0x1], 1 }
 0x935   :  { %2962 = vsyncpa [#allocation6], 1 }
 0x936   :  { %2963 = vsyncpa [#allocation9], 1 }
 0x937   :  { %2964 = vsyncpa [#allocation12], 1 }
 0x938   :  { %2965 = vsyncpa [#allocation15], 1 }
 0x939   :  { %2966 = vsyncpa [#allocation4], 1 }
 0x93a   :  { %2968 = vsyncpa [#allocation4 + $0x1], 1 }

// kernel: tpu_custom_call.1
= control target key start
LH: loop header
LB: loop body
LE: loop exit
PB: predicated region body
PF: predicated region fallthrough
CT: control target
= control target key end

     0   :  { %s4906_s0 = inlined_call_operand.hbm [shape: f32[2,32,128], index: 0, kind: input, shape index: {}]   ;;  %s4907_s1 = inlined_call_operand.hbm [shape: bf16[384,128], index: 1, kind: input, shape index: {}]   ;;  %s4908_s2 = inlined_call_operand.hbm [shape: bf16[128,128], index: 2, kind: input, shape index: {}]   ;;  %s4909_s3 = inlined_call_operand.hbm [shape: bf16[128,512], index: 3, kind: input, shape index: {}]   ;;  %s4910_s4 = inlined_call_operand.hbm [shape: bf16[128,512], index: 4, kind: input, shape index: {}]   ;;  %s4911_s5 = inlined_call_operand.hbm [shape: bf16[512,128], index: 5, kind: input, shape index: {}]   ;;  %s4912_s6 = inlined_call_operand.hbm [shape: f32[1,32,32], index: 6, kind: input, shape index: {}]   ;;  %s4913_s7 = inlined_call_operand.hbm [shape: f32[1,32,32], index: 7, kind: input, shape index: {}]   ;;  %s4914_s8 = inlined_call_operand.hbm [shape: f32[2,32,128], index: 8, kind: output, shape index: {}]  }
   0x1   :  { %4921 = sst [smem:[#allocation23_spill]] %s4907_s1 }
   0x2   :  { %4922 = sst [smem:[#allocation24_spill]] %s4908_s2 }
   0x3   :  { %13 = vsyncpa [#allocation3], 0 }
   0x4   :  { %15 = vsyncpa [#allocation3 + $0x1], 0 }
   0x5   :  { %16 = vsyncpa [#allocation6], 0 }
   0x6   :  { %17 = vsyncpa [#allocation9], 0 }
   0x7   :  { %18 = vsyncpa [#allocation12], 0 }
   0x8   :  { %19 = vsyncpa [#allocation15], 0 }
   0x9   :  { %20 = vsyncpa [#allocation4], 0 }
   0xa   :  { %22 = vsyncpa [#allocation4 + $0x1], 0  ;;  %s4245_s27 = smov 0   ;;  %s4247_s28 = smov 0  }
   0xb   :  { %s4249_s29 = smov 0   ;;  %s4251_s30 = smov 0  }
   0xc LB: > { %s4182_s9 = smov [#allocation5]   ;;  %s4266_s11 = sadd.s32 4294967295, %s4180_s30   ;;  %s4180_s30 = sphi %s4251_s30, %s4950_s30   ;;  %s4176_s29 = sphi %s4249_s29, %s4949_s29   ;;  %s4172_s28 = sphi %s4247_s28, %s4948_s28   ;;  %s4168_s27 = sphi %s4245_s27, %s4947_s27  }
   0xd   : > { %s244_s10 = sshll.u32 %s4182_s9, 4  ;;  %p3079_p0 = scmp.ge.s32.totalorder %s4180_s30, 1  ;;  %s245_s10 = int_to_ptr.vmem [resolvable:$true] %s244_s10 }
   0xe   : > { %p4917_p1 = scmp.eq.s32.totalorder %s4266_s11, 0  ;;  %p232_p2 = scmp.lt.s32.totalorder %s4180_s30, 3 }
   0xf   : > { %s4183_s13 = smov [#allocation8]   ;;  %s4184_s16 = smov [#allocation11]  }
  0x10   : > { %p4271_p3 = pnand %p3079_p0, %p232_p2  ;;  %s270_s14 = sshll.u32 %s4183_s13, 4  ;;  %s4284_s14 = int_to_ptr.vmem [resolvable:$true] %s270_s14 }
  0x11   : > { %s4286_s17 = sshll.u32 %s4184_s16, 4  ;;  %s3901_s19 = scalar_lea.vmem %s245_s10, 3072  ;;  %s297_s17 = int_to_ptr.vmem [resolvable:$true] %s4286_s17 }
  0x12   : > { %s4923_s12 = scalar_select %p4271_p3, 1, 0 }
  0x13   : > { %p3552_p5 = pneg %p4271_p3  ;;  %p3902_p8 = scmp.ne.s32.totalorder %s245_s10, %s3901_s19 }
  0x14   : > { %p3909_p11 = scmp.lt.s32.totalorder %s245_s10, %s245_s10  ;;  %p3910_p12 = scmp.lt.s32.totalorder %s3901_s19, %s3901_s19 }
  0x15   : > { %p4280_p6 = pnand %p3552_p5, %p4917_p1 }
  0x16   : > { %p3911_p13 = por %p3910_p12, %p3909_p11 }
  0x17   : > { %p4290_p7 = pneg %p4280_p6 }
  0x19   : > { %p3904_p9 = pnand %p3902_p8, %p4290_p7 }
  0x1b   : > { %p3905_p10 = pneg %p3904_p9 }
  0x1d   : > { %p3912_p0 = pnand %p3911_p13, %p3905_p10 }
  0x1f   : > { %3915 = shalt.err (!%p3912_p0)
}
  0x20   : > { %s4185_s20 = smov 64   ;;  %s4186_s21 = smov 4  }
  0x21   : > { %s4926_s1 = sld [smem:[#allocation23_spill]]  ;;  %s3927_s24 = scalar_lea.vmem %s4284_s14, 4096 }
  0x22   : > { %p3928_p2 = scmp.ne.s32.totalorder %s4284_s14, %s3927_s24  ;;  %p3935_p9 = scmp.lt.s32.totalorder %s4284_s14, %s4284_s14 }
  0x23   : > { %p3936_p10 = scmp.lt.s32.totalorder %s3927_s24, %s3927_s24 }
  0x24   : > { %p3930_p5 = pnand %p3928_p2, %p4290_p7 }
  0x25   : > { %p3937_p11 = por %p3936_p10, %p3935_p9 }
  0x26   : > { %p3931_p8 = pneg %p3930_p5 }
  0x27   : > { %3555 = dma.hbm_to_vmem [thread:$0]  (!%p4280_p6), %s4926_s1, 3072, %s245_s10, [#allocation6], %s4185_s20, %s4185_s20, %s4186_s21  }
  0x28   : > { %p3938_p12 = pnand %p3937_p11, %p3931_p8 }
  0x2a   : > { %3941 = shalt.err (!%p3938_p12)
}
  0x2b   : > { %s4187_s25 = smov 256   ;;  %s4188_s26 = smov 16  }
  0x2c   : > { %3561 = dma.hbm_to_vmem [thread:$0]  (!%p4280_p6), %s4909_s3, 4096, %s4284_s14, [#allocation9], %s4187_s25, %s4187_s25, %s4188_s26  }
  0x2d   : > { %s3953_s13 = scalar_lea.vmem %s297_s17, 4096  ;;  %p3961_p5 = scmp.lt.s32.totalorder %s297_s17, %s297_s17 }
  0x2e   : > { %p3954_p13 = scmp.ne.s32.totalorder %s297_s17, %s3953_s13  ;;  %p3962_p8 = scmp.lt.s32.totalorder %s3953_s13, %s3953_s13 }
  0x30   : > { %p3956_p0 = pnand %p3954_p13, %p4290_p7  ;;  %p3963_p9 = por %p3962_p8, %p3961_p5 }
  0x32   : > { %p3957_p2 = pneg %p3956_p0 }
  0x34   : > { %p3964_p10 = pnand %p3963_p9, %p3957_p2 }
  0x36   : > { %3967 = shalt.err (!%p3964_p10)
}
  0x37   : > { %3567 = dma.hbm_to_vmem [thread:$0]  (!%p4280_p6), %s4911_s5, 4096, %s297_s17, [#allocation12], %s4185_s20, %s4185_s20, %s4186_s21  }
  0x38   : > { %s4189_s14 = smov [#allocation7]   ;;  %s4190_s23 = smov [#allocation10]  }
  0x39   : > { %s257_s22 = sshll.u32 %s4189_s14, 4  ;;  %s283_s24 = sshll.u32 %s4190_s23, 4  ;;  %s258_s22 = int_to_ptr.vmem [resolvable:$true] %s257_s22  ;;  %s284_s24 = int_to_ptr.vmem [resolvable:$true] %s283_s24 }
  0x3a   : > { %s3979_s9 = scalar_lea.vmem %s258_s22, 1024  ;;  %p3987_p0 = scmp.lt.s32.totalorder %s258_s22, %s258_s22 }
  0x3b   : > { %p3980_p11 = scmp.ne.s32.totalorder %s258_s22, %s3979_s9  ;;  %p3988_p2 = scmp.lt.s32.totalorder %s3979_s9, %s3979_s9 }
  0x3d   : > { %p3982_p12 = pnand %p3980_p11, %p4290_p7  ;;  %p3989_p5 = por %p3988_p2, %p3987_p0 }
  0x3f   : > { %p3983_p13 = pneg %p3982_p12 }
  0x41   : > { %p3990_p8 = pnand %p3989_p5, %p3983_p13 }
  0x43   : > { %3993 = shalt.err (!%p3990_p8)
}
  0x44   : > { %s4927_s2 = sld [smem:[#allocation24_spill]]  ;;  %s4005_s13 = scalar_lea.vmem %s284_s24, 4096 }
  0x45   : > { %p4006_p9 = scmp.ne.s32.totalorder %s284_s24, %s4005_s13  ;;  %p4013_p12 = scmp.lt.s32.totalorder %s284_s24, %s284_s24 }
  0x46   : > { %p4014_p0 = scmp.lt.s32.totalorder %s4005_s13, %s4005_s13 }
  0x47   : > { %p4008_p10 = pnand %p4006_p9, %p4290_p7 }
  0x48   : > { %p4015_p13 = por %p4014_p0, %p4013_p12 }
  0x49   : > { %p4009_p11 = pneg %p4008_p10 }
  0x4a   : > { %3558 = dma.hbm_to_vmem [thread:$0]  (!%p4280_p6), %s4927_s2, 1024, %s258_s22, [#allocation6], %s4185_s20, %s4185_s20, %s4186_s21  }
  0x4b   : > { %p4016_p2 = pnand %p4015_p13, %p4009_p11 }
  0x4d   : > { %4019 = shalt.err (!%p4016_p2)
}
  0x4e   : > { %3564 = dma.hbm_to_vmem [thread:$0]  (!%p4280_p6), %s4910_s4, 4096, %s284_s24, [#allocation9], %s4187_s25, %s4187_s25, %s4188_s26  }
  0x4f   : > { %s4191_s20 = smov [#allocation13]  }
  0x50   : > { %s309_s21 = sshll.u32 %s4191_s20, 4  ;;  %s310_s21 = int_to_ptr.vmem [resolvable:$true] %s309_s21 }
  0x51   : > { %s4031_s14 = scalar_lea.vmem %s310_s21, 512  ;;  %p4039_p10 = scmp.lt.s32.totalorder %s310_s21, %s310_s21 }
  0x52   : > { %p4032_p5 = scmp.ne.s32.totalorder %s310_s21, %s4031_s14  ;;  %p4040_p11 = scmp.lt.s32.totalorder %s4031_s14, %s4031_s14 }
  0x54   : > { %p4034_p8 = pnand %p4032_p5, %p4290_p7  ;;  %p4041_p12 = por %p4040_p11, %p4039_p10 }
  0x56   : > { %p4035_p9 = pneg %p4034_p8 }
  0x58   : > { %p4042_p0 = pnand %p4041_p12, %p4035_p9 }
  0x5a   : > { %4045 = shalt.err (!%p4042_p0)
}
  0x5b   : > { %s4915_s22 = smov 128   ;;  %s4916_s23 = smov 8  }
  0x5c   : > { %3570 = dma.hbm_to_vmem [thread:$0]  (!%p4280_p6), %s4912_s6, 512, %s310_s21, [#allocation12], %s4915_s22, %s4915_s22, %s4916_s23  }
  0x5d   : > { %s4194_s24 = smov [#allocation14]  }
  0x5e   : > { %s322_s9 = sshll.u32 %s4194_s24, 4  ;;  %s323_s9 = int_to_ptr.vmem [resolvable:$true] %s322_s9 }
  0x5f   : > { %s4057_s17 = scalar_lea.vmem %s323_s9, 512  ;;  %p4065_p8 = scmp.lt.s32.totalorder %s323_s9, %s323_s9 }
  0x60   : > { %p4058_p13 = scmp.ne.s32.totalorder %s323_s9, %s4057_s17  ;;  %p4066_p9 = scmp.lt.s32.totalorder %s4057_s17, %s4057_s17 }
  0x62   : > { %p4060_p2 = pnand %p4058_p13, %p4290_p7  ;;  %p4067_p10 = por %p4066_p9, %p4065_p8 }
  0x64   : > { %p4061_p5 = pneg %p4060_p2 }
  0x66   : > { %p4068_p11 = pnand %p4067_p10, %p4061_p5 }
  0x68   : > { %4071 = shalt.err (!%p4068_p11)
}
  0x69   : > { %3573 = dma.hbm_to_vmem [thread:$0]  (!%p4280_p6), %s4913_s7, 512, %s323_s9, [#allocation15], %s4915_s22, %s4915_s22, %s4916_s23  }
  0x6a   : > { %s3078_s15 = sadd.s32 4294967294, %s4180_s30   ;;  %s4372_s18 = sadd.s32 1, %s4180_s30  }
  0x6b   : > { %s35_s16 = sadd.s32 1, %s4176_s29  ;;  %s32_s19 = ssub.s32 %s4180_s30, %s4372_s18 }
  0x6c   : > { %p42_p7 = scmp.ne.s32.totalorder %s4176_s29, %s4172_s28  ;;  %p33_p12 = scmp.eq.s32.totalorder %s32_s19, 0 }
  0x6d   : > { %p43_p0 = scmp.eq.s32.totalorder %s4180_s30, 0  ;;  %p48_p13 = scmp.ne.s32.totalorder %s4172_s28, %s4168_s27 }
  0x6e   : > { %p219_p2 = scmp.eq.s32.totalorder %s4266_s11, 1  ;;  %p225_p9 = scmp.eq.s32.totalorder %s3078_s15, 1 }
  0x6f   : > { %s4384_s20 = scalar_select %p33_p12, %s4176_s29, %s35_s16  }
  0x70   : > { %p44_p5 = por %p43_p0, %p42_p7  ;;  %p4388_p8 = por %p4917_p1, %p48_p13 }
  0x71   : > { %p4392_p6 = por %p219_p2, %p42_p7  ;;  %p3589_p10 = scmp.lt.s32.totalorder %s4180_s30, 2 }
  0x72   : > { %s4928_s21 = scalar_select %p4388_p8, 1, 0 }
  0x73   : > { %s4929_s14 = scalar_select %p4392_p6, 1, 0 }
  0x74   : > { %s336_s25 = sand.u32 1, %s4176_s29   ;;  %p4398_p11 = por %p225_p9, %p48_p13 }
  0x75   : > { %s3088_s24 = sshll.u32 %s336_s25, 5  ;;  %s3250_s9 = sshll.u32 %s4180_s30, 9 }
  0x76   : > { %s4930_s26 = scalar_select %p4398_p11, 1, 0 }
  0x77   : > { %s4406_s13 = scalar_lea.hbm %s4906_s0, %s3250_s9  ;;  %s340_s16 = scalar_lea.vmem [#allocation2], %s3088_s24 }
  0x78   : > { %s347_s19 = sshll.u32 %s340_s16, 4  ;;  %p4408_p7 = pnand %p3589_p10, %p44_p5  ;;  %s4412_s19 = int_to_ptr.vmem [resolvable:$true] %s347_s19 }
  0x79   : > { %s4414_s22 = scalar_lea.sflag [#allocation3], %s336_s25  ;;  %s4072_s23 = scalar_lea.hbm %s4406_s13, 512 }
  0x7a   : > { %p4073_p12 = scmp.ne.s32.totalorder %s4406_s13, %s4072_s23  ;;  %p4074_p0 = pneg %p4408_p7 }
  0x7b   : > { %s4077_s24 = scalar_lea.hbm %s4906_s0, 1024  ;;  %p4078_p5 = scmp.lt.s32.totalorder %s4406_s13, %s4906_s0 }
  0x7c   : > { %p4075_p13 = pnand %p4074_p0, %p4073_p12  ;;  %p4079_p9 = scmp.lt.s32.totalorder %s4077_s24, %s4072_s23 }
  0x7e   : > { %p4076_p2 = pneg %p4075_p13  ;;  %p4080_p10 = por %p4079_p9, %p4078_p5 }
  0x80   : > { %p4081_p4 = pnand %p4080_p10, %p4076_p2 }
  0x82   : > { %4084 = shalt.err (!%p4081_p4)
}
  0x83   : > { %s4085_s25 = scalar_lea.vmem %s4412_s19, 512  ;;  %s4195_s1 = smov [#allocation2]  }
  0x84   : > { %p4086_p1 = scmp.ne.s32.totalorder %s4412_s19, %s4085_s25  ;;  %s4090_s2 = sshll.u32 %s4195_s1, 4  ;;  %s4091_s2 = int_to_ptr.vmem [resolvable:$false] %s4090_s2 }
  0x85   : > { %s4092_s9 = scalar_lea.vmem %s4091_s2, 1024  ;;  %p4093_p13 = scmp.lt.s32.totalorder %s4412_s19, %s4091_s2 }
  0x86   : > { %p4088_p11 = pnand %p4086_p1, %p4074_p0  ;;  %p4094_p6 = scmp.lt.s32.totalorder %s4092_s9, %s4085_s25 }
  0x88   : > { %p4089_p12 = pneg %p4088_p11  ;;  %p4095_p8 = por %p4094_p6, %p4093_p13 }
  0x8a   : > { %p4096_p3 = pnand %p4095_p8, %p4089_p12 }
  0x8c   : > { %4099 = shalt.err (!%p4096_p3)
}
  0x8d   : > { %s4932_s23 = smov 8   ;;  %s4933_s17 = smov 128  }
  0x8e   : > { %3577 = dma.hbm_to_vmem [thread:$0]  (!%p4408_p7), %s4406_s13, 512, %s4412_s19, %s4414_s22, %s4933_s17, %s4933_s17, %s4932_s23  }
  0x8f   : > { %p4934_p1 = scmp.ne.s32.totalorder %s4923_s12, 0 }
  0x90   : > { %s4441_s1 = sand.u32 (!%p4934_p1), 1, %s4172_s28   ;;  %p4935_p3 = scmp.ne.s32.totalorder (!%p4934_p1), %s4928_s21, 0 }
  0x91   : > { %359 = sbr.rel (%p4934_p1) target bundleno = 2340 (0x924), region = 52  ;;  %s3092_s2 = sshll.u32 (!%p4934_p1), %s4441_s1, 5 }
  0x92   : > { %s362_s24 = scalar_lea.sflag (!%p4934_p1), [#allocation3], %s4441_s1  ;;  %s4447_s15 = scalar_lea.vmem (!%p4934_p1), [#allocation2], %s3092_s2 }
  0x96   : > { %4143 = dma.done.wait (%p4935_p3), %s362_s24, 512  }
  0x97   : > { %4145 = vsyncadd (%p4935_p3), %s362_s24, 4294966784  ;;  %p4936_p4 = scmp.eq.s32.totalorder %s4266_s11, 0 }
  0x99   : > { %4147 = dma.done.wait (%p4936_p4), [#allocation6], 4096   ;;  %p4937_p8 = pmov %p4936_p4 }
  0x9a   : > { %p4938_p6 = pmov %p4936_p4 }
  0x9b   : > { %4149 = vsyncadd (%p4937_p8), [#allocation6], 4294963200 }
  0x9c   : > { %4151 = dma.done.wait (%p4938_p6), [#allocation9], 8192   ;;  %p4939_p11 = pmov %p4936_p4 }
  0x9d   : > { %p4940_p7 = pmov %p4936_p4 }
  0x9e   : > { %4153 = vsyncadd (%p4939_p11), [#allocation9], 4294959104 }
  0x9f   : > { %4155 = dma.done.wait (%p4940_p7), [#allocation12], 4608   ;;  %p4941_p0 = pmov %p4936_p4 }
  0xa1   : > { %4157 = vsyncadd (%p4941_p0), [#allocation12], 4294962688  ;;  %p4942_p2 = pmov %p4941_p0 }
  0xa2   : > { %p4943_p5 = pmov %p4941_p0 }
  0xa3   : > { %4159 = dma.done.wait (%p4942_p2), [#allocation15], 512  }
  0xa4   : > { %4161 = vsyncadd (%p4943_p5), [#allocation15], 4294966784  ;;  %v429_v0 = vld [vmem:[%s4447_s15 + $0x10] sm:$0xff]  ;;  %v430_v1 = vld [vmem:[%s4447_s15 + $0x18] sm:$0xff]  ;;  %vm1087_vm0 = vcmask 261120   ;;  %s425_s12 = scalar_lea.vmem [#allocation16], %s3092_s2 }
  0xa5   : > { %v427_v2 = vld [vmem:[%s4447_s15] sm:$0xff]  ;;  %v433_v3 = vmul.f32 %v429_v0, %v429_v0  ;;  %v428_v5 = vld [vmem:[%s4447_s15 + $0x8] sm:$0xff]  ;;  %v434_v6 = vmul.f32 %v430_v1, %v430_v1  ;;  %v3648_v32 = vld [vmem:[#allocation5 + $0x10] sm:$0xff]   ;;  %s2938_s22 = sshll.u32 %s425_s12, 4  ;;  %s3251_s21 = sshll.u32 %s4266_s11, 9  ;;  %s4857_s22 = int_to_ptr.vmem [resolvable:$true] %s2938_s22 }
  0xa6   : > { %v431_v4 = vmul.f32 %v427_v2, %v427_v2  ;;  %v432_v7 = vmul.f32 %v428_v5, %v428_v5  ;;  %v3646_v8 = vld [vmem:[#allocation5] sm:$0xff]   ;;  %v3647_v31 = vld [vmem:[#allocation5 + $0x8] sm:$0xff]   ;;  %v3649_v33 = vld [vmem:[#allocation5 + $0x18] sm:$0xff]   ;;  %s4862_s10 = scalar_lea.hbm %s4914_s8, %s3251_s21  ;;  %s2925_s16 = scalar_lea.sflag [#allocation4], %s4441_s1 }
  0xa7   : > { %439 = vadd.xlane.f32.xlu0 %v433_v3  ;;  %3380 = vmatprep.mubr.bf16.mxu0 %v3646_v8  ;;  %v3650_v34 = vld [vmem:[#allocation5 + $0x20] sm:$0xff]   ;;  %v3651_v35 = vld [vmem:[#allocation5 + $0x28] sm:$0xff]   ;;  %v3652_v36 = vld [vmem:[#allocation5 + $0x30] sm:$0xff]   ;;  %s4100_s25 = scalar_lea.vmem %s4857_s22, 512  ;;  %p4944_p10 = scmp.ne.s32.totalorder %s4929_s14, 0 }
  0xa8   : > { %435 = vadd.xlane.f32.xlu1 %v431_v4  ;;  %v3653_v37 = vld [vmem:[#allocation5 + $0x38] sm:$0xff]   ;;  %v3654_v38 = vld [vmem:[#allocation5 + $0x40] sm:$0xff]   ;;  %v3655_v39 = vld [vmem:[#allocation5 + $0x48] sm:$0xff]   ;;  %p4101_p9 = scmp.ne.s32.totalorder %s4857_s22, %s4100_s25  ;;  %s4197_s11 = smov [#allocation16]  }
  0xa9   : > { %v3656_v40 = vld [vmem:[#allocation5 + $0x50] sm:$0xff]   ;;  %v3657_v41 = vld [vmem:[#allocation5 + $0x58] sm:$0xff]   ;;  %v3658_v42 = vld [vmem:[#allocation5 + $0x60] sm:$0xff]   ;;  %s4104_s9 = sshll.u32 %s4197_s11, 4  ;;  %s4105_s9 = int_to_ptr.vmem [resolvable:$false] %s4104_s9 }
  0xaa   : > { %v3659_v43 = vld [vmem:[#allocation5 + $0x68] sm:$0xff]   ;;  %v3660_v44 = vld [vmem:[#allocation5 + $0x70] sm:$0xff]   ;;  %v3661_v45 = vld [vmem:[#allocation5 + $0x78] sm:$0xff]   ;;  %p4102_p12 = pnand %p4101_p9, %p4944_p10  ;;  %s4106_s23 = scalar_lea.vmem %s4105_s9, 1024 }
  0xab   : > { %441 = vadd.xlane.f32.xlu0 %v434_v6  ;;  %v4473_v47 = vld [vmem:[#allocation13] sm:$0xff]  ;;  %v4478_v52 = vld [vmem:[#allocation14 + $0x8] sm:$0xff]  ;;  %v4482_v54 = vld [vmem:[#allocation14 + $0x18] sm:$0xff]  ;;  %p4107_p1 = scmp.lt.s32.totalorder %s4857_s22, %s4105_s9  ;;  %p4108_p3 = scmp.lt.s32.totalorder %s4106_s23, %s4100_s25 }
  0xac   : > { %437 = vadd.xlane.f32.xlu1 %v432_v7  ;;  %v4475_v49 = vld [vmem:[#allocation14] sm:$0xff]  ;;  %v4480_v53 = vld [vmem:[#allocation13 + $0x8] sm:$0xff]  ;;  %v4484_v55 = vld [vmem:[#allocation14 + $0x10] sm:$0xff]  ;;  %p4103_p13 = pneg %p4102_p12 }
  0xad   : > { %v4486_v56 = vld [vmem:[#allocation13 + $0x18] sm:$0xff]  ;;  %v4489_v59 = vld [vmem:[#allocation13 + $0x10] sm:$0xff]  ;;  %p4109_p4 = por %p4108_p3, %p4107_p1 }
  0xaf   : > { %p4110_p8 = pnand %p4109_p4, %p4103_p13 }
 0x130   : > { %v440_v9 = vpop.xlane.xlu0 %439 }
 0x131   : > { %v436_v10 = vpop.xlane.xlu1 %435  ;;  %v446_v11 = vmul.f32 0.0078125, %v440_v9 }
 0x132   : > { %v444_v12 = vmul.f32 0.0078125, %v436_v10 }
 0x133   : > { %v450_v13 = vadd.f32 1e-08, %v446_v11 }
 0x134   : > { %v448_v14 = vadd.f32 1e-08, %v444_v12  ;;  %v442_v15 = vpop.xlane.xlu0 %441 }
 0x135   : > { %v438_v16 = vpop.xlane.xlu1 %437  ;;  %v447_v17 = vmul.f32 0.0078125, %v442_v15 }
 0x136   : > { %v445_v18 = vmul.f32 0.0078125, %v438_v16  ;;  %3806 = vrsqrt.f32 %v448_v14 }
 0x137   : > { %3808 = vrsqrt.f32 %v450_v13  ;;  %v451_v19 = vadd.f32 1e-08, %v447_v17 }
 0x138   : > { %v449_v20 = vadd.f32 1e-08, %v445_v18 }
 0x139   : > { %3810 = vrsqrt.f32 %v451_v19 }
 0x13a   : > { %3812 = vrsqrt.f32 %v449_v20 }
 0x143   : > { %v3807_v21 = vpop.eup %3806 }
 0x144   : > { %v3809_v22 = vpop.eup %3808  ;;  %v456_v24 = vmul.f32 %v3807_v21, %v427_v2 }
 0x145   : > { %v458_v26 = vmul.f32 %v3809_v22, %v429_v0 }
 0x146   : > { %v3811_v23 = vpop.eup %3810 }
 0x147   : > { %v3813_v25 = vpop.eup %3812  ;;  %v459_v27 = vmul.f32 %v3811_v23, %v430_v1 }
 0x148   : > { %v457_v28 = vmul.f32 %v3813_v25, %v428_v5 }
 0x149   : > { %v461_v29 = vpack.c.bf16 %v459_v27, %v458_v26 }
 0x14a   : > { %v460_v30 = vpack.c.bf16 %v457_v28, %v456_v24 }
 0x14b   : > { %3376 = vmatprep.subr.bf16.mxu0 %v461_v29 }
 0x14c   : > { %3377 = vmatpush3.bf16.xpose.msra.mxu0 %v461_v29 }
 0x14d   : > { %3378 = vmatprep.subr.bf16.mxu0 %v460_v30 }
 0x154   : > { %3379 = vmatpush3.bf16.xpose.msra.mxu0 %v460_v30 }
 0x15b   : > { %3381 = vmatmul.mubr.bf16.vlgmr.msra.gmra.mxu0 %v3647_v31 }
 0x15c   : > { %3384 = vmatprep.mubr.bf16.mxu0 %v3648_v32 }
 0x163   : > { %3385 = vmatmul.mubr.bf16.gmra.mxu0 %v3649_v33 }
 0x164   : > { %3388 = vmatprep.mubr.bf16.mxu0 %v3650_v34 }
 0x16b   : > { %3389 = vmatmul.mubr.bf16.gmra.mxu0 %v3651_v35 }
 0x16c   : > { %3392 = vmatprep.mubr.bf16.mxu0 %v3652_v36 }
 0x173   : > { %3393 = vmatmul.mubr.bf16.gmra.mxu0 %v3653_v37 }
 0x174   : > { %3396 = vmatprep.mubr.bf16.mxu0 %v3654_v38 }
 0x17b   : > { %3397 = vmatmul.mubr.bf16.gmra.mxu0 %v3655_v39 }
 0x17c   : > { %3400 = vmatprep.mubr.bf16.mxu0 %v3656_v40 }
 0x183   : > { %3401 = vmatmul.mubr.bf16.gmra.mxu0 %v3657_v41 }
 0x184   : > { %3404 = vmatprep.mubr.bf16.mxu0 %v3658_v42 }
 0x18b   : > { %3405 = vmatmul.mubr.bf16.gmra.mxu0 %v3659_v43 }
 0x18c   : > { %3408 = vmatprep.mubr.bf16.mxu0 %v3660_v44 }
 0x193   : > { %3409 = vmatmul.mubr.bf16.gmra.mxu0 %v3661_v45 }
 0x21b   : > { %v3382_v46 = vpop.f32.mrf.mxu0 }
 0x21c   : > { %v903_v57 = vmul.f32 %v3382_v46, %v4475_v49  ;;  %v889_v4 = vmul.f32 %v3382_v46, %v4489_v59 }
 0x21d   : > { %v688_v48 = vpop.f32.mrf.mxu0 }
 0x21e   : > { %v887_v50 = vmul.f32 %v4473_v47, %v688_v48  ;;  %v905_v63 = vmul.f32 %v4484_v55, %v688_v48 }
 0x21f   : > { %v3383_v51 = vpop.f32.mrf.mxu0 }
 0x220   : > { %v904_v60 = vmul.f32 %v3383_v51, %v4478_v52  ;;  %v919_v0 = vadd.f32 %v903_v57, %v887_v50  ;;  %v890_v1 = vmul.f32 %v3383_v51, %v4486_v56  ;;  %v921_v10 = vadd.f32 %v905_v63, %v889_v4 }
 0x221   : > { %v691_v58 = vpop.f32.mrf.mxu0 }
 0x222   : > { %v888_v61 = vmul.f32 %v4480_v53, %v691_v58  ;;  %v906_v62 = vmul.f32 %v4482_v54, %v691_v58  ;;  %v935_v12 = vmul.f32 0.17677669, %v919_v0  ;;  %v937_v23 = vmul.f32 0.17677669, %v921_v10 }
 0x223   : > { %v3386_v2 = vpop.f32.mrf.mxu0 }
 0x224   : > { %v920_v3 = vadd.f32 %v904_v60, %v888_v61  ;;  %v922_v5 = vadd.f32 %v906_v62, %v890_v1  ;;  %v907_v6 = vmul.f32 %v3386_v2, %v4475_v49  ;;  %v893_v13 = vmul.f32 %v3386_v2, %v4489_v59 }
 0x225   : > { %v704_v7 = vpop.f32.mrf.mxu0 }
 0x226   : > { %v891_v8 = vmul.f32 %v4473_v47, %v704_v7  ;;  %v936_v9 = vmul.f32 0.17677669, %v920_v3  ;;  %v909_v14 = vmul.f32 %v4484_v55, %v704_v7  ;;  %v938_v16 = vmul.f32 0.17677669, %v922_v5 }
 0x227   : > { %v3387_v11 = vpop.f32.mrf.mxu0 }
 0x228   : > { %v908_v15 = vmul.f32 %v3387_v11, %v4478_v52  ;;  %v923_v17 = vadd.f32 %v907_v6, %v891_v8  ;;  %v894_v18 = vmul.f32 %v3387_v11, %v4486_v56  ;;  %v999_v20 = vpack.c.bf16 %v936_v9, %v935_v12 }
 0x229   : > { %v707_v19 = vpop.f32.mrf.mxu0  ;;  %v925_v25 = vadd.f32 %v909_v14, %v893_v13  ;;  %v1000_v30 = vpack.c.bf16 %v938_v16, %v937_v23 }
 0x22a   : > { %v892_v21 = vmul.f32 %v4480_v53, %v707_v19  ;;  %v910_v22 = vmul.f32 %v4482_v54, %v707_v19  ;;  %1007 = vxpose.xlu0.c.b16.start [1/2] (short) (narrow) %v999_v20, 32  ;;  %v939_v31 = vmul.f32 0.17677669, %v923_v17 }
 0x22b   : > { %v3390_v24 = vpop.f32.mrf.mxu0  ;;  %v941_v39 = vmul.f32 0.17677669, %v925_v25 }
 0x22c   : > { %v924_v26 = vadd.f32 %v908_v15, %v892_v21  ;;  %v926_v27 = vadd.f32 %v910_v22, %v894_v18  ;;  %v911_v28 = vmul.f32 %v3390_v24, %v4475_v49  ;;  %v897_v34 = vmul.f32 %v3390_v24, %v4489_v59 }
 0x22d   : > { %v720_v29 = vpop.f32.mrf.mxu0 }
 0x22e   : > { %v895_v32 = vmul.f32 %v4473_v47, %v720_v29  ;;  %v940_v33 = vmul.f32 0.17677669, %v924_v26  ;;  %v913_v35 = vmul.f32 %v4484_v55, %v720_v29  ;;  %1008 = vxpose.xlu0.c.b16.end [2/2] (short) (narrow) %v1000_v30, 32  ;;  %v942_v40 = vmul.f32 0.17677669, %v926_v27 }
 0x22f   : > { %v3391_v36 = vpop.f32.mrf.mxu0 }
 0x230   : > { %v898_v37 = vmul.f32 %v3391_v36, %v4486_v56  ;;  %v912_v38 = vmul.f32 %v3391_v36, %v4478_v52  ;;  %v927_v41 = vadd.f32 %v911_v28, %v895_v32  ;;  %v1001_v43 = vpack.c.bf16 %v940_v33, %v939_v31 }
 0x231   : > { %v723_v42 = vpop.f32.mrf.mxu0  ;;  %v929_v46 = vadd.f32 %v913_v35, %v897_v34  ;;  %v1002_v61 = vpack.c.bf16 %v942_v40, %v941_v39 }
 0x232   : > { %v896_v44 = vmul.f32 %v4480_v53, %v723_v42  ;;  %v914_v45 = vmul.f32 %v4482_v54, %v723_v42  ;;  %1023 = vxpose.xlu1.c.b16.start [1/2] (short) (narrow) %v1001_v43, 32  ;;  %v943_v62 = vmul.f32 0.17677669, %v927_v41 }
 0x233   : > { %v3394_v48 = vpop.f32.mrf.mxu0  ;;  %v945_v2 = vmul.f32 0.17677669, %v929_v46 }
 0x234   : > { %v928_v50 = vadd.f32 %v912_v38, %v896_v44  ;;  %v930_v51 = vadd.f32 %v914_v45, %v898_v37  ;;  %v915_v57 = vmul.f32 %v3394_v48, %v4475_v49  ;;  %v901_v58 = vmul.f32 %v3394_v48, %v4489_v59 }
 0x235   : > { %v736_v60 = vpop.f32.mrf.mxu0 }
 0x236   : > { %v899_v63 = vmul.f32 %v4473_v47, %v736_v60  ;;  %v917_v0 = vmul.f32 %v4484_v55, %v736_v60  ;;  %v944_v1 = vmul.f32 0.17677669, %v928_v50  ;;  %v946_v3 = vmul.f32 0.17677669, %v930_v51  ;;  %1024 = vxpose.xlu1.c.b16.end [2/2] (short) (narrow) %v1002_v61, 32 }
 0x237   : > { %v3395_v4 = vpop.f32.mrf.mxu0 }
 0x238   : > { %v931_v5 = vadd.f32 %v915_v57, %v899_v63  ;;  %v902_v6 = vmul.f32 %v3395_v4, %v4486_v56  ;;  %v916_v7 = vmul.f32 %v3395_v4, %v4478_v52  ;;  %v933_v8 = vadd.f32 %v917_v0, %v901_v58 }
 0x239   : > { %v739_v9 = vpop.f32.mrf.mxu0  ;;  %v1003_v10 = vpack.c.bf16 %v944_v1, %v943_v62  ;;  %v1004_v13 = vpack.c.bf16 %v946_v3, %v945_v2 }
 0x23a   : > { %v900_v11 = vmul.f32 %v4480_v53, %v739_v9  ;;  %v918_v12 = vmul.f32 %v4482_v54, %v739_v9  ;;  %v947_v17 = vmul.f32 0.17677669, %v931_v5  ;;  %v949_v18 = vmul.f32 0.17677669, %v933_v8 }
 0x23b   : > { %1039 = vxpose.xlu0.c.b16.start [1/2] (short) (narrow) %v1003_v10, 32  ;;  %v3398_v14 = vpop.f32.mrf.mxu0 }
 0x23c   : > { %v932_v15 = vadd.f32 %v916_v7, %v900_v11  ;;  %v934_v16 = vadd.f32 %v918_v12, %v902_v6  ;;  %v953_v19 = vmul.f32 %v3398_v14, %v4489_v59  ;;  %v967_v20 = vmul.f32 %v3398_v14, %v4475_v49 }
 0x23d   : > { %v752_v21 = vpop.f32.mrf.mxu0 }
 0x23e   : > { %v950_v22 = vmul.f32 0.17677669, %v934_v16  ;;  %v948_v23 = vmul.f32 0.17677669, %v932_v15  ;;  %v951_v24 = vmul.f32 %v4473_v47, %v752_v21  ;;  %v969_v25 = vmul.f32 %v4484_v55, %v752_v21 }
 0x23f   : > { %1040 = vxpose.xlu0.c.b16.end [2/2] (short) (narrow) %v1004_v13, 32  ;;  %v3399_v26 = vpop.f32.mrf.mxu0 }
 0x240   : > { %v1005_v27 = vpack.c.bf16 %v948_v23, %v947_v17  ;;  %v954_v28 = vmul.f32 %v3399_v26, %v4486_v56  ;;  %v1006_v29 = vpack.c.bf16 %v950_v22, %v949_v18  ;;  %v968_v30 = vmul.f32 %v3399_v26, %v4478_v52 }
 0x241   : > { %v755_v31 = vpop.f32.mrf.mxu0  ;;  %v983_v32 = vadd.f32 %v967_v20, %v951_v24  ;;  %v985_v35 = vadd.f32 %v969_v25, %v953_v19 }
 0x242   : > { %1055 = vxpose.xlu1.c.b16.start [1/2] (short) (narrow) %v1005_v27, 32  ;;  %v952_v33 = vmul.f32 %v4480_v53, %v755_v31  ;;  %v970_v34 = vmul.f32 %v4482_v54, %v755_v31 }
 0x243   : > { %v3402_v36 = vpop.f32.mrf.mxu0 }
 0x244   : > { %v984_v37 = vadd.f32 %v968_v30, %v952_v33  ;;  %v986_v38 = vadd.f32 %v970_v34, %v954_v28  ;;  %v971_v39 = vmul.f32 %v3402_v36, %v4475_v49  ;;  %v957_v40 = vmul.f32 %v3402_v36, %v4489_v59 }
 0x245   : > { %v768_v41 = vpop.f32.mrf.mxu0 }
 0x246   : > { %1056 = vxpose.xlu1.c.b16.end [2/2] (short) (narrow) %v1006_v29, 32  ;;  %v1072_v42 = vpack.c.bf16 %v986_v38, %v985_v35  ;;  %v1071_v43 = vpack.c.bf16 %v984_v37, %v983_v32  ;;  %v955_v44 = vmul.f32 %v4473_v47, %v768_v41  ;;  %v973_v45 = vmul.f32 %v4484_v55, %v768_v41  ;;  %v3662_v38 = vld [vmem:[#allocation5 + $0x80] sm:$0xff]  }
 0x247   : > { %v3403_v46 = vpop.f32.mrf.mxu0  ;;  %3412 = vmatprep.mubr.bf16.mxu0 %v3662_v38 }
 0x248   : > { %3428 = vmatprep.subr.bf16.mxu1 %v1072_v42  ;;  %v987_v48 = vadd.f32 %v971_v39, %v955_v44  ;;  %v958_v50 = vmul.f32 %v3403_v46, %v4486_v56  ;;  %v972_v51 = vmul.f32 %v3403_v46, %v4478_v52  ;;  %v989_v58 = vadd.f32 %v973_v45, %v957_v40  ;;  %v3663_v39 = vld [vmem:[#allocation5 + $0x88] sm:$0xff]  }
 0x249   : > { %3429 = vmatpush3.bf16.msra.mxu1 %v1072_v42  ;;  %v771_v57 = vpop.f32.mrf.mxu0  ;;  %3413 = vmatmul.mubr.bf16.gmra.mxu0 %v3663_v39  ;;  %v1308_v40 = vlaneseq }
 0x24a   : > { %3430 = vmatprep.subr.bf16.mxu1 %v1071_v43  ;;  %v956_v60 = vmul.f32 %v4480_v53, %v771_v57  ;;  %v974_v61 = vmul.f32 %v4482_v54, %v771_v57 }
 0x24b   : > { %v3406_v62 = vpop.f32.mrf.mxu0  ;;  %v4561_v41 = vshrl.u32 %v1308_v40, 7 }
 0x24c   : > { %v988_v63 = vadd.f32 %v972_v51, %v956_v60  ;;  %v990_v0 = vadd.f32 %v974_v61, %v958_v50  ;;  %v961_v1 = vmul.f32 %v3406_v62, %v4489_v59  ;;  %v975_v2 = vmul.f32 %v3406_v62, %v4475_v49 }
 0x24d   : > { %3431 = vmatpush3.bf16.msra.mxu1 %v1071_v43  ;;  %v784_v3 = vpop.f32.mrf.mxu0  ;;  %v1311_v42 = vadd.s32 16, %v4561_v41  ;;  %v4564_v43 = vand.u32 127, %v1308_v40  ;;  %v4568_v44 = vadd.s32 24, %v4561_v41  ;;  %v4573_v46 = vadd.s32 8, %v4561_v41 }
 0x24e   : > { %v959_v4 = vmul.f32 %v4473_v47, %v784_v3  ;;  %v977_v5 = vmul.f32 %v4484_v55, %v784_v3  ;;  %v1074_v6 = vpack.c.bf16 %v990_v0, %v989_v58  ;;  %v1073_v7 = vpack.c.bf16 %v988_v63, %v987_v48 }
 0x24f   : > { %v3407_v8 = vpop.f32.mrf.mxu0  ;;  %vm1317_vm1 = vcmp.ge.s32.totalorder %v1311_v42, %v4564_v43  ;;  %vm1315_vm2 = vcmp.ge.s32.totalorder %v4561_v41, %v4564_v43  ;;  %vm1318_vm3 = vcmp.ge.s32.totalorder %v4568_v44, %v4564_v43  ;;  %vm1316_vm4 = vcmp.ge.s32.totalorder %v4573_v46, %v4564_v43 }
 0x250   : > { %v991_v9 = vadd.f32 %v975_v2, %v959_v4  ;;  %v993_v10 = vadd.f32 %v977_v5, %v961_v1  ;;  %v962_v11 = vmul.f32 %v3407_v8, %v4486_v56  ;;  %v976_v12 = vmul.f32 %v3407_v8, %v4478_v52  ;;  %3436 = vmatprep.subr.bf16.mxu1 %v1074_v6 }
 0x251   : > { %v787_v13 = vpop.f32.mrf.mxu0 }
 0x252   : > { %v960_v14 = vmul.f32 %v4480_v53, %v787_v13  ;;  %v978_v15 = vmul.f32 %v4482_v54, %v787_v13  ;;  %v3664_v13 = vld [vmem:[#allocation5 + $0x90] sm:$0xff]  }
 0x253   : > { %v3410_v16 = vpop.f32.mrf.mxu0  ;;  %3416 = vmatprep.mubr.bf16.mxu0 %v3664_v13 }
 0x254   : > { %v992_v17 = vadd.f32 %v976_v12, %v960_v14  ;;  %v994_v18 = vadd.f32 %v978_v15, %v962_v11  ;;  %v965_v19 = vmul.f32 %v3410_v16, %v4489_v59  ;;  %v979_v20 = vmul.f32 %v3410_v16, %v4475_v49  ;;  %v3665_v16 = vld [vmem:[#allocation5 + $0x98] sm:$0xff]  }
 0x255   : > { %v800_v21 = vpop.f32.mrf.mxu0  ;;  %3417 = vmatmul.mubr.bf16.gmra.mxu0 %v3665_v16 }
 0x256   : > { %v963_v22 = vmul.f32 %v4473_v47, %v800_v21  ;;  %v981_v23 = vmul.f32 %v4484_v55, %v800_v21  ;;  %v1076_v24 = vpack.c.bf16 %v994_v18, %v993_v10  ;;  %v1075_v25 = vpack.c.bf16 %v992_v17, %v991_v9 }
 0x257   : > { %v3411_v26 = vpop.f32.mrf.mxu0 }
 0x258   : > { %v995_v27 = vadd.f32 %v979_v20, %v963_v22  ;;  %v997_v28 = vadd.f32 %v981_v23, %v965_v19  ;;  %v966_v29 = vmul.f32 %v3411_v26, %v4486_v56  ;;  %v980_v30 = vmul.f32 %v3411_v26, %v4478_v52 }
 0x259   : > { %v803_v31 = vpop.f32.mrf.mxu0 }
 0x25a   : > { %v964_v32 = vmul.f32 %v4480_v53, %v803_v31  ;;  %v982_v59 = vmul.f32 %v4482_v54, %v803_v31 }
 0x25c   : > { %v996_v49 = vadd.f32 %v980_v30, %v964_v32  ;;  %v998_v33 = vadd.f32 %v982_v59, %v966_v29 }
 0x25e   : > { %v1078_v34 = vpack.c.bf16 %v998_v33, %v997_v28  ;;  %v1077_v47 = vpack.c.bf16 %v996_v49, %v995_v27 }
 0x28c   : > { %v1015_v55 = vpop.trf.xlu0 }
 0x28d   : > { %3432 = vmatprep.mubr.msk.bf16.mxu1 %vm1087_vm0, %v1015_v55 }
 0x290   : > { %v1016_v35 = vpop.trf.xlu0 }
 0x291   : > { %3433 = vmatmul.mubr.msk.bf16.vlgmr.msra.gmra.mxu1 %vm1087_vm0, %v1016_v35  ;;  %v3666_v35 = vld [vmem:[#allocation5 + $0xa0] sm:$0xff]  }
 0x292   : > { %3437 = vmatpush3.bf16.msra.mxu1 %v1074_v6  ;;  %3420 = vmatprep.mubr.bf16.mxu0 %v3666_v35 }
 0x293   : > { %3438 = vmatprep.subr.bf16.mxu1 %v1073_v7 }
 0x294   : > { %v1031_v56 = vpop.trf.xlu1 }
 0x295   : > { %3440 = vmatprep.mubr.msk.bf16.mxu1 %vm1087_vm0, %v1031_v56 }
 0x296   : > { %3439 = vmatpush3.bf16.msra.mxu1 %v1073_v7 }
 0x297   : > { %3444 = vmatprep.subr.bf16.mxu1 %v1076_v24 }
 0x298   : > { %v1032_v52 = vpop.trf.xlu1 }
 0x299   : > { %3441 = vmatmul.mubr.msk.bf16.vlgmr.msra.gmra.mxu1 %vm1087_vm0, %v1032_v52  ;;  %v3667_v52 = vld [vmem:[#allocation5 + $0xa8] sm:$0xff]  }
 0x29a   : > { %3445 = vmatpush3.bf16.msra.mxu1 %v1076_v24  ;;  %3421 = vmatmul.mubr.bf16.gmra.mxu0 %v3667_v52 }
 0x29b   : > { %3446 = vmatprep.subr.bf16.mxu1 %v1075_v25 }
 0x29d   : > { %v1047_v53 = vpop.trf.xlu0 }
 0x29e   : > { %3448 = vmatprep.mubr.msk.bf16.mxu1 %vm1087_vm0, %v1047_v53  ;;  %3447 = vmatpush3.bf16.msra.mxu1 %v1075_v25  ;;  %v3668_v53 = vld [vmem:[#allocation5 + $0xb0] sm:$0xff]  }
 0x29f   : > { %3452 = vmatprep.subr.bf16.mxu1 %v1078_v34  ;;  %3424 = vmatprep.mubr.bf16.mxu0 %v3668_v53 }
 0x2a1   : > { %v1048_v54 = vpop.trf.xlu0 }
 0x2a2   : > { %3449 = vmatmul.mubr.msk.bf16.vlgmr.msra.gmra.mxu1 %vm1087_vm0, %v1048_v54  ;;  %v3669_v54 = vld [vmem:[#allocation5 + $0xb8] sm:$0xff]  }
 0x2a3   : > { %3453 = vmatpush3.bf16.msra.mxu1 %v1078_v34  ;;  %3425 = vmatmul.mubr.bf16.gmra.mxu0 %v3669_v54 }
 0x2a4   : > { %v1063_v36 = vpop.trf.xlu1  ;;  %3454 = vmatprep.subr.bf16.mxu1 %v1077_v47 }
 0x2a5   : > { %3456 = vmatprep.mubr.msk.bf16.mxu1 %vm1087_vm0, %v1063_v36 }
 0x2a7   : > { %3455 = vmatpush3.bf16.msra.mxu1 %v1077_v47 }
 0x2a8   : > { %v1064_v37 = vpop.trf.xlu1 }
 0x2aa   : > { %3457 = vmatmul.mubr.msk.bf16.vlgmr.msra.gmra.mxu1 %vm1087_vm0, %v1064_v37 }
 0x351   : > { %v3434_v45 = vpop.f32.mrf.mxu1 }
 0x352   : > { %v4577_v48 = vsel %vm1317_vm1, %v3434_v45, -1e+30 }
 0x353   : > { %v1128_v50 = vpop.f32.mrf.mxu1  ;;  %v1349_v51 = vsel %vm1087_vm0, %v4577_v48, -inf }
 0x354   : > { %v4586_v57 = vsel %vm1315_vm2, %v1128_v50, -1e+30  ;;  %1350 = vmax.xlane.f32.xlu0 %v1349_v51 }
 0x355   : > { %v3435_v58 = vpop.f32.mrf.mxu1  ;;  %v1343_v62 = vsel %vm1087_vm0, %v4586_v57, -inf }
 0x356   : > { %v4593_v60 = vsel %vm1318_vm3, %v3435_v58, -1e+30 }
 0x357   : > { %v1131_v61 = vpop.f32.mrf.mxu1  ;;  %v1352_v63 = vsel %vm1087_vm0, %v4593_v60, -inf }
 0x358   : > { %v4602_v0 = vsel %vm1316_vm4, %v1131_v61, -1e+30  ;;  %1344 = vmax.xlane.f32.xlu0 %v1343_v62  ;;  %1353 = vmax.xlane.f32.xlu1 %v1352_v63 }
 0x359   : > { %v3442_v1 = vpop.f32.mrf.mxu1  ;;  %v1346_v4 = vsel %vm1087_vm0, %v4602_v0, -inf }
 0x35a   : > { %v4606_v2 = vsel %vm1317_vm1, %v3442_v1, -1e+30 }
 0x35b   : > { %v1183_v3 = vpop.f32.mrf.mxu1  ;;  %v1361_v5 = vsel %vm1087_vm0, %v4606_v2, -inf }
 0x35c   : > { %v4615_v6 = vsel %vm1315_vm2, %v1183_v3, -1e+30  ;;  %1347 = vmax.xlane.f32.xlu1 %v1346_v4  ;;  %1362 = vmax.xlane.f32.xlu0 %v1361_v5 }
 0x35d   : > { %v3443_v7 = vpop.f32.mrf.mxu1  ;;  %v1355_v8 = vsel %vm1087_vm0, %v4615_v6, -inf }
 0x35e   : > { %v4622_v9 = vsel %vm1318_vm3, %v3443_v7, -1e+30 }
 0x35f   : > { %v1186_v10 = vpop.f32.mrf.mxu1  ;;  %v1364_v11 = vsel %vm1087_vm0, %v4622_v9, -inf }
 0x360   : > { %v4629_v12 = vsel %vm1316_vm4, %v1186_v10, -1e+30  ;;  %1356 = vmax.xlane.f32.xlu0 %v1355_v8  ;;  %1365 = vmax.xlane.f32.xlu1 %v1364_v11 }
 0x361   : > { %v1358_v15 = vsel %vm1087_vm0, %v4629_v12, -inf }
 0x362   : > { %v3450_v14 = vpop.f32.mrf.mxu1 }
 0x363   : > { %v4635_v17 = vsel %vm1317_vm1, %v3450_v14, -1e+30 }
 0x364   : > { %v1238_v18 = vpop.f32.mrf.mxu1  ;;  %v1373_v19 = vsel %vm1087_vm0, %v4635_v17, -inf  ;;  %1359 = vmax.xlane.f32.xlu1 %v1358_v15 }
 0x365   : > { %v4642_v20 = vsel %vm1315_vm2, %v1238_v18, -1e+30  ;;  %1374 = vmax.xlane.f32.xlu0 %v1373_v19 }
 0x366   : > { %v3451_v21 = vpop.f32.mrf.mxu1  ;;  %v1367_v22 = vsel %vm1087_vm0, %v4642_v20, -inf }
 0x367   : > { %v4649_v23 = vsel %vm1318_vm3, %v3451_v21, -1e+30 }
 0x368   : > { %v1241_v24 = vpop.f32.mrf.mxu1  ;;  %v1376_v25 = vsel %vm1087_vm0, %v4649_v23, -inf }
 0x369   : > { %v4656_v26 = vsel %vm1316_vm4, %v1241_v24, -1e+30  ;;  %1368 = vmax.xlane.f32.xlu0 %v1367_v22  ;;  %1377 = vmax.xlane.f32.xlu1 %v1376_v25 }
 0x36a   : > { %v3458_v27 = vpop.f32.mrf.mxu1  ;;  %v1370_v28 = vsel %vm1087_vm0, %v4656_v26, -inf }
 0x36b   : > { %v4662_v29 = vsel %vm1317_vm1, %v3458_v27, -1e+30 }
 0x36c   : > { %v1293_v30 = vpop.f32.mrf.mxu1  ;;  %v1385_v31 = vsel %vm1087_vm0, %v4662_v29, -inf }
 0x36d   : > { %v4669_v32 = vsel %vm1315_vm2, %v1293_v30, -1e+30  ;;  %1371 = vmax.xlane.f32.xlu1 %v1370_v28  ;;  %1386 = vmax.xlane.f32.xlu0 %v1385_v31 }
 0x36e   : > { %v3459_v59 = vpop.f32.mrf.mxu1  ;;  %v1379_v49 = vsel %vm1087_vm0, %v4669_v32, -inf }
 0x36f   : > { %v4676_v33 = vsel %vm1318_vm3, %v3459_v59, -1e+30 }
 0x370   : > { %v1388_v34 = vsel %vm1087_vm0, %v4676_v33, -inf  ;;  %v1296_v47 = vpop.f32.mrf.mxu1 }
 0x371   : > { %1380 = vmax.xlane.f32.xlu0 %v1379_v49  ;;  %1389 = vmax.xlane.f32.xlu1 %v1388_v34  ;;  %v4683_v55 = vsel %vm1316_vm4, %v1296_v47, -1e+30 }
 0x372   : > { %v1382_v56 = vsel %vm1087_vm0, %v4683_v55, -inf }
 0x375   : > { %1383 = vmax.xlane.f32.xlu1 %v1382_v56 }
 0x3dd   : > { %v1351_v36 = vpop.xlane.xlu0 %1350 }
 0x3de   : > { %v1393_v37 = vsub.f32 %v4577_v48, %v1351_v36 }
 0x3e0   : > { %v1411_v38 = vmul.f32 1.442695, %v1393_v37 }
 0x3e1   : > { %v1345_v39 = vpop.xlane.xlu0 %1344  ;;  %v1354_v40 = vpop.xlane.xlu1 %1353 }
 0x3e2   : > { %3814 = vpow2.f32 %v1411_v38  ;;  %v1391_v41 = vsub.f32 %v4586_v57, %v1345_v39  ;;  %v1394_v42 = vsub.f32 %v4593_v60, %v1354_v40 }
 0x3e4   : > { %v1407_v43 = vmul.f32 1.442695, %v1391_v41  ;;  %v1413_v44 = vmul.f32 1.442695, %v1394_v42 }
 0x3e5   : > { %v1348_v45 = vpop.xlane.xlu1 %1347  ;;  %v1363_v46 = vpop.xlane.xlu0 %1362 }
 0x3e6   : > { %3816 = vpow2.f32 %v1407_v43  ;;  %v1392_v50 = vsub.f32 %v4602_v0, %v1348_v45  ;;  %v1397_v51 = vsub.f32 %v4606_v2, %v1363_v46 }
 0x3e7   : > { %3818 = vpow2.f32 %v1413_v44 }
 0x3e8   : > { %v1409_v58 = vmul.f32 1.442695, %v1392_v50  ;;  %v1419_v48 = vmul.f32 1.442695, %v1397_v51 }
 0x3e9   : > { %v1357_v61 = vpop.xlane.xlu0 %1356  ;;  %v1366_v62 = vpop.xlane.xlu1 %1365 }
 0x3ea   : > { %3820 = vpow2.f32 %v1409_v58  ;;  %v1395_v63 = vsub.f32 %v4615_v6, %v1357_v61  ;;  %v1398_v57 = vsub.f32 %v4622_v9, %v1366_v62  ;;  %v4767_v62 = vpop.f32.mrf.mxu0 }
 0x3eb   : > { %3822 = vpow2.f32 %v1419_v48 }
 0x3ec   : > { %v1415_v60 = vmul.f32 1.442695, %v1395_v63  ;;  %v1421_v1 = vmul.f32 1.442695, %v1398_v57  ;;  %v816_v63 = vpop.f32.mrf.mxu0 }
 0x3ed   : > { %v1360_v3 = vpop.xlane.xlu1 %1359 }
 0x3ee   : > { %v1375_v4 = vpop.xlane.xlu0 %1374  ;;  %3824 = vpow2.f32 %v1415_v60  ;;  %v1396_v0 = vsub.f32 %v4629_v12, %v1360_v3  ;;  %v3415_v57 = vpop.f32.mrf.mxu0 }
 0x3ef   : > { %v1401_v2 = vsub.f32 %v4635_v17, %v1375_v4  ;;  %v4696_v5 = vpop.eup %3814  ;;  %3826 = vpow2.f32 %v1421_v1  ;;  %v1080_v60 = vpack.c.bf16 %v3415_v57, %v4767_v62 }
 0x3f0   : > { %v1417_v7 = vmul.f32 1.442695, %v1396_v0  ;;  %v1445_v6 = vsel %vm1087_vm0, %v4696_v5, 0.0  ;;  %v819_v1 = vpop.f32.mrf.mxu0 }
 0x3f1   : > { %v1427_v8 = vmul.f32 1.442695, %v1401_v2  ;;  %1446 = vadd.xlane.f32.xlu0 %v1445_v6  ;;  %v1079_v3 = vpack.c.bf16 %v819_v1, %v816_v63 }
 0x3f2   : > { %v1369_v10 = vpop.xlane.xlu0 %1368  ;;  %v1378_v9 = vpop.xlane.xlu1 %1377  ;;  %3828 = vpow2.f32 %v1417_v7 }
 0x3f3   : > { %v1399_v11 = vsub.f32 %v4642_v20, %v1369_v10  ;;  %v1402_v13 = vsub.f32 %v4649_v23, %v1378_v9  ;;  %v4702_v14 = vpop.eup %3816  ;;  %3830 = vpow2.f32 %v1427_v8  ;;  %3464 = vmatprep.mubr.msk.bf16.mxu1 %vm1087_vm0, %v1079_v3 }
 0x3f4   : > { %v4704_v12 = vpop.eup %3818  ;;  %v1439_v17 = vsel %vm1087_vm0, %v4702_v14, 0.0 }
 0x3f5   : > { %v1423_v15 = vmul.f32 1.442695, %v1399_v11  ;;  %v1429_v16 = vmul.f32 1.442695, %v1402_v13  ;;  %1440 = vadd.xlane.f32.xlu0 %v1439_v17  ;;  %v1448_v21 = vsel %vm1087_vm0, %v4704_v12, 0.0 }
 0x3f6   : > { %v1372_v18 = vpop.xlane.xlu1 %1371  ;;  %v1387_v19 = vpop.xlane.xlu0 %1386  ;;  %1449 = vadd.xlane.f32.xlu1 %v1448_v21 }
 0x3f7   : > { %3832 = vpow2.f32 %v1423_v15  ;;  %v1400_v20 = vsub.f32 %v4656_v26, %v1372_v18  ;;  %v1405_v22 = vsub.f32 %v4662_v29, %v1387_v19  ;;  %v4712_v23 = vpop.eup %3820  ;;  %v4773_v19 = vpop.f32.mrf.mxu0 }
 0x3f8   : > { %3834 = vpow2.f32 %v1429_v16  ;;  %v4714_v24 = vpop.eup %3822  ;;  %v1442_v28 = vsel %vm1087_vm0, %v4712_v23, 0.0 }
 0x3f9   : > { %v1425_v25 = vmul.f32 1.442695, %v1400_v20  ;;  %v1435_v27 = vmul.f32 1.442695, %v1405_v22  ;;  %v1457_v30 = vsel %vm1087_vm0, %v4714_v24, 0.0 }
 0x3fa   : > { %v1381_v31 = vpop.xlane.xlu0 %1380  ;;  %v1390_v59 = vpop.xlane.xlu1 %1389  ;;  %1458 = vadd.xlane.f32.xlu0 %v1457_v30  ;;  %1443 = vadd.xlane.f32.xlu1 %v1442_v28 }
 0x3fb   : > { %3836 = vpow2.f32 %v1425_v25  ;;  %v1403_v26 = vsub.f32 %v4669_v32, %v1381_v31  ;;  %v1406_v29 = vsub.f32 %v4676_v33, %v1390_v59  ;;  %v4722_v49 = vpop.eup %3824  ;;  %v832_v28 = vpop.f32.mrf.mxu0 }
 0x3fc   : > { %3838 = vpow2.f32 %v1435_v27  ;;  %v4724_v34 = vpop.eup %3826  ;;  %v1451_v56 = vsel %vm1087_vm0, %v4722_v49, 0.0 }
 0x3fd   : > { %v1431_v47 = vmul.f32 1.442695, %v1403_v26  ;;  %v1437_v35 = vmul.f32 1.442695, %v1406_v29  ;;  %v1460_v52 = vsel %vm1087_vm0, %v4724_v34, 0.0  ;;  %v3419_v29 = vpop.f32.mrf.mxu0 }
 0x3fe   : > { %v1384_v53 = vpop.xlane.xlu1 %1383  ;;  %1452 = vadd.xlane.f32.xlu0 %v1451_v56  ;;  %1461 = vadd.xlane.f32.xlu1 %v1460_v52 }
 0x3ff   : > { %3840 = vpow2.f32 %v1431_v47  ;;  %v1404_v32 = vsub.f32 %v4683_v55, %v1384_v53  ;;  %v4731_v33 = vpop.eup %3828 }
 0x400   : > { %3842 = vpow2.f32 %v1437_v35  ;;  %v4733_v54 = vpop.eup %3830  ;;  %v1454_v37 = vsel %vm1087_vm0, %v4731_v33, 0.0 }
 0x401   : > { %v1433_v36 = vmul.f32 1.442695, %v1404_v32  ;;  %v1469_v38 = vsel %vm1087_vm0, %v4733_v54, 0.0 }
 0x402   : > { %1470 = vadd.xlane.f32.xlu0 %v1469_v38  ;;  %1455 = vadd.xlane.f32.xlu1 %v1454_v37 }
 0x403   : > { %3844 = vpow2.f32 %v1433_v36 }
 0x404   : > { %v4739_v39 = vpop.eup %3832 }
 0x405   : > { %v4741_v40 = vpop.eup %3834  ;;  %v1463_v55 = vsel %vm1087_vm0, %v4739_v39, 0.0 }
 0x406   : > { %v1472_v41 = vsel %vm1087_vm0, %v4741_v40, 0.0  ;;  %1464 = vadd.xlane.f32.xlu0 %v1463_v55 }
 0x407   : > { %1473 = vadd.xlane.f32.xlu1 %v1472_v41 }
 0x408   : > { %v4747_v42 = vpop.eup %3836 }
 0x409   : > { %v4749_v43 = vpop.eup %3838  ;;  %v1466_v44 = vsel %vm1087_vm0, %v4747_v42, 0.0 }
 0x40a   : > { %v1481_v45 = vsel %vm1087_vm0, %v4749_v43, 0.0 }
 0x40b   : > { %1482 = vadd.xlane.f32.xlu0 %v1481_v45  ;;  %1467 = vadd.xlane.f32.xlu1 %v1466_v44 }
 0x40c   : > { %v4755_v46 = vpop.eup %3840 }
 0x40d   : > { %v4757_v50 = vpop.eup %3842  ;;  %v1475_v51 = vsel %vm1087_vm0, %v4755_v46, 0.0 }
 0x40e   : > { %v1484_v58 = vsel %vm1087_vm0, %v4757_v50, 0.0 }
 0x40f   : > { %1476 = vadd.xlane.f32.xlu0 %v1475_v51  ;;  %1485 = vadd.xlane.f32.xlu1 %v1484_v58 }
 0x410   : > { %v4763_v48 = vpop.eup %3844 }
 0x411   : > { %v1478_v61 = vsel %vm1087_vm0, %v4763_v48, 0.0 }
 0x413   : > { %1479 = vadd.xlane.f32.xlu1 %v1478_v61 }
 0x47a   : > { %v1447_v4 = vpop.xlane.xlu0 %1446 }
 0x47b   : > { %3846 = vrcp.f32 %v1447_v4 }
 0x47e   : > { %v1441_v0 = vpop.xlane.xlu0 %1440 }
 0x47f   : > { %v1450_v2 = vpop.xlane.xlu1 %1449 }
 0x480   : > { %3848 = vrcp.f32 %v1450_v2 }
 0x481   : > { %3850 = vrcp.f32 %v1441_v0 }
 0x483   : > { %v1444_v7 = vpop.xlane.xlu1 %1443  ;;  %v1459_v8 = vpop.xlane.xlu0 %1458 }
 0x484   : > { %3852 = vrcp.f32 %v1444_v7 }
 0x485   : > { %3854 = vrcp.f32 %v1459_v8 }
 0x487   : > { %v1462_v6 = vpop.xlane.xlu1 %1461  ;;  %v1453_v13 = vpop.xlane.xlu0 %1452 }
 0x488   : > { %3856 = vrcp.f32 %v1462_v6  ;;  %v3847_v10 = vpop.eup %3846 }
 0x489   : > { %v1505_v15 = vmul.f32 %v3847_v10, %v4696_v5 }
 0x48b   : > { %v1456_v9 = vpop.xlane.xlu1 %1455  ;;  %v1471_v30 = vpop.xlane.xlu0 %1470 }
 0x48c   : > { %3858 = vrcp.f32 %v1456_v9 }
 0x48d   : > { %v3849_v11 = vpop.eup %3848  ;;  %3860 = vrcp.f32 %v1453_v13 }
 0x48e   : > { %v1506_v16 = vmul.f32 %v3849_v11, %v4704_v12  ;;  %v3851_v17 = vpop.eup %3850 }
 0x48f   : > { %v1503_v25 = vmul.f32 %v3851_v17, %v4702_v14  ;;  %v1465_v53 = vpop.xlane.xlu0 %1464 }
 0x490   : > { %v1520_v18 = vpack.c.bf16 %v1506_v16, %v1505_v15  ;;  %v1474_v22 = vpop.xlane.xlu1 %1473 }
 0x491   : > { %v3853_v21 = vpop.eup %3852  ;;  %3862 = vrcp.f32 %v1474_v22 }
 0x492   : > { %3512 = vmatprep.subr.msk.bf16.mxu1 %vm1087_vm0, %v1520_v18  ;;  %v1537_v20 = vsel %vm1087_vm0, %v1520_v18, 0  ;;  %v1504_v27 = vmul.f32 %v3853_v21, %v4712_v23  ;;  %v3855_v5 = vpop.eup %3854  ;;  %3864 = vrcp.f32 %v1471_v30  ;;  %v835_v23 = vpop.f32.mrf.mxu0  ;;  %v3674_v30 = vld [vmem:[#allocation7 + $0x18] sm:$0xff]  }
 0x493   : > { %3461 = vmatpush3.bf16.xpose.msra.mxu1 %v1537_v20  ;;  %v1509_v26 = vmul.f32 %v3855_v5, %v4714_v24  ;;  %v1081_v36 = vpack.c.bf16 %v835_v23, %v832_v28  ;;  %v3672_v28 = vld [vmem:[#allocation7 + $0x28] sm:$0xff]   ;;  %v3673_v5 = vld [vmem:[#allocation7 + $0x20] sm:$0xff]  }
 0x494   : > { %v1519_v12 = vpack.c.bf16 %v1504_v27, %v1503_v25  ;;  %v1468_v56 = vpop.xlane.xlu1 %1467  ;;  %v3422_v24 = vpop.f32.mrf.mxu0 }
 0x495   : > { %v3857_v31 = vpop.eup %3856  ;;  %3866 = vrcp.f32 %v1468_v56 }
 0x496   : > { %3513 = vmatprep.subr.msk.bf16.mxu1 %vm1087_vm0, %v1519_v12  ;;  %v1510_v59 = vmul.f32 %v3857_v31, %v4724_v34  ;;  %v1534_v47 = vsel %vm1087_vm0, %v1519_v12, 0  ;;  %3868 = vrcp.f32 %v1465_v53  ;;  %v848_v44 = vpop.f32.mrf.mxu0  ;;  %v3675_v12 = vld [vmem:[#allocation7 + $0x10] sm:$0xff]   ;;  %v3676_v31 = vld [vmem:[#allocation7 + $0x8] sm:$0xff]  }
 0x498   : > { %v1522_v35 = vpack.c.bf16 %v1510_v59, %v1509_v26  ;;  %v1486_v41 = vpop.xlane.xlu1 %1485  ;;  %v3423_v58 = vpop.f32.mrf.mxu0  ;;  %v3677_v59 = vld [vmem:[#allocation7] sm:$0xff]  }
 0x499   : > { %v3859_v14 = vpop.eup %3858  ;;  %3870 = vrcp.f32 %v1486_v41  ;;  %v1084_v20 = vpack.c.bf16 %v3423_v58, %v3422_v24 }
 0x49a   : > { %v3861_v52 = vpop.eup %3860  ;;  %v1508_v32 = vmul.f32 %v3859_v14, %v4731_v33  ;;  %v1598_v37 = vsel %vm1087_vm0, %v1522_v35, 0  ;;  %v1483_v33 = vpop.xlane.xlu0 %1482 }
 0x49b   : > { %3463 = vmatpush3.bf16.xpose.msra.mxu1 %v1534_v47  ;;  %v1507_v34 = vmul.f32 %v3861_v52, %v4722_v49  ;;  %3872 = vrcp.f32 %v1483_v33 }
 0x49c   : > { %3514 = vmatprep.subr.msk.bf16.mxu1 %vm1087_vm0, %v1522_v35  ;;  %v1480_v57 = vpop.xlane.xlu1 %1479 }
 0x49d   : > { %v1521_v38 = vpack.c.bf16 %v1508_v32, %v1507_v34  ;;  %3874 = vrcp.f32 %v1480_v57  ;;  %v3678_v57 = vld [vmem:[#allocation8 + $0xe0] ss:$16 sps:$4 sm:$0xff]  }
 0x49e   : > { %v3863_v55 = vpop.eup %3862  ;;  %v1477_v3 = vpop.xlane.xlu0 %1476 }
 0x49f   : > { %v3865_v45 = vpop.eup %3864  ;;  %v1514_v51 = vmul.f32 %v3863_v55, %v4741_v40  ;;  %v1595_v61 = vsel %vm1087_vm0, %v1521_v38, 0  ;;  %3876 = vrcp.f32 %v1477_v3  ;;  %v1082_v40 = vpack.c.bf16 %v3419_v29, %v4773_v19  ;;  %v3683_v3 = vld [vmem:[#allocation8 + $0xec] ss:$16 sps:$4 sm:$0xff]  }
 0x4a0   : > { %v1513_v49 = vmul.f32 %v3865_v45, %v4733_v54 }
 0x4a2   : > { %3465 = vmatmul.mubr.msk.bf16.vlgmr.msra.gmra.mxu1 %vm1087_vm0, %v1080_v60  ;;  %v1524_v62 = vpack.c.bf16 %v1514_v51, %v1513_v49  ;;  %v3867_v63 = vpop.eup %3866  ;;  %v851_v60 = vpop.f32.mrf.mxu0 }
 0x4a3   : > { %3469 = vmatpush3.bf16.xpose.msra.mxu1 %v1598_v37  ;;  %3472 = vmatprep.mubr.msk.bf16.mxu1 %vm1087_vm0, %v1081_v36  ;;  %v3869_v1 = vpop.eup %3868  ;;  %v1512_v4 = vmul.f32 %v3867_v63, %v4747_v42  ;;  %v1083_v0 = vpack.c.bf16 %v851_v60, %v848_v44  ;;  %v3680_v60 = vld [vmem:[#allocation8 + $0xe4] ss:$16 sps:$4 sm:$0xff]  }
 0x4a4   : > { %3515 = vmatprep.subr.msk.bf16.mxu1 %vm1087_vm0, %v1521_v38  ;;  %v1511_v54 = vmul.f32 %v3869_v1, %v4739_v39  ;;  %v3426_v2 = vpop.f32.mrf.mxu0  ;;  %v1659_v7 = vsel %vm1087_vm0, %v1524_v62, 0  ;;  %v3681_v1 = vld [vmem:[#allocation8 + $0xe8] ss:$16 sps:$4 sm:$0xff]  }
 0x4a6   : > { %v1523_v8 = vpack.c.bf16 %v1512_v4, %v1511_v54  ;;  %v3871_v6 = vpop.eup %3870  ;;  %v864_v10 = vpop.f32.mrf.mxu0  ;;  %v3686_v4 = vld [vmem:[#allocation8 + $0xc4] ss:$16 sps:$4 sm:$0xff]   ;;  %v3687_v54 = vld [vmem:[#allocation8 + $0xc8] ss:$16 sps:$4 sm:$0xff]  }
 0x4a7   : > { %v1518_v9 = vmul.f32 %v3871_v6, %v4757_v50 }
 0x4a8   : > { %v3873_v42 = vpop.eup %3872  ;;  %v3427_v13 = vpop.f32.mrf.mxu0  ;;  %v1656_v39 = vsel %vm1087_vm0, %v1523_v8, 0 }
 0x4a9   : > { %v1517_v11 = vmul.f32 %v3873_v42, %v4749_v43  ;;  %v1086_v27 = vpack.c.bf16 %v3427_v13, %v3426_v2 }
 0x4aa   : > { %v3875_v16 = vpop.eup %3874  ;;  %v867_v17 = vpop.f32.mrf.mxu0 }
 0x4ab   : > { %3471 = vmatpush3.bf16.xpose.msra.mxu1 %v1595_v61  ;;  %v1526_v15 = vpack.c.bf16 %v1518_v9, %v1517_v11  ;;  %v1516_v19 = vmul.f32 %v3875_v16, %v4763_v48  ;;  %v1085_v21 = vpack.c.bf16 %v867_v17, %v864_v10  ;;  %v3670_v48 = vld [vmem:[#allocation7 + $0x38] sm:$0xff]   ;;  %v3887_v11 = vld [vmem:[%s4447_s15 + $0x8] sm:$0xff] }
 0x4ac   : > { %3516 = vmatprep.subr.msk.bf16.mxu1 %vm1087_vm0, %v1524_v62  ;;  %v3877_v18 = vpop.eup %3876  ;;  %3492 = vmatprep.subr.bf16.mxu0 %v3670_v48  ;;  %v3889_v17 = vld [vmem:[%s4447_s15 + $0x18] sm:$0xff] }
 0x4ad   : > { %v1515_v22 = vmul.f32 %v3877_v18, %v4755_v46  ;;  %v1720_v43 = vsel %vm1087_vm0, %v1526_v15, 0  ;;  %3493 = vmatpush3.bf16.msra.mxu0 %v3670_v48  ;;  %v3671_v46 = vld [vmem:[#allocation7 + $0x30] sm:$0xff]  }
 0x4ae   : > { %3494 = vmatprep.subr.bf16.mxu0 %v3671_v46  ;;  %v3696_v48 = vld [vmem:[#allocation8 + $0x80] ss:$16 sps:$4 sm:$0xff]  }
 0x4af   : > { %v1525_v50 = vpack.c.bf16 %v1516_v19, %v1515_v22  ;;  %v3695_v22 = vld [vmem:[#allocation8 + $0xac] ss:$16 sps:$4 sm:$0xff]  }
 0x4b1   : > { %v1717_v25 = vsel %vm1087_vm0, %v1525_v50, 0  ;;  %3495 = vmatpush3.bf16.msra.mxu0 %v3671_v46  ;;  %v3699_v46 = vld [vmem:[#allocation8 + $0x88] ss:$16 sps:$4 sm:$0xff]  }
 0x4b2   : > { %3473 = vmatmul.mubr.msk.bf16.vlgmr.msra.gmra.mxu1 %vm1087_vm0, %v1082_v40  ;;  %3496 = vmatprep.subr.bf16.mxu0 %v3672_v28  ;;  %v3684_v40 = vld [vmem:[#allocation8 + $0xc0] ss:$16 sps:$4 sm:$0xff]  }
 0x4b3   : > { %3477 = vmatpush3.bf16.xpose.msra.mxu1 %v1659_v7  ;;  %3480 = vmatprep.mubr.msk.bf16.mxu1 %vm1087_vm0, %v1083_v0  ;;  %v3689_v0 = vld [vmem:[#allocation8 + $0xcc] ss:$16 sps:$4 sm:$0xff]  }
 0x4b4   : > { %3517 = vmatprep.subr.msk.bf16.mxu1 %vm1087_vm0, %v1523_v8  ;;  %v3886_v8 = vld [vmem:[%s4447_s15] sm:$0xff] }
 0x4b5   : > { %3497 = vmatpush3.bf16.msra.mxu0 %v3672_v28  ;;  %v3704_v28 = vld [vmem:[#allocation8 + $0x64] ss:$16 sps:$4 sm:$0xff]  }
 0x4b6   : > { %3498 = vmatprep.subr.bf16.mxu0 %v3673_v5 }
 0x4b9   : > { %3499 = vmatpush3.bf16.msra.mxu0 %v3673_v5  ;;  %v3707_v5 = vld [vmem:[#allocation8 + $0x6c] ss:$16 sps:$4 sm:$0xff]  }
 0x4ba   : > { %3500 = vmatprep.subr.bf16.mxu0 %v3674_v30 }
 0x4bb   : > { %3479 = vmatpush3.bf16.xpose.msra.mxu1 %v1656_v39  ;;  %v3888_v39 = vld [vmem:[%s4447_s15 + $0x10] sm:$0xff] }
 0x4bc   : > { %3518 = vmatprep.subr.msk.bf16.mxu1 %vm1087_vm0, %v1526_v15 }
 0x4bd   : > { %3501 = vmatpush3.bf16.msra.mxu0 %v3674_v30  ;;  %v3702_v30 = vld [vmem:[#allocation8 + $0x60] ss:$16 sps:$4 sm:$0xff]  }
 0x4be   : > { %3502 = vmatprep.subr.bf16.mxu0 %v3675_v12 }
 0x4c1   : > { %3503 = vmatpush3.bf16.msra.mxu0 %v3675_v12  ;;  %v3705_v12 = vld [vmem:[#allocation8 + $0x68] ss:$16 sps:$4 sm:$0xff]  }
 0x4c2   : > { %3481 = vmatmul.mubr.msk.bf16.vlgmr.msra.gmra.mxu1 %vm1087_vm0, %v1084_v20  ;;  %3504 = vmatprep.subr.bf16.mxu0 %v3676_v31  ;;  %v3692_v20 = vld [vmem:[#allocation8 + $0xa4] ss:$16 sps:$4 sm:$0xff]  }
 0x4c3   : > { %3485 = vmatpush3.bf16.xpose.msra.mxu1 %v1720_v43  ;;  %3488 = vmatprep.mubr.msk.bf16.mxu1 %vm1087_vm0, %v1085_v21  ;;  %v3690_v43 = vld [vmem:[#allocation8 + $0xa0] ss:$16 sps:$4 sm:$0xff]  }
 0x4c4   : > { %3519 = vmatprep.subr.msk.bf16.mxu1 %vm1087_vm0, %v1525_v50  ;;  %v3693_v50 = vld [vmem:[#allocation8 + $0xa8] ss:$16 sps:$4 sm:$0xff]  }
 0x4c5   : > { %3505 = vmatpush3.bf16.msra.mxu0 %v3676_v31  ;;  %v3710_v31 = vld [vmem:[#allocation8 + $0x44] ss:$16 sps:$4 sm:$0xff]  }
 0x4c6   : > { %3506 = vmatprep.subr.bf16.mxu0 %v3677_v59 }
 0x4c9   : > { %3507 = vmatpush3.bf16.msra.mxu0 %v3677_v59  ;;  %v3713_v59 = vld [vmem:[#allocation8 + $0x4c] ss:$16 sps:$4 sm:$0xff]  }
 0x4ca   : > { %2187 = vmatprep.subr.bf16.mxu0 %v3683_v3  ;;  %v3726_v3 = vld [vmem:[#allocation10 + $0xe0] ss:$16 sps:$4 sm:$0xff]  }
 0x4cb   : > { %3487 = vmatpush3.bf16.xpose.msra.mxu1 %v1717_v25  ;;  %v3698_v25 = vld [vmem:[#allocation8 + $0x84] ss:$16 sps:$4 sm:$0xff]  }
 0x4cc   : > { %2134 = vmatprep.subr.bf16.mxu1 %v3680_v60 }
 0x4d2   : > { %3489 = vmatmul.mubr.msk.bf16.vlgmr.msra.gmra.mxu1 %vm1087_vm0, %v1086_v27  ;;  %v3701_v27 = vld [vmem:[#allocation8 + $0x8c] ss:$16 sps:$4 sm:$0xff]  }
 0x4d3   : > { %2135 = vmatpush1.bf16.msra.mxu1 %v3678_v57 }
 0x4d4   : > { %2136 = vmatprep.subr.bf16.mxu1 %v3686_v4  ;;  %v3729_v4 = vld [vmem:[#allocation10 + $0xe8] ss:$16 sps:$4 sm:$0xff]  }
 0x4d7   : > { %2137 = vmatpush1.bf16.msra.mxu1 %v3684_v40  ;;  %v3734_v40 = vld [vmem:[#allocation10 + $0xc4] ss:$16 sps:$4 sm:$0xff]  }
 0x4d8   : > { %2138 = vmatprep.subr.bf16.mxu1 %v3692_v20  ;;  %v3749_v20 = vld [vmem:[#allocation10 + $0x8c] ss:$16 sps:$4 sm:$0xff]  }
 0x4db   : > { %2139 = vmatpush1.bf16.msra.mxu1 %v3690_v43  ;;  %v3747_v43 = vld [vmem:[#allocation10 + $0x88] ss:$16 sps:$4 sm:$0xff]  }
 0x4dc   : > { %2140 = vmatprep.subr.bf16.mxu1 %v3698_v25  ;;  %v3755_v25 = vld [vmem:[#allocation10 + $0x6c] ss:$16 sps:$4 sm:$0xff]  }
 0x4df   : > { %2141 = vmatpush1.bf16.msra.mxu1 %v3696_v48  ;;  %v3753_v48 = vld [vmem:[#allocation10 + $0x68] ss:$16 sps:$4 sm:$0xff]  }
 0x4e0   : > { %2142 = vmatprep.subr.bf16.mxu1 %v3704_v28  ;;  %v3761_v28 = vld [vmem:[#allocation10 + $0x4c] ss:$16 sps:$4 sm:$0xff]  }
 0x4e3   : > { %2143 = vmatpush1.bf16.msra.mxu1 %v3702_v30  ;;  %v3759_v30 = vld [vmem:[#allocation10 + $0x48] ss:$16 sps:$4 sm:$0xff]  }
 0x4e4   : > { %2144 = vmatprep.subr.bf16.mxu1 %v3710_v31  ;;  %v3767_v31 = vld [vmem:[#allocation10 + $0x2c] ss:$16 sps:$4 sm:$0xff]  }
 0x562   : > { %v3466_v26 = vpop.f32.mrf.mxu1 }
 0x564   : > { %v1573_v29 = vpop.f32.mrf.mxu1 }
 0x566   : > { %v3467_v47 = vpop.f32.mrf.mxu1 }
 0x567   : > { %v1772_v56 = vpack.c.bf16 %v3467_v47, %v3466_v26  ;;  %v3708_v26 = vld [vmem:[#allocation8 + $0x40] ss:$16 sps:$4 sm:$0xff]  }
 0x568   : > { %v1576_v35 = vpop.f32.mrf.mxu1  ;;  %2145 = vmatpush1.bf16.msra.mxu1 %v3708_v26  ;;  %v3714_v47 = vld [vmem:[#allocation8 + $0x20] ss:$16 sps:$4 sm:$0xff]   ;;  %v3765_v26 = vld [vmem:[#allocation10 + $0x28] ss:$16 sps:$4 sm:$0xff]  }
 0x569   : > { %v1771_v14 = vpack.c.bf16 %v1576_v35, %v1573_v29  ;;  %v3711_v29 = vld [vmem:[#allocation8 + $0x48] ss:$16 sps:$4 sm:$0xff]   ;;  %v3716_v35 = vld [vmem:[#allocation8 + $0x24] ss:$16 sps:$4 sm:$0xff]  }
 0x56a   : > { %2146 = vmatprep.subr.bf16.mxu1 %v3716_v35  ;;  %v3768_v35 = vld [vmem:[#allocation10] ss:$16 sps:$4 sm:$0xff]  }
 0x56b   : > { %1779 = vxpose.xlu0.c.b16.start [1/8] (narrow) %v1771_v14, 32  ;;  %v3717_v14 = vld [vmem:[#allocation8 + $0x28] ss:$16 sps:$4 sm:$0xff]  }
 0x56c   : > { %2147 = vmatpush1.bf16.msra.mxu1 %v3714_v47  ;;  %v3773_v47 = vld [vmem:[#allocation10 + $0xc] ss:$16 sps:$4 sm:$0xff]  }
 0x56f   : > { %1780 = vxpose.xlu0.c.b16.cont [2/8] (narrow) %v1772_v56, 32  ;;  %v3719_v56 = vld [vmem:[#allocation8 + $0x2c] ss:$16 sps:$4 sm:$0xff]  }
 0x572   : > { %v3474_v23 = vpop.f32.mrf.mxu1 }
 0x574   : > { %v1634_v52 = vpop.f32.mrf.mxu1 }
 0x576   : > { %v3475_v53 = vpop.f32.mrf.mxu1 }
 0x577   : > { %v1774_v34 = vpack.c.bf16 %v3475_v53, %v3474_v23  ;;  %v3722_v23 = vld [vmem:[#allocation8 + $0x4] ss:$16 sps:$4 sm:$0xff]   ;;  %v3720_v53 = vld [vmem:[#allocation8] ss:$16 sps:$4 sm:$0xff]  }
 0x578   : > { %v1637_v32 = vpop.f32.mrf.mxu1  ;;  %2148 = vmatprep.subr.bf16.mxu1 %v3722_v23  ;;  %v3775_v23 = vld [vmem:[#allocation11 + $0xf8] sm:$0xff]  }
 0x579   : > { %v1773_v36 = vpack.c.bf16 %v1637_v32, %v1634_v52  ;;  %v3725_v52 = vld [vmem:[#allocation8 + $0xc] ss:$16 sps:$4 sm:$0xff]   ;;  %v3723_v32 = vld [vmem:[#allocation8 + $0x8] ss:$16 sps:$4 sm:$0xff]   ;;  %2149 = vmatpush1.bf16.msra.mxu1 %v3720_v53 }
 0x57a   : > { %v3777_v53 = vld [vmem:[#allocation11 + $0xb8] sm:$0xff]  }
 0x57b   : > { %1781 = vxpose.xlu0.c.b16.cont [3/8] (narrow) %v1773_v36, 32  ;;  %v3728_v36 = vld [vmem:[#allocation10 + $0xe4] ss:$16 sps:$4 sm:$0xff]  }
 0x57c   : > { %2432 = vmatprep.subr.bf16.mxu1 %v3728_v36  ;;  %v3779_v36 = vld [vmem:[#allocation11 + $0xf0] sm:$0xff]  }
 0x57f   : > { %1782 = vxpose.xlu0.c.b16.cont [4/8] (narrow) %v1774_v34, 32  ;;  %v4196_v34 = vmov 0  }
 0x580   : > { %2166 = vmatprep.mubr.bf16.mxu1 %v4196_v34 }
 0x582   : > { %v3482_v24 = vpop.f32.mrf.mxu1 }
 0x584   : > { %v1695_v37 = vpop.f32.mrf.mxu1 }
 0x586   : > { %v3483_v38 = vpop.f32.mrf.mxu1 }
 0x587   : > { %v1776_v44 = vpack.c.bf16 %v3483_v38, %v3482_v24  ;;  %v3731_v24 = vld [vmem:[#allocation10 + $0xec] ss:$16 sps:$4 sm:$0xff]  }
 0x588   : > { %v1698_v55 = vpop.f32.mrf.mxu1 }
 0x589   : > { %v1775_v41 = vpack.c.bf16 %v1698_v55, %v1695_v37 }
 0x58b   : > { %1783 = vxpose.xlu0.c.b16.cont [5/8] (narrow) %v1775_v41, 32 }
 0x58f   : > { %1784 = vxpose.xlu0.c.b16.cont [6/8] (narrow) %v1776_v44, 32 }
 0x592   : > { %v3490_v45 = vpop.f32.mrf.mxu1 }
 0x594   : > { %v1756_v33 = vpop.f32.mrf.mxu1 }
 0x596   : > { %v3491_v51 = vpop.f32.mrf.mxu1 }
 0x597   : > { %v1778_v61 = vpack.c.bf16 %v3491_v51, %v3490_v45 }
 0x598   : > { %v1759_v49 = vpop.f32.mrf.mxu1 }
 0x599   : > { %v1777_v58 = vpack.c.bf16 %v1759_v49, %v1756_v33 }
 0x59b   : > { %1785 = vxpose.xlu0.c.b16.cont [7/8] (narrow) %v1777_v58, 32 }
 0x59f   : > { %1786 = vxpose.xlu0.c.b16.end [8/8] (narrow) %v1778_v61, 32 }
 0x5e5   : > { %v1787_v62 = vpop.trf.xlu0 }
 0x5e6   : > { %3508 = vmatprep.mubr.bf16.mxu0 %v1787_v62 }
 0x5e9   : > { %v1788_v63 = vpop.trf.xlu0 }
 0x5ea   : > { %3509 = vmatmul.mubr.bf16.vlgmr.msra.gmra.mxu0 %v1788_v63 }
 0x5eb   : > { %2188 = vmatpush1.bf16.msra.mxu0 %v3681_v1  ;;  %2219 = vmatprep.mubr.bf16.mxu0 %v4196_v34 }
 0x5ec   : > { %2189 = vmatprep.subr.bf16.mxu0 %v3689_v0 }
 0x5ef   : > { %2190 = vmatpush1.bf16.msra.mxu0 %v3687_v54  ;;  %v3737_v54 = vld [vmem:[#allocation10 + $0xcc] ss:$16 sps:$4 sm:$0xff]  }
 0x5f0   : > { %2191 = vmatprep.subr.bf16.mxu0 %v3695_v22  ;;  %v3744_v22 = vld [vmem:[#allocation10 + $0x80] ss:$16 sps:$4 sm:$0xff]  }
 0x5f3   : > { %2192 = vmatpush1.bf16.msra.mxu0 %v3693_v50  ;;  %v3752_v50 = vld [vmem:[#allocation10 + $0x64] ss:$16 sps:$4 sm:$0xff]  }
 0x5f4   : > { %2193 = vmatprep.subr.bf16.mxu0 %v3701_v27  ;;  %v3750_v27 = vld [vmem:[#allocation10 + $0x60] ss:$16 sps:$4 sm:$0xff]  }
 0x5f7   : > { %2194 = vmatpush1.bf16.msra.mxu0 %v3699_v46  ;;  %v3758_v46 = vld [vmem:[#allocation10 + $0x44] ss:$16 sps:$4 sm:$0xff]  }
 0x5f8   : > { %2195 = vmatprep.subr.bf16.mxu0 %v3707_v5  ;;  %v3756_v5 = vld [vmem:[#allocation10 + $0x40] ss:$16 sps:$4 sm:$0xff]  }
 0x5fb   : > { %2196 = vmatpush1.bf16.msra.mxu0 %v3705_v12  ;;  %v3764_v12 = vld [vmem:[#allocation10 + $0x24] ss:$16 sps:$4 sm:$0xff]  }
 0x5fc   : > { %2197 = vmatprep.subr.bf16.mxu0 %v3713_v59  ;;  %v3762_v59 = vld [vmem:[#allocation10 + $0x20] ss:$16 sps:$4 sm:$0xff]  }
 0x5ff   : > { %2198 = vmatpush1.bf16.msra.mxu0 %v3711_v29  ;;  %v3770_v29 = vld [vmem:[#allocation10 + $0x4] ss:$16 sps:$4 sm:$0xff]  }
 0x600   : > { %2199 = vmatprep.subr.bf16.mxu0 %v3719_v56  ;;  %v3774_v56 = vld [vmem:[#allocation11 + $0x78] sm:$0xff]  }
 0x603   : > { %2200 = vmatpush1.bf16.msra.mxu0 %v3717_v14  ;;  %v3771_v14 = vld [vmem:[#allocation10 + $0x8] ss:$16 sps:$4 sm:$0xff]  }
 0x604   : > { %2201 = vmatprep.subr.bf16.mxu0 %v3725_v52  ;;  %v3776_v52 = vld [vmem:[#allocation11 + $0x38] sm:$0xff]  }
 0x607   : > { %2202 = vmatpush1.bf16.msra.mxu0 %v3723_v32  ;;  %v3778_v32 = vld [vmem:[#allocation11 + $0x70] sm:$0xff]  }
 0x608   : > { %2485 = vmatprep.subr.bf16.mxu0 %v3731_v24  ;;  %v3780_v24 = vld [vmem:[#allocation11 + $0x30] sm:$0xff]  }
 0x6aa   : > { %v3510_v2 = vpop.f32.mrf.mxu0 }
 0x6ab   : > { %v4822_v15 = vadd.f32 %v3888_v39, %v3510_v2 }
 0x6ac   : > { %v1893_v7 = vpop.f32.mrf.mxu0 }
 0x6ad   : > { %v4814_v6 = vadd.f32 %v3886_v8, %v1893_v7  ;;  %v1914_v19 = vmul.f32 %v4822_v15, %v4822_v15  ;;  %v3732_v7 = vld [vmem:[#allocation10 + $0xc0] ss:$16 sps:$4 sm:$0xff]   ;;  %v3735_v8 = vld [vmem:[#allocation10 + $0xc8] ss:$16 sps:$4 sm:$0xff]  }
 0x6ae   : > { %v3511_v10 = vpop.f32.mrf.mxu0 }
 0x6af   : > { %v1912_v42 = vmul.f32 %v4814_v6, %v4814_v6  ;;  %v4827_v18 = vadd.f32 %v3889_v17, %v3511_v10  ;;  %v3740_v10 = vld [vmem:[#allocation10 + $0xa4] ss:$16 sps:$4 sm:$0xff]   ;;  %v3741_v17 = vld [vmem:[#allocation10 + $0xa8] ss:$16 sps:$4 sm:$0xff]  }
 0x6b0   : > { %v1896_v9 = vpop.f32.mrf.mxu0 }
 0x6b1   : > { %v4819_v13 = vadd.f32 %v3887_v11, %v1896_v9  ;;  %1916 = vadd.xlane.f32.xlu1 %v1912_v42  ;;  %v1915_v21 = vmul.f32 %v4827_v18, %v4827_v18  ;;  %v3743_v42 = vld [vmem:[#allocation10 + $0xac] ss:$16 sps:$4 sm:$0xff]  }
 0x6b3   : > { %v1913_v16 = vmul.f32 %v4819_v13, %v4819_v13 }
 0x6b5   : > { %1918 = vadd.xlane.f32.xlu1 %v1913_v16  ;;  %v3738_v16 = vld [vmem:[#allocation10 + $0xa0] ss:$16 sps:$4 sm:$0xff]  }
 0x6b9   : > { %1920 = vadd.xlane.f32.xlu1 %v1914_v19 }
 0x6bd   : > { %1922 = vadd.xlane.f32.xlu1 %v1915_v21  ;;  %v3746_v21 = vld [vmem:[#allocation10 + $0x84] ss:$16 sps:$4 sm:$0xff]  }
 0x73a   : > { %v1917_v37 = vpop.xlane.xlu1 %1916 }
 0x73b   : > { %v1924_v38 = vmul.f32 0.0078125, %v1917_v37  ;;  %v3781_v37 = vld [vmem:[#allocation11 + $0xb0] sm:$0xff]  }
 0x73d   : > { %v1928_v55 = vadd.f32 1e-08, %v1924_v38  ;;  %v3782_v38 = vld [vmem:[#allocation11 + $0x68] sm:$0xff]  }
 0x73e   : > { %v1919_v41 = vpop.xlane.xlu1 %1918 }
 0x73f   : > { %v1925_v44 = vmul.f32 0.0078125, %v1919_v41  ;;  %3878 = vrsqrt.f32 %v1928_v55  ;;  %v3783_v55 = vld [vmem:[#allocation11 + $0xe8] sm:$0xff]  }
 0x740   : > { %v3785_v41 = vld [vmem:[#allocation11 + $0xa8] sm:$0xff]  }
 0x741   : > { %v1929_v45 = vadd.f32 1e-08, %v1925_v44  ;;  %v3786_v44 = vld [vmem:[#allocation11 + $0x60] sm:$0xff]  }
 0x742   : > { %v1921_v33 = vpop.xlane.xlu1 %1920 }
 0x743   : > { %3880 = vrsqrt.f32 %v1929_v45  ;;  %v1926_v51 = vmul.f32 0.0078125, %v1921_v33  ;;  %v3787_v45 = vld [vmem:[#allocation11 + $0xe0] sm:$0xff]  }
 0x744   : > { %v3788_v33 = vld [vmem:[#allocation11 + $0x20] sm:$0xff]  }
 0x745   : > { %v1930_v49 = vadd.f32 1e-08, %v1926_v51  ;;  %v3789_v51 = vld [vmem:[#allocation11 + $0xa0] sm:$0xff]  }
 0x746   : > { %v1923_v58 = vpop.xlane.xlu1 %1922 }
 0x747   : > { %v1927_v61 = vmul.f32 0.0078125, %v1923_v58  ;;  %3882 = vrsqrt.f32 %v1930_v49  ;;  %v3790_v49 = vld [vmem:[#allocation11 + $0x58] sm:$0xff]  }
 0x748   : > { %v3791_v58 = vld [vmem:[#allocation11 + $0xd8] sm:$0xff]  }
 0x749   : > { %v1931_v62 = vadd.f32 1e-08, %v1927_v61  ;;  %v3792_v61 = vld [vmem:[#allocation11 + $0x18] sm:$0xff]  }
 0x74b   : > { %3884 = vrsqrt.f32 %v1931_v62  ;;  %v3793_v62 = vld [vmem:[#allocation11 + $0x98] sm:$0xff]  }
 0x74c   : > { %v3879_v63 = vpop.eup %3878 }
 0x74d   : > { %v1936_v60 = vmul.f32 %v3879_v63, %v4814_v6  ;;  %v3794_v63 = vld [vmem:[#allocation11 + $0x50] sm:$0xff]  }
 0x750   : > { %v3881_v57 = vpop.eup %3880 }
 0x751   : > { %v1937_v1 = vmul.f32 %v3881_v57, %v4819_v13  ;;  %v3795_v57 = vld [vmem:[#allocation11 + $0xd0] sm:$0xff]  }
 0x753   : > { %v4837_v0 = vpack.c.bf16 %v1937_v1, %v1936_v60  ;;  %v3796_v60 = vld [vmem:[#allocation11 + $0x10] sm:$0xff]  }
 0x754   : > { %v3883_v2 = vpop.eup %3882  ;;  %v3797_v1 = vld [vmem:[#allocation11 + $0x90] sm:$0xff]  }
 0x755   : > { %2167 = vmatmul.mubr.bf16.vlgmr.msra.gmra.mxu1 %v4837_v0  ;;  %2220 = vmatmul.mubr.bf16.vlgmr.msra.gmra.mxu0 %v4837_v0  ;;  %v1938_v11 = vmul.f32 %v3883_v2, %v4822_v15  ;;  %v3803_v2 = vld [vmem:[#allocation11 + $0xc0] sm:$0xff]  }
 0x756   : > { %2433 = vmatpush1.bf16.msra.mxu1 %v3726_v3  ;;  %2486 = vmatpush1.bf16.msra.mxu0 %v3729_v4  ;;  %v3798_v3 = vld [vmem:[#allocation11 + $0x48] sm:$0xff]  }
 0x757   : > { %2434 = vmatprep.subr.bf16.mxu1 %v3734_v40  ;;  %2487 = vmatprep.subr.bf16.mxu0 %v3737_v54  ;;  %v3799_v4 = vld [vmem:[#allocation11 + $0xc8] sm:$0xff]   ;;  %v3802_v54 = vld [vmem:[#allocation11 + $0x40] sm:$0xff]  }
 0x758   : > { %v3885_v9 = vpop.eup %3884  ;;  %2176 = vmatprep.mubr.bf16.mxu1 %v4196_v34  ;;  %2229 = vmatprep.mubr.bf16.mxu0 %v4196_v34  ;;  %v3801_v40 = vld [vmem:[#allocation11 + $0x88] sm:$0xff]  }
 0x759   : > { %v1939_v39 = vmul.f32 %v3885_v9, %v4827_v18 }
 0x75a   : > { %2435 = vmatpush1.bf16.msra.mxu1 %v3732_v7  ;;  %2488 = vmatpush1.bf16.msra.mxu0 %v3735_v8  ;;  %v3804_v7 = vld [vmem:[#allocation11] sm:$0xff]  }
 0x75b   : > { %2436 = vmatprep.subr.bf16.mxu1 %v3740_v10  ;;  %2489 = vmatprep.subr.bf16.mxu0 %v3743_v42  ;;  %v1941_v19 = vpack.c.bf16 %v1939_v39, %v1938_v11  ;;  %v3805_v8 = vld [vmem:[#allocation11 + $0x80] sm:$0xff]  }
 0x75d   : > { %2177 = vmatmul.mubr.bf16.gmra.mxu1 %v1941_v19  ;;  %2230 = vmatmul.mubr.bf16.gmra.mxu0 %v1941_v19 }
 0x75e   : > { %2437 = vmatpush1.bf16.msra.mxu1 %v3738_v16  ;;  %2490 = vmatpush1.bf16.msra.mxu0 %v3741_v17 }
 0x75f   : > { %2438 = vmatprep.subr.bf16.mxu1 %v3746_v21  ;;  %2491 = vmatprep.subr.bf16.mxu0 %v3749_v20 }
 0x760   : > { %2464 = vmatprep.mubr.bf16.mxu1 %v4196_v34  ;;  %2517 = vmatprep.mubr.bf16.mxu0 %v4196_v34 }
 0x762   : > { %2439 = vmatpush1.bf16.msra.mxu1 %v3744_v22  ;;  %2492 = vmatpush1.bf16.msra.mxu0 %v3747_v43 }
 0x763   : > { %2440 = vmatprep.subr.bf16.mxu1 %v3752_v50  ;;  %2493 = vmatprep.subr.bf16.mxu0 %v3755_v25 }
 0x766   : > { %2441 = vmatpush1.bf16.msra.mxu1 %v3750_v27  ;;  %2494 = vmatpush1.bf16.msra.mxu0 %v3753_v48 }
 0x767   : > { %2442 = vmatprep.subr.bf16.mxu1 %v3758_v46  ;;  %2495 = vmatprep.subr.bf16.mxu0 %v3761_v28 }
 0x76a   : > { %2443 = vmatpush1.bf16.msra.mxu1 %v3756_v5  ;;  %2496 = vmatpush1.bf16.msra.mxu0 %v3759_v30 }
 0x76b   : > { %2444 = vmatprep.subr.bf16.mxu1 %v3764_v12  ;;  %2497 = vmatprep.subr.bf16.mxu0 %v3767_v31 }
 0x76e   : > { %2445 = vmatpush1.bf16.msra.mxu1 %v3762_v59  ;;  %2498 = vmatpush1.bf16.msra.mxu0 %v3765_v26 }
 0x76f   : > { %2446 = vmatprep.subr.bf16.mxu1 %v3770_v29  ;;  %2499 = vmatprep.subr.bf16.mxu0 %v3773_v47 }
 0x772   : > { %2447 = vmatpush1.bf16.msra.mxu1 %v3768_v35  ;;  %2500 = vmatpush1.bf16.msra.mxu0 %v3771_v14 }
 0x773   : > { %3320 = vmatprep.subr.bf16.mxu1 %v3774_v56  ;;  %3348 = vmatprep.subr.bf16.mxu0 %v3775_v23 }
 0x775   : > { %2465 = vmatmul.mubr.bf16.vlgmr.msra.gmra.mxu1 %v4837_v0  ;;  %2518 = vmatmul.mubr.bf16.vlgmr.msra.gmra.mxu0 %v4837_v0  ;;  %v3800_v0 = vld [vmem:[#allocation11 + $0x8] sm:$0xff]  }
 0x776   : > { %2474 = vmatprep.mubr.bf16.mxu1 %v4196_v34  ;;  %2527 = vmatprep.mubr.bf16.mxu0 %v4196_v34  ;;  %v3784_v34 = vld [vmem:[#allocation11 + $0x28] sm:$0xff]  }
 0x777   : > { %3321 = vmatpush3.bf16.msra.mxu1 %v3776_v52  ;;  %3349 = vmatpush3.bf16.msra.mxu0 %v3777_v53 }
 0x778   : > { %3322 = vmatprep.subr.bf16.mxu1 %v3778_v32  ;;  %3350 = vmatprep.subr.bf16.mxu0 %v3779_v36 }
 0x77b   : > { %3323 = vmatpush3.bf16.msra.mxu1 %v3780_v24  ;;  %3351 = vmatpush3.bf16.msra.mxu0 %v3781_v37 }
 0x77c   : > { %3324 = vmatprep.subr.bf16.mxu1 %v3782_v38  ;;  %3352 = vmatprep.subr.bf16.mxu0 %v3783_v55 }
 0x77d   : > { %2475 = vmatmul.mubr.bf16.gmra.mxu1 %v1941_v19  ;;  %2528 = vmatmul.mubr.bf16.gmra.mxu0 %v1941_v19 }
 0x77f   : > { %3325 = vmatpush3.bf16.msra.mxu1 %v3784_v34  ;;  %3353 = vmatpush3.bf16.msra.mxu0 %v3785_v41 }
 0x780   : > { %3326 = vmatprep.subr.bf16.mxu1 %v3786_v44  ;;  %3354 = vmatprep.subr.bf16.mxu0 %v3787_v45 }
 0x783   : > { %3327 = vmatpush3.bf16.msra.mxu1 %v3788_v33  ;;  %3355 = vmatpush3.bf16.msra.mxu0 %v3789_v51 }
 0x784   : > { %3328 = vmatprep.subr.bf16.mxu1 %v3790_v49  ;;  %3356 = vmatprep.subr.bf16.mxu0 %v3791_v58 }
 0x787   : > { %3329 = vmatpush3.bf16.msra.mxu1 %v3792_v61  ;;  %3357 = vmatpush3.bf16.msra.mxu0 %v3793_v62 }
 0x788   : > { %3330 = vmatprep.subr.bf16.mxu1 %v3794_v63  ;;  %3358 = vmatprep.subr.bf16.mxu0 %v3795_v57 }
 0x78b   : > { %3331 = vmatpush3.bf16.msra.mxu1 %v3796_v60  ;;  %3359 = vmatpush3.bf16.msra.mxu0 %v3797_v1 }
 0x78c   : > { %3332 = vmatprep.subr.bf16.mxu1 %v3798_v3  ;;  %3360 = vmatprep.subr.bf16.mxu0 %v3799_v4 }
 0x78f   : > { %3333 = vmatpush3.bf16.msra.mxu1 %v3800_v0  ;;  %3361 = vmatpush3.bf16.msra.mxu0 %v3801_v40 }
 0x790   : > { %3334 = vmatprep.subr.bf16.mxu1 %v3802_v54  ;;  %3362 = vmatprep.subr.bf16.mxu0 %v3803_v2 }
 0x793   : > { %3335 = vmatpush3.bf16.msra.mxu1 %v3804_v7  ;;  %3363 = vmatpush3.bf16.msra.mxu0 %v3805_v8 }
 0x815   : > { %v2168_v10 = vpop.f32.mrf.mxu1  ;;  %v2221_v42 = vpop.f32.mrf.mxu0 }
 0x817   : > { %v2170_v9 = vpop.f32.mrf.mxu1  ;;  %v2223_v11 = vpop.f32.mrf.mxu0 }
 0x819   : > { %v2172_v39 = vpop.f32.mrf.mxu1  ;;  %v2225_v16 = vpop.f32.mrf.mxu0 }
 0x81b   : > { %v2174_v17 = vpop.f32.mrf.mxu1  ;;  %v2227_v19 = vpop.f32.mrf.mxu0 }
 0x81d   : > { %v2178_v21 = vpop.f32.mrf.mxu1  ;;  %v2231_v20 = vpop.f32.mrf.mxu0 }
 0x81f   : > { %v2180_v22 = vpop.f32.mrf.mxu1  ;;  %v2233_v43 = vpop.f32.mrf.mxu0 }
 0x821   : > { %v2182_v50 = vpop.f32.mrf.mxu1  ;;  %v2235_v25 = vpop.f32.mrf.mxu0 }
 0x823   : > { %v2184_v27 = vpop.f32.mrf.mxu1  ;;  %v2237_v48 = vpop.f32.mrf.mxu0 }
 0x835   : > { %v2466_v46 = vpop.f32.mrf.mxu1  ;;  %v2519_v28 = vpop.f32.mrf.mxu0 }
 0x836   : > { %v2538_v52 = vmul.f32 %v2466_v46, %v2168_v10  ;;  %v2540_v53 = vmul.f32 %v2519_v28, %v2221_v42 }
 0x837   : > { %v2468_v5 = vpop.f32.mrf.mxu1  ;;  %v2521_v30 = vpop.f32.mrf.mxu0 }
 0x838   : > { %v2539_v35 = vmul.f32 %v2468_v5, %v2170_v9  ;;  %v2541_v14 = vmul.f32 %v2521_v30, %v2223_v11 }
 0x839   : > { %v2470_v12 = vpop.f32.mrf.mxu1  ;;  %v2523_v31 = vpop.f32.mrf.mxu0 }
 0x83a   : > { %v2542_v59 = vmul.f32 %v2470_v12, %v2172_v39  ;;  %v2544_v26 = vmul.f32 %v2523_v31, %v2225_v16 }
 0x83b   : > { %v2472_v29 = vpop.f32.mrf.mxu1  ;;  %v2525_v47 = vpop.f32.mrf.mxu0 }
 0x83c   : > { %v2543_v56 = vmul.f32 %v2472_v29, %v2174_v17  ;;  %v2545_v23 = vmul.f32 %v2525_v47, %v2227_v19  ;;  %v2554_v38 = vpack.c.bf16 %v2542_v59, %v2538_v52  ;;  %v2556_v55 = vpack.c.bf16 %v2544_v26, %v2540_v53 }
 0x83d   : > { %v2476_v32 = vpop.f32.mrf.mxu1  ;;  %v2529_v36 = vpop.f32.mrf.mxu0 }
 0x83e   : > { %v2555_v24 = vpack.c.bf16 %v2543_v56, %v2539_v35  ;;  %v2557_v37 = vpack.c.bf16 %v2545_v23, %v2541_v14  ;;  %v2546_v60 = vmul.f32 %v2476_v32, %v2178_v21  ;;  %v2548_v1 = vmul.f32 %v2529_v36, %v2231_v20 }
 0x83f   : > { %v2478_v34 = vpop.f32.mrf.mxu1  ;;  %v2531_v41 = vpop.f32.mrf.mxu0 }
 0x840   : > { %2850 = vmatprep.mubr.bf16.mxu1 %v2555_v24  ;;  %2899 = vmatprep.mubr.bf16.mxu0 %v2557_v37  ;;  %v2547_v61 = vmul.f32 %v2478_v34, %v2180_v22  ;;  %v2549_v62 = vmul.f32 %v2531_v41, %v2233_v43 }
 0x841   : > { %v2480_v44 = vpop.f32.mrf.mxu1  ;;  %v2533_v45 = vpop.f32.mrf.mxu0  ;;  %2851 = vmatmul.mubr.bf16.vlgmr.msra.gmra.mxu1 %v2554_v38  ;;  %2900 = vmatmul.mubr.bf16.vlgmr.msra.gmra.mxu0 %v2556_v55 }
 0x842   : > { %v2550_v33 = vmul.f32 %v2480_v44, %v2182_v50  ;;  %v2552_v51 = vmul.f32 %v2533_v45, %v2235_v25 }
 0x843   : > { %v2482_v49 = vpop.f32.mrf.mxu1  ;;  %v2535_v58 = vpop.f32.mrf.mxu0 }
 0x844   : > { %v2551_v63 = vmul.f32 %v2482_v49, %v2184_v27  ;;  %v2553_v57 = vmul.f32 %v2535_v58, %v2237_v48  ;;  %v2558_v0 = vpack.c.bf16 %v2550_v33, %v2546_v60  ;;  %v2560_v40 = vpack.c.bf16 %v2552_v51, %v2548_v1 }
 0x846   : > { %v2559_v3 = vpack.c.bf16 %v2551_v63, %v2547_v61  ;;  %v2561_v4 = vpack.c.bf16 %v2553_v57, %v2549_v62 }
 0x848   : > { %2858 = vmatprep.mubr.bf16.mxu1 %v2559_v3  ;;  %2907 = vmatprep.mubr.bf16.mxu0 %v2561_v4 }
 0x849   : > { %2859 = vmatmul.mubr.bf16.gmra.mxu1 %v2558_v0  ;;  %2908 = vmatmul.mubr.bf16.gmra.mxu0 %v2560_v40 }
 0x901   : > { %v3336_v54 = vpop.f32.mrf.mxu1  ;;  %v3364_v2 = vpop.f32.mrf.mxu0 }
 0x903   : > { %v3337_v7 = vpop.f32.mrf.mxu1  ;;  %v3365_v8 = vpop.f32.mrf.mxu0 }
 0x904   : > { %v3338_v10 = vadd.f32 %v3337_v7, %v3336_v54  ;;  %v3366_v42 = vadd.f32 %v3365_v8, %v3364_v2 }
 0x905   : > { %v3339_v9 = vpop.f32.mrf.mxu1  ;;  %v3367_v11 = vpop.f32.mrf.mxu0 }
 0x906   : > { %v2902_v39 = vadd.f32 %v3366_v42, %v3338_v10 }
 0x907   : > { %v3340_v16 = vpop.f32.mrf.mxu1  ;;  %v3368_v17 = vpop.f32.mrf.mxu0 }
 0x908   : > { %v2916_v19 = vadd.f32 %v2902_v39, %v4814_v6  ;;  %v3341_v21 = vadd.f32 %v3340_v16, %v3339_v9  ;;  %v3369_v20 = vadd.f32 %v3368_v17, %v3367_v11 }
 0x909   : > { %v3342_v22 = vpop.f32.mrf.mxu1  ;;  %v3370_v43 = vpop.f32.mrf.mxu0 }
 0x90a   : > { %2920 = vst [vmem:[%s425_s12] sm:$0xff] %v2916_v19  ;;  %v2905_v50 = vadd.f32 %v3369_v20, %v3341_v21 }
 0x90b   : > { %v3343_v25 = vpop.f32.mrf.mxu1  ;;  %v3371_v27 = vpop.f32.mrf.mxu0 }
 0x90c   : > { %v2917_v48 = vadd.f32 %v2905_v50, %v4819_v13  ;;  %v3344_v46 = vadd.f32 %v3343_v25, %v3342_v22  ;;  %v3372_v28 = vadd.f32 %v3371_v27, %v3370_v43 }
 0x90d   : > { %v3345_v5 = vpop.f32.mrf.mxu1  ;;  %v3373_v30 = vpop.f32.mrf.mxu0 }
 0x90e   : > { %2921 = vst [vmem:[%s425_s12 + $0x8] sm:$0xff] %v2917_v48  ;;  %v2910_v6 = vadd.f32 %v3372_v28, %v3344_v46 }
 0x90f   : > { %v3346_v12 = vpop.f32.mrf.mxu1  ;;  %v3374_v31 = vpop.f32.mrf.mxu0 }
 0x910   : > { %v2918_v59 = vadd.f32 %v2910_v6, %v4822_v15  ;;  %v3347_v26 = vadd.f32 %v3346_v12, %v3345_v5  ;;  %v3375_v29 = vadd.f32 %v3374_v31, %v3373_v30 }
 0x912   : > { %2922 = vst [vmem:[%s425_s12 + $0x10] sm:$0xff] %v2918_v59  ;;  %v2913_v13 = vadd.f32 %v3375_v29, %v3347_v26 }
 0x914   : > { %v2919_v47 = vadd.f32 %v2913_v13, %v4827_v18 }
 0x916   : > { %2923 = vst [vmem:[%s425_s12 + $0x18] sm:$0xff] %v2919_v47 }
 0x917   : > { %4113 = shalt.err (!%p4110_p8)
}
 0x918   : > { %s4114_s17 = scalar_lea.hbm %s4862_s10, 512  ;;  %s4118_s15 = scalar_lea.hbm %s4914_s8, 1024 }
 0x919   : > { %p4115_p6 = scmp.ne.s32.totalorder %s4862_s10, %s4114_s17  ;;  %p4119_p0 = scmp.lt.s32.totalorder %s4862_s10, %s4914_s8 }
 0x91a   : > { %p4120_p2 = scmp.lt.s32.totalorder %s4118_s15, %s4114_s17 }
 0x91b   : > { %p4116_p11 = pnand %p4115_p6, %p4944_p10 }
 0x91c   : > { %p4121_p5 = por %p4120_p2, %p4119_p0 }
 0x91d   : > { %p4117_p7 = pneg %p4116_p11 }
 0x91f   : > { %p4122_p9 = pnand %p4121_p5, %p4117_p7 }
 0x921   : > { %4125 = shalt.err (!%p4122_p9)
}
 0x922   : > { %s4198_s13 = smov 128   ;;  %s4199_s19 = smov 8  }
 0x923   : > { %3550 = dma.vmem_to_hbm [thread:$0]  (%p4944_p10), %s4857_s22, 512, %s4862_s10, %s2925_s16, %s4198_s13, %s4198_s13, %s4199_s19  }
 0x924 PF: > { %s2953_s25 = sand.u32 1, %s4168_s27   ;;  %p4945_p12 = scmp.ne.s32.totalorder %s4930_s26, 0 }
 0x925   : > { %p4946_p13 = scmp.ge.s32.totalorder %s4180_s30, 2  ;;  %s2954_s11 = scalar_lea.sflag [#allocation4], %s2953_s25 }
 0x927   : > { %p3579_p1 = pnand %p4946_p13, %p4945_p12 }
 0x929   : > { %p3580_p3 = pneg %p3579_p1 }
 0x92b   : > { %4163 = dma.done.wait (%p3580_p3), %s2954_s11, 512  }
 0x92c   : > { %4165 = vsyncadd (%p3580_p3), %s2954_s11, 4294966784  ;;  %p25_p4 = scmp.ge.s32.totalorder %s4372_s18, 4   ;;  %s4947_s27 = smov %s4172_s28 }
 0x92d   : > { %s4948_s28 = smov %s4176_s29  ;;  %s4949_s29 = smov %s4384_s20 }
 0x92e   : > { %s4950_s30 = smov %s4372_s18  ;;  %27 = sbr.rel (!%p25_p4) target bundleno = 12 (0xc), region = 125 }
 0x933   :  { %2959 = vsyncpa [#allocation3], 1 }
 0x934   :  { %2961 = vsyncpa [#allocation3 + $0x1], 1 }
 0x935   :  { %2962 = vsyncpa [#allocation6], 1 }
 0x936   :  { %2963 = vsyncpa [#allocation9], 1 }
 0x937   :  { %2964 = vsyncpa [#allocation12], 1 }
 0x938   :  { %2965 = vsyncpa [#allocation15], 1 }
 0x939   :  { %2966 = vsyncpa [#allocation4], 1 }
 0x93a   :  { %2968 = vsyncpa [#allocation4 + $0x1], 1 }

// kernel: tpu_custom_call.1
= control target key start
LH: loop header
LB: loop body
LE: loop exit
PB: predicated region body
PF: predicated region fallthrough
CT: control target
= control target key end

     0   :  { %s4906_s0 = inlined_call_operand.hbm [shape: f32[2,32,128], index: 0, kind: input, shape index: {}]   ;;  %s4907_s1 = inlined_call_operand.hbm [shape: bf16[384,128], index: 1, kind: input, shape index: {}]   ;;  %s4908_s2 = inlined_call_operand.hbm [shape: bf16[128,128], index: 2, kind: input, shape index: {}]   ;;  %s4909_s3 = inlined_call_operand.hbm [shape: bf16[128,512], index: 3, kind: input, shape index: {}]   ;;  %s4910_s4 = inlined_call_operand.hbm [shape: bf16[128,512], index: 4, kind: input, shape index: {}]   ;;  %s4911_s5 = inlined_call_operand.hbm [shape: bf16[512,128], index: 5, kind: input, shape index: {}]   ;;  %s4912_s6 = inlined_call_operand.hbm [shape: f32[1,32,32], index: 6, kind: input, shape index: {}]   ;;  %s4913_s7 = inlined_call_operand.hbm [shape: f32[1,32,32], index: 7, kind: input, shape index: {}]   ;;  %s4914_s8 = inlined_call_operand.hbm [shape: f32[2,32,128], index: 8, kind: output, shape index: {}]  }
   0x1   :  { %4921 = sst [smem:[#allocation23_spill]] %s4907_s1 }
   0x2   :  { %4922 = sst [smem:[#allocation24_spill]] %s4908_s2 }
   0x3   :  { %13 = vsyncpa [#allocation3], 0 }
   0x4   :  { %15 = vsyncpa [#allocation3 + $0x1], 0 }
   0x5   :  { %16 = vsyncpa [#allocation6], 0 }
   0x6   :  { %17 = vsyncpa [#allocation9], 0 }
   0x7   :  { %18 = vsyncpa [#allocation12], 0 }
   0x8   :  { %19 = vsyncpa [#allocation15], 0 }
   0x9   :  { %20 = vsyncpa [#allocation4], 0 }
   0xa   :  { %22 = vsyncpa [#allocation4 + $0x1], 0  ;;  %s4245_s27 = smov 0   ;;  %s4247_s28 = smov 0  }
   0xb   :  { %s4249_s29 = smov 0   ;;  %s4251_s30 = smov 0  }
   0xc LB: > { %s4182_s9 = smov [#allocation5]   ;;  %s4266_s11 = sadd.s32 4294967295, %s4180_s30   ;;  %s4180_s30 = sphi %s4251_s30, %s4950_s30   ;;  %s4176_s29 = sphi %s4249_s29, %s4949_s29   ;;  %s4172_s28 = sphi %s4247_s28, %s4948_s28   ;;  %s4168_s27 = sphi %s4245_s27, %s4947_s27  }
   0xd   : > { %s244_s10 = sshll.u32 %s4182_s9, 4  ;;  %p3079_p0 = scmp.ge.s32.totalorder %s4180_s30, 1  ;;  %s245_s10 = int_to_ptr.vmem [resolvable:$true] %s244_s10 }
   0xe   : > { %p4917_p1 = scmp.eq.s32.totalorder %s4266_s11, 0  ;;  %p232_p2 = scmp.lt.s32.totalorder %s4180_s30, 3 }
   0xf   : > { %s4183_s13 = smov [#allocation8]   ;;  %s4184_s16 = smov [#allocation11]  }
  0x10   : > { %p4271_p3 = pnand %p3079_p0, %p232_p2  ;;  %s270_s14 = sshll.u32 %s4183_s13, 4  ;;  %s4284_s14 = int_to_ptr.vmem [resolvable:$true] %s270_s14 }
  0x11   : > { %s4286_s17 = sshll.u32 %s4184_s16, 4  ;;  %s3901_s19 = scalar_lea.vmem %s245_s10, 3072  ;;  %s297_s17 = int_to_ptr.vmem [resolvable:$true] %s4286_s17 }
  0x12   : > { %s4923_s12 = scalar_select %p4271_p3, 1, 0 }
  0x13   : > { %p3552_p5 = pneg %p4271_p3  ;;  %p3902_p8 = scmp.ne.s32.totalorder %s245_s10, %s3901_s19 }
  0x14   : > { %p3909_p11 = scmp.lt.s32.totalorder %s245_s10, %s245_s10  ;;  %p3910_p12 = scmp.lt.s32.totalorder %s3901_s19, %s3901_s19 }
  0x15   : > { %p4280_p6 = pnand %p3552_p5, %p4917_p1 }
  0x16   : > { %p3911_p13 = por %p3910_p12, %p3909_p11 }
  0x17   : > { %p4290_p7 = pneg %p4280_p6 }
  0x19   : > { %p3904_p9 = pnand %p3902_p8, %p4290_p7 }
  0x1b   : > { %p3905_p10 = pneg %p3904_p9 }
  0x1d   : > { %p3912_p0 = pnand %p3911_p13, %p3905_p10 }
  0x1f   : > { %3915 = shalt.err (!%p3912_p0)
}
  0x20   : > { %s4185_s20 = smov 64   ;;  %s4186_s21 = smov 4  }
  0x21   : > { %s4926_s1 = sld [smem:[#allocation23_spill]]  ;;  %s3927_s24 = scalar_lea.vmem %s4284_s14, 4096 }
  0x22   : > { %p3928_p2 = scmp.ne.s32.totalorder %s4284_s14, %s3927_s24  ;;  %p3935_p9 = scmp.lt.s32.totalorder %s4284_s14, %s4284_s14 }
  0x23   : > { %p3936_p10 = scmp.lt.s32.totalorder %s3927_s24, %s3927_s24 }
  0x24   : > { %p3930_p5 = pnand %p3928_p2, %p4290_p7 }
  0x25   : > { %p3937_p11 = por %p3936_p10, %p3935_p9 }
  0x26   : > { %p3931_p8 = pneg %p3930_p5 }
  0x27   : > { %3555 = dma.hbm_to_vmem [thread:$0]  (!%p4280_p6), %s4926_s1, 3072, %s245_s10, [#allocation6], %s4185_s20, %s4185_s20, %s4186_s21  }
  0x28   : > { %p3938_p12 = pnand %p3937_p11, %p3931_p8 }
  0x2a   : > { %3941 = shalt.err (!%p3938_p12)
}
  0x2b   : > { %s4187_s25 = smov 256   ;;  %s4188_s26 = smov 16  }
  0x2c   : > { %3561 = dma.hbm_to_vmem [thread:$0]  (!%p4280_p6), %s4909_s3, 4096, %s4284_s14, [#allocation9], %s4187_s25, %s4187_s25, %s4188_s26  }
  0x2d   : > { %s3953_s13 = scalar_lea.vmem %s297_s17, 4096  ;;  %p3961_p5 = scmp.lt.s32.totalorder %s297_s17, %s297_s17 }
  0x2e   : > { %p3954_p13 = scmp.ne.s32.totalorder %s297_s17, %s3953_s13  ;;  %p3962_p8 = scmp.lt.s32.totalorder %s3953_s13, %s3953_s13 }
  0x30   : > { %p3956_p0 = pnand %p3954_p13, %p4290_p7  ;;  %p3963_p9 = por %p3962_p8, %p3961_p5 }
  0x32   : > { %p3957_p2 = pneg %p3956_p0 }
  0x34   : > { %p3964_p10 = pnand %p3963_p9, %p3957_p2 }
  0x36   : > { %3967 = shalt.err (!%p3964_p10)
}
  0x37   : > { %3567 = dma.hbm_to_vmem [thread:$0]  (!%p4280_p6), %s4911_s5, 4096, %s297_s17, [#allocation12], %s4185_s20, %s4185_s20, %s4186_s21  }
  0x38   : > { %s4189_s14 = smov [#allocation7]   ;;  %s4190_s23 = smov [#allocation10]  }
  0x39   : > { %s257_s22 = sshll.u32 %s4189_s14, 4  ;;  %s283_s24 = sshll.u32 %s4190_s23, 4  ;;  %s258_s22 = int_to_ptr.vmem [resolvable:$true] %s257_s22  ;;  %s284_s24 = int_to_ptr.vmem [resolvable:$true] %s283_s24 }
  0x3a   : > { %s3979_s9 = scalar_lea.vmem %s258_s22, 1024  ;;  %p3987_p0 = scmp.lt.s32.totalorder %s258_s22, %s258_s22 }
  0x3b   : > { %p3980_p11 = scmp.ne.s32.totalorder %s258_s22, %s3979_s9  ;;  %p3988_p2 = scmp.lt.s32.totalorder %s3979_s9, %s3979_s9 }
  0x3d   : > { %p3982_p12 = pnand %p3980_p11, %p4290_p7  ;;  %p3989_p5 = por %p3988_p2, %p3987_p0 }
  0x3f   : > { %p3983_p13 = pneg %p3982_p12 }
  0x41   : > { %p3990_p8 = pnand %p3989_p5, %p3983_p13 }
  0x43   : > { %3993 = shalt.err (!%p3990_p8)
}
  0x44   : > { %s4927_s2 = sld [smem:[#allocation24_spill]]  ;;  %s4005_s13 = scalar_lea.vmem %s284_s24, 4096 }
  0x45   : > { %p4006_p9 = scmp.ne.s32.totalorder %s284_s24, %s4005_s13  ;;  %p4013_p12 = scmp.lt.s32.totalorder %s284_s24, %s284_s24 }
  0x46   : > { %p4014_p0 = scmp.lt.s32.totalorder %s4005_s13, %s4005_s13 }
  0x47   : > { %p4008_p10 = pnand %p4006_p9, %p4290_p7 }
  0x48   : > { %p4015_p13 = por %p4014_p0, %p4013_p12 }
  0x49   : > { %p4009_p11 = pneg %p4008_p10 }
  0x4a   : > { %3558 = dma.hbm_to_vmem [thread:$0]  (!%p4280_p6), %s4927_s2, 1024, %s258_s22, [#allocation6], %s4185_s20, %s4185_s20, %s4186_s21  }
  0x4b   : > { %p4016_p2 = pnand %p4015_p13, %p4009_p11 }
  0x4d   : > { %4019 = shalt.err (!%p4016_p2)
}
  0x4e   : > { %3564 = dma.hbm_to_vmem [thread:$0]  (!%p4280_p6), %s4910_s4, 4096, %s284_s24, [#allocation9], %s4187_s25, %s4187_s25, %s4188_s26  }
  0x4f   : > { %s4191_s20 = smov [#allocation13]  }
  0x50   : > { %s309_s21 = sshll.u32 %s4191_s20, 4  ;;  %s310_s21 = int_to_ptr.vmem [resolvable:$true] %s309_s21 }
  0x51   : > { %s4031_s14 = scalar_lea.vmem %s310_s21, 512  ;;  %p4039_p10 = scmp.lt.s32.totalorder %s310_s21, %s310_s21 }
  0x52   : > { %p4032_p5 = scmp.ne.s32.totalorder %s310_s21, %s4031_s14  ;;  %p4040_p11 = scmp.lt.s32.totalorder %s4031_s14, %s4031_s14 }
  0x54   : > { %p4034_p8 = pnand %p4032_p5, %p4290_p7  ;;  %p4041_p12 = por %p4040_p11, %p4039_p10 }
  0x56   : > { %p4035_p9 = pneg %p4034_p8 }
  0x58   : > { %p4042_p0 = pnand %p4041_p12, %p4035_p9 }
  0x5a   : > { %4045 = shalt.err (!%p4042_p0)
}
  0x5b   : > { %s4915_s22 = smov 128   ;;  %s4916_s23 = smov 8  }
  0x5c   : > { %3570 = dma.hbm_to_vmem [thread:$0]  (!%p4280_p6), %s4912_s6, 512, %s310_s21, [#allocation12], %s4915_s22, %s4915_s22, %s4916_s23  }
  0x5d   : > { %s4194_s24 = smov [#allocation14]  }
  0x5e   : > { %s322_s9 = sshll.u32 %s4194_s24, 4  ;;  %s323_s9 = int_to_ptr.vmem [resolvable:$true] %s322_s9 }
  0x5f   : > { %s4057_s17 = scalar_lea.vmem %s323_s9, 512  ;;  %p4065_p8 = scmp.lt.s32.totalorder %s323_s9, %s323_s9 }
  0x60   : > { %p4058_p13 = scmp.ne.s32.totalorder %s323_s9, %s4057_s17  ;;  %p4066_p9 = scmp.lt.s32.totalorder %s4057_s17, %s4057_s17 }
  0x62   : > { %p4060_p2 = pnand %p4058_p13, %p4290_p7  ;;  %p4067_p10 = por %p4066_p9, %p4065_p8 }
  0x64   : > { %p4061_p5 = pneg %p4060_p2 }
  0x66   : > { %p4068_p11 = pnand %p4067_p10, %p4061_p5 }
  0x68   : > { %4071 = shalt.err (!%p4068_p11)
}
  0x69   : > { %3573 = dma.hbm_to_vmem [thread:$0]  (!%p4280_p6), %s4913_s7, 512, %s323_s9, [#allocation15], %s4915_s22, %s4915_s22, %s4916_s23  }
  0x6a   : > { %s3078_s15 = sadd.s32 4294967294, %s4180_s30   ;;  %s4372_s18 = sadd.s32 1, %s4180_s30  }
  0x6b   : > { %s35_s16 = sadd.s32 1, %s4176_s29  ;;  %s32_s19 = ssub.s32 %s4180_s30, %s4372_s18 }
  0x6c   : > { %p42_p7 = scmp.ne.s32.totalorder %s4176_s29, %s4172_s28  ;;  %p33_p12 = scmp.eq.s32.totalorder %s32_s19, 0 }
  0x6d   : > { %p43_p0 = scmp.eq.s32.totalorder %s4180_s30, 0  ;;  %p48_p13 = scmp.ne.s32.totalorder %s4172_s28, %s4168_s27 }
  0x6e   : > { %p219_p2 = scmp.eq.s32.totalorder %s4266_s11, 1  ;;  %p225_p9 = scmp.eq.s32.totalorder %s3078_s15, 1 }
  0x6f   : > { %s4384_s20 = scalar_select %p33_p12, %s4176_s29, %s35_s16  }
  0x70   : > { %p44_p5 = por %p43_p0, %p42_p7  ;;  %p4388_p8 = por %p4917_p1, %p48_p13 }
  0x71   : > { %p4392_p6 = por %p219_p2, %p42_p7  ;;  %p3589_p10 = scmp.lt.s32.totalorder %s4180_s30, 2 }
  0x72   : > { %s4928_s21 = scalar_select %p4388_p8, 1, 0 }
  0x73   : > { %s4929_s14 = scalar_select %p4392_p6, 1, 0 }
  0x74   : > { %s336_s25 = sand.u32 1, %s4176_s29   ;;  %p4398_p11 = por %p225_p9, %p48_p13 }
  0x75   : > { %s3088_s24 = sshll.u32 %s336_s25, 5  ;;  %s3250_s9 = sshll.u32 %s4180_s30, 9 }
  0x76   : > { %s4930_s26 = scalar_select %p4398_p11, 1, 0 }
  0x77   : > { %s4406_s13 = scalar_lea.hbm %s4906_s0, %s3250_s9  ;;  %s340_s16 = scalar_lea.vmem [#allocation2], %s3088_s24 }
  0x78   : > { %s347_s19 = sshll.u32 %s340_s16, 4  ;;  %p4408_p7 = pnand %p3589_p10, %p44_p5  ;;  %s4412_s19 = int_to_ptr.vmem [resolvable:$true] %s347_s19 }
  0x79   : > { %s4414_s22 = scalar_lea.sflag [#allocation3], %s336_s25  ;;  %s4072_s23 = scalar_lea.hbm %s4406_s13, 512 }
  0x7a   : > { %p4073_p12 = scmp.ne.s32.totalorder %s4406_s13, %s4072_s23  ;;  %p4074_p0 = pneg %p4408_p7 }
  0x7b   : > { %s4077_s24 = scalar_lea.hbm %s4906_s0, 1024  ;;  %p4078_p5 = scmp.lt.s32.totalorder %s4406_s13, %s4906_s0 }
  0x7c   : > { %p4075_p13 = pnand %p4074_p0, %p4073_p12  ;;  %p4079_p9 = scmp.lt.s32.totalorder %s4077_s24, %s4072_s23 }
  0x7e   : > { %p4076_p2 = pneg %p4075_p13  ;;  %p4080_p10 = por %p4079_p9, %p4078_p5 }
  0x80   : > { %p4081_p4 = pnand %p4080_p10, %p4076_p2 }
  0x82   : > { %4084 = shalt.err (!%p4081_p4)
}
  0x83   : > { %s4085_s25 = scalar_lea.vmem %s4412_s19, 512  ;;  %s4195_s1 = smov [#allocation2]  }
  0x84   : > { %p4086_p1 = scmp.ne.s32.totalorder %s4412_s19, %s4085_s25  ;;  %s4090_s2 = sshll.u32 %s4195_s1, 4  ;;  %s4091_s2 = int_to_ptr.vmem [resolvable:$false] %s4090_s2 }
  0x85   : > { %s4092_s9 = scalar_lea.vmem %s4091_s2, 1024  ;;  %p4093_p13 = scmp.lt.s32.totalorder %s4412_s19, %s4091_s2 }
  0x86   : > { %p4088_p11 = pnand %p4086_p1, %p4074_p0  ;;  %p4094_p6 = scmp.lt.s32.totalorder %s4092_s9, %s4085_s25 }
  0x88   : > { %p4089_p12 = pneg %p4088_p11  ;;  %p4095_p8 = por %p4094_p6, %p4093_p13 }
  0x8a   : > { %p4096_p3 = pnand %p4095_p8, %p4089_p12 }
  0x8c   : > { %4099 = shalt.err (!%p4096_p3)
}
  0x8d   : > { %s4932_s23 = smov 8   ;;  %s4933_s17 = smov 128  }
  0x8e   : > { %3577 = dma.hbm_to_vmem [thread:$0]  (!%p4408_p7), %s4406_s13, 512, %s4412_s19, %s4414_s22, %s4933_s17, %s4933_s17, %s4932_s23  }
  0x8f   : > { %p4934_p1 = scmp.ne.s32.totalorder %s4923_s12, 0 }
  0x90   : > { %s4441_s1 = sand.u32 (!%p4934_p1), 1, %s4172_s28   ;;  %p4935_p3 = scmp.ne.s32.totalorder (!%p4934_p1), %s4928_s21, 0 }
  0x91   : > { %359 = sbr.rel (%p4934_p1) target bundleno = 2340 (0x924), region = 52  ;;  %s3092_s2 = sshll.u32 (!%p4934_p1), %s4441_s1, 5 }
  0x92   : > { %s362_s24 = scalar_lea.sflag (!%p4934_p1), [#allocation3], %s4441_s1  ;;  %s4447_s15 = scalar_lea.vmem (!%p4934_p1), [#allocation2], %s3092_s2 }
  0x96   : > { %4143 = dma.done.wait (%p4935_p3), %s362_s24, 512  }
  0x97   : > { %4145 = vsyncadd (%p4935_p3), %s362_s24, 4294966784  ;;  %p4936_p4 = scmp.eq.s32.totalorder %s4266_s11, 0 }
  0x99   : > { %4147 = dma.done.wait (%p4936_p4), [#allocation6], 4096   ;;  %p4937_p8 = pmov %p4936_p4 }
  0x9a   : > { %p4938_p6 = pmov %p4936_p4 }
  0x9b   : > { %4149 = vsyncadd (%p4937_p8), [#allocation6], 4294963200 }
  0x9c   : > { %4151 = dma.done.wait (%p4938_p6), [#allocation9], 8192   ;;  %p4939_p11 = pmov %p4936_p4 }
  0x9d   : > { %p4940_p7 = pmov %p4936_p4 }
  0x9e   : > { %4153 = vsyncadd (%p4939_p11), [#allocation9], 4294959104 }
  0x9f   : > { %4155 = dma.done.wait (%p4940_p7), [#allocation12], 4608   ;;  %p4941_p0 = pmov %p4936_p4 }
  0xa1   : > { %4157 = vsyncadd (%p4941_p0), [#allocation12], 4294962688  ;;  %p4942_p2 = pmov %p4941_p0 }
  0xa2   : > { %p4943_p5 = pmov %p4941_p0 }
  0xa3   : > { %4159 = dma.done.wait (%p4942_p2), [#allocation15], 512  }
  0xa4   : > { %4161 = vsyncadd (%p4943_p5), [#allocation15], 4294966784  ;;  %v429_v0 = vld [vmem:[%s4447_s15 + $0x10] sm:$0xff]  ;;  %v430_v1 = vld [vmem:[%s4447_s15 + $0x18] sm:$0xff]  ;;  %vm1087_vm0 = vcmask 261120   ;;  %s425_s12 = scalar_lea.vmem [#allocation16], %s3092_s2 }
  0xa5   : > { %v427_v2 = vld [vmem:[%s4447_s15] sm:$0xff]  ;;  %v433_v3 = vmul.f32 %v429_v0, %v429_v0  ;;  %v428_v5 = vld [vmem:[%s4447_s15 + $0x8] sm:$0xff]  ;;  %v434_v6 = vmul.f32 %v430_v1, %v430_v1  ;;  %v3648_v32 = vld [vmem:[#allocation5 + $0x10] sm:$0xff]   ;;  %s2938_s22 = sshll.u32 %s425_s12, 4  ;;  %s3251_s21 = sshll.u32 %s4266_s11, 9  ;;  %s4857_s22 = int_to_ptr.vmem [resolvable:$true] %s2938_s22 }
  0xa6   : > { %v431_v4 = vmul.f32 %v427_v2, %v427_v2  ;;  %v432_v7 = vmul.f32 %v428_v5, %v428_v5  ;;  %v3646_v8 = vld [vmem:[#allocation5] sm:$0xff]   ;;  %v3647_v31 = vld [vmem:[#allocation5 + $0x8] sm:$0xff]   ;;  %v3649_v33 = vld [vmem:[#allocation5 + $0x18] sm:$0xff]   ;;  %s4862_s10 = scalar_lea.hbm %s4914_s8, %s3251_s21  ;;  %s2925_s16 = scalar_lea.sflag [#allocation4], %s4441_s1 }
  0xa7   : > { %439 = vadd.xlane.f32.xlu0 %v433_v3  ;;  %3380 = vmatprep.mubr.bf16.mxu0 %v3646_v8  ;;  %v3650_v34 = vld [vmem:[#allocation5 + $0x20] sm:$0xff]   ;;  %v3651_v35 = vld [vmem:[#allocation5 + $0x28] sm:$0xff]   ;;  %v3652_v36 = vld [vmem:[#allocation5 + $0x30] sm:$0xff]   ;;  %s4100_s25 = scalar_lea.vmem %s4857_s22, 512  ;;  %p4944_p10 = scmp.ne.s32.totalorder %s4929_s14, 0 }
  0xa8   : > { %435 = vadd.xlane.f32.xlu1 %v431_v4  ;;  %v3653_v37 = vld [vmem:[#allocation5 + $0x38] sm:$0xff]   ;;  %v3654_v38 = vld [vmem:[#allocation5 + $0x40] sm:$0xff]   ;;  %v3655_v39 = vld [vmem:[#allocation5 + $0x48] sm:$0xff]   ;;  %p4101_p9 = scmp.ne.s32.totalorder %s4857_s22, %s4100_s25  ;;  %s4197_s11 = smov [#allocation16]  }
  0xa9   : > { %v3656_v40 = vld [vmem:[#allocation5 + $0x50] sm:$0xff]   ;;  %v3657_v41 = vld [vmem:[#allocation5 + $0x58] sm:$0xff]   ;;  %v3658_v42 = vld [vmem:[#allocation5 + $0x60] sm:$0xff]   ;;  %s4104_s9 = sshll.u32 %s4197_s11, 4  ;;  %s4105_s9 = int_to_ptr.vmem [resolvable:$false] %s4104_s9 }
  0xaa   : > { %v3659_v43 = vld [vmem:[#allocation5 + $0x68] sm:$0xff]   ;;  %v3660_v44 = vld [vmem:[#allocation5 + $0x70] sm:$0xff]   ;;  %v3661_v45 = vld [vmem:[#allocation5 + $0x78] sm:$0xff]   ;;  %p4102_p12 = pnand %p4101_p9, %p4944_p10  ;;  %s4106_s23 = scalar_lea.vmem %s4105_s9, 1024 }
  0xab   : > { %441 = vadd.xlane.f32.xlu0 %v434_v6  ;;  %v4473_v47 = vld [vmem:[#allocation13] sm:$0xff]  ;;  %v4478_v52 = vld [vmem:[#allocation14 + $0x8] sm:$0xff]  ;;  %v4482_v54 = vld [vmem:[#allocation14 + $0x18] sm:$0xff]  ;;  %p4107_p1 = scmp.lt.s32.totalorder %s4857_s22, %s4105_s9  ;;  %p4108_p3 = scmp.lt.s32.totalorder %s4106_s23, %s4100_s25 }
  0xac   : > { %437 = vadd.xlane.f32.xlu1 %v432_v7  ;;  %v4475_v49 = vld [vmem:[#allocation14] sm:$0xff]  ;;  %v4480_v53 = vld [vmem:[#allocation13 + $0x8] sm:$0xff]  ;;  %v4484_v55 = vld [vmem:[#allocation14 + $0x10] sm:$0xff]  ;;  %p4103_p13 = pneg %p4102_p12 }
  0xad   : > { %v4486_v56 = vld [vmem:[#allocation13 + $0x18] sm:$0xff]  ;;  %v4489_v59 = vld [vmem:[#allocation13 + $0x10] sm:$0xff]  ;;  %p4109_p4 = por %p4108_p3, %p4107_p1 }
  0xaf   : > { %p4110_p8 = pnand %p4109_p4, %p4103_p13 }
 0x130   : > { %v440_v9 = vpop.xlane.xlu0 %439 }
 0x131   : > { %v436_v10 = vpop.xlane.xlu1 %435  ;;  %v446_v11 = vmul.f32 0.0078125, %v440_v9 }
 0x132   : > { %v444_v12 = vmul.f32 0.0078125, %v436_v10 }
 0x133   : > { %v450_v13 = vadd.f32 1e-08, %v446_v11 }
 0x134   : > { %v448_v14 = vadd.f32 1e-08, %v444_v12  ;;  %v442_v15 = vpop.xlane.xlu0 %441 }
 0x135   : > { %v438_v16 = vpop.xlane.xlu1 %437  ;;  %v447_v17 = vmul.f32 0.0078125, %v442_v15 }
 0x136   : > { %v445_v18 = vmul.f32 0.0078125, %v438_v16  ;;  %3806 = vrsqrt.f32 %v448_v14 }
 0x137   : > { %3808 = vrsqrt.f32 %v450_v13  ;;  %v451_v19 = vadd.f32 1e-08, %v447_v17 }
 0x138   : > { %v449_v20 = vadd.f32 1e-08, %v445_v18 }
 0x139   : > { %3810 = vrsqrt.f32 %v451_v19 }
 0x13a   : > { %3812 = vrsqrt.f32 %v449_v20 }
 0x143   : > { %v3807_v21 = vpop.eup %3806 }
 0x144   : > { %v3809_v22 = vpop.eup %3808  ;;  %v456_v24 = vmul.f32 %v3807_v21, %v427_v2 }
 0x145   : > { %v458_v26 = vmul.f32 %v3809_v22, %v429_v0 }
 0x146   : > { %v3811_v23 = vpop.eup %3810 }
 0x147   : > { %v3813_v25 = vpop.eup %3812  ;;  %v459_v27 = vmul.f32 %v3811_v23, %v430_v1 }
 0x148   : > { %v457_v28 = vmul.f32 %v3813_v25, %v428_v5 }
 0x149   : > { %v461_v29 = vpack.c.bf16 %v459_v27, %v458_v26 }
 0x14a   : > { %v460_v30 = vpack.c.bf16 %v457_v28, %v456_v24 }
 0x14b   : > { %3376 = vmatprep.subr.bf16.mxu0 %v461_v29 }
 0x14c   : > { %3377 = vmatpush3.bf16.xpose.msra.mxu0 %v461_v29 }
 0x14d   : > { %3378 = vmatprep.subr.bf16.mxu0 %v460_v30 }
 0x154   : > { %3379 = vmatpush3.bf16.xpose.msra.mxu0 %v460_v30 }
 0x15b   : > { %3381 = vmatmul.mubr.bf16.vlgmr.msra.gmra.mxu0 %v3647_v31 }
 0x15c   : > { %3384 = vmatprep.mubr.bf16.mxu0 %v3648_v32 }
 0x163   : > { %3385 = vmatmul.mubr.bf16.gmra.mxu0 %v3649_v33 }
 0x164   : > { %3388 = vmatprep.mubr.bf16.mxu0 %v3650_v34 }
 0x16b   : > { %3389 = vmatmul.mubr.bf16.gmra.mxu0 %v3651_v35 }
 0x16c   : > { %3392 = vmatprep.mubr.bf16.mxu0 %v3652_v36 }
 0x173   : > { %3393 = vmatmul.mubr.bf16.gmra.mxu0 %v3653_v37 }
 0x174   : > { %3396 = vmatprep.mubr.bf16.mxu0 %v3654_v38 }
 0x17b   : > { %3397 = vmatmul.mubr.bf16.gmra.mxu0 %v3655_v39 }
 0x17c   : > { %3400 = vmatprep.mubr.bf16.mxu0 %v3656_v40 }
 0x183   : > { %3401 = vmatmul.mubr.bf16.gmra.mxu0 %v3657_v41 }
 0x184   : > { %3404 = vmatprep.mubr.bf16.mxu0 %v3658_v42 }
 0x18b   : > { %3405 = vmatmul.mubr.bf16.gmra.mxu0 %v3659_v43 }
 0x18c   : > { %3408 = vmatprep.mubr.bf16.mxu0 %v3660_v44 }
 0x193   : > { %3409 = vmatmul.mubr.bf16.gmra.mxu0 %v3661_v45 }
 0x21b   : > { %v3382_v46 = vpop.f32.mrf.mxu0 }
 0x21c   : > { %v903_v57 = vmul.f32 %v3382_v46, %v4475_v49  ;;  %v889_v4 = vmul.f32 %v3382_v46, %v4489_v59 }
 0x21d   : > { %v688_v48 = vpop.f32.mrf.mxu0 }
 0x21e   : > { %v887_v50 = vmul.f32 %v4473_v47, %v688_v48  ;;  %v905_v63 = vmul.f32 %v4484_v55, %v688_v48 }
 0x21f   : > { %v3383_v51 = vpop.f32.mrf.mxu0 }
 0x220   : > { %v904_v60 = vmul.f32 %v3383_v51, %v4478_v52  ;;  %v919_v0 = vadd.f32 %v903_v57, %v887_v50  ;;  %v890_v1 = vmul.f32 %v3383_v51, %v4486_v56  ;;  %v921_v10 = vadd.f32 %v905_v63, %v889_v4 }
 0x221   : > { %v691_v58 = vpop.f32.mrf.mxu0 }
 0x222   : > { %v888_v61 = vmul.f32 %v4480_v53, %v691_v58  ;;  %v906_v62 = vmul.f32 %v4482_v54, %v691_v58  ;;  %v935_v12 = vmul.f32 0.17677669, %v919_v0  ;;  %v937_v23 = vmul.f32 0.17677669, %v921_v10 }
 0x223   : > { %v3386_v2 = vpop.f32.mrf.mxu0 }
 0x224   : > { %v920_v3 = vadd.f32 %v904_v60, %v888_v61  ;;  %v922_v5 = vadd.f32 %v906_v62, %v890_v1  ;;  %v907_v6 = vmul.f32 %v3386_v2, %v4475_v49  ;;  %v893_v13 = vmul.f32 %v3386_v2, %v4489_v59 }
 0x225   : > { %v704_v7 = vpop.f32.mrf.mxu0 }
 0x226   : > { %v891_v8 = vmul.f32 %v4473_v47, %v704_v7  ;;  %v936_v9 = vmul.f32 0.17677669, %v920_v3  ;;  %v909_v14 = vmul.f32 %v4484_v55, %v704_v7  ;;  %v938_v16 = vmul.f32 0.17677669, %v922_v5 }
 0x227   : > { %v3387_v11 = vpop.f32.mrf.mxu0 }
 0x228   : > { %v908_v15 = vmul.f32 %v3387_v11, %v4478_v52  ;;  %v923_v17 = vadd.f32 %v907_v6, %v891_v8  ;;  %v894_v18 = vmul.f32 %v3387_v11, %v4486_v56  ;;  %v999_v20 = vpack.c.bf16 %v936_v9, %v935_v12 }
 0x229   : > { %v707_v19 = vpop.f32.mrf.mxu0  ;;  %v925_v25 = vadd.f32 %v909_v14, %v893_v13  ;;  %v1000_v30 = vpack.c.bf16 %v938_v16, %v937_v23 }
 0x22a   : > { %v892_v21 = vmul.f32 %v4480_v53, %v707_v19  ;;  %v910_v22 = vmul.f32 %v4482_v54, %v707_v19  ;;  %1007 = vxpose.xlu0.c.b16.start [1/2] (short) (narrow) %v999_v20, 32  ;;  %v939_v31 = vmul.f32 0.17677669, %v923_v17 }
 0x22b   : > { %v3390_v24 = vpop.f32.mrf.mxu0  ;;  %v941_v39 = vmul.f32 0.17677669, %v925_v25 }
 0x22c   : > { %v924_v26 = vadd.f32 %v908_v15, %v892_v21  ;;  %v926_v27 = vadd.f32 %v910_v22, %v894_v18  ;;  %v911_v28 = vmul.f32 %v3390_v24, %v4475_v49  ;;  %v897_v34 = vmul.f32 %v3390_v24, %v4489_v59 }
 0x22d   : > { %v720_v29 = vpop.f32.mrf.mxu0 }
 0x22e   : > { %v895_v32 = vmul.f32 %v4473_v47, %v720_v29  ;;  %v940_v33 = vmul.f32 0.17677669, %v924_v26  ;;  %v913_v35 = vmul.f32 %v4484_v55, %v720_v29  ;;  %1008 = vxpose.xlu0.c.b16.end [2/2] (short) (narrow) %v1000_v30, 32  ;;  %v942_v40 = vmul.f32 0.17677669, %v926_v27 }
 0x22f   : > { %v3391_v36 = vpop.f32.mrf.mxu0 }
 0x230   : > { %v898_v37 = vmul.f32 %v3391_v36, %v4486_v56  ;;  %v912_v38 = vmul.f32 %v3391_v36, %v4478_v52  ;;  %v927_v41 = vadd.f32 %v911_v28, %v895_v32  ;;  %v1001_v43 = vpack.c.bf16 %v940_v33, %v939_v31 }
 0x231   : > { %v723_v42 = vpop.f32.mrf.mxu0  ;;  %v929_v46 = vadd.f32 %v913_v35, %v897_v34  ;;  %v1002_v61 = vpack.c.bf16 %v942_v40, %v941_v39 }
 0x232   : > { %v896_v44 = vmul.f32 %v4480_v53, %v723_v42  ;;  %v914_v45 = vmul.f32 %v4482_v54, %v723_v42  ;;  %1023 = vxpose.xlu1.c.b16.start [1/2] (short) (narrow) %v1001_v43, 32  ;;  %v943_v62 = vmul.f32 0.17677669, %v927_v41 }
 0x233   : > { %v3394_v48 = vpop.f32.mrf.mxu0  ;;  %v945_v2 = vmul.f32 0.17677669, %v929_v46 }
 0x234   : > { %v928_v50 = vadd.f32 %v912_v38, %v896_v44  ;;  %v930_v51 = vadd.f32 %v914_v45, %v898_v37  ;;  %v915_v57 = vmul.f32 %v3394_v48, %v4475_v49  ;;  %v901_v58 = vmul.f32 %v3394_v48, %v4489_v59 }
 0x235   : > { %v736_v60 = vpop.f32.mrf.mxu0 }
 0x236   : > { %v899_v63 = vmul.f32 %v4473_v47, %v736_v60  ;;  %v917_v0 = vmul.f32 %v4484_v55, %v736_v60  ;;  %v944_v1 = vmul.f32 0.17677669, %v928_v50  ;;  %v946_v3 = vmul.f32 0.17677669, %v930_v51  ;;  %1024 = vxpose.xlu1.c.b16.end [2/2] (short) (narrow) %v1002_v61, 32 }
 0x237   : > { %v3395_v4 = vpop.f32.mrf.mxu0 }
 0x238   : > { %v931_v5 = vadd.f32 %v915_v57, %v899_v63  ;;  %v902_v6 = vmul.f32 %v3395_v4, %v4486_v56  ;;  %v916_v7 = vmul.f32 %v3395_v4, %v4478_v52  ;;  %v933_v8 = vadd.f32 %v917_v0, %v901_v58 }
 0x239   : > { %v739_v9 = vpop.f32.mrf.mxu0  ;;  %v1003_v10 = vpack.c.bf16 %v944_v1, %v943_v62  ;;  %v1004_v13 = vpack.c.bf16 %v946_v3, %v945_v2 }
 0x23a   : > { %v900_v11 = vmul.f32 %v4480_v53, %v739_v9  ;;  %v918_v12 = vmul.f32 %v4482_v54, %v739_v9  ;;  %v947_v17 = vmul.f32 0.17677669, %v931_v5  ;;  %v949_v18 = vmul.f32 0.17677669, %v933_v8 }
 0x23b   : > { %1039 = vxpose.xlu0.c.b16.start [1/2] (short) (narrow) %v1003_v10, 32  ;;  %v3398_v14 = vpop.f32.mrf.mxu0 }
 0x23c   : > { %v932_v15 = vadd.f32 %v916_v7, %v900_v11  ;;  %v934_v16 = vadd.f32 %v918_v12, %v902_v6  ;;  %v953_v19 = vmul.f32 %v3398_v14, %v4489_v59  ;;  %v967_v20 = vmul.f32 %v3398_v14, %v4475_v49 }
 0x23d   : > { %v752_v21 = vpop.f32.mrf.mxu0 }
 0x23e   : > { %v950_v22 = vmul.f32 0.17677669, %v934_v16  ;;  %v948_v23 = vmul.f32 0.17677669, %v932_v15  ;;  %v951_v24 = vmul.f32 %v4473_v47, %v752_v21  ;;  %v969_v25 = vmul.f32 %v4484_v55, %v752_v21 }
 0x23f   : > { %1040 = vxpose.xlu0.c.b16.end [2/2] (short) (narrow) %v1004_v13, 32  ;;  %v3399_v26 = vpop.f32.mrf.mxu0 }
 0x240   : > { %v1005_v27 = vpack.c.bf16 %v948_v23, %v947_v17  ;;  %v954_v28 = vmul.f32 %v3399_v26, %v4486_v56  ;;  %v1006_v29 = vpack.c.bf16 %v950_v22, %v949_v18  ;;  %v968_v30 = vmul.f32 %v3399_v26, %v4478_v52 }
 0x241   : > { %v755_v31 = vpop.f32.mrf.mxu0  ;;  %v983_v32 = vadd.f32 %v967_v20, %v951_v24  ;;  %v985_v35 = vadd.f32 %v969_v25, %v953_v19 }
 0x242   : > { %1055 = vxpose.xlu1.c.b16.start [1/2] (short) (narrow) %v1005_v27, 32  ;;  %v952_v33 = vmul.f32 %v4480_v53, %v755_v31  ;;  %v970_v34 = vmul.f32 %v4482_v54, %v755_v31 }
 0x243   : > { %v3402_v36 = vpop.f32.mrf.mxu0 }
 0x244   : > { %v984_v37 = vadd.f32 %v968_v30, %v952_v33  ;;  %v986_v38 = vadd.f32 %v970_v34, %v954_v28  ;;  %v971_v39 = vmul.f32 %v3402_v36, %v4475_v49  ;;  %v957_v40 = vmul.f32 %v3402_v36, %v4489_v59 }
 0x245   : > { %v768_v41 = vpop.f32.mrf.mxu0 }
 0x246   : > { %1056 = vxpose.xlu1.c.b16.end [2/2] (short) (narrow) %v1006_v29, 32  ;;  %v1072_v42 = vpack.c.bf16 %v986_v38, %v985_v35  ;;  %v1071_v43 = vpack.c.bf16 %v984_v37, %v983_v32  ;;  %v955_v44 = vmul.f32 %v4473_v47, %v768_v41  ;;  %v973_v45 = vmul.f32 %v4484_v55, %v768_v41  ;;  %v3662_v38 = vld [vmem:[#allocation5 + $0x80] sm:$0xff]  }
 0x247   : > { %v3403_v46 = vpop.f32.mrf.mxu0  ;;  %3412 = vmatprep.mubr.bf16.mxu0 %v3662_v38 }
 0x248   : > { %3428 = vmatprep.subr.bf16.mxu1 %v1072_v42  ;;  %v987_v48 = vadd.f32 %v971_v39, %v955_v44  ;;  %v958_v50 = vmul.f32 %v3403_v46, %v4486_v56  ;;  %v972_v51 = vmul.f32 %v3403_v46, %v4478_v52  ;;  %v989_v58 = vadd.f32 %v973_v45, %v957_v40  ;;  %v3663_v39 = vld [vmem:[#allocation5 + $0x88] sm:$0xff]  }
 0x249   : > { %3429 = vmatpush3.bf16.msra.mxu1 %v1072_v42  ;;  %v771_v57 = vpop.f32.mrf.mxu0  ;;  %3413 = vmatmul.mubr.bf16.gmra.mxu0 %v3663_v39  ;;  %v1308_v40 = vlaneseq }
 0x24a   : > { %3430 = vmatprep.subr.bf16.mxu1 %v1071_v43  ;;  %v956_v60 = vmul.f32 %v4480_v53, %v771_v57  ;;  %v974_v61 = vmul.f32 %v4482_v54, %v771_v57 }
 0x24b   : > { %v3406_v62 = vpop.f32.mrf.mxu0  ;;  %v4561_v41 = vshrl.u32 %v1308_v40, 7 }
 0x24c   : > { %v988_v63 = vadd.f32 %v972_v51, %v956_v60  ;;  %v990_v0 = vadd.f32 %v974_v61, %v958_v50  ;;  %v961_v1 = vmul.f32 %v3406_v62, %v4489_v59  ;;  %v975_v2 = vmul.f32 %v3406_v62, %v4475_v49 }
 0x24d   : > { %3431 = vmatpush3.bf16.msra.mxu1 %v1071_v43  ;;  %v784_v3 = vpop.f32.mrf.mxu0  ;;  %v1311_v42 = vadd.s32 16, %v4561_v41  ;;  %v4564_v43 = vand.u32 127, %v1308_v40  ;;  %v4568_v44 = vadd.s32 24, %v4561_v41  ;;  %v4573_v46 = vadd.s32 8, %v4561_v41 }
 0x24e   : > { %v959_v4 = vmul.f32 %v4473_v47, %v784_v3  ;;  %v977_v5 = vmul.f32 %v4484_v55, %v784_v3  ;;  %v1074_v6 = vpack.c.bf16 %v990_v0, %v989_v58  ;;  %v1073_v7 = vpack.c.bf16 %v988_v63, %v987_v48 }
 0x24f   : > { %v3407_v8 = vpop.f32.mrf.mxu0  ;;  %vm1317_vm1 = vcmp.ge.s32.totalorder %v1311_v42, %v4564_v43  ;;  %vm1315_vm2 = vcmp.ge.s32.totalorder %v4561_v41, %v4564_v43  ;;  %vm1318_vm3 = vcmp.ge.s32.totalorder %v4568_v44, %v4564_v43  ;;  %vm1316_vm4 = vcmp.ge.s32.totalorder %v4573_v46, %v4564_v43 }
 0x250   : > { %v991_v9 = vadd.f32 %v975_v2, %v959_v4  ;;  %v993_v10 = vadd.f32 %v977_v5, %v961_v1  ;;  %v962_v11 = vmul.f32 %v3407_v8, %v4486_v56  ;;  %v976_v12 = vmul.f32 %v3407_v8, %v4478_v52  ;;  %3436 = vmatprep.subr.bf16.mxu1 %v1074_v6 }
 0x251   : > { %v787_v13 = vpop.f32.mrf.mxu0 }
 0x252   : > { %v960_v14 = vmul.f32 %v4480_v53, %v787_v13  ;;  %v978_v15 = vmul.f32 %v4482_v54, %v787_v13  ;;  %v3664_v13 = vld [vmem:[#allocation5 + $0x90] sm:$0xff]  }
 0x253   : > { %v3410_v16 = vpop.f32.mrf.mxu0  ;;  %3416 = vmatprep.mubr.bf16.mxu0 %v3664_v13 }
 0x254   : > { %v992_v17 = vadd.f32 %v976_v12, %v960_v14  ;;  %v994_v18 = vadd.f32 %v978_v15, %v962_v11  ;;  %v965_v19 = vmul.f32 %v3410_v16, %v4489_v59  ;;  %v979_v20 = vmul.f32 %v3410_v16, %v4475_v49  ;;  %v3665_v16 = vld [vmem:[#allocation5 + $0x98] sm:$0xff]  }
 0x255   : > { %v800_v21 = vpop.f32.mrf.mxu0  ;;  %3417 = vmatmul.mubr.bf16.gmra.mxu0 %v3665_v16 }
 0x256   : > { %v963_v22 = vmul.f32 %v4473_v47, %v800_v21  ;;  %v981_v23 = vmul.f32 %v4484_v55, %v800_v21  ;;  %v1076_v24 = vpack.c.bf16 %v994_v18, %v993_v10  ;;  %v1075_v25 = vpack.c.bf16 %v992_v17, %v991_v9 }
 0x257   : > { %v3411_v26 = vpop.f32.mrf.mxu0 }
 0x258   : > { %v995_v27 = vadd.f32 %v979_v20, %v963_v22  ;;  %v997_v28 = vadd.f32 %v981_v23, %v965_v19  ;;  %v966_v29 = vmul.f32 %v3411_v26, %v4486_v56  ;;  %v980_v30 = vmul.f32 %v3411_v26, %v4478_v52 }
 0x259   : > { %v803_v31 = vpop.f32.mrf.mxu0 }
 0x25a   : > { %v964_v32 = vmul.f32 %v4480_v53, %v803_v31  ;;  %v982_v59 = vmul.f32 %v4482_v54, %v803_v31 }
 0x25c   : > { %v996_v49 = vadd.f32 %v980_v30, %v964_v32  ;;  %v998_v33 = vadd.f32 %v982_v59, %v966_v29 }
 0x25e   : > { %v1078_v34 = vpack.c.bf16 %v998_v33, %v997_v28  ;;  %v1077_v47 = vpack.c.bf16 %v996_v49, %v995_v27 }
 0x28c   : > { %v1015_v55 = vpop.trf.xlu0 }
 0x28d   : > { %3432 = vmatprep.mubr.msk.bf16.mxu1 %vm1087_vm0, %v1015_v55 }
 0x290   : > { %v1016_v35 = vpop.trf.xlu0 }
 0x291   : > { %3433 = vmatmul.mubr.msk.bf16.vlgmr.msra.gmra.mxu1 %vm1087_vm0, %v1016_v35  ;;  %v3666_v35 = vld [vmem:[#allocation5 + $0xa0] sm:$0xff]  }
 0x292   : > { %3437 = vmatpush3.bf16.msra.mxu1 %v1074_v6  ;;  %3420 = vmatprep.mubr.bf16.mxu0 %v3666_v35 }
 0x293   : > { %3438 = vmatprep.subr.bf16.mxu1 %v1073_v7 }
 0x294   : > { %v1031_v56 = vpop.trf.xlu1 }
 0x295   : > { %3440 = vmatprep.mubr.msk.bf16.mxu1 %vm1087_vm0, %v1031_v56 }
 0x296   : > { %3439 = vmatpush3.bf16.msra.mxu1 %v1073_v7 }
 0x297   : > { %3444 = vmatprep.subr.bf16.mxu1 %v1076_v24 }
 0x298   : > { %v1032_v52 = vpop.trf.xlu1 }
 0x299   : > { %3441 = vmatmul.mubr.msk.bf16.vlgmr.msra.gmra.mxu1 %vm1087_vm0, %v1032_v52  ;;  %v3667_v52 = vld [vmem:[#allocation5 + $0xa8] sm:$0xff]  }
 0x29a   : > { %3445 = vmatpush3.bf16.msra.mxu1 %v1076_v24  ;;  %3421 = vmatmul.mubr.bf16.gmra.mxu0 %v3667_v52 }
 0x29b   : > { %3446 = vmatprep.subr.bf16.mxu1 %v1075_v25 }
 0x29d   : > { %v1047_v53 = vpop.trf.xlu0 }
 0x29e   : > { %3448 = vmatprep.mubr.msk.bf16.mxu1 %vm1087_vm0, %v1047_v53  ;;  %3447 = vmatpush3.bf16.msra.mxu1 %v1075_v25  ;;  %v3668_v53 = vld [vmem:[#allocation5 + $0xb0] sm:$0xff]  }
 0x29f   : > { %3452 = vmatprep.subr.bf16.mxu1 %v1078_v34  ;;  %3424 = vmatprep.mubr.bf16.mxu0 %v3668_v53 }
 0x2a1   : > { %v1048_v54 = vpop.trf.xlu0 }
 0x2a2   : > { %3449 = vmatmul.mubr.msk.bf16.vlgmr.msra.gmra.mxu1 %vm1087_vm0, %v1048_v54  ;;  %v3669_v54 = vld [vmem:[#allocation5 + $0xb8] sm:$0xff]  }
 0x2a3   : > { %3453 = vmatpush3.bf16.msra.mxu1 %v1078_v34  ;;  %3425 = vmatmul.mubr.bf16.gmra.mxu0 %v3669_v54 }
 0x2a4   : > { %v1063_v36 = vpop.trf.xlu1  ;;  %3454 = vmatprep.subr.bf16.mxu1 %v1077_v47 }
 0x2a5   : > { %3456 = vmatprep.mubr.msk.bf16.mxu1 %vm1087_vm0, %v1063_v36 }
 0x2a7   : > { %3455 = vmatpush3.bf16.msra.mxu1 %v1077_v47 }
 0x2a8   : > { %v1064_v37 = vpop.trf.xlu1 }
 0x2aa   : > { %3457 = vmatmul.mubr.msk.bf16.vlgmr.msra.gmra.mxu1 %vm1087_vm0, %v1064_v37 }
 0x351   : > { %v3434_v45 = vpop.f32.mrf.mxu1 }
 0x352   : > { %v4577_v48 = vsel %vm1317_vm1, %v3434_v45, -1e+30 }
 0x353   : > { %v1128_v50 = vpop.f32.mrf.mxu1  ;;  %v1349_v51 = vsel %vm1087_vm0, %v4577_v48, -inf }
 0x354   : > { %v4586_v57 = vsel %vm1315_vm2, %v1128_v50, -1e+30  ;;  %1350 = vmax.xlane.f32.xlu0 %v1349_v51 }
 0x355   : > { %v3435_v58 = vpop.f32.mrf.mxu1  ;;  %v1343_v62 = vsel %vm1087_vm0, %v4586_v57, -inf }
 0x356   : > { %v4593_v60 = vsel %vm1318_vm3, %v3435_v58, -1e+30 }
 0x357   : > { %v1131_v61 = vpop.f32.mrf.mxu1  ;;  %v1352_v63 = vsel %vm1087_vm0, %v4593_v60, -inf }
 0x358   : > { %v4602_v0 = vsel %vm1316_vm4, %v1131_v61, -1e+30  ;;  %1344 = vmax.xlane.f32.xlu0 %v1343_v62  ;;  %1353 = vmax.xlane.f32.xlu1 %v1352_v63 }
 0x359   : > { %v3442_v1 = vpop.f32.mrf.mxu1  ;;  %v1346_v4 = vsel %vm1087_vm0, %v4602_v0, -inf }
 0x35a   : > { %v4606_v2 = vsel %vm1317_vm1, %v3442_v1, -1e+30 }
 0x35b   : > { %v1183_v3 = vpop.f32.mrf.mxu1  ;;  %v1361_v5 = vsel %vm1087_vm0, %v4606_v2, -inf }
 0x35c   : > { %v4615_v6 = vsel %vm1315_vm2, %v1183_v3, -1e+30  ;;  %1347 = vmax.xlane.f32.xlu1 %v1346_v4  ;;  %1362 = vmax.xlane.f32.xlu0 %v1361_v5 }
 0x35d   : > { %v3443_v7 = vpop.f32.mrf.mxu1  ;;  %v1355_v8 = vsel %vm1087_vm0, %v4615_v6, -inf }
 0x35e   : > { %v4622_v9 = vsel %vm1318_vm3, %v3443_v7, -1e+30 }
 0x35f   : > { %v1186_v10 = vpop.f32.mrf.mxu1  ;;  %v1364_v11 = vsel %vm1087_vm0, %v4622_v9, -inf }
 0x360   : > { %v4629_v12 = vsel %vm1316_vm4, %v1186_v10, -1e+30  ;;  %1356 = vmax.xlane.f32.xlu0 %v1355_v8  ;;  %1365 = vmax.xlane.f32.xlu1 %v1364_v11 }
 0x361   : > { %v1358_v15 = vsel %vm1087_vm0, %v4629_v12, -inf }
 0x362   : > { %v3450_v14 = vpop.f32.mrf.mxu1 }
 0x363   : > { %v4635_v17 = vsel %vm1317_vm1, %v3450_v14, -1e+30 }
 0x364   : > { %v1238_v18 = vpop.f32.mrf.mxu1  ;;  %v1373_v19 = vsel %vm1087_vm0, %v4635_v17, -inf  ;;  %1359 = vmax.xlane.f32.xlu1 %v1358_v15 }
 0x365   : > { %v4642_v20 = vsel %vm1315_vm2, %v1238_v18, -1e+30  ;;  %1374 = vmax.xlane.f32.xlu0 %v1373_v19 }
 0x366   : > { %v3451_v21 = vpop.f32.mrf.mxu1  ;;  %v1367_v22 = vsel %vm1087_vm0, %v4642_v20, -inf }
 0x367   : > { %v4649_v23 = vsel %vm1318_vm3, %v3451_v21, -1e+30 }
 0x368   : > { %v1241_v24 = vpop.f32.mrf.mxu1  ;;  %v1376_v25 = vsel %vm1087_vm0, %v4649_v23, -inf }
 0x369   : > { %v4656_v26 = vsel %vm1316_vm4, %v1241_v24, -1e+30  ;;  %1368 = vmax.xlane.f32.xlu0 %v1367_v22  ;;  %1377 = vmax.xlane.f32.xlu1 %v1376_v25 }
 0x36a   : > { %v3458_v27 = vpop.f32.mrf.mxu1  ;;  %v1370_v28 = vsel %vm1087_vm0, %v4656_v26, -inf }
 0x36b   : > { %v4662_v29 = vsel %vm1317_vm1, %v3458_v27, -1e+30 }
 0x36c   : > { %v1293_v30 = vpop.f32.mrf.mxu1  ;;  %v1385_v31 = vsel %vm1087_vm0, %v4662_v29, -inf }
 0x36d   : > { %v4669_v32 = vsel %vm1315_vm2, %v1293_v30, -1e+30  ;;  %1371 = vmax.xlane.f32.xlu1 %v1370_v28  ;;  %1386 = vmax.xlane.f32.xlu0 %v1385_v31 }
 0x36e   : > { %v3459_v59 = vpop.f32.mrf.mxu1  ;;  %v1379_v49 = vsel %vm1087_vm0, %v4669_v32, -inf }
 0x36f   : > { %v4676_v33 = vsel %vm1318_vm3, %v3459_v59, -1e+30 }
 0x370   : > { %v1388_v34 = vsel %vm1087_vm0, %v4676_v33, -inf  ;;  %v1296_v47 = vpop.f32.mrf.mxu1 }
 0x371   : > { %1380 = vmax.xlane.f32.xlu0 %v1379_v49  ;;  %1389 = vmax.xlane.f32.xlu1 %v1388_v34  ;;  %v4683_v55 = vsel %vm1316_vm4, %v1296_v47, -1e+30 }
 0x372   : > { %v1382_v56 = vsel %vm1087_vm0, %v4683_v55, -inf }
 0x375   : > { %1383 = vmax.xlane.f32.xlu1 %v1382_v56 }
 0x3dd   : > { %v1351_v36 = vpop.xlane.xlu0 %1350 }
 0x3de   : > { %v1393_v37 = vsub.f32 %v4577_v48, %v1351_v36 }
 0x3e0   : > { %v1411_v38 = vmul.f32 1.442695, %v1393_v37 }
 0x3e1   : > { %v1345_v39 = vpop.xlane.xlu0 %1344  ;;  %v1354_v40 = vpop.xlane.xlu1 %1353 }
 0x3e2   : > { %3814 = vpow2.f32 %v1411_v38  ;;  %v1391_v41 = vsub.f32 %v4586_v57, %v1345_v39  ;;  %v1394_v42 = vsub.f32 %v4593_v60, %v1354_v40 }
 0x3e4   : > { %v1407_v43 = vmul.f32 1.442695, %v1391_v41  ;;  %v1413_v44 = vmul.f32 1.442695, %v1394_v42 }
 0x3e5   : > { %v1348_v45 = vpop.xlane.xlu1 %1347  ;;  %v1363_v46 = vpop.xlane.xlu0 %1362 }
 0x3e6   : > { %3816 = vpow2.f32 %v1407_v43  ;;  %v1392_v50 = vsub.f32 %v4602_v0, %v1348_v45  ;;  %v1397_v51 = vsub.f32 %v4606_v2, %v1363_v46 }
 0x3e7   : > { %3818 = vpow2.f32 %v1413_v44 }
 0x3e8   : > { %v1409_v58 = vmul.f32 1.442695, %v1392_v50  ;;  %v1419_v48 = vmul.f32 1.442695, %v1397_v51 }
 0x3e9   : > { %v1357_v61 = vpop.xlane.xlu0 %1356  ;;  %v1366_v62 = vpop.xlane.xlu1 %1365 }
 0x3ea   : > { %3820 = vpow2.f32 %v1409_v58  ;;  %v1395_v63 = vsub.f32 %v4615_v6, %v1357_v61  ;;  %v1398_v57 = vsub.f32 %v4622_v9, %v1366_v62  ;;  %v4767_v62 = vpop.f32.mrf.mxu0 }
 0x3eb   : > { %3822 = vpow2.f32 %v1419_v48 }
 0x3ec   : > { %v1415_v60 = vmul.f32 1.442695, %v1395_v63  ;;  %v1421_v1 = vmul.f32 1.442695, %v1398_v57  ;;  %v816_v63 = vpop.f32.mrf.mxu0 }
 0x3ed   : > { %v1360_v3 = vpop.xlane.xlu1 %1359 }
 0x3ee   : > { %v1375_v4 = vpop.xlane.xlu0 %1374  ;;  %3824 = vpow2.f32 %v1415_v60  ;;  %v1396_v0 = vsub.f32 %v4629_v12, %v1360_v3  ;;  %v3415_v57 = vpop.f32.mrf.mxu0 }
 0x3ef   : > { %v1401_v2 = vsub.f32 %v4635_v17, %v1375_v4  ;;  %v4696_v5 = vpop.eup %3814  ;;  %3826 = vpow2.f32 %v1421_v1  ;;  %v1080_v60 = vpack.c.bf16 %v3415_v57, %v4767_v62 }
 0x3f0   : > { %v1417_v7 = vmul.f32 1.442695, %v1396_v0  ;;  %v1445_v6 = vsel %vm1087_vm0, %v4696_v5, 0.0  ;;  %v819_v1 = vpop.f32.mrf.mxu0 }
 0x3f1   : > { %v1427_v8 = vmul.f32 1.442695, %v1401_v2  ;;  %1446 = vadd.xlane.f32.xlu0 %v1445_v6  ;;  %v1079_v3 = vpack.c.bf16 %v819_v1, %v816_v63 }
 0x3f2   : > { %v1369_v10 = vpop.xlane.xlu0 %1368  ;;  %v1378_v9 = vpop.xlane.xlu1 %1377  ;;  %3828 = vpow2.f32 %v1417_v7 }
 0x3f3   : > { %v1399_v11 = vsub.f32 %v4642_v20, %v1369_v10  ;;  %v1402_v13 = vsub.f32 %v4649_v23, %v1378_v9  ;;  %v4702_v14 = vpop.eup %3816  ;;  %3830 = vpow2.f32 %v1427_v8  ;;  %3464 = vmatprep.mubr.msk.bf16.mxu1 %vm1087_vm0, %v1079_v3 }
 0x3f4   : > { %v4704_v12 = vpop.eup %3818  ;;  %v1439_v17 = vsel %vm1087_vm0, %v4702_v14, 0.0 }
 0x3f5   : > { %v1423_v15 = vmul.f32 1.442695, %v1399_v11  ;;  %v1429_v16 = vmul.f32 1.442695, %v1402_v13  ;;  %1440 = vadd.xlane.f32.xlu0 %v1439_v17  ;;  %v1448_v21 = vsel %vm1087_vm0, %v4704_v12, 0.0 }
 0x3f6   : > { %v1372_v18 = vpop.xlane.xlu1 %1371  ;;  %v1387_v19 = vpop.xlane.xlu0 %1386  ;;  %1449 = vadd.xlane.f32.xlu1 %v1448_v21 }
 0x3f7   : > { %3832 = vpow2.f32 %v1423_v15  ;;  %v1400_v20 = vsub.f32 %v4656_v26, %v1372_v18  ;;  %v1405_v22 = vsub.f32 %v4662_v29, %v1387_v19  ;;  %v4712_v23 = vpop.eup %3820  ;;  %v4773_v19 = vpop.f32.mrf.mxu0 }
 0x3f8   : > { %3834 = vpow2.f32 %v1429_v16  ;;  %v4714_v24 = vpop.eup %3822  ;;  %v1442_v28 = vsel %vm1087_vm0, %v4712_v23, 0.0 }
 0x3f9   : > { %v1425_v25 = vmul.f32 1.442695, %v1400_v20  ;;  %v1435_v27 = vmul.f32 1.442695, %v1405_v22  ;;  %v1457_v30 = vsel %vm1087_vm0, %v4714_v24, 0.0 }
 0x3fa   : > { %v1381_v31 = vpop.xlane.xlu0 %1380  ;;  %v1390_v59 = vpop.xlane.xlu1 %1389  ;;  %1458 = vadd.xlane.f32.xlu0 %v1457_v30  ;;  %1443 = vadd.xlane.f32.xlu1 %v1442_v28 }
 0x3fb   : > { %3836 = vpow2.f32 %v1425_v25  ;;  %v1403_v26 = vsub.f32 %v4669_v32, %v1381_v31  ;;  %v1406_v29 = vsub.f32 %v4676_v33, %v1390_v59  ;;  %v4722_v49 = vpop.eup %3824  ;;  %v832_v28 = vpop.f32.mrf.mxu0 }
 0x3fc   : > { %3838 = vpow2.f32 %v1435_v27  ;;  %v4724_v34 = vpop.eup %3826  ;;  %v1451_v56 = vsel %vm1087_vm0, %v4722_v49, 0.0 }
 0x3fd   : > { %v1431_v47 = vmul.f32 1.442695, %v1403_v26  ;;  %v1437_v35 = vmul.f32 1.442695, %v1406_v29  ;;  %v1460_v52 = vsel %vm1087_vm0, %v4724_v34, 0.0  ;;  %v3419_v29 = vpop.f32.mrf.mxu0 }
 0x3fe   : > { %v1384_v53 = vpop.xlane.xlu1 %1383  ;;  %1452 = vadd.xlane.f32.xlu0 %v1451_v56  ;;  %1461 = vadd.xlane.f32.xlu1 %v1460_v52 }
 0x3ff   : > { %3840 = vpow2.f32 %v1431_v47  ;;  %v1404_v32 = vsub.f32 %v4683_v55, %v1384_v53  ;;  %v4731_v33 = vpop.eup %3828 }
 0x400   : > { %3842 = vpow2.f32 %v1437_v35  ;;  %v4733_v54 = vpop.eup %3830  ;;  %v1454_v37 = vsel %vm1087_vm0, %v4731_v33, 0.0 }
 0x401   : > { %v1433_v36 = vmul.f32 1.442695, %v1404_v32  ;;  %v1469_v38 = vsel %vm1087_vm0, %v4733_v54, 0.0 }
 0x402   : > { %1470 = vadd.xlane.f32.xlu0 %v1469_v38  ;;  %1455 = vadd.xlane.f32.xlu1 %v1454_v37 }
 0x403   : > { %3844 = vpow2.f32 %v1433_v36 }
 0x404   : > { %v4739_v39 = vpop.eup %3832 }
 0x405   : > { %v4741_v40 = vpop.eup %3834  ;;  %v1463_v55 = vsel %vm1087_vm0, %v4739_v39, 0.0 }
 0x406   : > { %v1472_v41 = vsel %vm1087_vm0, %v4741_v40, 0.0  ;;  %1464 = vadd.xlane.f32.xlu0 %v1463_v55 }
 0x407   : > { %1473 = vadd.xlane.f32.xlu1 %v1472_v41 }
 0x408   : > { %v4747_v42 = vpop.eup %3836 }
 0x409   : > { %v4749_v43 = vpop.eup %3838  ;;  %v1466_v44 = vsel %vm1087_vm0, %v4747_v42, 0.0 }
 0x40a   : > { %v1481_v45 = vsel %vm1087_vm0, %v4749_v43, 0.0 }
 0x40b   : > { %1482 = vadd.xlane.f32.xlu0 %v1481_v45  ;;  %1467 = vadd.xlane.f32.xlu1 %v1466_v44 }
 0x40c   : > { %v4755_v46 = vpop.eup %3840 }
 0x40d   : > { %v4757_v50 = vpop.eup %3842  ;;  %v1475_v51 = vsel %vm1087_vm0, %v4755_v46, 0.0 }
 0x40e   : > { %v1484_v58 = vsel %vm1087_vm0, %v4757_v50, 0.0 }
 0x40f   : > { %1476 = vadd.xlane.f32.xlu0 %v1475_v51  ;;  %1485 = vadd.xlane.f32.xlu1 %v1484_v58 }
 0x410   : > { %v4763_v48 = vpop.eup %3844 }
 0x411   : > { %v1478_v61 = vsel %vm1087_vm0, %v4763_v48, 0.0 }
 0x413   : > { %1479 = vadd.xlane.f32.xlu1 %v1478_v61 }
 0x47a   : > { %v1447_v4 = vpop.xlane.xlu0 %1446 }
 0x47b   : > { %3846 = vrcp.f32 %v1447_v4 }
 0x47e   : > { %v1441_v0 = vpop.xlane.xlu0 %1440 }
 0x47f   : > { %v1450_v2 = vpop.xlane.xlu1 %1449 }
 0x480   : > { %3848 = vrcp.f32 %v1450_v2 }
 0x481   : > { %3850 = vrcp.f32 %v1441_v0 }
 0x483   : > { %v1444_v7 = vpop.xlane.xlu1 %1443  ;;  %v1459_v8 = vpop.xlane.xlu0 %1458 }
 0x484   : > { %3852 = vrcp.f32 %v1444_v7 }
 0x485   : > { %3854 = vrcp.f32 %v1459_v8 }
 0x487   : > { %v1462_v6 = vpop.xlane.xlu1 %1461  ;;  %v1453_v13 = vpop.xlane.xlu0 %1452 }
 0x488   : > { %3856 = vrcp.f32 %v1462_v6  ;;  %v3847_v10 = vpop.eup %3846 }
 0x489   : > { %v1505_v15 = vmul.f32 %v3847_v10, %v4696_v5 }
 0x48b   : > { %v1456_v9 = vpop.xlane.xlu1 %1455  ;;  %v1471_v30 = vpop.xlane.xlu0 %1470 }
 0x48c   : > { %3858 = vrcp.f32 %v1456_v9 }
 0x48d   : > { %v3849_v11 = vpop.eup %3848  ;;  %3860 = vrcp.f32 %v1453_v13 }
 0x48e   : > { %v1506_v16 = vmul.f32 %v3849_v11, %v4704_v12  ;;  %v3851_v17 = vpop.eup %3850 }
 0x48f   : > { %v1503_v25 = vmul.f32 %v3851_v17, %v4702_v14  ;;  %v1465_v53 = vpop.xlane.xlu0 %1464 }
 0x490   : > { %v1520_v18 = vpack.c.bf16 %v1506_v16, %v1505_v15  ;;  %v1474_v22 = vpop.xlane.xlu1 %1473 }
 0x491   : > { %v3853_v21 = vpop.eup %3852  ;;  %3862 = vrcp.f32 %v1474_v22 }
 0x492   : > { %3512 = vmatprep.subr.msk.bf16.mxu1 %vm1087_vm0, %v1520_v18  ;;  %v1537_v20 = vsel %vm1087_vm0, %v1520_v18, 0  ;;  %v1504_v27 = vmul.f32 %v3853_v21, %v4712_v23  ;;  %v3855_v5 = vpop.eup %3854  ;;  %3864 = vrcp.f32 %v1471_v30  ;;  %v835_v23 = vpop.f32.mrf.mxu0  ;;  %v3674_v30 = vld [vmem:[#allocation7 + $0x18] sm:$0xff]  }
 0x493   : > { %3461 = vmatpush3.bf16.xpose.msra.mxu1 %v1537_v20  ;;  %v1509_v26 = vmul.f32 %v3855_v5, %v4714_v24  ;;  %v1081_v36 = vpack.c.bf16 %v835_v23, %v832_v28  ;;  %v3672_v28 = vld [vmem:[#allocation7 + $0x28] sm:$0xff]   ;;  %v3673_v5 = vld [vmem:[#allocation7 + $0x20] sm:$0xff]  }
 0x494   : > { %v1519_v12 = vpack.c.bf16 %v1504_v27, %v1503_v25  ;;  %v1468_v56 = vpop.xlane.xlu1 %1467  ;;  %v3422_v24 = vpop.f32.mrf.mxu0 }
 0x495   : > { %v3857_v31 = vpop.eup %3856  ;;  %3866 = vrcp.f32 %v1468_v56 }
 0x496   : > { %3513 = vmatprep.subr.msk.bf16.mxu1 %vm1087_vm0, %v1519_v12  ;;  %v1510_v59 = vmul.f32 %v3857_v31, %v4724_v34  ;;  %v1534_v47 = vsel %vm1087_vm0, %v1519_v12, 0  ;;  %3868 = vrcp.f32 %v1465_v53  ;;  %v848_v44 = vpop.f32.mrf.mxu0  ;;  %v3675_v12 = vld [vmem:[#allocation7 + $0x10] sm:$0xff]   ;;  %v3676_v31 = vld [vmem:[#allocation7 + $0x8] sm:$0xff]  }
 0x498   : > { %v1522_v35 = vpack.c.bf16 %v1510_v59, %v1509_v26  ;;  %v1486_v41 = vpop.xlane.xlu1 %1485  ;;  %v3423_v58 = vpop.f32.mrf.mxu0  ;;  %v3677_v59 = vld [vmem:[#allocation7] sm:$0xff]  }
 0x499   : > { %v3859_v14 = vpop.eup %3858  ;;  %3870 = vrcp.f32 %v1486_v41  ;;  %v1084_v20 = vpack.c.bf16 %v3423_v58, %v3422_v24 }
 0x49a   : > { %v3861_v52 = vpop.eup %3860  ;;  %v1508_v32 = vmul.f32 %v3859_v14, %v4731_v33  ;;  %v1598_v37 = vsel %vm1087_vm0, %v1522_v35, 0  ;;  %v1483_v33 = vpop.xlane.xlu0 %1482 }
 0x49b   : > { %3463 = vmatpush3.bf16.xpose.msra.mxu1 %v1534_v47  ;;  %v1507_v34 = vmul.f32 %v3861_v52, %v4722_v49  ;;  %3872 = vrcp.f32 %v1483_v33 }
 0x49c   : > { %3514 = vmatprep.subr.msk.bf16.mxu1 %vm1087_vm0, %v1522_v35  ;;  %v1480_v57 = vpop.xlane.xlu1 %1479 }
 0x49d   : > { %v1521_v38 = vpack.c.bf16 %v1508_v32, %v1507_v34  ;;  %3874 = vrcp.f32 %v1480_v57  ;;  %v3678_v57 = vld [vmem:[#allocation8 + $0xe0] ss:$16 sps:$4 sm:$0xff]  }
 0x49e   : > { %v3863_v55 = vpop.eup %3862  ;;  %v1477_v3 = vpop.xlane.xlu0 %1476 }
 0x49f   : > { %v3865_v45 = vpop.eup %3864  ;;  %v1514_v51 = vmul.f32 %v3863_v55, %v4741_v40  ;;  %v1595_v61 = vsel %vm1087_vm0, %v1521_v38, 0  ;;  %3876 = vrcp.f32 %v1477_v3  ;;  %v1082_v40 = vpack.c.bf16 %v3419_v29, %v4773_v19  ;;  %v3683_v3 = vld [vmem:[#allocation8 + $0xec] ss:$16 sps:$4 sm:$0xff]  }
 0x4a0   : > { %v1513_v49 = vmul.f32 %v3865_v45, %v4733_v54 }
 0x4a2   : > { %3465 = vmatmul.mubr.msk.bf16.vlgmr.msra.gmra.mxu1 %vm1087_vm0, %v1080_v60  ;;  %v1524_v62 = vpack.c.bf16 %v1514_v51, %v1513_v49  ;;  %v3867_v63 = vpop.eup %3866  ;;  %v851_v60 = vpop.f32.mrf.mxu0 }
 0x4a3   : > { %3469 = vmatpush3.bf16.xpose.msra.mxu1 %v1598_v37  ;;  %3472 = vmatprep.mubr.msk.bf16.mxu1 %vm1087_vm0, %v1081_v36  ;;  %v3869_v1 = vpop.eup %3868  ;;  %v1512_v4 = vmul.f32 %v3867_v63, %v4747_v42  ;;  %v1083_v0 = vpack.c.bf16 %v851_v60, %v848_v44  ;;  %v3680_v60 = vld [vmem:[#allocation8 + $0xe4] ss:$16 sps:$4 sm:$0xff]  }
 0x4a4   : > { %3515 = vmatprep.subr.msk.bf16.mxu1 %vm1087_vm0, %v1521_v38  ;;  %v1511_v54 = vmul.f32 %v3869_v1, %v4739_v39  ;;  %v3426_v2 = vpop.f32.mrf.mxu0  ;;  %v1659_v7 = vsel %vm1087_vm0, %v1524_v62, 0  ;;  %v3681_v1 = vld [vmem:[#allocation8 + $0xe8] ss:$16 sps:$4 sm:$0xff]  }
 0x4a6   : > { %v1523_v8 = vpack.c.bf16 %v1512_v4, %v1511_v54  ;;  %v3871_v6 = vpop.eup %3870  ;;  %v864_v10 = vpop.f32.mrf.mxu0  ;;  %v3686_v4 = vld [vmem:[#allocation8 + $0xc4] ss:$16 sps:$4 sm:$0xff]   ;;  %v3687_v54 = vld [vmem:[#allocation8 + $0xc8] ss:$16 sps:$4 sm:$0xff]  }
 0x4a7   : > { %v1518_v9 = vmul.f32 %v3871_v6, %v4757_v50 }
 0x4a8   : > { %v3873_v42 = vpop.eup %3872  ;;  %v3427_v13 = vpop.f32.mrf.mxu0  ;;  %v1656_v39 = vsel %vm1087_vm0, %v1523_v8, 0 }
 0x4a9   : > { %v1517_v11 = vmul.f32 %v3873_v42, %v4749_v43  ;;  %v1086_v27 = vpack.c.bf16 %v3427_v13, %v3426_v2 }
 0x4aa   : > { %v3875_v16 = vpop.eup %3874  ;;  %v867_v17 = vpop.f32.mrf.mxu0 }
 0x4ab   : > { %3471 = vmatpush3.bf16.xpose.msra.mxu1 %v1595_v61  ;;  %v1526_v15 = vpack.c.bf16 %v1518_v9, %v1517_v11  ;;  %v1516_v19 = vmul.f32 %v3875_v16, %v4763_v48  ;;  %v1085_v21 = vpack.c.bf16 %v867_v17, %v864_v10  ;;  %v3670_v48 = vld [vmem:[#allocation7 + $0x38] sm:$0xff]   ;;  %v3887_v11 = vld [vmem:[%s4447_s15 + $0x8] sm:$0xff] }
 0x4ac   : > { %3516 = vmatprep.subr.msk.bf16.mxu1 %vm1087_vm0, %v1524_v62  ;;  %v3877_v18 = vpop.eup %3876  ;;  %3492 = vmatprep.subr.bf16.mxu0 %v3670_v48  ;;  %v3889_v17 = vld [vmem:[%s4447_s15 + $0x18] sm:$0xff] }
 0x4ad   : > { %v1515_v22 = vmul.f32 %v3877_v18, %v4755_v46  ;;  %v1720_v43 = vsel %vm1087_vm0, %v1526_v15, 0  ;;  %3493 = vmatpush3.bf16.msra.mxu0 %v3670_v48  ;;  %v3671_v46 = vld [vmem:[#allocation7 + $0x30] sm:$0xff]  }
 0x4ae   : > { %3494 = vmatprep.subr.bf16.mxu0 %v3671_v46  ;;  %v3696_v48 = vld [vmem:[#allocation8 + $0x80] ss:$16 sps:$4 sm:$0xff]  }
 0x4af   : > { %v1525_v50 = vpack.c.bf16 %v1516_v19, %v1515_v22  ;;  %v3695_v22 = vld [vmem:[#allocation8 + $0xac] ss:$16 sps:$4 sm:$0xff]  }
 0x4b1   : > { %v1717_v25 = vsel %vm1087_vm0, %v1525_v50, 0  ;;  %3495 = vmatpush3.bf16.msra.mxu0 %v3671_v46  ;;  %v3699_v46 = vld [vmem:[#allocation8 + $0x88] ss:$16 sps:$4 sm:$0xff]  }
 0x4b2   : > { %3473 = vmatmul.mubr.msk.bf16.vlgmr.msra.gmra.mxu1 %vm1087_vm0, %v1082_v40  ;;  %3496 = vmatprep.subr.bf16.mxu0 %v3672_v28  ;;  %v3684_v40 = vld [vmem:[#allocation8 + $0xc0] ss:$16 sps:$4 sm:$0xff]  }
 0x4b3   : > { %3477 = vmatpush3.bf16.xpose.msra.mxu1 %v1659_v7  ;;  %3480 = vmatprep.mubr.msk.bf16.mxu1 %vm1087_vm0, %v1083_v0  ;;  %v3689_v0 = vld [vmem:[#allocation8 + $0xcc] ss:$16 sps:$4 sm:$0xff]  }
 0x4b4   : > { %3517 = vmatprep.subr.msk.bf16.mxu1 %vm1087_vm0, %v1523_v8  ;;  %v3886_v8 = vld [vmem:[%s4447_s15] sm:$0xff] }
 0x4b5   : > { %3497 = vmatpush3.bf16.msra.mxu0 %v3672_v28  ;;  %v3704_v28 = vld [vmem:[#allocation8 + $0x64] ss:$16 sps:$4 sm:$0xff]  }
 0x4b6   : > { %3498 = vmatprep.subr.bf16.mxu0 %v3673_v5 }
 0x4b9   : > { %3499 = vmatpush3.bf16.msra.mxu0 %v3673_v5  ;;  %v3707_v5 = vld [vmem:[#allocation8 + $0x6c] ss:$16 sps:$4 sm:$0xff]  }
 0x4ba   : > { %3500 = vmatprep.subr.bf16.mxu0 %v3674_v30 }
 0x4bb   : > { %3479 = vmatpush3.bf16.xpose.msra.mxu1 %v1656_v39  ;;  %v3888_v39 = vld [vmem:[%s4447_s15 + $0x10] sm:$0xff] }
 0x4bc   : > { %3518 = vmatprep.subr.msk.bf16.mxu1 %vm1087_vm0, %v1526_v15 }
 0x4bd   : > { %3501 = vmatpush3.bf16.msra.mxu0 %v3674_v30  ;;  %v3702_v30 = vld [vmem:[#allocation8 + $0x60] ss:$16 sps:$4 sm:$0xff]  }
 0x4be   : > { %3502 = vmatprep.subr.bf16.mxu0 %v3675_v12 }
 0x4c1   : > { %3503 = vmatpush3.bf16.msra.mxu0 %v3675_v12  ;;  %v3705_v12 = vld [vmem:[#allocation8 + $0x68] ss:$16 sps:$4 sm:$0xff]  }
 0x4c2   : > { %3481 = vmatmul.mubr.msk.bf16.vlgmr.msra.gmra.mxu1 %vm1087_vm0, %v1084_v20  ;;  %3504 = vmatprep.subr.bf16.mxu0 %v3676_v31  ;;  %v3692_v20 = vld [vmem:[#allocation8 + $0xa4] ss:$16 sps:$4 sm:$0xff]  }
 0x4c3   : > { %3485 = vmatpush3.bf16.xpose.msra.mxu1 %v1720_v43  ;;  %3488 = vmatprep.mubr.msk.bf16.mxu1 %vm1087_vm0, %v1085_v21  ;;  %v3690_v43 = vld [vmem:[#allocation8 + $0xa0] ss:$16 sps:$4 sm:$0xff]  }
 0x4c4   : > { %3519 = vmatprep.subr.msk.bf16.mxu1 %vm1087_vm0, %v1525_v50  ;;  %v3693_v50 = vld [vmem:[#allocation8 + $0xa8] ss:$16 sps:$4 sm:$0xff]  }
 0x4c5   : > { %3505 = vmatpush3.bf16.msra.mxu0 %v3676_v31  ;;  %v3710_v31 = vld [vmem:[#allocation8 + $0x44] ss:$16 sps:$4 sm:$0xff]  }
 0x4c6   : > { %3506 = vmatprep.subr.bf16.mxu0 %v3677_v59 }
 0x4c9   : > { %3507 = vmatpush3.bf16.msra.mxu0 %v3677_v59  ;;  %v3713_v59 = vld [vmem:[#allocation8 + $0x4c] ss:$16 sps:$4 sm:$0xff]  }
 0x4ca   : > { %2187 = vmatprep.subr.bf16.mxu0 %v3683_v3  ;;  %v3726_v3 = vld [vmem:[#allocation10 + $0xe0] ss:$16 sps:$4 sm:$0xff]  }
 0x4cb   : > { %3487 = vmatpush3.bf16.xpose.msra.mxu1 %v1717_v25  ;;  %v3698_v25 = vld [vmem:[#allocation8 + $0x84] ss:$16 sps:$4 sm:$0xff]  }
 0x4cc   : > { %2134 = vmatprep.subr.bf16.mxu1 %v3680_v60 }
 0x4d2   : > { %3489 = vmatmul.mubr.msk.bf16.vlgmr.msra.gmra.mxu1 %vm1087_vm0, %v1086_v27  ;;  %v3701_v27 = vld [vmem:[#allocation8 + $0x8c] ss:$16 sps:$4 sm:$0xff]  }
 0x4d3   : > { %2135 = vmatpush1.bf16.msra.mxu1 %v3678_v57 }
 0x4d4   : > { %2136 = vmatprep.subr.bf16.mxu1 %v3686_v4  ;;  %v3729_v4 = vld [vmem:[#allocation10 + $0xe8] ss:$16 sps:$4 sm:$0xff]  }
 0x4d7   : > { %2137 = vmatpush1.bf16.msra.mxu1 %v3684_v40  ;;  %v3734_v40 = vld [vmem:[#allocation10 + $0xc4] ss:$16 sps:$4 sm:$0xff]  }
 0x4d8   : > { %2138 = vmatprep.subr.bf16.mxu1 %v3692_v20  ;;  %v3749_v20 = vld [vmem:[#allocation10 + $0x8c] ss:$16 sps:$4 sm:$0xff]  }
 0x4db   : > { %2139 = vmatpush1.bf16.msra.mxu1 %v3690_v43  ;;  %v3747_v43 = vld [vmem:[#allocation10 + $0x88] ss:$16 sps:$4 sm:$0xff]  }
 0x4dc   : > { %2140 = vmatprep.subr.bf16.mxu1 %v3698_v25  ;;  %v3755_v25 = vld [vmem:[#allocation10 + $0x6c] ss:$16 sps:$4 sm:$0xff]  }
 0x4df   : > { %2141 = vmatpush1.bf16.msra.mxu1 %v3696_v48  ;;  %v3753_v48 = vld [vmem:[#allocation10 + $0x68] ss:$16 sps:$4 sm:$0xff]  }
 0x4e0   : > { %2142 = vmatprep.subr.bf16.mxu1 %v3704_v28  ;;  %v3761_v28 = vld [vmem:[#allocation10 + $0x4c] ss:$16 sps:$4 sm:$0xff]  }
 0x4e3   : > { %2143 = vmatpush1.bf16.msra.mxu1 %v3702_v30  ;;  %v3759_v30 = vld [vmem:[#allocation10 + $0x48] ss:$16 sps:$4 sm:$0xff]  }
 0x4e4   : > { %2144 = vmatprep.subr.bf16.mxu1 %v3710_v31  ;;  %v3767_v31 = vld [vmem:[#allocation10 + $0x2c] ss:$16 sps:$4 sm:$0xff]  }
 0x562   : > { %v3466_v26 = vpop.f32.mrf.mxu1 }
 0x564   : > { %v1573_v29 = vpop.f32.mrf.mxu1 }
 0x566   : > { %v3467_v47 = vpop.f32.mrf.mxu1 }
 0x567   : > { %v1772_v56 = vpack.c.bf16 %v3467_v47, %v3466_v26  ;;  %v3708_v26 = vld [vmem:[#allocation8 + $0x40] ss:$16 sps:$4 sm:$0xff]  }
 0x568   : > { %v1576_v35 = vpop.f32.mrf.mxu1  ;;  %2145 = vmatpush1.bf16.msra.mxu1 %v3708_v26  ;;  %v3714_v47 = vld [vmem:[#allocation8 + $0x20] ss:$16 sps:$4 sm:$0xff]   ;;  %v3765_v26 = vld [vmem:[#allocation10 + $0x28] ss:$16 sps:$4 sm:$0xff]  }
 0x569   : > { %v1771_v14 = vpack.c.bf16 %v1576_v35, %v1573_v29  ;;  %v3711_v29 = vld [vmem:[#allocation8 + $0x48] ss:$16 sps:$4 sm:$0xff]   ;;  %v3716_v35 = vld [vmem:[#allocation8 + $0x24] ss:$16 sps:$4 sm:$0xff]  }
 0x56a   : > { %2146 = vmatprep.subr.bf16.mxu1 %v3716_v35  ;;  %v3768_v35 = vld [vmem:[#allocation10] ss:$16 sps:$4 sm:$0xff]  }
 0x56b   : > { %1779 = vxpose.xlu0.c.b16.start [1/8] (narrow) %v1771_v14, 32  ;;  %v3717_v14 = vld [vmem:[#allocation8 + $0x28] ss:$16 sps:$4 sm:$0xff]  }
 0x56c   : > { %2147 = vmatpush1.bf16.msra.mxu1 %v3714_v47  ;;  %v3773_v47 = vld [vmem:[#allocation10 + $0xc] ss:$16 sps:$4 sm:$0xff]  }
 0x56f   : > { %1780 = vxpose.xlu0.c.b16.cont [2/8] (narrow) %v1772_v56, 32  ;;  %v3719_v56 = vld [vmem:[#allocation8 + $0x2c] ss:$16 sps:$4 sm:$0xff]  }
 0x572   : > { %v3474_v23 = vpop.f32.mrf.mxu1 }
 0x574   : > { %v1634_v52 = vpop.f32.mrf.mxu1 }
 0x576   : > { %v3475_v53 = vpop.f32.mrf.mxu1 }
 0x577   : > { %v1774_v34 = vpack.c.bf16 %v3475_v53, %v3474_v23  ;;  %v3722_v23 = vld [vmem:[#allocation8 + $0x4] ss:$16 sps:$4 sm:$0xff]   ;;  %v3720_v53 = vld [vmem:[#allocation8] ss:$16 sps:$4 sm:$0xff]  }
 0x578   : > { %v1637_v32 = vpop.f32.mrf.mxu1  ;;  %2148 = vmatprep.subr.bf16.mxu1 %v3722_v23  ;;  %v3775_v23 = vld [vmem:[#allocation11 + $0xf8] sm:$0xff]  }
 0x579   : > { %v1773_v36 = vpack.c.bf16 %v1637_v32, %v1634_v52  ;;  %v3725_v52 = vld [vmem:[#allocation8 + $0xc] ss:$16 sps:$4 sm:$0xff]   ;;  %v3723_v32 = vld [vmem:[#allocation8 + $0x8] ss:$16 sps:$4 sm:$0xff]   ;;  %2149 = vmatpush1.bf16.msra.mxu1 %v3720_v53 }
 0x57a   : > { %v3777_v53 = vld [vmem:[#allocation11 + $0xb8] sm:$0xff]  }
 0x57b   : > { %1781 = vxpose.xlu0.c.b16.cont [3/8] (narrow) %v1773_v36, 32  ;;  %v3728_v36 = vld [vmem:[#allocation10 + $0xe4] ss:$16 sps:$4 sm:$0xff]  }
 0x57c   : > { %2432 = vmatprep.subr.bf16.mxu1 %v3728_v36  ;;  %v3779_v36 = vld [vmem:[#allocation11 + $0xf0] sm:$0xff]  }
 0x57f   : > { %1782 = vxpose.xlu0.c.b16.cont [4/8] (narrow) %v1774_v34, 32  ;;  %v4196_v34 = vmov 0  }
 0x580   : > { %2166 = vmatprep.mubr.bf16.mxu1 %v4196_v34 }
 0x582   : > { %v3482_v24 = vpop.f32.mrf.mxu1 }
 0x584   : > { %v1695_v37 = vpop.f32.mrf.mxu1 }
 0x586   : > { %v3483_v38 = vpop.f32.mrf.mxu1 }
 0x587   : > { %v1776_v44 = vpack.c.bf16 %v3483_v38, %v3482_v24  ;;  %v3731_v24 = vld [vmem:[#allocation10 + $0xec] ss:$16 sps:$4 sm:$0xff]  }
 0x588   : > { %v1698_v55 = vpop.f32.mrf.mxu1 }
 0x589   : > { %v1775_v41 = vpack.c.bf16 %v1698_v55, %v1695_v37 }
 0x58b   : > { %1783 = vxpose.xlu0.c.b16.cont [5/8] (narrow) %v1775_v41, 32 }
 0x58f   : > { %1784 = vxpose.xlu0.c.b16.cont [6/8] (narrow) %v1776_v44, 32 }
 0x592   : > { %v3490_v45 = vpop.f32.mrf.mxu1 }
 0x594   : > { %v1756_v33 = vpop.f32.mrf.mxu1 }
 0x596   : > { %v3491_v51 = vpop.f32.mrf.mxu1 }
 0x597   : > { %v1778_v61 = vpack.c.bf16 %v3491_v51, %v3490_v45 }
 0x598   : > { %v1759_v49 = vpop.f32.mrf.mxu1 }
 0x599   : > { %v1777_v58 = vpack.c.bf16 %v1759_v49, %v1756_v33 }
 0x59b   : > { %1785 = vxpose.xlu0.c.b16.cont [7/8] (narrow) %v1777_v58, 32 }
 0x59f   : > { %1786 = vxpose.xlu0.c.b16.end [8/8] (narrow) %v1778_v61, 32 }
 0x5e5   : > { %v1787_v62 = vpop.trf.xlu0 }
 0x5e6   : > { %3508 = vmatprep.mubr.bf16.mxu0 %v1787_v62 }
 0x5e9   : > { %v1788_v63 = vpop.trf.xlu0 }
 0x5ea   : > { %3509 = vmatmul.mubr.bf16.vlgmr.msra.gmra.mxu0 %v1788_v63 }
 0x5eb   : > { %2188 = vmatpush1.bf16.msra.mxu0 %v3681_v1  ;;  %2219 = vmatprep.mubr.bf16.mxu0 %v4196_v34 }
 0x5ec   : > { %2189 = vmatprep.subr.bf16.mxu0 %v3689_v0 }
 0x5ef   : > { %2190 = vmatpush1.bf16.msra.mxu0 %v3687_v54  ;;  %v3737_v54 = vld [vmem:[#allocation10 + $0xcc] ss:$16 sps:$4 sm:$0xff]  }
 0x5f0   : > { %2191 = vmatprep.subr.bf16.mxu0 %v3695_v22  ;;  %v3744_v22 = vld [vmem:[#allocation10 + $0x80] ss:$16 sps:$4 sm:$0xff]  }
 0x5f3   : > { %2192 = vmatpush1.bf16.msra.mxu0 %v3693_v50  ;;  %v3752_v50 = vld [vmem:[#allocation10 + $0x64] ss:$16 sps:$4 sm:$0xff]  }
 0x5f4   : > { %2193 = vmatprep.subr.bf16.mxu0 %v3701_v27  ;;  %v3750_v27 = vld [vmem:[#allocation10 + $0x60] ss:$16 sps:$4 sm:$0xff]  }
 0x5f7   : > { %2194 = vmatpush1.bf16.msra.mxu0 %v3699_v46  ;;  %v3758_v46 = vld [vmem:[#allocation10 + $0x44] ss:$16 sps:$4 sm:$0xff]  }
 0x5f8   : > { %2195 = vmatprep.subr.bf16.mxu0 %v3707_v5  ;;  %v3756_v5 = vld [vmem:[#allocation10 + $0x40] ss:$16 sps:$4 sm:$0xff]  }
 0x5fb   : > { %2196 = vmatpush1.bf16.msra.mxu0 %v3705_v12  ;;  %v3764_v12 = vld [vmem:[#allocation10 + $0x24] ss:$16 sps:$4 sm:$0xff]  }
 0x5fc   : > { %2197 = vmatprep.subr.bf16.mxu0 %v3713_v59  ;;  %v3762_v59 = vld [vmem:[#allocation10 + $0x20] ss:$16 sps:$4 sm:$0xff]  }
 0x5ff   : > { %2198 = vmatpush1.bf16.msra.mxu0 %v3711_v29  ;;  %v3770_v29 = vld [vmem:[#allocation10 + $0x4] ss:$16 sps:$4 sm:$0xff]  }
 0x600   : > { %2199 = vmatprep.subr.bf16.mxu0 %v3719_v56  ;;  %v3774_v56 = vld [vmem:[#allocation11 + $0x78] sm:$0xff]  }
 0x603   : > { %2200 = vmatpush1.bf16.msra.mxu0 %v3717_v14  ;;  %v3771_v14 = vld [vmem:[#allocation10 + $0x8] ss:$16 sps:$4 sm:$0xff]  }
 0x604   : > { %2201 = vmatprep.subr.bf16.mxu0 %v3725_v52  ;;  %v3776_v52 = vld [vmem:[#allocation11 + $0x38] sm:$0xff]  }
 0x607   : > { %2202 = vmatpush1.bf16.msra.mxu0 %v3723_v32  ;;  %v3778_v32 = vld [vmem:[#allocation11 + $0x70] sm:$0xff]  }
 0x608   : > { %2485 = vmatprep.subr.bf16.mxu0 %v3731_v24  ;;  %v3780_v24 = vld [vmem:[#allocation11 + $0x30] sm:$0xff]  }
 0x6aa   : > { %v3510_v2 = vpop.f32.mrf.mxu0 }
 0x6ab   : > { %v4822_v15 = vadd.f32 %v3888_v39, %v3510_v2 }
 0x6ac   : > { %v1893_v7 = vpop.f32.mrf.mxu0 }
 0x6ad   : > { %v4814_v6 = vadd.f32 %v3886_v8, %v1893_v7  ;;  %v1914_v19 = vmul.f32 %v4822_v15, %v4822_v15  ;;  %v3732_v7 = vld [vmem:[#allocation10 + $0xc0] ss:$16 sps:$4 sm:$0xff]   ;;  %v3735_v8 = vld [vmem:[#allocation10 + $0xc8] ss:$16 sps:$4 sm:$0xff]  }
 0x6ae   : > { %v3511_v10 = vpop.f32.mrf.mxu0 }
 0x6af   : > { %v1912_v42 = vmul.f32 %v4814_v6, %v4814_v6  ;;  %v4827_v18 = vadd.f32 %v3889_v17, %v3511_v10  ;;  %v3740_v10 = vld [vmem:[#allocation10 + $0xa4] ss:$16 sps:$4 sm:$0xff]   ;;  %v3741_v17 = vld [vmem:[#allocation10 + $0xa8] ss:$16 sps:$4 sm:$0xff]  }
 0x6b0   : > { %v1896_v9 = vpop.f32.mrf.mxu0 }
 0x6b1   : > { %v4819_v13 = vadd.f32 %v3887_v11, %v1896_v9  ;;  %1916 = vadd.xlane.f32.xlu1 %v1912_v42  ;;  %v1915_v21 = vmul.f32 %v4827_v18, %v4827_v18  ;;  %v3743_v42 = vld [vmem:[#allocation10 + $0xac] ss:$16 sps:$4 sm:$0xff]  }
 0x6b3   : > { %v1913_v16 = vmul.f32 %v4819_v13, %v4819_v13 }
 0x6b5   : > { %1918 = vadd.xlane.f32.xlu1 %v1913_v16  ;;  %v3738_v16 = vld [vmem:[#allocation10 + $0xa0] ss:$16 sps:$4 sm:$0xff]  }
 0x6b9   : > { %1920 = vadd.xlane.f32.xlu1 %v1914_v19 }
 0x6bd   : > { %1922 = vadd.xlane.f32.xlu1 %v1915_v21  ;;  %v3746_v21 = vld [vmem:[#allocation10 + $0x84] ss:$16 sps:$4 sm:$0xff]  }
 0x73a   : > { %v1917_v37 = vpop.xlane.xlu1 %1916 }
 0x73b   : > { %v1924_v38 = vmul.f32 0.0078125, %v1917_v37  ;;  %v3781_v37 = vld [vmem:[#allocation11 + $0xb0] sm:$0xff]  }
 0x73d   : > { %v1928_v55 = vadd.f32 1e-08, %v1924_v38  ;;  %v3782_v38 = vld [vmem:[#allocation11 + $0x68] sm:$0xff]  }
 0x73e   : > { %v1919_v41 = vpop.xlane.xlu1 %1918 }
 0x73f   : > { %v1925_v44 = vmul.f32 0.0078125, %v1919_v41  ;;  %3878 = vrsqrt.f32 %v1928_v55  ;;  %v3783_v55 = vld [vmem:[#allocation11 + $0xe8] sm:$0xff]  }
 0x740   : > { %v3785_v41 = vld [vmem:[#allocation11 + $0xa8] sm:$0xff]  }
 0x741   : > { %v1929_v45 = vadd.f32 1e-08, %v1925_v44  ;;  %v3786_v44 = vld [vmem:[#allocation11 + $0x60] sm:$0xff]  }
 0x742   : > { %v1921_v33 = vpop.xlane.xlu1 %1920 }
 0x743   : > { %3880 = vrsqrt.f32 %v1929_v45  ;;  %v1926_v51 = vmul.f32 0.0078125, %v1921_v33  ;;  %v3787_v45 = vld [vmem:[#allocation11 + $0xe0] sm:$0xff]  }
 0x744   : > { %v3788_v33 = vld [vmem:[#allocation11 + $0x20] sm:$0xff]  }
 0x745   : > { %v1930_v49 = vadd.f32 1e-08, %v1926_v51  ;;  %v3789_v51 = vld [vmem:[#allocation11 + $0xa0] sm:$0xff]  }
 0x746   : > { %v1923_v58 = vpop.xlane.xlu1 %1922 }
 0x747   : > { %v1927_v61 = vmul.f32 0.0078125, %v1923_v58  ;;  %3882 = vrsqrt.f32 %v1930_v49  ;;  %v3790_v49 = vld [vmem:[#allocation11 + $0x58] sm:$0xff]  }
 0x748   : > { %v3791_v58 = vld [vmem:[#allocation11 + $0xd8] sm:$0xff]  }
 0x749   : > { %v1931_v62 = vadd.f32 1e-08, %v1927_v61  ;;  %v3792_v61 = vld [vmem:[#allocation11 + $0x18] sm:$0xff]  }
 0x74b   : > { %3884 = vrsqrt.f32 %v1931_v62  ;;  %v3793_v62 = vld [vmem:[#allocation11 + $0x98] sm:$0xff]  }
 0x74c   : > { %v3879_v63 = vpop.eup %3878 }
 0x74d   : > { %v1936_v60 = vmul.f32 %v3879_v63, %v4814_v6  ;;  %v3794_v63 = vld [vmem:[#allocation11 + $0x50] sm:$0xff]  }
 0x750   : > { %v3881_v57 = vpop.eup %3880 }
 0x751   : > { %v1937_v1 = vmul.f32 %v3881_v57, %v4819_v13  ;;  %v3795_v57 = vld [vmem:[#allocation11 + $0xd0] sm:$0xff]  }
 0x753   : > { %v4837_v0 = vpack.c.bf16 %v1937_v1, %v1936_v60  ;;  %v3796_v60 = vld [vmem:[#allocation11 + $0x10] sm:$0xff]  }
 0x754   : > { %v3883_v2 = vpop.eup %3882  ;;  %v3797_v1 = vld [vmem:[#allocation11 + $0x90] sm:$0xff]  }
 0x755   : > { %2167 = vmatmul.mubr.bf16.vlgmr.msra.gmra.mxu1 %v4837_v0  ;;  %2220 = vmatmul.mubr.bf16.vlgmr.msra.gmra.mxu0 %v4837_v0  ;;  %v1938_v11 = vmul.f32 %v3883_v2, %v4822_v15  ;;  %v3803_v2 = vld [vmem:[#allocation11 + $0xc0] sm:$0xff]  }
 0x756   : > { %2433 = vmatpush1.bf16.msra.mxu1 %v3726_v3  ;;  %2486 = vmatpush1.bf16.msra.mxu0 %v3729_v4  ;;  %v3798_v3 = vld [vmem:[#allocation11 + $0x48] sm:$0xff]  }
 0x757   : > { %2434 = vmatprep.subr.bf16.mxu1 %v3734_v40  ;;  %2487 = vmatprep.subr.bf16.mxu0 %v3737_v54  ;;  %v3799_v4 = vld [vmem:[#allocation11 + $0xc8] sm:$0xff]   ;;  %v3802_v54 = vld [vmem:[#allocation11 + $0x40] sm:$0xff]  }
 0x758   : > { %v3885_v9 = vpop.eup %3884  ;;  %2176 = vmatprep.mubr.bf16.mxu1 %v4196_v34  ;;  %2229 = vmatprep.mubr.bf16.mxu0 %v4196_v34  ;;  %v3801_v40 = vld [vmem:[#allocation11 + $0x88] sm:$0xff]  }
 0x759   : > { %v1939_v39 = vmul.f32 %v3885_v9, %v4827_v18 }
 0x75a   : > { %2435 = vmatpush1.bf16.msra.mxu1 %v3732_v7  ;;  %2488 = vmatpush1.bf16.msra.mxu0 %v3735_v8  ;;  %v3804_v7 = vld [vmem:[#allocation11] sm:$0xff]  }
 0x75b   : > { %2436 = vmatprep.subr.bf16.mxu1 %v3740_v10  ;;  %2489 = vmatprep.subr.bf16.mxu0 %v3743_v42  ;;  %v1941_v19 = vpack.c.bf16 %v1939_v39, %v1938_v11  ;;  %v3805_v8 = vld [vmem:[#allocation11 + $0x80] sm:$0xff]  }
 0x75d   : > { %2177 = vmatmul.mubr.bf16.gmra.mxu1 %v1941_v19  ;;  %2230 = vmatmul.mubr.bf16.gmra.mxu0 %v1941_v19 }
 0x75e   : > { %2437 = vmatpush1.bf16.msra.mxu1 %v3738_v16  ;;  %2490 = vmatpush1.bf16.msra.mxu0 %v3741_v17 }
 0x75f   : > { %2438 = vmatprep.subr.bf16.mxu1 %v3746_v21  ;;  %2491 = vmatprep.subr.bf16.mxu0 %v3749_v20 }
 0x760   : > { %2464 = vmatprep.mubr.bf16.mxu1 %v4196_v34  ;;  %2517 = vmatprep.mubr.bf16.mxu0 %v4196_v34 }
 0x762   : > { %2439 = vmatpush1.bf16.msra.mxu1 %v3744_v22  ;;  %2492 = vmatpush1.bf16.msra.mxu0 %v3747_v43 }
 0x763   : > { %2440 = vmatprep.subr.bf16.mxu1 %v3752_v50  ;;  %2493 = vmatprep.subr.bf16.mxu0 %v3755_v25 }
 0x766   : > { %2441 = vmatpush1.bf16.msra.mxu1 %v3750_v27  ;;  %2494 = vmatpush1.bf16.msra.mxu0 %v3753_v48 }
 0x767   : > { %2442 = vmatprep.subr.bf16.mxu1 %v3758_v46  ;;  %2495 = vmatprep.subr.bf16.mxu0 %v3761_v28 }
 0x76a   : > { %2443 = vmatpush1.bf16.msra.mxu1 %v3756_v5  ;;  %2496 = vmatpush1.bf16.msra.mxu0 %v3759_v30 }
 0x76b   : > { %2444 = vmatprep.subr.bf16.mxu1 %v3764_v12  ;;  %2497 = vmatprep.subr.bf16.mxu0 %v3767_v31 }
 0x76e   : > { %2445 = vmatpush1.bf16.msra.mxu1 %v3762_v59  ;;  %2498 = vmatpush1.bf16.msra.mxu0 %v3765_v26 }
 0x76f   : > { %2446 = vmatprep.subr.bf16.mxu1 %v3770_v29  ;;  %2499 = vmatprep.subr.bf16.mxu0 %v3773_v47 }
 0x772   : > { %2447 = vmatpush1.bf16.msra.mxu1 %v3768_v35  ;;  %2500 = vmatpush1.bf16.msra.mxu0 %v3771_v14 }
 0x773   : > { %3320 = vmatprep.subr.bf16.mxu1 %v3774_v56  ;;  %3348 = vmatprep.subr.bf16.mxu0 %v3775_v23 }
 0x775   : > { %2465 = vmatmul.mubr.bf16.vlgmr.msra.gmra.mxu1 %v4837_v0  ;;  %2518 = vmatmul.mubr.bf16.vlgmr.msra.gmra.mxu0 %v4837_v0  ;;  %v3800_v0 = vld [vmem:[#allocation11 + $0x8] sm:$0xff]  }
 0x776   : > { %2474 = vmatprep.mubr.bf16.mxu1 %v4196_v34  ;;  %2527 = vmatprep.mubr.bf16.mxu0 %v4196_v34  ;;  %v3784_v34 = vld [vmem:[#allocation11 + $0x28] sm:$0xff]  }
 0x777   : > { %3321 = vmatpush3.bf16.msra.mxu1 %v3776_v52  ;;  %3349 = vmatpush3.bf16.msra.mxu0 %v3777_v53 }
 0x778   : > { %3322 = vmatprep.subr.bf16.mxu1 %v3778_v32  ;;  %3350 = vmatprep.subr.bf16.mxu0 %v3779_v36 }
 0x77b   : > { %3323 = vmatpush3.bf16.msra.mxu1 %v3780_v24  ;;  %3351 = vmatpush3.bf16.msra.mxu0 %v3781_v37 }
 0x77c   : > { %3324 = vmatprep.subr.bf16.mxu1 %v3782_v38  ;;  %3352 = vmatprep.subr.bf16.mxu0 %v3783_v55 }
 0x77d   : > { %2475 = vmatmul.mubr.bf16.gmra.mxu1 %v1941_v19  ;;  %2528 = vmatmul.mubr.bf16.gmra.mxu0 %v1941_v19 }
 0x77f   : > { %3325 = vmatpush3.bf16.msra.mxu1 %v3784_v34  ;;  %3353 = vmatpush3.bf16.msra.mxu0 %v3785_v41 }
 0x780   : > { %3326 = vmatprep.subr.bf16.mxu1 %v3786_v44  ;;  %3354 = vmatprep.subr.bf16.mxu0 %v3787_v45 }
 0x783   : > { %3327 = vmatpush3.bf16.msra.mxu1 %v3788_v33  ;;  %3355 = vmatpush3.bf16.msra.mxu0 %v3789_v51 }
 0x784   : > { %3328 = vmatprep.subr.bf16.mxu1 %v3790_v49  ;;  %3356 = vmatprep.subr.bf16.mxu0 %v3791_v58 }
 0x787   : > { %3329 = vmatpush3.bf16.msra.mxu1 %v3792_v61  ;;  %3357 = vmatpush3.bf16.msra.mxu0 %v3793_v62 }
 0x788   : > { %3330 = vmatprep.subr.bf16.mxu1 %v3794_v63  ;;  %3358 = vmatprep.subr.bf16.mxu0 %v3795_v57 }
 0x78b   : > { %3331 = vmatpush3.bf16.msra.mxu1 %v3796_v60  ;;  %3359 = vmatpush3.bf16.msra.mxu0 %v3797_v1 }
 0x78c   : > { %3332 = vmatprep.subr.bf16.mxu1 %v3798_v3  ;;  %3360 = vmatprep.subr.bf16.mxu0 %v3799_v4 }
 0x78f   : > { %3333 = vmatpush3.bf16.msra.mxu1 %v3800_v0  ;;  %3361 = vmatpush3.bf16.msra.mxu0 %v3801_v40 }
 0x790   : > { %3334 = vmatprep.subr.bf16.mxu1 %v3802_v54  ;;  %3362 = vmatprep.subr.bf16.mxu0 %v3803_v2 }
 0x793   : > { %3335 = vmatpush3.bf16.msra.mxu1 %v3804_v7  ;;  %3363 = vmatpush3.bf16.msra.mxu0 %v3805_v8 }
 0x815   : > { %v2168_v10 = vpop.f32.mrf.mxu1  ;;  %v2221_v42 = vpop.f32.mrf.mxu0 }
 0x817   : > { %v2170_v9 = vpop.f32.mrf.mxu1  ;;  %v2223_v11 = vpop.f32.mrf.mxu0 }
 0x819   : > { %v2172_v39 = vpop.f32.mrf.mxu1  ;;  %v2225_v16 = vpop.f32.mrf.mxu0 }
 0x81b   : > { %v2174_v17 = vpop.f32.mrf.mxu1  ;;  %v2227_v19 = vpop.f32.mrf.mxu0 }
 0x81d   : > { %v2178_v21 = vpop.f32.mrf.mxu1  ;;  %v2231_v20 = vpop.f32.mrf.mxu0 }
 0x81f   : > { %v2180_v22 = vpop.f32.mrf.mxu1  ;;  %v2233_v43 = vpop.f32.mrf.mxu0 }
 0x821   : > { %v2182_v50 = vpop.f32.mrf.mxu1  ;;  %v2235_v25 = vpop.f32.mrf.mxu0 }
 0x823   : > { %v2184_v27 = vpop.f32.mrf.mxu1  ;;  %v2237_v48 = vpop.f32.mrf.mxu0 }
 0x835   : > { %v2466_v46 = vpop.f32.mrf.mxu1  ;;  %v2519_v28 = vpop.f32.mrf.mxu0 }
 0x836   : > { %v2538_v52 = vmul.f32 %v2466_v46, %v2168_v10  ;;  %v2540_v53 = vmul.f32 %v2519_v28, %v2221_v42 }
 0x837   : > { %v2468_v5 = vpop.f32.mrf.mxu1  ;;  %v2521_v30 = vpop.f32.mrf.mxu0 }
 0x838   : > { %v2539_v35 = vmul.f32 %v2468_v5, %v2170_v9  ;;  %v2541_v14 = vmul.f32 %v2521_v30, %v2223_v11 }
 0x839   : > { %v2470_v12 = vpop.f32.mrf.mxu1  ;;  %v2523_v31 = vpop.f32.mrf.mxu0 }
 0x83a   : > { %v2542_v59 = vmul.f32 %v2470_v12, %v2172_v39  ;;  %v2544_v26 = vmul.f32 %v2523_v31, %v2225_v16 }
 0x83b   : > { %v2472_v29 = vpop.f32.mrf.mxu1  ;;  %v2525_v47 = vpop.f32.mrf.mxu0 }
 0x83c   : > { %v2543_v56 = vmul.f32 %v2472_v29, %v2174_v17  ;;  %v2545_v23 = vmul.f32 %v2525_v47, %v2227_v19  ;;  %v2554_v38 = vpack.c.bf16 %v2542_v59, %v2538_v52  ;;  %v2556_v55 = vpack.c.bf16 %v2544_v26, %v2540_v53 }
 0x83d   : > { %v2476_v32 = vpop.f32.mrf.mxu1  ;;  %v2529_v36 = vpop.f32.mrf.mxu0 }
 0x83e   : > { %v2555_v24 = vpack.c.bf16 %v2543_v56, %v2539_v35  ;;  %v2557_v37 = vpack.c.bf16 %v2545_v23, %v2541_v14  ;;  %v2546_v60 = vmul.f32 %v2476_v32, %v2178_v21  ;;  %v2548_v1 = vmul.f32 %v2529_v36, %v2231_v20 }
 0x83f   : > { %v2478_v34 = vpop.f32.mrf.mxu1  ;;  %v2531_v41 = vpop.f32.mrf.mxu0 }
 0x840   : > { %2850 = vmatprep.mubr.bf16.mxu1 %v2555_v24  ;;  %2899 = vmatprep.mubr.bf16.mxu0 %v2557_v37  ;;  %v2547_v61 = vmul.f32 %v2478_v34, %v2180_v22  ;;  %v2549_v62 = vmul.f32 %v2531_v41, %v2233_v43 }
 0x841   : > { %v2480_v44 = vpop.f32.mrf.mxu1  ;;  %v2533_v45 = vpop.f32.mrf.mxu0  ;;  %2851 = vmatmul.mubr.bf16.vlgmr.msra.gmra.mxu1 %v2554_v38  ;;  %2900 = vmatmul.mubr.bf16.vlgmr.msra.gmra.mxu0 %v2556_v55 }
 0x842   : > { %v2550_v33 = vmul.f32 %v2480_v44, %v2182_v50  ;;  %v2552_v51 = vmul.f32 %v2533_v45, %v2235_v25 }
 0x843   : > { %v2482_v49 = vpop.f32.mrf.mxu1  ;;  %v2535_v58 = vpop.f32.mrf.mxu0 }
 0x844   : > { %v2551_v63 = vmul.f32 %v2482_v49, %v2184_v27  ;;  %v2553_v57 = vmul.f32 %v2535_v58, %v2237_v48  ;;  %v2558_v0 = vpack.c.bf16 %v2550_v33, %v2546_v60  ;;  %v2560_v40 = vpack.c.bf16 %v2552_v51, %v2548_v1 }
 0x846   : > { %v2559_v3 = vpack.c.bf16 %v2551_v63, %v2547_v61  ;;  %v2561_v4 = vpack.c.bf16 %v2553_v57, %v2549_v62 }
 0x848   : > { %2858 = vmatprep.mubr.bf16.mxu1 %v2559_v3  ;;  %2907 = vmatprep.mubr.bf16.mxu0 %v2561_v4 }
 0x849   : > { %2859 = vmatmul.mubr.bf16.gmra.mxu1 %v2558_v0  ;;  %2908 = vmatmul.mubr.bf16.gmra.mxu0 %v2560_v40 }
 0x901   : > { %v3336_v54 = vpop.f32.mrf.mxu1  ;;  %v3364_v2 = vpop.f32.mrf.mxu0 }
 0x903   : > { %v3337_v7 = vpop.f32.mrf.mxu1  ;;  %v3365_v8 = vpop.f32.mrf.mxu0 }
 0x904   : > { %v3338_v10 = vadd.f32 %v3337_v7, %v3336_v54  ;;  %v3366_v42 = vadd.f32 %v3365_v8, %v3364_v2 }
 0x905   : > { %v3339_v9 = vpop.f32.mrf.mxu1  ;;  %v3367_v11 = vpop.f32.mrf.mxu0 }
 0x906   : > { %v2902_v39 = vadd.f32 %v3366_v42, %v3338_v10 }
 0x907   : > { %v3340_v16 = vpop.f32.mrf.mxu1  ;;  %v3368_v17 = vpop.f32.mrf.mxu0 }
 0x908   : > { %v2916_v19 = vadd.f32 %v2902_v39, %v4814_v6  ;;  %v3341_v21 = vadd.f32 %v3340_v16, %v3339_v9  ;;  %v3369_v20 = vadd.f32 %v3368_v17, %v3367_v11 }
 0x909   : > { %v3342_v22 = vpop.f32.mrf.mxu1  ;;  %v3370_v43 = vpop.f32.mrf.mxu0 }
 0x90a   : > { %2920 = vst [vmem:[%s425_s12] sm:$0xff] %v2916_v19  ;;  %v2905_v50 = vadd.f32 %v3369_v20, %v3341_v21 }
 0x90b   : > { %v3343_v25 = vpop.f32.mrf.mxu1  ;;  %v3371_v27 = vpop.f32.mrf.mxu0 }
 0x90c   : > { %v2917_v48 = vadd.f32 %v2905_v50, %v4819_v13  ;;  %v3344_v46 = vadd.f32 %v3343_v25, %v3342_v22  ;;  %v3372_v28 = vadd.f32 %v3371_v27, %v3370_v43 }
 0x90d   : > { %v3345_v5 = vpop.f32.mrf.mxu1  ;;  %v3373_v30 = vpop.f32.mrf.mxu0 }
 0x90e   : > { %2921 = vst [vmem:[%s425_s12 + $0x8] sm:$0xff] %v2917_v48  ;;  %v2910_v6 = vadd.f32 %v3372_v28, %v3344_v46 }
 0x90f   : > { %v3346_v12 = vpop.f32.mrf.mxu1  ;;  %v3374_v31 = vpop.f32.mrf.mxu0 }
 0x910   : > { %v2918_v59 = vadd.f32 %v2910_v6, %v4822_v15  ;;  %v3347_v26 = vadd.f32 %v3346_v12, %v3345_v5  ;;  %v3375_v29 = vadd.f32 %v3374_v31, %v3373_v30 }
 0x912   : > { %2922 = vst [vmem:[%s425_s12 + $0x10] sm:$0xff] %v2918_v59  ;;  %v2913_v13 = vadd.f32 %v3375_v29, %v3347_v26 }
 0x914   : > { %v2919_v47 = vadd.f32 %v2913_v13, %v4827_v18 }
 0x916   : > { %2923 = vst [vmem:[%s425_s12 + $0x18] sm:$0xff] %v2919_v47 }
 0x917   : > { %4113 = shalt.err (!%p4110_p8)
}
 0x918   : > { %s4114_s17 = scalar_lea.hbm %s4862_s10, 512  ;;  %s4118_s15 = scalar_lea.hbm %s4914_s8, 1024 }
 0x919   : > { %p4115_p6 = scmp.ne.s32.totalorder %s4862_s10, %s4114_s17  ;;  %p4119_p0 = scmp.lt.s32.totalorder %s4862_s10, %s4914_s8 }
 0x91a   : > { %p4120_p2 = scmp.lt.s32.totalorder %s4118_s15, %s4114_s17 }
 0x91b   : > { %p4116_p11 = pnand %p4115_p6, %p4944_p10 }
 0x91c   : > { %p4121_p5 = por %p4120_p2, %p4119_p0 }
 0x91d   : > { %p4117_p7 = pneg %p4116_p11 }
 0x91f   : > { %p4122_p9 = pnand %p4121_p5, %p4117_p7 }
 0x921   : > { %4125 = shalt.err (!%p4122_p9)
}
 0x922   : > { %s4198_s13 = smov 128   ;;  %s4199_s19 = smov 8  }
 0x923   : > { %3550 = dma.vmem_to_hbm [thread:$0]  (%p4944_p10), %s4857_s22, 512, %s4862_s10, %s2925_s16, %s4198_s13, %s4198_s13, %s4199_s19  }
 0x924 PF: > { %s2953_s25 = sand.u32 1, %s4168_s27   ;;  %p4945_p12 = scmp.ne.s32.totalorder %s4930_s26, 0 }
 0x925   : > { %p4946_p13 = scmp.ge.s32.totalorder %s4180_s30, 2  ;;  %s2954_s11 = scalar_lea.sflag [#allocation4], %s2953_s25 }
 0x927   : > { %p3579_p1 = pnand %p4946_p13, %p4945_p12 }
 0x929   : > { %p3580_p3 = pneg %p3579_p1 }
 0x92b   : > { %4163 = dma.done.wait (%p3580_p3), %s2954_s11, 512  }
 0x92c   : > { %4165 = vsyncadd (%p3580_p3), %s2954_s11, 4294966784  ;;  %p25_p4 = scmp.ge.s32.totalorder %s4372_s18, 4   ;;  %s4947_s27 = smov %s4172_s28 }
 0x92d   : > { %s4948_s28 = smov %s4176_s29  ;;  %s4949_s29 = smov %s4384_s20 }
 0x92e   : > { %s4950_s30 = smov %s4372_s18  ;;  %27 = sbr.rel (!%p25_p4) target bundleno = 12 (0xc), region = 125 }
 0x933   :  { %2959 = vsyncpa [#allocation3], 1 }
 0x934   :  { %2961 = vsyncpa [#allocation3 + $0x1], 1 }
 0x935   :  { %2962 = vsyncpa [#allocation6], 1 }
 0x936   :  { %2963 = vsyncpa [#allocation9], 1 }
 0x937   :  { %2964 = vsyncpa [#allocation12], 1 }
 0x938   :  { %2965 = vsyncpa [#allocation15], 1 }
 0x939   :  { %2966 = vsyncpa [#allocation4], 1 }
 0x93a   :  { %2968 = vsyncpa [#allocation4 + $0x1], 1 }

</bundles_post_ra>
